<compile_context>
chip_gen: v7x
topology: tpu7x:2x2x1
jax: 0.10.0
libtpu: 0.0.40
codegen_flags: <defaults>
</compile_context>

<pallas_src>
import functools
import math

import jax
import jax.numpy as jnp
from jax import lax
from jax.experimental import pallas as pl
from jax.experimental.pallas import tpu as pltpu


# -----------------------------------------------------------------------------
# Kernel 1: 3x3x3 conv (padding=1, stride=1) + bias, fused InstanceNorm-1 stats
# -----------------------------------------------------------------------------
def _conv3_kernel(xm_ref, x0_ref, xp_ref, w_ref, b_ref, m_ref,
                  y_ref, s_ref, ss_ref, *, W, compute_dtype, precision):
    d = pl.program_id(1)
    D = pl.num_programs(1)
    Co = w_ref.shape[1]
    S = x0_ref.shape[-1]

    masks = m_ref[...]                       # (9, S) f32 h/w boundary masks
    planes = (xm_ref, x0_ref, xp_ref)        # depth neighbours d-1, d, d+1

    acc = jnp.zeros((Co, S), jnp.float32)
    for dz in range(3):
        pd = d + dz - 1                      # source depth (clamped in index_map)
        valid = jnp.logical_and(pd >= 0, pd <= D - 1).astype(jnp.float32)
        plane = planes[dz][0, 0].astype(jnp.float32) * valid        # (Ci, S)
        for dy in range(3):
            for dx in range(3):
                sft = (dy - 1) * W + (dx - 1)
                k = sft % S
                if k == 0:
                    shifted = plane
                else:
                    # shifted[:, p] = plane[:, (p + sft) mod S]  (lane rotation)
                    shifted = jnp.concatenate([plane[:, k:], plane[:, :k]],
                                              axis=1)
                rhs = (shifted * masks[dy * 3 + dx][None, :]).astype(compute_dtype)
                w_tap = w_ref[dz * 9 + dy * 3 + dx]                  # (Co, Ci)
                acc = acc + jnp.dot(w_tap, rhs,
                                    preferred_element_type=jnp.float32,
                                    precision=precision)

    out = acc + b_ref[...]                   # fused bias epilogue (Co,1)+(Co,S)
    y_ref[0, 0] = out.astype(y_ref.dtype)

    # fused InstanceNorm-1 statistics, accumulated across the "arbitrary" d axis
    @pl.when(d == 0)
    def _():
        s_ref[...] = jnp.zeros_like(s_ref)
        ss_ref[...] = jnp.zeros_like(ss_ref)
    s_ref[0] = s_ref[0] + jnp.sum(out, axis=1, keepdims=True)
    ss_ref[0] = ss_ref[0] + jnp.sum(out * out, axis=1, keepdims=True)


def _conv3x3x3(x, w_tap, bias, masks, *, H, W, compute_dtype, precision,
               out_dtype):
    N, D, Ci, S = x.shape
    Co = w_tap.shape[1]
    kernel = functools.partial(_conv3_kernel, W=W, compute_dtype=compute_dtype,
                               precision=precision)
    return pl.pallas_call(
        kernel,
        out_shape=(jax.ShapeDtypeStruct((N, D, Co, S), out_dtype),
                   jax.ShapeDtypeStruct((N, Co, 1), jnp.float32),
                   jax.ShapeDtypeStruct((N, Co, 1), jnp.float32)),
        grid_spec=pltpu.PrefetchScalarGridSpec(
            num_scalar_prefetch=0,
            grid=(N, D),
            in_specs=[
                pl.BlockSpec((1, 1, Ci, S),
                             lambda n, d: (n, jnp.clip(d - 1, 0, D - 1), 0, 0)),
                pl.BlockSpec((1, 1, Ci, S), lambda n, d: (n, d, 0, 0)),
                pl.BlockSpec((1, 1, Ci, S),
                             lambda n, d: (n, jnp.clip(d + 1, 0, D - 1), 0, 0)),
                pl.BlockSpec((27, Co, Ci), lambda n, d: (0, 0, 0)),
                pl.BlockSpec((Co, 1), lambda n, d: (0, 0)),
                pl.BlockSpec((9, S), lambda n, d: (0, 0)),
            ],
            out_specs=(
                pl.BlockSpec((1, 1, Co, S), lambda n, d: (n, d, 0, 0)),
                pl.BlockSpec((1, Co, 1), lambda n, d: (n, 0, 0)),
                pl.BlockSpec((1, Co, 1), lambda n, d: (n, 0, 0)),
            ),
        ),
        compiler_params=pltpu.CompilerParams(
            dimension_semantics=("parallel", "arbitrary")),
    )(x, x, x, w_tap, bias, masks)


# -----------------------------------------------------------------------------
# Kernel 2: InstanceNorm-1 apply + LeakyReLU + 1x1x1 conv + bias,
#           fused InstanceNorm-2 statistics
# -----------------------------------------------------------------------------
def _pointwise_kernel(x_ref, a_ref, b_ref, w_ref, bc_ref,
                      y_ref, s_ref, ss_ref, *, leak, compute_dtype, precision):
    d = pl.program_id(1)
    x = x_ref[0, 0].astype(jnp.float32)                # (Ci, S)
    act = x * a_ref[0] + b_ref[0]                      # InstanceNorm-1 (scale/shift)
    act = jnp.where(act >= 0, act, leak * act)         # LeakyReLU
    out = jnp.dot(w_ref[...].astype(compute_dtype), act.astype(compute_dtype),
                  preferred_element_type=jnp.float32, precision=precision)
    out = out + bc_ref[...]                            # conv2 bias
    y_ref[0, 0] = out.astype(y_ref.dtype)

    @pl.when(d == 0)
    def _():
        s_ref[...] = jnp.zeros_like(s_ref)
        ss_ref[...] = jnp.zeros_like(ss_ref)
    s_ref[0] = s_ref[0] + jnp.sum(out, axis=1, keepdims=True)
    ss_ref[0] = ss_ref[0] + jnp.sum(out * out, axis=1, keepdims=True)


def _norm_lrelu_conv1x1(y1, scale, shift, w2, bias2, *, leak, compute_dtype,
                        precision, out_dtype):
    N, D, Ci, S = y1.shape
    Co = w2.shape[0]
    kernel = functools.partial(_pointwise_kernel, leak=leak,
                               compute_dtype=compute_dtype, precision=precision)
    return pl.pallas_call(
        kernel,
        out_shape=(jax.ShapeDtypeStruct((N, D, Co, S), out_dtype),
                   jax.ShapeDtypeStruct((N, Co, 1), jnp.float32),
                   jax.ShapeDtypeStruct((N, Co, 1), jnp.float32)),
        grid_spec=pltpu.PrefetchScalarGridSpec(
            num_scalar_prefetch=0,
            grid=(N, D),
            in_specs=[
                pl.BlockSpec((1, 1, Ci, S), lambda n, d: (n, d, 0, 0)),
                pl.BlockSpec((1, Ci, 1), lambda n, d: (n, 0, 0)),
                pl.BlockSpec((1, Ci, 1), lambda n, d: (n, 0, 0)),
                pl.BlockSpec((Co, Ci), lambda n, d: (0, 0)),
                pl.BlockSpec((Co, 1), lambda n, d: (0, 0)),
            ],
            out_specs=(
                pl.BlockSpec((1, 1, Co, S), lambda n, d: (n, d, 0, 0)),
                pl.BlockSpec((1, Co, 1), lambda n, d: (n, 0, 0)),
                pl.BlockSpec((1, Co, 1), lambda n, d: (n, 0, 0)),
            ),
        ),
        compiler_params=pltpu.CompilerParams(
            dimension_semantics=("parallel", "arbitrary")),
    )(y1, scale, shift, w2, bias2)


# -----------------------------------------------------------------------------
# Kernel 3: InstanceNorm-2 apply + LeakyReLU (elementwise, fully parallel)
# -----------------------------------------------------------------------------
def _norm_act_kernel(x_ref, a_ref, b_ref, o_ref, *, leak):
    y = x_ref[0, 0].astype(jnp.float32) * a_ref[0] + b_ref[0]
    o_ref[0, 0] = jnp.where(y >= 0, y, leak * y)


def _norm_lrelu(y2, scale, shift, *, leak):
    N, D, C, S = y2.shape
    kernel = functools.partial(_norm_act_kernel, leak=leak)
    return pl.pallas_call(
        kernel,
        out_shape=jax.ShapeDtypeStruct((N, D, C, S), jnp.float32),
        grid_spec=pltpu.PrefetchScalarGridSpec(
            num_scalar_prefetch=0,
            grid=(N, D),
            in_specs=[
                pl.BlockSpec((1, 1, C, S), lambda n, d: (n, d, 0, 0)),
                pl.BlockSpec((1, C, 1), lambda n, d: (n, 0, 0)),
                pl.BlockSpec((1, C, 1), lambda n, d: (n, 0, 0)),
            ],
            out_specs=pl.BlockSpec((1, 1, C, S), lambda n, d: (n, d, 0, 0)),
        ),
        compiler_params=pltpu.CompilerParams(
            dimension_semantics=("parallel", "parallel")),
    )(y2, scale, shift)


# -----------------------------------------------------------------------------
# Glue (tiny XLA ops: per-(n,c) scalars, weight reshapes, boundary masks)
# -----------------------------------------------------------------------------
def _affine_from_stats(ssum, ssq, gamma, beta, count, eps):
    mean = ssum / count                                        # (N, C, 1)
    var = jnp.maximum(ssq / count - mean * mean, 0.0)          # biased, like torch
    scale = gamma.reshape(1, -1, 1) * lax.rsqrt(var + eps)
    shift = beta.reshape(1, -1, 1) - mean * scale
    return scale, shift


def _hw_boundary_masks(H, W):
    hh = jnp.arange(H, dtype=jnp.int32)[:, None]
    ww = jnp.arange(W, dtype=jnp.int32)[None, :]
    rows = []
    for dy in range(3):
        for dx in range(3):
            ok = ((hh + dy - 1 >= 0) & (hh + dy - 1 < H) &
                  (ww + dx - 1 >= 0) & (ww + dx - 1 < W))
            rows.append(ok.reshape(-1))
    return jnp.stack(rows).astype(jnp.float32)                 # (9, H*W)


def localization_module_forward(params, x, *, leakiness=0.01, eps=1e-5,
                                compute_dtype=jnp.float32):
    """LocalizationModule forward. x: (N, C_in, D, H, W) float32 (NCDHW)."""
    N, C1, D, H, W = x.shape
    S = H * W
    C2 = params["conv2.w"].shape[0]
    use_f32 = jnp.dtype(compute_dtype) == jnp.dtype(jnp.float32)
    precision = lax.Precision.HIGHEST if use_f32 else None
    inter_dtype = jnp.float32 if use_f32 else jnp.bfloat16

    # Single layout change for the whole module: (N,C,D,H,W) -> (N,D,C,H*W)
    xl = x.reshape(N, C1, D, S).transpose(0, 2, 1, 3).astype(inter_dtype)

    # Hoisted, tiny constant tensors
    masks = _hw_boundary_masks(H, W)
    w1 = params["conv1.w"].transpose(2, 3, 4, 0, 1).reshape(27, C1, C1)
    w1 = w1.astype(compute_dtype)
    b1 = params["conv1.b"].reshape(C1, 1).astype(jnp.float32)
    w2 = params["conv2.w"].reshape(C2, C1).astype(compute_dtype)
    b2 = params["conv2.b"].reshape(C2, 1).astype(jnp.float32)

    # conv1 (3x3x3) + bias, fused InstanceNorm-1 statistics
    y1, s1, ss1 = _conv3x3x3(xl, w1, b1, masks, H=H, W=W,
                             compute_dtype=compute_dtype, precision=precision,
                             out_dtype=inter_dtype)
    a1, sh1 = _affine_from_stats(s1, ss1, params["bn1.g"], params["bn1.b"],
                                 float(D * S), eps)

    # InstanceNorm-1 + LeakyReLU + conv2 (1x1x1) + bias, fused IN-2 statistics
    y2, s2, ss2 = _norm_lrelu_conv1x1(y1, a1, sh1, w2, b2, leak=leakiness,
                                      compute_dtype=compute_dtype,
                                      precision=precision, out_dtype=inter_dtype)
    a2, sh2 = _affine_from_stats(s2, ss2, params["bn2.g"], params["bn2.b"],
                                 float(D * S), eps)

    # InstanceNorm-2 + LeakyReLU
    out = _norm_lrelu(y2, a2, sh2, leak=leakiness)

    return out.transpose(0, 2, 1, 3).reshape(N, C2, D, H, W)


# -----------------------------------------------------------------------------
# Parameters (deterministic synthetic, torch layouts) + pure-JAX reference
# -----------------------------------------------------------------------------
def init_params(in_channels, out_channels, seed=0):
    keys = jax.random.split(jax.random.PRNGKey(seed), 8)
    return {
        "conv1.w": jax.random.normal(keys[0],
                                     (in_channels, in_channels, 3, 3, 3),
                                     jnp.float32) / math.sqrt(27 * in_channels),
        "conv1.b": 0.05 * jax.random.normal(keys[1], (in_channels,), jnp.float32),
        "bn1.g": 1.0 + 0.1 * jax.random.normal(keys[2], (in_channels,), jnp.float32),
        "bn1.b": 0.1 * jax.random.normal(keys[3], (in_channels,), jnp.float32),
        "conv2.w": jax.random.normal(keys[4],
                                     (out_channels, in_channels, 1, 1, 1),
                                     jnp.float32) / math.sqrt(in_channels),
        "conv2.b": 0.05 * jax.random.normal(keys[5], (out_channels,), jnp.float32),
        "bn2.g": 1.0 + 0.1 * jax.random.normal(keys[6], (out_channels,), jnp.float32),
        "bn2.b": 0.1 * jax.random.normal(keys[7], (out_channels,), jnp.float32),
    }


def reference_forward(params, x, leakiness=0.01, eps=1e-5):
    def conv(x, w, b, pad):
        y = lax.conv_general_dilated(
            x, w, window_strides=(1, 1, 1), padding=[(pad, pad)] * 3,
            dimension_numbers=("NCDHW", "OIDHW", "NCDHW"),
            precision=lax.Precision.HIGHEST)
        return y + b.reshape(1, -1, 1, 1, 1)

    def in_lrelu(x, g, b):
        mean = jnp.mean(x, axis=(2, 3, 4), keepdims=True)
        var = jnp.mean(jnp.square(x - mean), axis=(2, 3, 4), keepdims=True)
        y = (x - mean) * lax.rsqrt(var + eps)
        y = y * g.reshape(1, -1, 1, 1, 1) + b.reshape(1, -1, 1, 1, 1)
        return jnp.where(y >= 0, y, leakiness * y)

    x = in_lrelu(conv(x, params["conv1.w"], params["conv1.b"], 1),
                 params["bn1.g"], params["bn1.b"])
    x = in_lrelu(conv(x, params["conv2.w"], params["conv2.b"], 0),
                 params["bn2.g"], params["bn2.b"])
    return x


if __name__ == "__main__":
    N, C_IN, C_OUT, D, H, W = 2, 32, 16, 16, 16, 16   # one of the network's (in,out) pairs
    params = init_params(C_IN, C_OUT, seed=0)
    x = jax.random.normal(jax.random.PRNGKey(0), (N, C_IN, D, H, W), jnp.float32)

    # f32 path (validated against a pure-JAX reference)
    fwd_f32 = jax.jit(functools.partial(localization_module_forward,
                                        compute_dtype=jnp.float32))
    out = jax.block_until_ready(fwd_f32(params, x))
    assert out.shape == (N, C_OUT, D, H, W), out.shape
    assert bool(jnp.all(jnp.isfinite(out)))

    ref = jax.block_until_ready(jax.jit(reference_forward)(params, x))
    err = float(jnp.max(jnp.abs(out - ref)))
    assert err < 5e-2, f"f32 max abs error vs reference: {err}"

    # bf16-operand / f32-accumulate path (v6e / v7x MXU friendly)
    fwd_bf16 = jax.jit(functools.partial(localization_module_forward,
                                         compute_dtype=jnp.bfloat16))
    out_bf16 = jax.block_until_ready(fwd_bf16(params, x))
    assert out_bf16.shape == (N, C_OUT, D, H, W)
    assert bool(jnp.all(jnp.isfinite(out_bf16)))
    assert float(jnp.max(jnp.abs(out_bf16.astype(jnp.float32) - ref))) < 0.5

    print("KERNEL_OK")
</pallas_src>

<mosaic_0001>
module attributes {stable_mosaic.version = 11 : i64} {
  func.func @_pointwise_kernel(%arg0: i32, %arg1: i32, %arg2: memref<1x1x32x256xf32, #tpu.memory_space<vmem>>, %arg3: memref<1x32x1xf32, #tpu.memory_space<vmem>>, %arg4: memref<1x32x1xf32, #tpu.memory_space<vmem>>, %arg5: memref<16x32xf32, #tpu.memory_space<vmem>>, %arg6: memref<16x1xf32, #tpu.memory_space<vmem>>, %arg7: memref<1x1x16x256xf32, #tpu.memory_space<vmem>>, %arg8: memref<1x16x1xf32, #tpu.memory_space<vmem>>, %arg9: memref<1x16x1xf32, #tpu.memory_space<vmem>>) attributes {dimension_semantics = [#tpu.dimension_semantics<parallel>, #tpu.dimension_semantics<arbitrary>], iteration_bounds = array<i64: 2, 16>, scalar_prefetch = 0 : i64, scratch_operands = 0 : i64, tpu.core_type = #tpu.core_type<tc>, window_params = [{transform_indices = @transform_0, window_bounds = array<i64: 1, 1, 32, 256>}, {transform_indices = @transform_1, window_bounds = array<i64: 1, 32, 1>}, {transform_indices = @transform_2, window_bounds = array<i64: 1, 32, 1>}, {pipeline_mode = #tpu.pipeline_mode<synchronous>, transform_indices = @transform_3, window_bounds = array<i64: 16, 32>}, {pipeline_mode = #tpu.pipeline_mode<synchronous>, transform_indices = @transform_4, window_bounds = array<i64: 16, 1>}, {transform_indices = @transform_5, window_bounds = array<i64: 1, 1, 16, 256>}, {transform_indices = @transform_6, window_bounds = array<i64: 1, 16, 1>}, {transform_indices = @transform_7, window_bounds = array<i64: 1, 16, 1>}]} {
    %c0 = arith.constant 0 : index
    %c0_0 = arith.constant 0 : index
    %c0_1 = arith.constant 0 : index
    %c0_2 = arith.constant 0 : index
    %0 = vector.load %arg2[%c0, %c0_0, %c0_1, %c0_2] : memref<1x1x32x256xf32, #tpu.memory_space<vmem>>, vector<1x1x32x256xf32>
    %1 = vector.shape_cast %0 : vector<1x1x32x256xf32> to vector<32x256xf32>
    %c0_3 = arith.constant 0 : index
    %c0_4 = arith.constant 0 : index
    %c0_5 = arith.constant 0 : index
    %2 = vector.load %arg3[%c0_3, %c0_4, %c0_5] : memref<1x32x1xf32, #tpu.memory_space<vmem>>, vector<1x32x1xf32>
    %3 = vector.shape_cast %2 : vector<1x32x1xf32> to vector<32x1xf32>
    %4 = vector.broadcast %3 : vector<32x1xf32> to vector<32x256xf32>
    %5 = arith.mulf %1, %4 : vector<32x256xf32>
    %c0_6 = arith.constant 0 : index
    %c0_7 = arith.constant 0 : index
    %c0_8 = arith.constant 0 : index
    %6 = vector.load %arg4[%c0_6, %c0_7, %c0_8] : memref<1x32x1xf32, #tpu.memory_space<vmem>>, vector<1x32x1xf32>
    %7 = vector.shape_cast %6 : vector<1x32x1xf32> to vector<32x1xf32>
    %8 = vector.broadcast %7 : vector<32x1xf32> to vector<32x256xf32>
    %9 = arith.addf %5, %8 : vector<32x256xf32>
    %cst = arith.constant 0.000000e+00 : f32
    %10 = vector.broadcast %cst : f32 to vector<32x256xf32>
    %11 = arith.cmpf oge, %9, %10 : vector<32x256xf32>
    %cst_9 = arith.constant 0.00999999977 : f32
    %12 = vector.broadcast %cst_9 : f32 to vector<32x256xf32>
    %13 = arith.mulf %12, %9 : vector<32x256xf32>
    %14 = arith.select %11, %9, %13 : vector<32x256xi1>, vector<32x256xf32>
    %c0_10 = arith.constant 0 : index
    %c0_11 = arith.constant 0 : index
    %15 = vector.load %arg5[%c0_10, %c0_11] : memref<16x32xf32, #tpu.memory_space<vmem>>, vector<16x32xf32>
    %cst_12 = arith.constant dense<0.000000e+00> : vector<16x256xf32>
    %16 = tpu.matmul %15, %14, %cst_12 {dimension_numbers = #tpu.dot_dimension_numbers<[1], [0], [0], [1], [0, 0, 1, 1], [], []>, precision = #tpu.contract_precision<fp32>} : vector<16x32xf32>, vector<32x256xf32>, vector<16x256xf32> -> vector<16x256xf32>
    %c0_13 = arith.constant 0 : index
    %c0_14 = arith.constant 0 : index
    %17 = vector.load %arg6[%c0_13, %c0_14] : memref<16x1xf32, #tpu.memory_space<vmem>>, vector<16x1xf32>
    %18 = vector.broadcast %17 : vector<16x1xf32> to vector<16x256xf32>
    %19 = arith.addf %16, %18 : vector<16x256xf32>
    %c0_15 = arith.constant 0 : index
    %c0_16 = arith.constant 0 : index
    %c0_17 = arith.constant 0 : index
    %c0_18 = arith.constant 0 : index
    %20 = vector.load %arg7[%c0_15, %c0_16, %c0_17, %c0_18] : memref<1x1x16x256xf32, #tpu.memory_space<vmem>>, vector<1x1x16x256xf32>
    %21 = vector.shape_cast %20 : vector<1x1x16x256xf32> to vector<16x256xf32>
    %22 = vector.shape_cast %19 : vector<16x256xf32> to vector<1x1x16x256xf32>
    tpu.vector_store %arg7[%c0_15, %c0_16, %c0_17, %c0_18], %22 {strides = array<i32>} : memref<1x1x16x256xf32, #tpu.memory_space<vmem>>, vector<1x1x16x256xf32>,
    %c0_i32 = arith.constant 0 : i32
    %23 = arith.cmpi eq, %arg1, %c0_i32 : i32
    %24 = arith.extui %23 : i1 to i32
    %c0_i32_19 = arith.constant 0 : i32
    %25 = arith.cmpi ne, %24, %c0_i32_19 : i32
    scf.if %25 {
      %cst_34 = arith.constant 0.000000e+00 : f32
      %43 = vector.broadcast %cst_34 : f32 to vector<1x16x1xf32>
      %c0_35 = arith.constant 0 : index
      %c0_36 = arith.constant 0 : index
      %c0_37 = arith.constant 0 : index
      %44 = vector.load %arg8[%c0_35, %c0_36, %c0_37] : memref<1x16x1xf32, #tpu.memory_space<vmem>>, vector<1x16x1xf32>
      tpu.vector_store %arg8[%c0_35, %c0_36, %c0_37], %43 {strides = array<i32>} : memref<1x16x1xf32, #tpu.memory_space<vmem>>, vector<1x16x1xf32>,
      %cst_38 = arith.constant 0.000000e+00 : f32
      %45 = vector.broadcast %cst_38 : f32 to vector<1x16x1xf32>
      %c0_39 = arith.constant 0 : index
      %c0_40 = arith.constant 0 : index
      %c0_41 = arith.constant 0 : index
      %46 = vector.load %arg9[%c0_39, %c0_40, %c0_41] : memref<1x16x1xf32, #tpu.memory_space<vmem>>, vector<1x16x1xf32>
      tpu.vector_store %arg9[%c0_39, %c0_40, %c0_41], %45 {strides = array<i32>} : memref<1x16x1xf32, #tpu.memory_space<vmem>>, vector<1x16x1xf32>,
    } else {
    }
    %c0_20 = arith.constant 0 : index
    %c0_21 = arith.constant 0 : index
    %c0_22 = arith.constant 0 : index
    %26 = vector.load %arg8[%c0_20, %c0_21, %c0_22] : memref<1x16x1xf32, #tpu.memory_space<vmem>>, vector<1x16x1xf32>
    %27 = vector.shape_cast %26 : vector<1x16x1xf32> to vector<16x1xf32>
    %cst_23 = arith.constant dense<0.000000e+00> : vector<16xf32>
    %28 = vector.multi_reduction <add>, %19, %cst_23 [1] : vector<16x256xf32> to vector<16xf32>
    %29 = vector.shape_cast %28 : vector<16xf32> to vector<16x1xf32>
    %30 = arith.addf %27, %29 : vector<16x1xf32>
    %c0_24 = arith.constant 0 : index
    %c0_25 = arith.constant 0 : index
    %c0_26 = arith.constant 0 : index
    %31 = vector.load %arg8[%c0_24, %c0_25, %c0_26] : memref<1x16x1xf32, #tpu.memory_space<vmem>>, vector<1x16x1xf32>
    %32 = vector.shape_cast %31 : vector<1x16x1xf32> to vector<16x1xf32>
    %33 = vector.shape_cast %30 : vector<16x1xf32> to vector<1x16x1xf32>
    tpu.vector_store %arg8[%c0_24, %c0_25, %c0_26], %33 {strides = array<i32>} : memref<1x16x1xf32, #tpu.memory_space<vmem>>, vector<1x16x1xf32>,
    %c0_27 = arith.constant 0 : index
    %c0_28 = arith.constant 0 : index
    %c0_29 = arith.constant 0 : index
    %34 = vector.load %arg9[%c0_27, %c0_28, %c0_29] : memref<1x16x1xf32, #tpu.memory_space<vmem>>, vector<1x16x1xf32>
    %35 = vector.shape_cast %34 : vector<1x16x1xf32> to vector<16x1xf32>
    %36 = arith.mulf %19, %19 : vector<16x256xf32>
    %cst_30 = arith.constant dense<0.000000e+00> : vector<16xf32>
    %37 = vector.multi_reduction <add>, %36, %cst_30 [1] : vector<16x256xf32> to vector<16xf32>
    %38 = vector.shape_cast %37 : vector<16xf32> to vector<16x1xf32>
    %39 = arith.addf %35, %38 : vector<16x1xf32>
    %c0_31 = arith.constant 0 : index
    %c0_32 = arith.constant 0 : index
    %c0_33 = arith.constant 0 : index
    %40 = vector.load %arg9[%c0_31, %c0_32, %c0_33] : memref<1x16x1xf32, #tpu.memory_space<vmem>>, vector<1x16x1xf32>
    %41 = vector.shape_cast %40 : vector<1x16x1xf32> to vector<16x1xf32>
    %42 = vector.shape_cast %39 : vector<16x1xf32> to vector<1x16x1xf32>
    tpu.vector_store %arg9[%c0_31, %c0_32, %c0_33], %42 {strides = array<i32>} : memref<1x16x1xf32, #tpu.memory_space<vmem>>, vector<1x16x1xf32>,
    return
  }
  func.func @transform_0(%arg0: i32, %arg1: i32) -> (i32, i32, i32, i32) {
    %c0_i32 = arith.constant 0 : i32
    %c0_i32_0 = arith.constant 0 : i32
    %c0_i32_1 = arith.constant 0 : i32
    return %arg0, %arg1, %c0_i32, %c0_i32_0 : i32, i32, i32, i32
  }
  func.func @transform_1(%arg0: i32, %arg1: i32) -> (i32, i32, i32) {
    %c0_i32 = arith.constant 0 : i32
    %c0_i32_0 = arith.constant 0 : i32
    %c0_i32_1 = arith.constant 0 : i32
    return %arg0, %c0_i32, %c0_i32_0 : i32, i32, i32
  }
  func.func @transform_2(%arg0: i32, %arg1: i32) -> (i32, i32, i32) {
    %c0_i32 = arith.constant 0 : i32
    %c0_i32_0 = arith.constant 0 : i32
    %c0_i32_1 = arith.constant 0 : i32
    return %arg0, %c0_i32, %c0_i32_0 : i32, i32, i32
  }
  func.func @transform_3(%arg0: i32, %arg1: i32) -> (i32, i32) {
    %c0_i32 = arith.constant 0 : i32
    %c0_i32_0 = arith.constant 0 : i32
    %c0_i32_1 = arith.constant 0 : i32
    return %c0_i32, %c0_i32_0 : i32, i32
  }
  func.func @transform_4(%arg0: i32, %arg1: i32) -> (i32, i32) {
    %c0_i32 = arith.constant 0 : i32
    %c0_i32_0 = arith.constant 0 : i32
    %c0_i32_1 = arith.constant 0 : i32
    return %c0_i32, %c0_i32_0 : i32, i32
  }
  func.func @transform_5(%arg0: i32, %arg1: i32) -> (i32, i32, i32, i32) {
    %c0_i32 = arith.constant 0 : i32
    %c0_i32_0 = arith.constant 0 : i32
    %c0_i32_1 = arith.constant 0 : i32
    return %arg0, %arg1, %c0_i32, %c0_i32_0 : i32, i32, i32, i32
  }
  func.func @transform_6(%arg0: i32, %arg1: i32) -> (i32, i32, i32) {
    %c0_i32 = arith.constant 0 : i32
    %c0_i32_0 = arith.constant 0 : i32
    %c0_i32_1 = arith.constant 0 : i32
    return %arg0, %c0_i32, %c0_i32_0 : i32, i32, i32
  }
  func.func @transform_7(%arg0: i32, %arg1: i32) -> (i32, i32, i32) {
    %c0_i32 = arith.constant 0 : i32
    %c0_i32_0 = arith.constant 0 : i32
    %c0_i32_1 = arith.constant 0 : i32
    return %arg0, %c0_i32, %c0_i32_0 : i32, i32, i32
  }
}

module attributes {stable_mosaic.version = 11 : i64} {
  func.func @_conv3_kernel(%arg0: i32, %arg1: i32, %arg2: memref<1x1x32x256xf32, #tpu.memory_space<vmem>>, %arg3: memref<1x1x32x256xf32, #tpu.memory_space<vmem>>, %arg4: memref<1x1x32x256xf32, #tpu.memory_space<vmem>>, %arg5: memref<27x32x32xf32, #tpu.memory_space<vmem>>, %arg6: memref<32x1xf32, #tpu.memory_space<vmem>>, %arg7: memref<9x256xf32, #tpu.memory_space<vmem>>, %arg8: memref<1x1x32x256xf32, #tpu.memory_space<vmem>>, %arg9: memref<1x32x1xf32, #tpu.memory_space<vmem>>, %arg10: memref<1x32x1xf32, #tpu.memory_space<vmem>>) attributes {dimension_semantics = [#tpu.dimension_semantics<parallel>, #tpu.dimension_semantics<arbitrary>], iteration_bounds = array<i64: 2, 16>, scalar_prefetch = 0 : i64, scratch_operands = 0 : i64, tpu.core_type = #tpu.core_type<tc>, window_params = [{transform_indices = @transform_0, window_bounds = array<i64: 1, 1, 32, 256>}, {transform_indices = @transform_1, window_bounds = array<i64: 1, 1, 32, 256>}, {transform_indices = @transform_2, window_bounds = array<i64: 1, 1, 32, 256>}, {pipeline_mode = #tpu.pipeline_mode<synchronous>, transform_indices = @transform_3, window_bounds = array<i64: 27, 32, 32>}, {pipeline_mode = #tpu.pipeline_mode<synchronous>, transform_indices = @transform_4, window_bounds = array<i64: 32, 1>}, {pipeline_mode = #tpu.pipeline_mode<synchronous>, transform_indices = @transform_5, window_bounds = array<i64: 9, 256>}, {transform_indices = @transform_6, window_bounds = array<i64: 1, 1, 32, 256>}, {transform_indices = @transform_7, window_bounds = array<i64: 1, 32, 1>}, {transform_indices = @transform_8, window_bounds = array<i64: 1, 32, 1>}]} {
    %c0 = arith.constant 0 : index
    %c0_0 = arith.constant 0 : index
    %0 = vector.load %arg7[%c0, %c0_0] : memref<9x256xf32, #tpu.memory_space<vmem>>, vector<9x256xf32>
    %cst = arith.constant 0.000000e+00 : f32
    %1 = vector.broadcast %cst : f32 to vector<32x256xf32>
    %c0_i32 = arith.constant 0 : i32
    %2 = arith.addi %arg1, %c0_i32 : i32
    %c1_i32 = arith.constant 1 : i32
    %3 = arith.subi %2, %c1_i32 : i32
    %c0_i32_1 = arith.constant 0 : i32
    %4 = arith.cmpi sge, %3, %c0_i32_1 : i32
    %c15_i32 = arith.constant 15 : i32
    %5 = arith.cmpi sle, %3, %c15_i32 : i32
    %6 = arith.andi %4, %5 : i1
    %7 = arith.extui %6 : i1 to i32
    %8 = arith.sitofp %7 : i32 to f32
    %c0_2 = arith.constant 0 : index
    %c0_3 = arith.constant 0 : index
    %c0_4 = arith.constant 0 : index
    %c0_5 = arith.constant 0 : index
    %9 = vector.load %arg2[%c0_2, %c0_3, %c0_4, %c0_5] : memref<1x1x32x256xf32, #tpu.memory_space<vmem>>, vector<1x1x32x256xf32>
    %10 = vector.shape_cast %9 : vector<1x1x32x256xf32> to vector<32x256xf32>
    %11 = vector.broadcast %8 : f32 to vector<32x256xf32>
    %12 = arith.mulf %10, %11 : vector<32x256xf32>
    %13 = vector.extract_strided_slice %12 {offsets = [0, 239], sizes = [32, 17], strides = [1, 1]} : vector<32x256xf32> to vector<32x17xf32>
    %14 = vector.extract_strided_slice %12 {offsets = [0, 0], sizes = [32, 239], strides = [1, 1]} : vector<32x256xf32> to vector<32x239xf32>
    %15 = tpu.concatenate %13, %14 in 1 : vector<32x17xf32>, vector<32x239xf32> -> vector<32x256xf32>
    %16 = vector.extract_strided_slice %0 {offsets = [0, 0], sizes = [1, 256], strides = [1, 1]} : vector<9x256xf32> to vector<1x256xf32>
    %17 = vector.shape_cast %16 : vector<1x256xf32> to vector<256xf32>
    %18 = vector.shape_cast %17 : vector<256xf32> to vector<1x256xf32>
    %19 = vector.broadcast %18 : vector<1x256xf32> to vector<32x256xf32>
    %20 = arith.mulf %15, %19 : vector<32x256xf32>
    %c0_6 = arith.constant 0 : index
    %c0_7 = arith.constant 0 : index
    %c0_8 = arith.constant 0 : index
    %21 = vector.load %arg5[%c0_6, %c0_7, %c0_8] : memref<27x32x32xf32, #tpu.memory_space<vmem>>, vector<1x32x32xf32>
    %22 = vector.shape_cast %21 : vector<1x32x32xf32> to vector<32x32xf32>
    %cst_9 = arith.constant dense<0.000000e+00> : vector<32x256xf32>
    %23 = tpu.matmul %22, %20, %cst_9 {dimension_numbers = #tpu.dot_dimension_numbers<[1], [0], [0], [1], [0, 0, 1, 1], [], []>, precision = #tpu.contract_precision<fp32>} : vector<32x32xf32>, vector<32x256xf32>, vector<32x256xf32> -> vector<32x256xf32>
    %24 = arith.addf %1, %23 : vector<32x256xf32>
    %25 = vector.extract_strided_slice %12 {offsets = [0, 240], sizes = [32, 16], strides = [1, 1]} : vector<32x256xf32> to vector<32x16xf32>
    %26 = vector.extract_strided_slice %12 {offsets = [0, 0], sizes = [32, 240], strides = [1, 1]} : vector<32x256xf32> to vector<32x240xf32>
    %27 = tpu.concatenate %25, %26 in 1 : vector<32x16xf32>, vector<32x240xf32> -> vector<32x256xf32>
    %28 = vector.extract_strided_slice %0 {offsets = [1, 0], sizes = [1, 256], strides = [1, 1]} : vector<9x256xf32> to vector<1x256xf32>
    %29 = vector.shape_cast %28 : vector<1x256xf32> to vector<256xf32>
    %30 = vector.shape_cast %29 : vector<256xf32> to vector<1x256xf32>
    %31 = vector.broadcast %30 : vector<1x256xf32> to vector<32x256xf32>
    %32 = arith.mulf %27, %31 : vector<32x256xf32>
    %c1 = arith.constant 1 : index
    %c0_10 = arith.constant 0 : index
    %c0_11 = arith.constant 0 : index
    %33 = vector.load %arg5[%c1, %c0_10, %c0_11] : memref<27x32x32xf32, #tpu.memory_space<vmem>>, vector<1x32x32xf32>
    %34 = vector.shape_cast %33 : vector<1x32x32xf32> to vector<32x32xf32>
    %cst_12 = arith.constant dense<0.000000e+00> : vector<32x256xf32>
    %35 = tpu.matmul %34, %32, %cst_12 {dimension_numbers = #tpu.dot_dimension_numbers<[1], [0], [0], [1], [0, 0, 1, 1], [], []>, precision = #tpu.contract_precision<fp32>} : vector<32x32xf32>, vector<32x256xf32>, vector<32x256xf32> -> vector<32x256xf32>
    %36 = arith.addf %24, %35 : vector<32x256xf32>
    %37 = vector.extract_strided_slice %12 {offsets = [0, 241], sizes = [32, 15], strides = [1, 1]} : vector<32x256xf32> to vector<32x15xf32>
    %38 = vector.extract_strided_slice %12 {offsets = [0, 0], sizes = [32, 241], strides = [1, 1]} : vector<32x256xf32> to vector<32x241xf32>
    %39 = tpu.concatenate %37, %38 in 1 : vector<32x15xf32>, vector<32x241xf32> -> vector<32x256xf32>
    %40 = vector.extract_strided_slice %0 {offsets = [2, 0], sizes = [1, 256], strides = [1, 1]} : vector<9x256xf32> to vector<1x256xf32>
    %41 = vector.shape_cast %40 : vector<1x256xf32> to vector<256xf32>
    %42 = vector.shape_cast %41 : vector<256xf32> to vector<1x256xf32>
    %43 = vector.broadcast %42 : vector<1x256xf32> to vector<32x256xf32>
    %44 = arith.mulf %39, %43 : vector<32x256xf32>
    %c2 = arith.constant 2 : index
    %c0_13 = arith.constant 0 : index
    %c0_14 = arith.constant 0 : index
    %45 = vector.load %arg5[%c2, %c0_13, %c0_14] : memref<27x32x32xf32, #tpu.memory_space<vmem>>, vector<1x32x32xf32>
    %46 = vector.shape_cast %45 : vector<1x32x32xf32> to vector<32x32xf32>
    %cst_15 = arith.constant dense<0.000000e+00> : vector<32x256xf32>
    %47 = tpu.matmul %46, %44, %cst_15 {dimension_numbers = #tpu.dot_dimension_numbers<[1], [0], [0], [1], [0, 0, 1, 1], [], []>, precision = #tpu.contract_precision<fp32>} : vector<32x32xf32>, vector<32x256xf32>, vector<32x256xf32> -> vector<32x256xf32>
    %48 = arith.addf %36, %47 : vector<32x256xf32>
    %49 = vector.extract_strided_slice %12 {offsets = [0, 255], sizes = [32, 1], strides = [1, 1]} : vector<32x256xf32> to vector<32x1xf32>
    %50 = vector.extract_strided_slice %12 {offsets = [0, 0], sizes = [32, 255], strides = [1, 1]} : vector<32x256xf32> to vector<32x255xf32>
    %51 = tpu.concatenate %49, %50 in 1 : vector<32x1xf32>, vector<32x255xf32> -> vector<32x256xf32>
    %52 = vector.extract_strided_slice %0 {offsets = [3, 0], sizes = [1, 256], strides = [1, 1]} : vector<9x256xf32> to vector<1x256xf32>
    %53 = vector.shape_cast %52 : vector<1x256xf32> to vector<256xf32>
    %54 = vector.shape_cast %53 : vector<256xf32> to vector<1x256xf32>
    %55 = vector.broadcast %54 : vector<1x256xf32> to vector<32x256xf32>
    %56 = arith.mulf %51, %55 : vector<32x256xf32>
    %c3 = arith.constant 3 : index
    %c0_16 = arith.constant 0 : index
    %c0_17 = arith.constant 0 : index
    %57 = vector.load %arg5[%c3, %c0_16, %c0_17] : memref<27x32x32xf32, #tpu.memory_space<vmem>>, vector<1x32x32xf32>
    %58 = vector.shape_cast %57 : vector<1x32x32xf32> to vector<32x32xf32>
    %cst_18 = arith.constant dense<0.000000e+00> : vector<32x256xf32>
    %59 = tpu.matmul %58, %56, %cst_18 {dimension_numbers = #tpu.dot_dimension_numbers<[1], [0], [0], [1], [0, 0, 1, 1], [], []>, precision = #tpu.contract_precision<fp32>} : vector<32x32xf32>, vector<32x256xf32>, vector<32x256xf32> -> vector<32x256xf32>
    %60 = arith.addf %48, %59 : vector<32x256xf32>
    %61 = vector.extract_strided_slice %0 {offsets = [4, 0], sizes = [1, 256], strides = [1, 1]} : vector<9x256xf32> to vector<1x256xf32>
    %62 = vector.shape_cast %61 : vector<1x256xf32> to vector<256xf32>
    %63 = vector.shape_cast %62 : vector<256xf32> to vector<1x256xf32>
    %64 = vector.broadcast %63 : vector<1x256xf32> to vector<32x256xf32>
    %65 = arith.mulf %12, %64 : vector<32x256xf32>
    %c4 = arith.constant 4 : index
    %c0_19 = arith.constant 0 : index
    %c0_20 = arith.constant 0 : index
    %66 = vector.load %arg5[%c4, %c0_19, %c0_20] : memref<27x32x32xf32, #tpu.memory_space<vmem>>, vector<1x32x32xf32>
    %67 = vector.shape_cast %66 : vector<1x32x32xf32> to vector<32x32xf32>
    %cst_21 = arith.constant dense<0.000000e+00> : vector<32x256xf32>
    %68 = tpu.matmul %67, %65, %cst_21 {dimension_numbers = #tpu.dot_dimension_numbers<[1], [0], [0], [1], [0, 0, 1, 1], [], []>, precision = #tpu.contract_precision<fp32>} : vector<32x32xf32>, vector<32x256xf32>, vector<32x256xf32> -> vector<32x256xf32>
    %69 = arith.addf %60, %68 : vector<32x256xf32>
    %70 = vector.extract_strided_slice %12 {offsets = [0, 1], sizes = [32, 255], strides = [1, 1]} : vector<32x256xf32> to vector<32x255xf32>
    %71 = vector.extract_strided_slice %12 {offsets = [0, 0], sizes = [32, 1], strides = [1, 1]} : vector<32x256xf32> to vector<32x1xf32>
    %72 = tpu.concatenate %70, %71 in 1 : vector<32x255xf32>, vector<32x1xf32> -> vector<32x256xf32>
    %73 = vector.extract_strided_slice %0 {offsets = [5, 0], sizes = [1, 256], strides = [1, 1]} : vector<9x256xf32> to vector<1x256xf32>
    %74 = vector.shape_cast %73 : vector<1x256xf32> to vector<256xf32>
    %75 = vector.shape_cast %74 : vector<256xf32> to vector<1x256xf32>
    %76 = vector.broadcast %75 : vector<1x256xf32> to vector<32x256xf32>
    %77 = arith.mulf %72, %76 : vector<32x256xf32>
    %c5 = arith.constant 5 : index
    %c0_22 = arith.constant 0 : index
    %c0_23 = arith.constant 0 : index
    %78 = vector.load %arg5[%c5, %c0_22, %c0_23] : memref<27x32x32xf32, #tpu.memory_space<vmem>>, vector<1x32x32xf32>
    %79 = vector.shape_cast %78 : vector<1x32x32xf32> to vector<32x32xf32>
    %cst_24 = arith.constant dense<0.000000e+00> : vector<32x256xf32>
    %80 = tpu.matmul %79, %77, %cst_24 {dimension_numbers = #tpu.dot_dimension_numbers<[1], [0], [0], [1], [0, 0, 1, 1], [], []>, precision = #tpu.contract_precision<fp32>} : vector<32x32xf32>, vector<32x256xf32>, vector<32x256xf32> -> vector<32x256xf32>
    %81 = arith.addf %69, %80 : vector<32x256xf32>
    %82 = vector.extract_strided_slice %12 {offsets = [0, 15], sizes = [32, 241], strides = [1, 1]} : vector<32x256xf32> to vector<32x241xf32>
    %83 = vector.extract_strided_slice %12 {offsets = [0, 0], sizes = [32, 15], strides = [1, 1]} : vector<32x256xf32> to vector<32x15xf32>
    %84 = tpu.concatenate %82, %83 in 1 : vector<32x241xf32>, vector<32x15xf32> -> vector<32x256xf32>
    %85 = vector.extract_strided_slice %0 {offsets = [6, 0], sizes = [1, 256], strides = [1, 1]} : vector<9x256xf32> to vector<1x256xf32>
    %86 = vector.shape_cast %85 : vector<1x256xf32> to vector<256xf32>
    %87 = vector.shape_cast %86 : vector<256xf32> to vector<1x256xf32>
    %88 = vector.broadcast %87 : vector<1x256xf32> to vector<32x256xf32>
    %89 = arith.mulf %84, %88 : vector<32x256xf32>
    %c6 = arith.constant 6 : index
    %c0_25 = arith.constant 0 : index
    %c0_26 = arith.constant 0 : index
    %90 = vector.load %arg5[%c6, %c0_25, %c0_26] : memref<27x32x32xf32, #tpu.memory_space<vmem>>, vector<1x32x32xf32>
    %91 = vector.shape_cast %90 : vector<1x32x32xf32> to vector<32x32xf32>
    %cst_27 = arith.constant dense<0.000000e+00> : vector<32x256xf32>
    %92 = tpu.matmul %91, %89, %cst_27 {dimension_numbers = #tpu.dot_dimension_numbers<[1], [0], [0], [1], [0, 0, 1, 1], [], []>, precision = #tpu.contract_precision<fp32>} : vector<32x32xf32>, vector<32x256xf32>, vector<32x256xf32> -> vector<32x256xf32>
    %93 = arith.addf %81, %92 : vector<32x256xf32>
    %94 = vector.extract_strided_slice %12 {offsets = [0, 16], sizes = [32, 240], strides = [1, 1]} : vector<32x256xf32> to vector<32x240xf32>
    %95 = vector.extract_strided_slice %12 {offsets = [0, 0], sizes = [32, 16], strides = [1, 1]} : vector<32x256xf32> to vector<32x16xf32>
    %96 = tpu.concatenate %94, %95 in 1 : vector<32x240xf32>, vector<32x16xf32> -> vector<32x256xf32>
    %97 = vector.extract_strided_slice %0 {offsets = [7, 0], sizes = [1, 256], strides = [1, 1]} : vector<9x256xf32> to vector<1x256xf32>
    %98 = vector.shape_cast %97 : vector<1x256xf32> to vector<256xf32>
    %99 = vector.shape_cast %98 : vector<256xf32> to vector<1x256xf32>
    %100 = vector.broadcast %99 : vector<1x256xf32> to vector<32x256xf32>
    %101 = arith.mulf %96, %100 : vector<32x256xf32>
    %c7 = arith.constant 7 : index
    %c0_28 = arith.constant 0 : index
    %c0_29 = arith.constant 0 : index
    %102 = vector.load %arg5[%c7, %c0_28, %c0_29] : memref<27x32x32xf32, #tpu.memory_space<vmem>>, vector<1x32x32xf32>
    %103 = vector.shape_cast %102 : vector<1x32x32xf32> to vector<32x32xf32>
    %cst_30 = arith.constant dense<0.000000e+00> : vector<32x256xf32>
    %104 = tpu.matmul %103, %101, %cst_30 {dimension_numbers = #tpu.dot_dimension_numbers<[1], [0], [0], [1], [0, 0, 1, 1], [], []>, precision = #tpu.contract_precision<fp32>} : vector<32x32xf32>, vector<32x256xf32>, vector<32x256xf32> -> vector<32x256xf32>
    %105 = arith.addf %93, %104 : vector<32x256xf32>
    %106 = vector.extract_strided_slice %12 {offsets = [0, 17], sizes = [32, 239], strides = [1, 1]} : vector<32x256xf32> to vector<32x239xf32>
    %107 = vector.extract_strided_slice %12 {offsets = [0, 0], sizes = [32, 17], strides = [1, 1]} : vector<32x256xf32> to vector<32x17xf32>
    %108 = tpu.concatenate %106, %107 in 1 : vector<32x239xf32>, vector<32x17xf32> -> vector<32x256xf32>
    %109 = vector.extract_strided_slice %0 {offsets = [8, 0], sizes = [1, 256], strides = [1, 1]} : vector<9x256xf32> to vector<1x256xf32>
    %110 = vector.shape_cast %109 : vector<1x256xf32> to vector<256xf32>
    %111 = vector.shape_cast %110 : vector<256xf32> to vector<1x256xf32>
    %112 = vector.broadcast %111 : vector<1x256xf32> to vector<32x256xf32>
    %113 = arith.mulf %108, %112 : vector<32x256xf32>
    %c8 = arith.constant 8 : index
    %c0_31 = arith.constant 0 : index
    %c0_32 = arith.constant 0 : index
    %114 = vector.load %arg5[%c8, %c0_31, %c0_32] : memref<27x32x32xf32, #tpu.memory_space<vmem>>, vector<1x32x32xf32>
    %115 = vector.shape_cast %114 : vector<1x32x32xf32> to vector<32x32xf32>
    %cst_33 = arith.constant dense<0.000000e+00> : vector<32x256xf32>
    %116 = tpu.matmul %115, %113, %cst_33 {dimension_numbers = #tpu.dot_dimension_numbers<[1], [0], [0], [1], [0, 0, 1, 1], [], []>, precision = #tpu.contract_precision<fp32>} : vector<32x32xf32>, vector<32x256xf32>, vector<32x256xf32> -> vector<32x256xf32>
    %117 = arith.addf %105, %116 : vector<32x256xf32>
    %c1_i32_34 = arith.constant 1 : i32
    %118 = arith.addi %arg1, %c1_i32_34 : i32
    %c1_i32_35 = arith.constant 1 : i32
    %119 = arith.subi %118, %c1_i32_35 : i32
    %c0_i32_36 = arith.constant 0 : i32
    %120 = arith.cmpi sge, %119, %c0_i32_36 : i32
    %c15_i32_37 = arith.constant 15 : i32
    %121 = arith.cmpi sle, %119, %c15_i32_37 : i32
    %122 = arith.andi %120, %121 : i1
    %123 = arith.extui %122 : i1 to i32
    %124 = arith.sitofp %123 : i32 to f32
    %c0_38 = arith.constant 0 : index
    %c0_39 = arith.constant 0 : index
    %c0_40 = arith.constant 0 : index
    %c0_41 = arith.constant 0 : index
    %125 = vector.load %arg3[%c0_38, %c0_39, %c0_40, %c0_41] : memref<1x1x32x256xf32, #tpu.memory_space<vmem>>, vector<1x1x32x256xf32>
    %126 = vector.shape_cast %125 : vector<1x1x32x256xf32> to vector<32x256xf32>
    %127 = vector.broadcast %124 : f32 to vector<32x256xf32>
    %128 = arith.mulf %126, %127 : vector<32x256xf32>
    %129 = vector.extract_strided_slice %128 {offsets = [0, 239], sizes = [32, 17], strides = [1, 1]} : vector<32x256xf32> to vector<32x17xf32>
    %130 = vector.extract_strided_slice %128 {offsets = [0, 0], sizes = [32, 239], strides = [1, 1]} : vector<32x256xf32> to vector<32x239xf32>
    %131 = tpu.concatenate %129, %130 in 1 : vector<32x17xf32>, vector<32x239xf32> -> vector<32x256xf32>
    %132 = vector.extract_strided_slice %0 {offsets = [0, 0], sizes = [1, 256], strides = [1, 1]} : vector<9x256xf32> to vector<1x256xf32>
    %133 = vector.shape_cast %132 : vector<1x256xf32> to vector<256xf32>
    %134 = vector.shape_cast %133 : vector<256xf32> to vector<1x256xf32>
    %135 = vector.broadcast %134 : vector<1x256xf32> to vector<32x256xf32>
    %136 = arith.mulf %131, %135 : vector<32x256xf32>
    %c9 = arith.constant 9 : index
    %c0_42 = arith.constant 0 : index
    %c0_43 = arith.constant 0 : index
    %137 = vector.load %arg5[%c9, %c0_42, %c0_43] : memref<27x32x32xf32, #tpu.memory_space<vmem>>, vector<1x32x32xf32>
    %138 = vector.shape_cast %137 : vector<1x32x32xf32> to vector<32x32xf32>
    %cst_44 = arith.constant dense<0.000000e+00> : vector<32x256xf32>
    %139 = tpu.matmul %138, %136, %cst_44 {dimension_numbers = #tpu.dot_dimension_numbers<[1], [0], [0], [1], [0, 0, 1, 1], [], []>, precision = #tpu.contract_precision<fp32>} : vector<32x32xf32>, vector<32x256xf32>, vector<32x256xf32> -> vector<32x256xf32>
    %140 = arith.addf %117, %139 : vector<32x256xf32>
    %141 = vector.extract_strided_slice %128 {offsets = [0, 240], sizes = [32, 16], strides = [1, 1]} : vector<32x256xf32> to vector<32x16xf32>
    %142 = vector.extract_strided_slice %128 {offsets = [0, 0], sizes = [32, 240], strides = [1, 1]} : vector<32x256xf32> to vector<32x240xf32>
    %143 = tpu.concatenate %141, %142 in 1 : vector<32x16xf32>, vector<32x240xf32> -> vector<32x256xf32>
    %144 = vector.extract_strided_slice %0 {offsets = [1, 0], sizes = [1, 256], strides = [1, 1]} : vector<9x256xf32> to vector<1x256xf32>
    %145 = vector.shape_cast %144 : vector<1x256xf32> to vector<256xf32>
    %146 = vector.shape_cast %145 : vector<256xf32> to vector<1x256xf32>
    %147 = vector.broadcast %146 : vector<1x256xf32> to vector<32x256xf32>
    %148 = arith.mulf %143, %147 : vector<32x256xf32>
    %c10 = arith.constant 10 : index
    %c0_45 = arith.constant 0 : index
    %c0_46 = arith.constant 0 : index
    %149 = vector.load %arg5[%c10, %c0_45, %c0_46] : memref<27x32x32xf32, #tpu.memory_space<vmem>>, vector<1x32x32xf32>
    %150 = vector.shape_cast %149 : vector<1x32x32xf32> to vector<32x32xf32>
    %cst_47 = arith.constant dense<0.000000e+00> : vector<32x256xf32>
    %151 = tpu.matmul %150, %148, %cst_47 {dimension_numbers = #tpu.dot_dimension_numbers<[1], [0], [0], [1], [0, 0, 1, 1], [], []>, precision = #tpu.contract_precision<fp32>} : vector<32x32xf32>, vector<32x256xf32>, vector<32x256xf32> -> vector<32x256xf32>
    %152 = arith.addf %140, %151 : vector<32x256xf32>
    %153 = vector.extract_strided_slice %128 {offsets = [0, 241], sizes = [32, 15], strides = [1, 1]} : vector<32x256xf32> to vector<32x15xf32>
    %154 = vector.extract_strided_slice %128 {offsets = [0, 0], sizes = [32, 241], strides = [1, 1]} : vector<32x256xf32> to vector<32x241xf32>
    %155 = tpu.concatenate %153, %154 in 1 : vector<32x15xf32>, vector<32x241xf32> -> vector<32x256xf32>
    %156 = vector.extract_strided_slice %0 {offsets = [2, 0], sizes = [1, 256], strides = [1, 1]} : vector<9x256xf32> to vector<1x256xf32>
    %157 = vector.shape_cast %156 : vector<1x256xf32> to vector<256xf32>
    %158 = vector.shape_cast %157 : vector<256xf32> to vector<1x256xf32>
    %159 = vector.broadcast %158 : vector<1x256xf32> to vector<32x256xf32>
    %160 = arith.mulf %155, %159 : vector<32x256xf32>
    %c11 = arith.constant 11 : index
    %c0_48 = arith.constant 0 : index
    %c0_49 = arith.constant 0 : index
    %161 = vector.load %arg5[%c11, %c0_48, %c0_49] : memref<27x32x32xf32, #tpu.memory_space<vmem>>, vector<1x32x32xf32>
    %162 = vector.shape_cast %161 : vector<1x32x32xf32> to vector<32x32xf32>
    %cst_50 = arith.constant dense<0.000000e+00> : vector<32x256xf32>
    %163 = tpu.matmul %162, %160, %cst_50 {dimension_numbers = #tpu.dot_dimension_numbers<[1], [0], [0], [1], [0, 0, 1, 1], [], []>, precision = #tpu.contract_precision<fp32>} : vector<32x32xf32>, vector<32x256xf32>, vector<32x256xf32> -> vector<32x256xf32>
    %164 = arith.addf %152, %163 : vector<32x256xf32>
    %165 = vector.extract_strided_slice %128 {offsets = [0, 255], sizes = [32, 1], strides = [1, 1]} : vector<32x256xf32> to vector<32x1xf32>
    %166 = vector.extract_strided_slice %128 {offsets = [0, 0], sizes = [32, 255], strides = [1, 1]} : vector<32x256xf32> to vector<32x255xf32>
    %167 = tpu.concatenate %165, %166 in 1 : vector<32x1xf32>, vector<32x255xf32> -> vector<32x256xf32>
    %168 = vector.extract_strided_slice %0 {offsets = [3, 0], sizes = [1, 256], strides = [1, 1]} : vector<9x256xf32> to vector<1x256xf32>
    %169 = vector.shape_cast %168 : vector<1x256xf32> to vector<256xf32>
    %170 = vector.shape_cast %169 : vector<256xf32> to vector<1x256xf32>
    %171 = vector.broadcast %170 : vector<1x256xf32> to vector<32x256xf32>
    %172 = arith.mulf %167, %171 : vector<32x256xf32>
    %c12 = arith.constant 12 : index
    %c0_51 = arith.constant 0 : index
    %c0_52 = arith.constant 0 : index
    %173 = vector.load %arg5[%c12, %c0_51, %c0_52] : memref<27x32x32xf32, #tpu.memory_space<vmem>>, vector<1x32x32xf32>
    %174 = vector.shape_cast %173 : vector<1x32x32xf32> to vector<32x32xf32>
    %cst_53 = arith.constant dense<0.000000e+00> : vector<32x256xf32>
    %175 = tpu.matmul %174, %172, %cst_53 {dimension_numbers = #tpu.dot_dimension_numbers<[1], [0], [0], [1], [0, 0, 1, 1], [], []>, precision = #tpu.contract_precision<fp32>} : vector<32x32xf32>, vector<32x256xf32>, vector<32x256xf32> -> vector<32x256xf32>
    %176 = arith.addf %164, %175 : vector<32x256xf32>
    %177 = vector.extract_strided_slice %0 {offsets = [4, 0], sizes = [1, 256], strides = [1, 1]} : vector<9x256xf32> to vector<1x256xf32>
    %178 = vector.shape_cast %177 : vector<1x256xf32> to vector<256xf32>
    %179 = vector.shape_cast %178 : vector<256xf32> to vector<1x256xf32>
    %180 = vector.broadcast %179 : vector<1x256xf32> to vector<32x256xf32>
    %181 = arith.mulf %128, %180 : vector<32x256xf32>
    %c13 = arith.constant 13 : index
    %c0_54 = arith.constant 0 : index
    %c0_55 = arith.constant 0 : index
    %182 = vector.load %arg5[%c13, %c0_54, %c0_55] : memref<27x32x32xf32, #tpu.memory_space<vmem>>, vector<1x32x32xf32>
    %183 = vector.shape_cast %182 : vector<1x32x32xf32> to vector<32x32xf32>
    %cst_56 = arith.constant dense<0.000000e+00> : vector<32x256xf32>
    %184 = tpu.matmul %183, %181, %cst_56 {dimension_numbers = #tpu.dot_dimension_numbers<[1], [0], [0], [1], [0, 0, 1, 1], [], []>, precision = #tpu.contract_precision<fp32>} : vector<32x32xf32>, vector<32x256xf32>, vector<32x256xf32> -> vector<32x256xf32>
    %185 = arith.addf %176, %184 : vector<32x256xf32>
    %186 = vector.extract_strided_slice %128 {offsets = [0, 1], sizes = [32, 255], strides = [1, 1]} : vector<32x256xf32> to vector<32x255xf32>
    %187 = vector.extract_strided_slice %128 {offsets = [0, 0], sizes = [32, 1], strides = [1, 1]} : vector<32x256xf32> to vector<32x1xf32>
    %188 = tpu.concatenate %186, %187 in 1 : vector<32x255xf32>, vector<32x1xf32> -> vector<32x256xf32>
    %189 = vector.extract_strided_slice %0 {offsets = [5, 0], sizes = [1, 256], strides = [1, 1]} : vector<9x256xf32> to vector<1x256xf32>
    %190 = vector.shape_cast %189 : vector<1x256xf32> to vector<256xf32>
    %191 = vector.shape_cast %190 : vector<256xf32> to vector<1x256xf32>
    %192 = vector.broadcast %191 : vector<1x256xf32> to vector<32x256xf32>
    %193 = arith.mulf %188, %192 : vector<32x256xf32>
    %c14 = arith.constant 14 : index
    %c0_57 = arith.constant 0 : index
    %c0_58 = arith.constant 0 : index
    %194 = vector.load %arg5[%c14, %c0_57, %c0_58] : memref<27x32x32xf32, #tpu.memory_space<vmem>>, vector<1x32x32xf32>
    %195 = vector.shape_cast %194 : vector<1x32x32xf32> to vector<32x32xf32>
    %cst_59 = arith.constant dense<0.000000e+00> : vector<32x256xf32>
    %196 = tpu.matmul %195, %193, %cst_59 {dimension_numbers = #tpu.dot_dimension_numbers<[1], [0], [0], [1], [0, 0, 1, 1], [], []>, precision = #tpu.contract_precision<fp32>} : vector<32x32xf32>, vector<32x256xf32>, vector<32x256xf32> -> vector<32x256xf32>
    %197 = arith.addf %185, %196 : vector<32x256xf32>
    %198 = vector.extract_strided_slice %128 {offsets = [0, 15], sizes = [32, 241], strides = [1, 1]} : vector<32x256xf32> to vector<32x241xf32>
    %199 = vector.extract_strided_slice %128 {offsets = [0, 0], sizes = [32, 15], strides = [1, 1]} : vector<32x256xf32> to vector<32x15xf32>
    %200 = tpu.concatenate %198, %199 in 1 : vector<32x241xf32>, vector<32x15xf32> -> vector<32x256xf32>
    %201 = vector.extract_strided_slice %0 {offsets = [6, 0], sizes = [1, 256], strides = [1, 1]} : vector<9x256xf32> to vector<1x256xf32>
    %202 = vector.shape_cast %201 : vector<1x256xf32> to vector<256xf32>
    %203 = vector.shape_cast %202 : vector<256xf32> to vector<1x256xf32>
    %204 = vector.broadcast %203 : vector<1x256xf32> to vector<32x256xf32>
    %205 = arith.mulf %200, %204 : vector<32x256xf32>
    %c15 = arith.constant 15 : index
    %c0_60 = arith.constant 0 : index
    %c0_61 = arith.constant 0 : index
    %206 = vector.load %arg5[%c15, %c0_60, %c0_61] : memref<27x32x32xf32, #tpu.memory_space<vmem>>, vector<1x32x32xf32>
    %207 = vector.shape_cast %206 : vector<1x32x32xf32> to vector<32x32xf32>
    %cst_62 = arith.constant dense<0.000000e+00> : vector<32x256xf32>
    %208 = tpu.matmul %207, %205, %cst_62 {dimension_numbers = #tpu.dot_dimension_numbers<[1], [0], [0], [1], [0, 0, 1, 1], [], []>, precision = #tpu.contract_precision<fp32>} : vector<32x32xf32>, vector<32x256xf32>, vector<32x256xf32> -> vector<32x256xf32>
    %209 = arith.addf %197, %208 : vector<32x256xf32>
    %210 = vector.extract_strided_slice %128 {offsets = [0, 16], sizes = [32, 240], strides = [1, 1]} : vector<32x256xf32> to vector<32x240xf32>
    %211 = vector.extract_strided_slice %128 {offsets = [0, 0], sizes = [32, 16], strides = [1, 1]} : vector<32x256xf32> to vector<32x16xf32>
    %212 = tpu.concatenate %210, %211 in 1 : vector<32x240xf32>, vector<32x16xf32> -> vector<32x256xf32>
    %213 = vector.extract_strided_slice %0 {offsets = [7, 0], sizes = [1, 256], strides = [1, 1]} : vector<9x256xf32> to vector<1x256xf32>
    %214 = vector.shape_cast %213 : vector<1x256xf32> to vector<256xf32>
    %215 = vector.shape_cast %214 : vector<256xf32> to vector<1x256xf32>
    %216 = vector.broadcast %215 : vector<1x256xf32> to vector<32x256xf32>
    %217 = arith.mulf %212, %216 : vector<32x256xf32>
    %c16 = arith.constant 16 : index
    %c0_63 = arith.constant 0 : index
    %c0_64 = arith.constant 0 : index
    %218 = vector.load %arg5[%c16, %c0_63, %c0_64] : memref<27x32x32xf32, #tpu.memory_space<vmem>>, vector<1x32x32xf32>
    %219 = vector.shape_cast %218 : vector<1x32x32xf32> to vector<32x32xf32>
    %cst_65 = arith.constant dense<0.000000e+00> : vector<32x256xf32>
    %220 = tpu.matmul %219, %217, %cst_65 {dimension_numbers = #tpu.dot_dimension_numbers<[1], [0], [0], [1], [0, 0, 1, 1], [], []>, precision = #tpu.contract_precision<fp32>} : vector<32x32xf32>, vector<32x256xf32>, vector<32x256xf32> -> vector<32x256xf32>
    %221 = arith.addf %209, %220 : vector<32x256xf32>
    %222 = vector.extract_strided_slice %128 {offsets = [0, 17], sizes = [32, 239], strides = [1, 1]} : vector<32x256xf32> to vector<32x239xf32>
    %223 = vector.extract_strided_slice %128 {offsets = [0, 0], sizes = [32, 17], strides = [1, 1]} : vector<32x256xf32> to vector<32x17xf32>
    %224 = tpu.concatenate %222, %223 in 1 : vector<32x239xf32>, vector<32x17xf32> -> vector<32x256xf32>
    %225 = vector.extract_strided_slice %0 {offsets = [8, 0], sizes = [1, 256], strides = [1, 1]} : vector<9x256xf32> to vector<1x256xf32>
    %226 = vector.shape_cast %225 : vector<1x256xf32> to vector<256xf32>
    %227 = vector.shape_cast %226 : vector<256xf32> to vector<1x256xf32>
    %228 = vector.broadcast %227 : vector<1x256xf32> to vector<32x256xf32>
    %229 = arith.mulf %224, %228 : vector<32x256xf32>
    %c17 = arith.constant 17 : index
    %c0_66 = arith.constant 0 : index
    %c0_67 = arith.constant 0 : index
    %230 = vector.load %arg5[%c17, %c0_66, %c0_67] : memref<27x32x32xf32, #tpu.memory_space<vmem>>, vector<1x32x32xf32>
    %231 = vector.shape_cast %230 : vector<1x32x32xf32> to vector<32x32xf32>
    %cst_68 = arith.constant dense<0.000000e+00> : vector<32x256xf32>
    %232 = tpu.matmul %231, %229, %cst_68 {dimension_numbers = #tpu.dot_dimension_numbers<[1], [0], [0], [1], [0, 0, 1, 1], [], []>, precision = #tpu.contract_precision<fp32>} : vector<32x32xf32>, vector<32x256xf32>, vector<32x256xf32> -> vector<32x256xf32>
    %233 = arith.addf %221, %232 : vector<32x256xf32>
    %c2_i32 = arith.constant 2 : i32
    %234 = arith.addi %arg1, %c2_i32 : i32
    %c1_i32_69 = arith.constant 1 : i32
    %235 = arith.subi %234, %c1_i32_69 : i32
    %c0_i32_70 = arith.constant 0 : i32
    %236 = arith.cmpi sge, %235, %c0_i32_70 : i32
    %c15_i32_71 = arith.constant 15 : i32
    %237 = arith.cmpi sle, %235, %c15_i32_71 : i32
    %238 = arith.andi %236, %237 : i1
    %239 = arith.extui %238 : i1 to i32
    %240 = arith.sitofp %239 : i32 to f32
    %c0_72 = arith.constant 0 : index
    %c0_73 = arith.constant 0 : index
    %c0_74 = arith.constant 0 : index
    %c0_75 = arith.constant 0 : index
    %241 = vector.load %arg4[%c0_72, %c0_73, %c0_74, %c0_75] : memref<1x1x32x256xf32, #tpu.memory_space<vmem>>, vector<1x1x32x256xf32>
    %242 = vector.shape_cast %241 : vector<1x1x32x256xf32> to vector<32x256xf32>
    %243 = vector.broadcast %240 : f32 to vector<32x256xf32>
    %244 = arith.mulf %242, %243 : vector<32x256xf32>
    %245 = vector.extract_strided_slice %244 {offsets = [0, 239], sizes = [32, 17], strides = [1, 1]} : vector<32x256xf32> to vector<32x17xf32>
    %246 = vector.extract_strided_slice %244 {offsets = [0, 0], sizes = [32, 239], strides = [1, 1]} : vector<32x256xf32> to vector<32x239xf32>
    %247 = tpu.concatenate %245, %246 in 1 : vector<32x17xf32>, vector<32x239xf32> -> vector<32x256xf32>
    %248 = vector.extract_strided_slice %0 {offsets = [0, 0], sizes = [1, 256], strides = [1, 1]} : vector<9x256xf32> to vector<1x256xf32>
    %249 = vector.shape_cast %248 : vector<1x256xf32> to vector<256xf32>
    %250 = vector.shape_cast %249 : vector<256xf32> to vector<1x256xf32>
    %251 = vector.broadcast %250 : vector<1x256xf32> to vector<32x256xf32>
    %252 = arith.mulf %247, %251 : vector<32x256xf32>
    %c18 = arith.constant 18 : index
    %c0_76 = arith.constant 0 : index
    %c0_77 = arith.constant 0 : index
    %253 = vector.load %arg5[%c18, %c0_76, %c0_77] : memref<27x32x32xf32, #tpu.memory_space<vmem>>, vector<1x32x32xf32>
    %254 = vector.shape_cast %253 : vector<1x32x32xf32> to vector<32x32xf32>
    %cst_78 = arith.constant dense<0.000000e+00> : vector<32x256xf32>
    %255 = tpu.matmul %254, %252, %cst_78 {dimension_numbers = #tpu.dot_dimension_numbers<[1], [0], [0], [1], [0, 0, 1, 1], [], []>, precision = #tpu.contract_precision<fp32>} : vector<32x32xf32>, vector<32x256xf32>, vector<32x256xf32> -> vector<32x256xf32>
    %256 = arith.addf %233, %255 : vector<32x256xf32>
    %257 = vector.extract_strided_slice %244 {offsets = [0, 240], sizes = [32, 16], strides = [1, 1]} : vector<32x256xf32> to vector<32x16xf32>
    %258 = vector.extract_strided_slice %244 {offsets = [0, 0], sizes = [32, 240], strides = [1, 1]} : vector<32x256xf32> to vector<32x240xf32>
    %259 = tpu.concatenate %257, %258 in 1 : vector<32x16xf32>, vector<32x240xf32> -> vector<32x256xf32>
    %260 = vector.extract_strided_slice %0 {offsets = [1, 0], sizes = [1, 256], strides = [1, 1]} : vector<9x256xf32> to vector<1x256xf32>
    %261 = vector.shape_cast %260 : vector<1x256xf32> to vector<256xf32>
    %262 = vector.shape_cast %261 : vector<256xf32> to vector<1x256xf32>
    %263 = vector.broadcast %262 : vector<1x256xf32> to vector<32x256xf32>
    %264 = arith.mulf %259, %263 : vector<32x256xf32>
    %c19 = arith.constant 19 : index
    %c0_79 = arith.constant 0 : index
    %c0_80 = arith.constant 0 : index
    %265 = vector.load %arg5[%c19, %c0_79, %c0_80] : memref<27x32x32xf32, #tpu.memory_space<vmem>>, vector<1x32x32xf32>
    %266 = vector.shape_cast %265 : vector<1x32x32xf32> to vector<32x32xf32>
    %cst_81 = arith.constant dense<0.000000e+00> : vector<32x256xf32>
    %267 = tpu.matmul %266, %264, %cst_81 {dimension_numbers = #tpu.dot_dimension_numbers<[1], [0], [0], [1], [0, 0, 1, 1], [], []>, precision = #tpu.contract_precision<fp32>} : vector<32x32xf32>, vector<32x256xf32>, vector<32x256xf32> -> vector<32x256xf32>
    %268 = arith.addf %256, %267 : vector<32x256xf32>
    %269 = vector.extract_strided_slice %244 {offsets = [0, 241], sizes = [32, 15], strides = [1, 1]} : vector<32x256xf32> to vector<32x15xf32>
    %270 = vector.extract_strided_slice %244 {offsets = [0, 0], sizes = [32, 241], strides = [1, 1]} : vector<32x256xf32> to vector<32x241xf32>
    %271 = tpu.concatenate %269, %270 in 1 : vector<32x15xf32>, vector<32x241xf32> -> vector<32x256xf32>
    %272 = vector.extract_strided_slice %0 {offsets = [2, 0], sizes = [1, 256], strides = [1, 1]} : vector<9x256xf32> to vector<1x256xf32>
    %273 = vector.shape_cast %272 : vector<1x256xf32> to vector<256xf32>
    %274 = vector.shape_cast %273 : vector<256xf32> to vector<1x256xf32>
    %275 = vector.broadcast %274 : vector<1x256xf32> to vector<32x256xf32>
    %276 = arith.mulf %271, %275 : vector<32x256xf32>
    %c20 = arith.constant 20 : index
    %c0_82 = arith.constant 0 : index
    %c0_83 = arith.constant 0 : index
    %277 = vector.load %arg5[%c20, %c0_82, %c0_83] : memref<27x32x32xf32, #tpu.memory_space<vmem>>, vector<1x32x32xf32>
    %278 = vector.shape_cast %277 : vector<1x32x32xf32> to vector<32x32xf32>
    %cst_84 = arith.constant dense<0.000000e+00> : vector<32x256xf32>
    %279 = tpu.matmul %278, %276, %cst_84 {dimension_numbers = #tpu.dot_dimension_numbers<[1], [0], [0], [1], [0, 0, 1, 1], [], []>, precision = #tpu.contract_precision<fp32>} : vector<32x32xf32>, vector<32x256xf32>, vector<32x256xf32> -> vector<32x256xf32>
    %280 = arith.addf %268, %279 : vector<32x256xf32>
    %281 = vector.extract_strided_slice %244 {offsets = [0, 255], sizes = [32, 1], strides = [1, 1]} : vector<32x256xf32> to vector<32x1xf32>
    %282 = vector.extract_strided_slice %244 {offsets = [0, 0], sizes = [32, 255], strides = [1, 1]} : vector<32x256xf32> to vector<32x255xf32>
    %283 = tpu.concatenate %281, %282 in 1 : vector<32x1xf32>, vector<32x255xf32> -> vector<32x256xf32>
    %284 = vector.extract_strided_slice %0 {offsets = [3, 0], sizes = [1, 256], strides = [1, 1]} : vector<9x256xf32> to vector<1x256xf32>
    %285 = vector.shape_cast %284 : vector<1x256xf32> to vector<256xf32>
    %286 = vector.shape_cast %285 : vector<256xf32> to vector<1x256xf32>
    %287 = vector.broadcast %286 : vector<1x256xf32> to vector<32x256xf32>
    %288 = arith.mulf %283, %287 : vector<32x256xf32>
    %c21 = arith.constant 21 : index
    %c0_85 = arith.constant 0 : index
    %c0_86 = arith.constant 0 : index
    %289 = vector.load %arg5[%c21, %c0_85, %c0_86] : memref<27x32x32xf32, #tpu.memory_space<vmem>>, vector<1x32x32xf32>
    %290 = vector.shape_cast %289 : vector<1x32x32xf32> to vector<32x32xf32>
    %cst_87 = arith.constant dense<0.000000e+00> : vector<32x256xf32>
    %291 = tpu.matmul %290, %288, %cst_87 {dimension_numbers = #tpu.dot_dimension_numbers<[1], [0], [0], [1], [0, 0, 1, 1], [], []>, precision = #tpu.contract_precision<fp32>} : vector<32x32xf32>, vector<32x256xf32>, vector<32x256xf32> -> vector<32x256xf32>
    %292 = arith.addf %280, %291 : vector<32x256xf32>
    %293 = vector.extract_strided_slice %0 {offsets = [4, 0], sizes = [1, 256], strides = [1, 1]} : vector<9x256xf32> to vector<1x256xf32>
    %294 = vector.shape_cast %293 : vector<1x256xf32> to vector<256xf32>
    %295 = vector.shape_cast %294 : vector<256xf32> to vector<1x256xf32>
    %296 = vector.broadcast %295 : vector<1x256xf32> to vector<32x256xf32>
    %297 = arith.mulf %244, %296 : vector<32x256xf32>
    %c22 = arith.constant 22 : index
    %c0_88 = arith.constant 0 : index
    %c0_89 = arith.constant 0 : index
    %298 = vector.load %arg5[%c22, %c0_88, %c0_89] : memref<27x32x32xf32, #tpu.memory_space<vmem>>, vector<1x32x32xf32>
    %299 = vector.shape_cast %298 : vector<1x32x32xf32> to vector<32x32xf32>
    %cst_90 = arith.constant dense<0.000000e+00> : vector<32x256xf32>
    %300 = tpu.matmul %299, %297, %cst_90 {dimension_numbers = #tpu.dot_dimension_numbers<[1], [0], [0], [1], [0, 0, 1, 1], [], []>, precision = #tpu.contract_precision<fp32>} : vector<32x32xf32>, vector<32x256xf32>, vector<32x256xf32> -> vector<32x256xf32>
    %301 = arith.addf %292, %300 : vector<32x256xf32>
    %302 = vector.extract_strided_slice %244 {offsets = [0, 1], sizes = [32, 255], strides = [1, 1]} : vector<32x256xf32> to vector<32x255xf32>
    %303 = vector.extract_strided_slice %244 {offsets = [0, 0], sizes = [32, 1], strides = [1, 1]} : vector<32x256xf32> to vector<32x1xf32>
    %304 = tpu.concatenate %302, %303 in 1 : vector<32x255xf32>, vector<32x1xf32> -> vector<32x256xf32>
    %305 = vector.extract_strided_slice %0 {offsets = [5, 0], sizes = [1, 256], strides = [1, 1]} : vector<9x256xf32> to vector<1x256xf32>
    %306 = vector.shape_cast %305 : vector<1x256xf32> to vector<256xf32>
    %307 = vector.shape_cast %306 : vector<256xf32> to vector<1x256xf32>
    %308 = vector.broadcast %307 : vector<1x256xf32> to vector<32x256xf32>
    %309 = arith.mulf %304, %308 : vector<32x256xf32>
    %c23 = arith.constant 23 : index
    %c0_91 = arith.constant 0 : index
    %c0_92 = arith.constant 0 : index
    %310 = vector.load %arg5[%c23, %c0_91, %c0_92] : memref<27x32x32xf32, #tpu.memory_space<vmem>>, vector<1x32x32xf32>
    %311 = vector.shape_cast %310 : vector<1x32x32xf32> to vector<32x32xf32>
    %cst_93 = arith.constant dense<0.000000e+00> : vector<32x256xf32>
    %312 = tpu.matmul %311, %309, %cst_93 {dimension_numbers = #tpu.dot_dimension_numbers<[1], [0], [0], [1], [0, 0, 1, 1], [], []>, precision = #tpu.contract_precision<fp32>} : vector<32x32xf32>, vector<32x256xf32>, vector<32x256xf32> -> vector<32x256xf32>
    %313 = arith.addf %301, %312 : vector<32x256xf32>
    %314 = vector.extract_strided_slice %244 {offsets = [0, 15], sizes = [32, 241], strides = [1, 1]} : vector<32x256xf32> to vector<32x241xf32>
    %315 = vector.extract_strided_slice %244 {offsets = [0, 0], sizes = [32, 15], strides = [1, 1]} : vector<32x256xf32> to vector<32x15xf32>
    %316 = tpu.concatenate %314, %315 in 1 : vector<32x241xf32>, vector<32x15xf32> -> vector<32x256xf32>
    %317 = vector.extract_strided_slice %0 {offsets = [6, 0], sizes = [1, 256], strides = [1, 1]} : vector<9x256xf32> to vector<1x256xf32>
    %318 = vector.shape_cast %317 : vector<1x256xf32> to vector<256xf32>
    %319 = vector.shape_cast %318 : vector<256xf32> to vector<1x256xf32>
    %320 = vector.broadcast %319 : vector<1x256xf32> to vector<32x256xf32>
    %321 = arith.mulf %316, %320 : vector<32x256xf32>
    %c24 = arith.constant 24 : index
    %c0_94 = arith.constant 0 : index
    %c0_95 = arith.constant 0 : index
    %322 = vector.load %arg5[%c24, %c0_94, %c0_95] : memref<27x32x32xf32, #tpu.memory_space<vmem>>, vector<1x32x32xf32>
    %323 = vector.shape_cast %322 : vector<1x32x32xf32> to vector<32x32xf32>
    %cst_96 = arith.constant dense<0.000000e+00> : vector<32x256xf32>
    %324 = tpu.matmul %323, %321, %cst_96 {dimension_numbers = #tpu.dot_dimension_numbers<[1], [0], [0], [1], [0, 0, 1, 1], [], []>, precision = #tpu.contract_precision<fp32>} : vector<32x32xf32>, vector<32x256xf32>, vector<32x256xf32> -> vector<32x256xf32>
    %325 = arith.addf %313, %324 : vector<32x256xf32>
    %326 = vector.extract_strided_slice %244 {offsets = [0, 16], sizes = [32, 240], strides = [1, 1]} : vector<32x256xf32> to vector<32x240xf32>
    %327 = vector.extract_strided_slice %244 {offsets = [0, 0], sizes = [32, 16], strides = [1, 1]} : vector<32x256xf32> to vector<32x16xf32>
    %328 = tpu.concatenate %326, %327 in 1 : vector<32x240xf32>, vector<32x16xf32> -> vector<32x256xf32>
    %329 = vector.extract_strided_slice %0 {offsets = [7, 0], sizes = [1, 256], strides = [1, 1]} : vector<9x256xf32> to vector<1x256xf32>
    %330 = vector.shape_cast %329 : vector<1x256xf32> to vector<256xf32>
    %331 = vector.shape_cast %330 : vector<256xf32> to vector<1x256xf32>
    %332 = vector.broadcast %331 : vector<1x256xf32> to vector<32x256xf32>
    %333 = arith.mulf %328, %332 : vector<32x256xf32>
    %c25 = arith.constant 25 : index
    %c0_97 = arith.constant 0 : index
    %c0_98 = arith.constant 0 : index
    %334 = vector.load %arg5[%c25, %c0_97, %c0_98] : memref<27x32x32xf32, #tpu.memory_space<vmem>>, vector<1x32x32xf32>
    %335 = vector.shape_cast %334 : vector<1x32x32xf32> to vector<32x32xf32>
    %cst_99 = arith.constant dense<0.000000e+00> : vector<32x256xf32>
    %336 = tpu.matmul %335, %333, %cst_99 {dimension_numbers = #tpu.dot_dimension_numbers<[1], [0], [0], [1], [0, 0, 1, 1], [], []>, precision = #tpu.contract_precision<fp32>} : vector<32x32xf32>, vector<32x256xf32>, vector<32x256xf32> -> vector<32x256xf32>
    %337 = arith.addf %325, %336 : vector<32x256xf32>
    %338 = vector.extract_strided_slice %244 {offsets = [0, 17], sizes = [32, 239], strides = [1, 1]} : vector<32x256xf32> to vector<32x239xf32>
    %339 = vector.extract_strided_slice %244 {offsets = [0, 0], sizes = [32, 17], strides = [1, 1]} : vector<32x256xf32> to vector<32x17xf32>
    %340 = tpu.concatenate %338, %339 in 1 : vector<32x239xf32>, vector<32x17xf32> -> vector<32x256xf32>
    %341 = vector.extract_strided_slice %0 {offsets = [8, 0], sizes = [1, 256], strides = [1, 1]} : vector<9x256xf32> to vector<1x256xf32>
    %342 = vector.shape_cast %341 : vector<1x256xf32> to vector<256xf32>
    %343 = vector.shape_cast %342 : vector<256xf32> to vector<1x256xf32>
    %344 = vector.broadcast %343 : vector<1x256xf32> to vector<32x256xf32>
    %345 = arith.mulf %340, %344 : vector<32x256xf32>
    %c26 = arith.constant 26 : index
    %c0_100 = arith.constant 0 : index
    %c0_101 = arith.constant 0 : index
    %346 = vector.load %arg5[%c26, %c0_100, %c0_101] : memref<27x32x32xf32, #tpu.memory_space<vmem>>, vector<1x32x32xf32>
    %347 = vector.shape_cast %346 : vector<1x32x32xf32> to vector<32x32xf32>
    %cst_102 = arith.constant dense<0.000000e+00> : vector<32x256xf32>
    %348 = tpu.matmul %347, %345, %cst_102 {dimension_numbers = #tpu.dot_dimension_numbers<[1], [0], [0], [1], [0, 0, 1, 1], [], []>, precision = #tpu.contract_precision<fp32>} : vector<32x32xf32>, vector<32x256xf32>, vector<32x256xf32> -> vector<32x256xf32>
    %349 = arith.addf %337, %348 : vector<32x256xf32>
    %c0_103 = arith.constant 0 : index
    %c0_104 = arith.constant 0 : index
    %350 = vector.load %arg6[%c0_103, %c0_104] : memref<32x1xf32, #tpu.memory_space<vmem>>, vector<32x1xf32>
    %351 = vector.broadcast %350 : vector<32x1xf32> to vector<32x256xf32>
    %352 = arith.addf %349, %351 : vector<32x256xf32>
    %c0_105 = arith.constant 0 : index
    %c0_106 = arith.constant 0 : index
    %c0_107 = arith.constant 0 : index
    %c0_108 = arith.constant 0 : index
    %353 = vector.load %arg8[%c0_105, %c0_106, %c0_107, %c0_108] : memref<1x1x32x256xf32, #tpu.memory_space<vmem>>, vector<1x1x32x256xf32>
    %354 = vector.shape_cast %353 : vector<1x1x32x256xf32> to vector<32x256xf32>
    %355 = vector.shape_cast %352 : vector<32x256xf32> to vector<1x1x32x256xf32>
    tpu.vector_store %arg8[%c0_105, %c0_106, %c0_107, %c0_108], %355 {strides = array<i32>} : memref<1x1x32x256xf32, #tpu.memory_space<vmem>>, vector<1x1x32x256xf32>,
    %c0_i32_109 = arith.constant 0 : i32
    %356 = arith.cmpi eq, %arg1, %c0_i32_109 : i32
    %357 = arith.extui %356 : i1 to i32
    %c0_i32_110 = arith.constant 0 : i32
    %358 = arith.cmpi ne, %357, %c0_i32_110 : i32
    scf.if %358 {
      %cst_125 = arith.constant 0.000000e+00 : f32
      %376 = vector.broadcast %cst_125 : f32 to vector<1x32x1xf32>
      %c0_126 = arith.constant 0 : index
      %c0_127 = arith.constant 0 : index
      %c0_128 = arith.constant 0 : index
      %377 = vector.load %arg9[%c0_126, %c0_127, %c0_128] : memref<1x32x1xf32, #tpu.memory_space<vmem>>, vector<1x32x1xf32>
      tpu.vector_store %arg9[%c0_126, %c0_127, %c0_128], %376 {strides = array<i32>} : memref<1x32x1xf32, #tpu.memory_space<vmem>>, vector<1x32x1xf32>,
      %cst_129 = arith.constant 0.000000e+00 : f32
      %378 = vector.broadcast %cst_129 : f32 to vector<1x32x1xf32>
      %c0_130 = arith.constant 0 : index
      %c0_131 = arith.constant 0 : index
      %c0_132 = arith.constant 0 : index
      %379 = vector.load %arg10[%c0_130, %c0_131, %c0_132] : memref<1x32x1xf32, #tpu.memory_space<vmem>>, vector<1x32x1xf32>
      tpu.vector_store %arg10[%c0_130, %c0_131, %c0_132], %378 {strides = array<i32>} : memref<1x32x1xf32, #tpu.memory_space<vmem>>, vector<1x32x1xf32>,
    } else {
    }
    %c0_111 = arith.constant 0 : index
    %c0_112 = arith.constant 0 : index
    %c0_113 = arith.constant 0 : index
    %359 = vector.load %arg9[%c0_111, %c0_112, %c0_113] : memref<1x32x1xf32, #tpu.memory_space<vmem>>, vector<1x32x1xf32>
    %360 = vector.shape_cast %359 : vector<1x32x1xf32> to vector<32x1xf32>
    %cst_114 = arith.constant dense<0.000000e+00> : vector<32xf32>
    %361 = vector.multi_reduction <add>, %352, %cst_114 [1] : vector<32x256xf32> to vector<32xf32>
    %362 = vector.shape_cast %361 : vector<32xf32> to vector<32x1xf32>
    %363 = arith.addf %360, %362 : vector<32x1xf32>
    %c0_115 = arith.constant 0 : index
    %c0_116 = arith.constant 0 : index
    %c0_117 = arith.constant 0 : index
    %364 = vector.load %arg9[%c0_115, %c0_116, %c0_117] : memref<1x32x1xf32, #tpu.memory_space<vmem>>, vector<1x32x1xf32>
    %365 = vector.shape_cast %364 : vector<1x32x1xf32> to vector<32x1xf32>
    %366 = vector.shape_cast %363 : vector<32x1xf32> to vector<1x32x1xf32>
    tpu.vector_store %arg9[%c0_115, %c0_116, %c0_117], %366 {strides = array<i32>} : memref<1x32x1xf32, #tpu.memory_space<vmem>>, vector<1x32x1xf32>,
    %c0_118 = arith.constant 0 : index
    %c0_119 = arith.constant 0 : index
    %c0_120 = arith.constant 0 : index
    %367 = vector.load %arg10[%c0_118, %c0_119, %c0_120] : memref<1x32x1xf32, #tpu.memory_space<vmem>>, vector<1x32x1xf32>
    %368 = vector.shape_cast %367 : vector<1x32x1xf32> to vector<32x1xf32>
    %369 = arith.mulf %352, %352 : vector<32x256xf32>
    %cst_121 = arith.constant dense<0.000000e+00> : vector<32xf32>
    %370 = vector.multi_reduction <add>, %369, %cst_121 [1] : vector<32x256xf32> to vector<32xf32>
    %371 = vector.shape_cast %370 : vector<32xf32> to vector<32x1xf32>
    %372 = arith.addf %368, %371 : vector<32x1xf32>
    %c0_122 = arith.constant 0 : index
    %c0_123 = arith.constant 0 : index
    %c0_124 = arith.constant 0 : index
    %373 = vector.load %arg10[%c0_122, %c0_123, %c0_124] : memref<1x32x1xf32, #tpu.memory_space<vmem>>, vector<1x32x1xf32>
    %374 = vector.shape_cast %373 : vector<1x32x1xf32> to vector<32x1xf32>
    %375 = vector.shape_cast %372 : vector<32x1xf32> to vector<1x32x1xf32>
    tpu.vector_store %arg10[%c0_122, %c0_123, %c0_124], %375 {strides = array<i32>} : memref<1x32x1xf32, #tpu.memory_space<vmem>>, vector<1x32x1xf32>,
    return
  }
  func.func @transform_0(%arg0: i32, %arg1: i32) -> (i32, i32, i32, i32) {
    %c1_i32 = arith.constant 1 : i32
    %0 = arith.subi %arg1, %c1_i32 : i32
    %c0_i32 = arith.constant 0 : i32
    %c15_i32 = arith.constant 15 : i32
    %1 = arith.maxsi %c0_i32, %0 : i32
    %2 = arith.minsi %c15_i32, %1 : i32
    %c0_i32_0 = arith.constant 0 : i32
    %c0_i32_1 = arith.constant 0 : i32
    %c0_i32_2 = arith.constant 0 : i32
    return %arg0, %2, %c0_i32_0, %c0_i32_1 : i32, i32, i32, i32
  }
  func.func @transform_1(%arg0: i32, %arg1: i32) -> (i32, i32, i32, i32) {
    %c0_i32 = arith.constant 0 : i32
    %c0_i32_0 = arith.constant 0 : i32
    %c0_i32_1 = arith.constant 0 : i32
    return %arg0, %arg1, %c0_i32, %c0_i32_0 : i32, i32, i32, i32
  }
  func.func @transform_2(%arg0: i32, %arg1: i32) -> (i32, i32, i32, i32) {
    %c1_i32 = arith.constant 1 : i32
    %0 = arith.addi %arg1, %c1_i32 : i32
    %c0_i32 = arith.constant 0 : i32
    %c15_i32 = arith.constant 15 : i32
    %1 = arith.maxsi %c0_i32, %0 : i32
    %2 = arith.minsi %c15_i32, %1 : i32
    %c0_i32_0 = arith.constant 0 : i32
    %c0_i32_1 = arith.constant 0 : i32
    %c0_i32_2 = arith.constant 0 : i32
    return %arg0, %2, %c0_i32_0, %c0_i32_1 : i32, i32, i32, i32
  }
  func.func @transform_3(%arg0: i32, %arg1: i32) -> (i32, i32, i32) {
    %c0_i32 = arith.constant 0 : i32
    %c0_i32_0 = arith.constant 0 : i32
    %c0_i32_1 = arith.constant 0 : i32
    %c0_i32_2 = arith.constant 0 : i32
    return %c0_i32, %c0_i32_0, %c0_i32_1 : i32, i32, i32
  }
  func.func @transform_4(%arg0: i32, %arg1: i32) -> (i32, i32) {
    %c0_i32 = arith.constant 0 : i32
    %c0_i32_0 = arith.constant 0 : i32
    %c0_i32_1 = arith.constant 0 : i32
    return %c0_i32, %c0_i32_0 : i32, i32
  }
  func.func @transform_5(%arg0: i32, %arg1: i32) -> (i32, i32) {
    %c0_i32 = arith.constant 0 : i32
    %c0_i32_0 = arith.constant 0 : i32
    %c0_i32_1 = arith.constant 0 : i32
    return %c0_i32, %c0_i32_0 : i32, i32
  }
  func.func @transform_6(%arg0: i32, %arg1: i32) -> (i32, i32, i32, i32) {
    %c0_i32 = arith.constant 0 : i32
    %c0_i32_0 = arith.constant 0 : i32
    %c0_i32_1 = arith.constant 0 : i32
    return %arg0, %arg1, %c0_i32, %c0_i32_0 : i32, i32, i32, i32
  }
  func.func @transform_7(%arg0: i32, %arg1: i32) -> (i32, i32, i32) {
    %c0_i32 = arith.constant 0 : i32
    %c0_i32_0 = arith.constant 0 : i32
    %c0_i32_1 = arith.constant 0 : i32
    return %arg0, %c0_i32, %c0_i32_0 : i32, i32, i32
  }
  func.func @transform_8(%arg0: i32, %arg1: i32) -> (i32, i32, i32) {
    %c0_i32 = arith.constant 0 : i32
    %c0_i32_0 = arith.constant 0 : i32
    %c0_i32_1 = arith.constant 0 : i32
    return %arg0, %c0_i32, %c0_i32_0 : i32, i32, i32
  }
}

module attributes {stable_mosaic.version = 11 : i64} {
  func.func @_norm_act_kernel(%arg0: i32, %arg1: i32, %arg2: memref<1x1x16x256xf32, #tpu.memory_space<vmem>>, %arg3: memref<1x16x1xf32, #tpu.memory_space<vmem>>, %arg4: memref<1x16x1xf32, #tpu.memory_space<vmem>>, %arg5: memref<1x1x16x256xf32, #tpu.memory_space<vmem>>) attributes {dimension_semantics = [#tpu.dimension_semantics<parallel>, #tpu.dimension_semantics<parallel>], iteration_bounds = array<i64: 2, 16>, scalar_prefetch = 0 : i64, scratch_operands = 0 : i64, tpu.core_type = #tpu.core_type<tc>, window_params = [{transform_indices = @transform_0, window_bounds = array<i64: 1, 1, 16, 256>}, {transform_indices = @transform_1, window_bounds = array<i64: 1, 16, 1>}, {transform_indices = @transform_2, window_bounds = array<i64: 1, 16, 1>}, {transform_indices = @transform_3, window_bounds = array<i64: 1, 1, 16, 256>}]} {
    %c0 = arith.constant 0 : index
    %c0_0 = arith.constant 0 : index
    %c0_1 = arith.constant 0 : index
    %c0_2 = arith.constant 0 : index
    %0 = vector.load %arg2[%c0, %c0_0, %c0_1, %c0_2] : memref<1x1x16x256xf32, #tpu.memory_space<vmem>>, vector<1x1x16x256xf32>
    %1 = vector.shape_cast %0 : vector<1x1x16x256xf32> to vector<16x256xf32>
    %c0_3 = arith.constant 0 : index
    %c0_4 = arith.constant 0 : index
    %c0_5 = arith.constant 0 : index
    %2 = vector.load %arg3[%c0_3, %c0_4, %c0_5] : memref<1x16x1xf32, #tpu.memory_space<vmem>>, vector<1x16x1xf32>
    %3 = vector.shape_cast %2 : vector<1x16x1xf32> to vector<16x1xf32>
    %4 = vector.broadcast %3 : vector<16x1xf32> to vector<16x256xf32>
    %5 = arith.mulf %1, %4 : vector<16x256xf32>
    %c0_6 = arith.constant 0 : index
    %c0_7 = arith.constant 0 : index
    %c0_8 = arith.constant 0 : index
    %6 = vector.load %arg4[%c0_6, %c0_7, %c0_8] : memref<1x16x1xf32, #tpu.memory_space<vmem>>, vector<1x16x1xf32>
    %7 = vector.shape_cast %6 : vector<1x16x1xf32> to vector<16x1xf32>
    %8 = vector.broadcast %7 : vector<16x1xf32> to vector<16x256xf32>
    %9 = arith.addf %5, %8 : vector<16x256xf32>
    %cst = arith.constant 0.000000e+00 : f32
    %10 = vector.broadcast %cst : f32 to vector<16x256xf32>
    %11 = arith.cmpf oge, %9, %10 : vector<16x256xf32>
    %cst_9 = arith.constant 0.00999999977 : f32
    %12 = vector.broadcast %cst_9 : f32 to vector<16x256xf32>
    %13 = arith.mulf %12, %9 : vector<16x256xf32>
    %14 = arith.select %11, %9, %13 : vector<16x256xi1>, vector<16x256xf32>
    %c0_10 = arith.constant 0 : index
    %c0_11 = arith.constant 0 : index
    %c0_12 = arith.constant 0 : index
    %c0_13 = arith.constant 0 : index
    %15 = vector.load %arg5[%c0_10, %c0_11, %c0_12, %c0_13] : memref<1x1x16x256xf32, #tpu.memory_space<vmem>>, vector<1x1x16x256xf32>
    %16 = vector.shape_cast %15 : vector<1x1x16x256xf32> to vector<16x256xf32>
    %17 = vector.shape_cast %14 : vector<16x256xf32> to vector<1x1x16x256xf32>
    tpu.vector_store %arg5[%c0_10, %c0_11, %c0_12, %c0_13], %17 {strides = array<i32>} : memref<1x1x16x256xf32, #tpu.memory_space<vmem>>, vector<1x1x16x256xf32>,
    return
  }
  func.func @transform_0(%arg0: i32, %arg1: i32) -> (i32, i32, i32, i32) {
    %c0_i32 = arith.constant 0 : i32
    %c0_i32_0 = arith.constant 0 : i32
    %c0_i32_1 = arith.constant 0 : i32
    return %arg0, %arg1, %c0_i32, %c0_i32_0 : i32, i32, i32, i32
  }
  func.func @transform_1(%arg0: i32, %arg1: i32) -> (i32, i32, i32) {
    %c0_i32 = arith.constant 0 : i32
    %c0_i32_0 = arith.constant 0 : i32
    %c0_i32_1 = arith.constant 0 : i32
    return %arg0, %c0_i32, %c0_i32_0 : i32, i32, i32
  }
  func.func @transform_2(%arg0: i32, %arg1: i32) -> (i32, i32, i32) {
    %c0_i32 = arith.constant 0 : i32
    %c0_i32_0 = arith.constant 0 : i32
    %c0_i32_1 = arith.constant 0 : i32
    return %arg0, %c0_i32, %c0_i32_0 : i32, i32, i32
  }
  func.func @transform_3(%arg0: i32, %arg1: i32) -> (i32, i32, i32, i32) {
    %c0_i32 = arith.constant 0 : i32
    %c0_i32_0 = arith.constant 0 : i32
    %c0_i32_1 = arith.constant 0 : i32
    return %arg0, %arg1, %c0_i32, %c0_i32_0 : i32, i32, i32, i32
  }
}

</mosaic_0001>

<bundles_post_ra>
// kernel: localization_module_forward.4
= control target key start
LH: loop header
LB: loop body
LE: loop exit
PB: predicated region body
PF: predicated region fallthrough
CT: control target
= control target key end

     0   :  { %s1542_s24 = smov 0   ;;  %s1544_s25 = smov 0   ;;  %s1768_s0 = inlined_call_operand.vmem [shape: f32[2,16,32,256], index: 0, kind: input, shape index: {}]   ;;  %s1769_s1 = inlined_call_operand.vmem [shape: f32[2,32,1], index: 1, kind: input, shape index: {}]   ;;  %s1770_s2 = inlined_call_operand.vmem [shape: f32[2,32,1], index: 2, kind: input, shape index: {}]   ;;  %s1771_s3 = inlined_call_operand.vmem [shape: f32[16,32], index: 3, kind: input, shape index: {}]   ;;  %s1772_s4 = inlined_call_operand.vmem [shape: f32[16,1], index: 4, kind: input, shape index: {}]   ;;  %s1773_s5 = inlined_call_operand.vmem [shape: f32[2,16,16,256], index: 5, kind: output, shape index: {0}]   ;;  %s1774_s6 = inlined_call_operand.vmem [shape: f32[2,16,1], index: 6, kind: output, shape index: {1}]   ;;  %s1775_s7 = inlined_call_operand.vmem [shape: f32[2,16,1], index: 7, kind: output, shape index: {2}]  }
   0x1   :  { %s1546_s26 = smov 0   ;;  %s1548_s27 = smov 0  }
   0x2   :  { %s1550_s28 = smov 0  }
   0x3 LB: > { %s27_s29 = sadd.s32 1, %s1489_s26  ;;  %s30_s30 = sadd.s32 1, %s1493_s27  ;;  %s1497_s28 = sphi %s1550_s28, %s18_s28   ;;  %s1493_s27 = sphi %s1548_s27, %s1779_s27   ;;  %s1489_s26 = sphi %s1546_s26, %s1778_s26   ;;  %s1485_s25 = sphi %s1544_s25, %s1777_s25   ;;  %s1481_s24 = sphi %s1542_s24, %s1776_s24  }
   0x4   : > { %p28_p0 = scmp.ge.s32.totalorder %s27_s29, 16  ;;  %p1320_p1 = scmp.ge.s32.totalorder %s1497_s28, 1 }
   0x5   : > { %p282_p2 = scmp.lt.s32.totalorder %s1497_s28, 33 }
   0x6   : > { %s1781_s29 = smov (%p28_p0, %s27_s29), 0  ;;  %s1783_s30 = smov (!%p28_p0, %s30_s30), %s1493_s27 }
   0x7   : > { %p283_p3 = pnand %p1320_p1, %p282_p2  ;;  %p32_p4 = scmp.ge.s32.totalorder %s1783_s30, 2 }
   0x8   : > { %p342_p5 = scmp.lt.s32.totalorder (!%p283_p3), %s1485_s25, 1  ;;  %v1499_v0 = vmov (!%p283_p3), 0   ;;  %v479_v9 = vld [vmem:[%s1772_s4 + $0x8] sm:$0xff] (!%p283_p3)  ;;  %v478_v10 = vld [vmem:[%s1772_s4] sm:$0xff] (!%p283_p3)  ;;  %v1500_v11 = vmov (!%p283_p3), 0.0   ;;  %p344_p6 = scmp.lt.s32.totalorder (!%p283_p3), %s1481_s24, 15 }
   0x9   : > { %s1785_s30 = smov (%p32_p4, %s1783_s30), 0  ;;  %286 = sbr.rel (%p283_p3) target bundleno = 567 (0x237), region = 40 }
   0xa   : > { %1458 = vset.pattern.permute.xlu1 (!%p283_p3), %v1499_v0  ;;  %1457 = vset.pattern.permute.xlu0 (!%p283_p3), %v1499_v0  ;;  %v476_v12 = vld [vmem:[%s1771_s3] sm:$0xff] (!%p283_p3)  ;;  %vm490_vm0 = vcmask (!%p283_p3), 261120   ;;  %v477_v14 = vld [vmem:[%s1771_s3 + $0x8] sm:$0xff] (!%p283_p3)  ;;  %p1335_p7 = scmp.ne.s32.totalorder (!%p283_p3), %s1481_s24, 0 }
   0xb   : > { %569 = vmatprep.mubr.f32.mxu1 (!%p283_p3), %v1500_v11  ;;  %880 = vmatprep.mubr.f32.mxu0 (!%p283_p3), %v1500_v11  ;;  %v492_v13 = vsel (!%p283_p3), %vm490_vm0, %v476_v12, 0  ;;  %v495_v16 = vsel (!%p283_p3), %vm490_vm0, %v477_v14, 0 }
   0xc   : > { %v1614_v15 = vand.u32 (!%p283_p3), 4294901760, %v492_v13  ;;  %v1624_v18 = vand.u32 (!%p283_p3), 4294901760, %v495_v16 }
   0xe   : > { %v1622_v17 = vsub.f32 (!%p283_p3), %v492_v13, %v1614_v15  ;;  %v1630_v24 = vsub.f32 (!%p283_p3), %v495_v16, %v1624_v18 }
  0x10   : > { %s1787_s25 = smov (!%p342_p5, %s1485_s25), 1  ;;  %v572_v23 = vand.u32 4294901760, %v1622_v17  ;;  %v583_v34 = vand.u32 4294901760, %v1630_v24  ;;  %vm1097_vm9 = vcmask (!%p1335_p7), 7168  }
  0x11   : > { %s1338_s8 = sshll.u32 %s1787_s25, 5  ;;  %s1340_s9 = sshll.u32 %s1787_s25, 4 }
  0x12   : > { %s360_s12 = scalar_lea.vmem %s1770_s2, %s1338_s8  ;;  %s1584_s15 = scalar_lea.vmem %s1774_s6, %s1340_s9  ;;  %v1637_v33 = vsub.f32 %v1622_v17, %v572_v23  ;;  %v1648_v50 = vsub.f32 %v1630_v24, %v583_v34 }
  0x13   : > { %s1589_s18 = scalar_lea.vmem %s1775_s7, %s1340_s9  ;;  %v420_v1 = vld [vmem:[%s360_s12] sm:$0xff]  ;;  %s355_s21 = scalar_lea.vmem %s1769_s1, %s1338_s8  ;;  %v421_v3 = vld [vmem:[%s360_s12 + $0x8] sm:$0xff]  ;;  %v423_v7 = vld [vmem:[%s360_s12 + $0x18] sm:$0xff] }
  0x14   : > { %426 = vperm.xlu1 %1458, %v420_v1   ;;  %v388_v2 = vld [vmem:[%s355_s21] sm:$0xff]  ;;  %v389_v4 = vld [vmem:[%s355_s21 + $0x8] sm:$0xff]  ;;  %v391_v5 = vld [vmem:[%s355_s21 + $0x18] sm:$0xff]  ;;  %s1604_s10 = scalar_select %p344_p6, %s1481_s24, 15  ;;  %v574_v49 = vand.u32 4294901760, %v1637_v33 }
  0x15   : > { %394 = vperm.xlu0 %1457, %v388_v2   ;;  %v390_v6 = vld [vmem:[%s355_s21 + $0x10] sm:$0xff]  ;;  %s1329_s9 = sshll.u32 %s1787_s25, 6 }
  0x16   : > { %v422_v8 = vld [vmem:[%s360_s12 + $0x10] sm:$0xff]  ;;  %s1321_s11 = sshll.u32 %s1604_s10, 3  ;;  %s1322_s12 = sshll.u32 %s1787_s25, 7 }
  0x17   : > { %s348_s16 = sadd.s32 %s1322_s12, %s1321_s11  ;;  %s1328_s8 = sshll.u32 %s1604_s10, 2 }
  0x18   : > { %431 = vperm.xlu1 %1458, %v421_v3   ;;  %s1323_s20 = sshll.u32 %s348_s16, 3  ;;  %s367_s11 = sadd.s32 %s1329_s9, %s1328_s8 }
  0x19   : > { %399 = vperm.xlu0 %1457, %v389_v4   ;;  %s1619_s23 = scalar_lea.vmem %s1768_s0, %s1323_s20  ;;  %s1330_s12 = sshll.u32 %s367_s11, 3 }
  0x1a   : > { %v380_v19 = vld [vmem:[%s1619_s23] sm:$0xff]  ;;  %v381_v20 = vld [vmem:[%s1619_s23 + $0x8] sm:$0xff]  ;;  %v382_v30 = vld [vmem:[%s1619_s23 + $0x10] sm:$0xff]  ;;  %s369_s16 = scalar_lea.vmem %s1773_s5, %s1330_s12 }
  0x1b   : > { %v383_v31 = vld [vmem:[%s1619_s23 + $0x18] sm:$0xff]  ;;  %v386_v39 = vld [vmem:[%s1619_s23 + $0x30] sm:$0xff]  ;;  %v384_v47 = vld [vmem:[%s1619_s23 + $0x20] sm:$0xff] }
  0x1c   : > { %409 = vperm.xlu1 %1458, %v391_v5   ;;  %v387_v40 = vld [vmem:[%s1619_s23 + $0x38] sm:$0xff]  ;;  %v385_v48 = vld [vmem:[%s1619_s23 + $0x28] sm:$0xff] }
  0x1d   : > { %404 = vperm.xlu0 %1457, %v390_v6  }
  0x20   : > { %441 = vperm.xlu1 %1458, %v423_v7  }
  0x21   : > { %436 = vperm.xlu0 %1457, %v422_v8  }
  0x24   : > { %487 = vperm.xlu1 %1458, %v479_v9  }
  0x25   : > { %482 = vperm.xlu0 %1457, %v478_v10  }
  0x93   : > { %v427_v21 = vpop.permute.xlu1 %426 }
  0x94   : > { %v395_v22 = vpop.permute.xlu0 %394 }
  0x95   : > { %v412_v25 = vmul.f32 %v395_v22, %v380_v19  ;;  %v413_v26 = vmul.f32 %v395_v22, %v381_v20 }
  0x97   : > { %v444_v27 = vadd.f32 %v427_v21, %v412_v25  ;;  %v445_v28 = vadd.f32 %v427_v21, %v413_v26  ;;  %v432_v29 = vpop.permute.xlu1 %431 }
  0x98   : > { %v400_v32 = vpop.permute.xlu0 %399 }
  0x99   : > { %vm452_vm1 = vcmp.ge.f32.partialorder %v444_v27, 0.0  ;;  %vm453_vm2 = vcmp.ge.f32.partialorder %v445_v28, 0.0  ;;  %v460_v35 = vmul.f32 0.01, %v444_v27  ;;  %v461_v36 = vmul.f32 0.01, %v445_v28 }
  0x9a   : > { %v414_v37 = vmul.f32 %v400_v32, %v382_v30  ;;  %v415_v38 = vmul.f32 %v400_v32, %v383_v31 }
  0x9b   : > { %v410_v41 = vpop.permute.xlu1 %409  ;;  %v469_v42 = vsel %vm453_vm2, %v445_v28, %v461_v36  ;;  %v468_v43 = vsel %vm452_vm1, %v444_v27, %v460_v35 }
  0x9c   : > { %v446_v44 = vadd.f32 %v432_v29, %v414_v37  ;;  %v447_v45 = vadd.f32 %v432_v29, %v415_v38  ;;  %v405_v46 = vpop.permute.xlu0 %404  ;;  %v418_v51 = vmul.f32 %v410_v41, %v386_v39  ;;  %v419_v52 = vmul.f32 %v410_v41, %v387_v40 }
  0x9d   : > { %v497_v53 = vand.u32 4294901760, %v469_v42  ;;  %v499_v54 = vand.u32 4294901760, %v468_v43  ;;  %v416_v57 = vmul.f32 %v405_v46, %v384_v47  ;;  %v417_v58 = vmul.f32 %v405_v46, %v385_v48 }
  0x9e   : > { %vm454_vm3 = vcmp.ge.f32.partialorder %v446_v44, 0.0  ;;  %vm455_vm4 = vcmp.ge.f32.partialorder %v447_v45, 0.0  ;;  %v462_v55 = vmul.f32 0.01, %v446_v44  ;;  %v463_v56 = vmul.f32 0.01, %v447_v45 }
  0x9f   : > { %v442_v59 = vpop.permute.xlu1 %441  ;;  %v1650_v60 = vsub.f32 %v469_v42, %v497_v53  ;;  %v1652_v61 = vsub.f32 %v468_v43, %v499_v54 }
  0xa0   : > { %v450_v62 = vadd.f32 %v442_v59, %v418_v51  ;;  %v451_v63 = vadd.f32 %v442_v59, %v419_v52  ;;  %v437_v0 = vpop.permute.xlu0 %436  ;;  %v471_v1 = vsel %vm455_vm4, %v447_v45, %v463_v56  ;;  %v470_v2 = vsel %vm454_vm3, %v446_v44, %v462_v55 }
  0xa1   : > { %v448_v3 = vadd.f32 %v437_v0, %v416_v57  ;;  %v449_v4 = vadd.f32 %v437_v0, %v417_v58  ;;  %v501_v5 = vand.u32 4294901760, %v471_v1  ;;  %v503_v6 = vand.u32 4294901760, %v470_v2 }
  0xa2   : > { %vm458_vm5 = vcmp.ge.f32.partialorder %v450_v62, 0.0  ;;  %vm459_vm6 = vcmp.ge.f32.partialorder %v451_v63, 0.0  ;;  %v466_v7 = vmul.f32 0.01, %v450_v62  ;;  %v467_v8 = vmul.f32 0.01, %v451_v63 }
  0xa3   : > { %vm456_vm7 = vcmp.ge.f32.partialorder %v448_v3, 0.0  ;;  %vm457_vm8 = vcmp.ge.f32.partialorder %v449_v4, 0.0  ;;  %v464_v9 = vmul.f32 0.01, %v448_v3  ;;  %v465_v10 = vmul.f32 0.01, %v449_v4 }
  0xa4   : > { %v474_v12 = vsel %vm458_vm5, %v450_v62, %v466_v7  ;;  %v475_v13 = vsel %vm459_vm6, %v451_v63, %v467_v8  ;;  %v1654_v14 = vpack.c.bf16 %v501_v5, %v497_v53  ;;  %v1656_v16 = vsub.f32 %v471_v1, %v501_v5 }
  0xa5   : > { %v472_v19 = vsel %vm456_vm7, %v448_v3, %v464_v9  ;;  %v473_v20 = vsel %vm457_vm8, %v449_v4, %v465_v10  ;;  %v1658_v21 = vpack.c.bf16 %v503_v6, %v499_v54  ;;  %v1660_v22 = vsub.f32 %v470_v2, %v503_v6  ;;  %v483_v9 = vpop.permute.xlu0 %482 }
  0xa6   : > { %1343 = vmatprep.subr.bf16.mxu1 %v1654_v14  ;;  %1367 = vmatprep.subr.bf16.mxu0 %v1654_v14  ;;  %v505_v25 = vand.u32 4294901760, %v473_v20  ;;  %v509_v26 = vand.u32 4294901760, %v475_v13  ;;  %v507_v27 = vand.u32 4294901760, %v472_v19  ;;  %v511_v28 = vand.u32 4294901760, %v474_v12 }
  0xa7   : > { %1345 = vmatpush1.bf16.msra.mxu1 %v1658_v21  ;;  %1369 = vmatpush1.bf16.msra.mxu0 %v1658_v21  ;;  %v594_v29 = vand.u32 4294901760, %v1650_v60  ;;  %v606_v30 = vand.u32 4294901760, %v1656_v16  ;;  %v600_v31 = vand.u32 4294901760, %v1652_v61  ;;  %v612_v32 = vand.u32 4294901760, %v1660_v22 }
  0xa8   : > { %v1670_v35 = vpack.c.bf16 %v509_v26, %v505_v25  ;;  %v1672_v36 = vsub.f32 %v473_v20, %v505_v25  ;;  %v1674_v37 = vsub.f32 %v475_v13, %v509_v26  ;;  %v1676_v38 = vpack.c.bf16 %v511_v28, %v507_v27 }
  0xa9   : > { %v1678_v39 = vsub.f32 %v472_v19, %v507_v27  ;;  %v1680_v40 = vsub.f32 %v474_v12, %v511_v28  ;;  %v595_v41 = vsub.f32 %v1650_v60, %v594_v29  ;;  %v607_v42 = vsub.f32 %v1656_v16, %v606_v30 }
  0xaa   : > { %1347 = vmatprep.subr.bf16.mxu1 %v1670_v35  ;;  %1371 = vmatprep.subr.bf16.mxu0 %v1670_v35  ;;  %v1374_v43 = vpack.c.bf16 %v606_v30, %v594_v29  ;;  %v601_v44 = vsub.f32 %v1652_v61, %v600_v31  ;;  %v613_v45 = vsub.f32 %v1660_v22, %v612_v32  ;;  %v618_v46 = vand.u32 4294901760, %v1672_v36 }
  0xab   : > { %1349 = vmatpush1.bf16.msra.mxu1 %v1676_v38  ;;  %1373 = vmatpush1.bf16.msra.mxu0 %v1676_v38  ;;  %v596_v47 = vand.u32 4294901760, %v595_v41  ;;  %v608_v48 = vand.u32 4294901760, %v607_v42  ;;  %v630_v51 = vand.u32 4294901760, %v1674_v37  ;;  %v585_v52 = vand.u32 4294901760, %v1648_v50 }
  0xac   : > { %1375 = vmatprep.subr.bf16.mxu0 %v1374_v43  ;;  %v602_v53 = vand.u32 4294901760, %v601_v44  ;;  %v614_v54 = vand.u32 4294901760, %v613_v45  ;;  %v619_v55 = vsub.f32 %v1672_v36, %v618_v46  ;;  %v624_v56 = vand.u32 4294901760, %v1678_v39 }
  0xad   : > { %v1350_v57 = vpack.c.bf16 %v608_v48, %v596_v47  ;;  %v1376_v58 = vpack.c.bf16 %v612_v32, %v600_v31  ;;  %v631_v59 = vsub.f32 %v1674_v37, %v630_v51  ;;  %v636_v62 = vand.u32 4294901760, %v1680_v40 }
  0xae   : > { %575 = vmatmul.mubr.f32.vlgmr.msra.gmra.mrb[0].mxu1 %v574_v49  ;;  %884 = vmatmul.mubr.f32.vlgmr.msra.gmra.mrb[0].mxu0 %v572_v23  ;;  %v1352_v50 = vpack.c.bf16 %v614_v54, %v602_v53  ;;  %v1378_v63 = vpack.c.bf16 %v630_v51, %v618_v46  ;;  %v620_v0 = vand.u32 4294901760, %v619_v55  ;;  %v625_v1 = vsub.f32 %v1678_v39, %v624_v56 }
  0xaf   : > { %1351 = vmatprep.subr.bf16.mxu1 %v1350_v57  ;;  %1377 = vmatpush1.bf16.msra.mxu0 %v1376_v58  ;;  %v632_v2 = vand.u32 4294901760, %v631_v59  ;;  %v637_v3 = vsub.f32 %v1680_v40, %v636_v62  ;;  %v1380_v23 = vpack.c.bf16 %v636_v62, %v624_v56  ;;  %v1358_v6 = vpack.c.bf16 %v1656_v16, %v1650_v60 }
  0xb0   : > { %1353 = vmatpush1.bf16.msra.mxu1 %v1352_v50  ;;  %1379 = vmatprep.subr.bf16.mxu0 %v1378_v63  ;;  %v626_v4 = vand.u32 4294901760, %v625_v1  ;;  %v1360_v7 = vpack.c.bf16 %v1660_v22, %v1652_v61  ;;  %v1364_v60 = vpack.c.bf16 %v1680_v40, %v1678_v39  ;;  %v1501_v26 = vmov (!%p1335_p7), 0.0  }
  0xb1   : > { %580 = vmatprep.mubr.f32.mxu1 %v1500_v11  ;;  %889 = vmatprep.mubr.f32.mxu0 %v1500_v11  ;;  %v1354_v33 = vpack.c.bf16 %v632_v2, %v620_v0  ;;  %v638_v49 = vand.u32 4294901760, %v637_v3  ;;  %1098 = vst.msk [vmem:[%s1584_s15] sm:$0xff] (!%p1335_p7), %vm1097_vm9, %v1501_v26  ;;  %1099 = vst.msk [vmem:[%s1584_s15 + $0x8] sm:$0xff] (!%p1335_p7), %vm1097_vm9, %v1501_v26 }
  0xb2   : > { %586 = vmatmul.mubr.f32.gmra.mrb[2].mxu1 %v585_v52  ;;  %893 = vmatmul.mubr.f32.gmra.mrb[2].mxu0 %v583_v34  ;;  %v1362_v34 = vpack.c.bf16 %v1674_v37, %v1672_v36  ;;  %1100 = vst.msk [vmem:[%s1589_s18] sm:$0xff] (!%p1335_p7), %vm1097_vm9, %v1501_v26  ;;  %1101 = vst.msk [vmem:[%s1589_s18 + $0x8] sm:$0xff] (!%p1335_p7), %vm1097_vm9, %v1501_v26 }
  0xb3   : > { %1355 = vmatprep.subr.bf16.mxu1 %v1354_v33  ;;  %v1356_v5 = vpack.c.bf16 %v638_v49, %v626_v4  ;;  %1381 = vmatpush1.bf16.msra.mxu0 %v1380_v23 }
  0xb4   : > { %1383 = vmatprep.subr.bf16.mxu0 %v1654_v14  ;;  %696 = vmatprep.mubr.f32.mxu1 %v1500_v11  ;;  %v488_v14 = vpop.permute.xlu1 %487 }
  0xb5   : > { %1357 = vmatpush1.bf16.msra.mxu1 %v1356_v5  ;;  %987 = vmatprep.mubr.f32.mxu0 %v1500_v11 }
  0xb6   : > { %1359 = vmatprep.subr.bf16.mxu1 %v1358_v6  ;;  %989 = vmatmul.mubr.f32.vlgmr.msra.gmra.mrb[0].mxu0 %v1614_v15 }
  0xb7   : > { %1385 = vmatpush1.bf16.msra.mxu0 %v1658_v21  ;;  %994 = vmatprep.mubr.f32.mxu0 %v1500_v11 }
  0xb8   : > { %698 = vmatmul.mubr.f32.vlgmr.msra.gmra.mrb[0].mxu1 %v1614_v15  ;;  %1387 = vmatprep.subr.bf16.mxu0 %v1670_v35 }
  0xb9   : > { %1361 = vmatpush1.bf16.msra.mxu1 %v1360_v7  ;;  %703 = vmatprep.mubr.f32.mxu1 %v1500_v11 }
  0xba   : > { %1363 = vmatprep.subr.bf16.mxu1 %v1362_v34  ;;  %996 = vmatmul.mubr.f32.gmra.mrb[2].mxu0 %v1624_v18 }
  0xbb   : > { %1389 = vmatpush1.bf16.msra.mxu0 %v1676_v38  ;;  %1074 = vmatprep.mubr.f32.mxu0 %v1500_v11 }
  0xbc   : > { %705 = vmatmul.mubr.f32.gmra.mrb[2].mxu1 %v1624_v18 }
  0xbd   : > { %1365 = vmatpush1.bf16.msra.mxu1 %v1364_v60  ;;  %791 = vmatprep.mubr.f32.mxu1 %v1500_v11 }
  0xbe   : > { %1076 = vmatmul.mubr.f32.vlgmr.msra.gmra.mrb[0].mxu0 %v1614_v15 }
  0xbf   : > { %1081 = vmatprep.mubr.f32.mxu0 %v1500_v11 }
  0xc0   : > { %794 = vmatmul.mubr.f32.vlgmr.msra.gmra.mrb[0].mxu1 %v1622_v17 }
  0xc1   : > { %799 = vmatprep.mubr.f32.mxu1 %v1500_v11 }
  0xc2   : > { %1083 = vmatmul.mubr.f32.gmra.mrb[2].mxu0 %v1624_v18 }
  0xc4   : > { %802 = vmatmul.mubr.f32.gmra.mrb[2].mxu1 %v1630_v24 }
 0x191   : > { %v1077_v61 = vpop.f32.mrb[0].mxu0 }
 0x192   : > { %v1079_v8 = vpop.f32.mrb[1].mxu0 }
 0x193   : > { %v795_v10 = vpop.f32.mrb[0].mxu1 }
 0x194   : > { %v1390_v12 = vadd.f32 %v795_v10, %v483_v9  ;;  %v797_v15 = vpop.f32.mrb[1].mxu1 }
 0x195   : > { %v1392_v17 = vadd.f32 %v797_v15, %v483_v9  ;;  %v1084_v11 = vpop.f32.mrb[2].mxu0 }
 0x196   : > { %v1391_v13 = vadd.f32 %v1390_v12, %v1077_v61  ;;  %v1086_v18 = vpop.f32.mrb[3].mxu0 }
 0x197   : > { %v1393_v24 = vadd.f32 %v1392_v17, %v1079_v8  ;;  %v803_v16 = vpop.f32.mrb[2].mxu1  ;;  %1096 = sbr.rel (%p1335_p7) target bundleno = 414 (0x19e), region = 44 }
 0x198   : > { %1089 = vst [vmem:[%s369_s16] sm:$0xff] %v1391_v13  ;;  %v1394_v19 = vadd.f32 %v803_v16, %v488_v14  ;;  %v805_v20 = vpop.f32.mrb[3].mxu1 }
 0x199   : > { %1090 = vst [vmem:[%s369_s16 + $0x8] sm:$0xff] %v1393_v24  ;;  %v1396_v21 = vadd.f32 %v805_v20, %v488_v14 }
 0x19a   : > { %v1395_v22 = vadd.f32 %v1394_v19, %v1084_v11 }
 0x19b   : > { %v1397_v25 = vadd.f32 %v1396_v21, %v1086_v18 }
 0x19c   : > { %1091 = vst [vmem:[%s369_s16 + $0x10] sm:$0xff] %v1395_v22 }
 0x19d   : > { %1092 = vst [vmem:[%s369_s16 + $0x18] sm:$0xff] %v1397_v25 }
 0x19e PF: > { %v1117_v27 = vmul.f32 %v1391_v13, %v1391_v13  ;;  %v1118_v28 = vmul.f32 %v1393_v24, %v1393_v24  ;;  %v1104_v29 = vadd.f32 %v1393_v24, %v1391_v13  ;;  %v1119_v30 = vmul.f32 %v1395_v22, %v1395_v22  ;;  %v1102_v37 = vld [vmem:[%s1584_s15] sm:$0xff]  ;;  %v1103_v42 = vld [vmem:[%s1584_s15 + $0x8] sm:$0xff] }
 0x19f   : > { %v1120_v31 = vmul.f32 %v1397_v25, %v1397_v25  ;;  %v1107_v35 = vadd.f32 %v1397_v25, %v1395_v22  ;;  %vm1112_vm10 = vcmask 7168   ;;  %v1115_v38 = vld [vmem:[%s1589_s18] sm:$0xff]  ;;  %v1116_v44 = vld [vmem:[%s1589_s18 + $0x8] sm:$0xff] }
 0x1a0   : > { %v1121_v32 = vadd.f32 %v1118_v28, %v1117_v27  ;;  %1105 = vadd.xlane.f32.xlu0 %v1104_v29 }
 0x1a1   : > { %v1124_v36 = vadd.f32 %v1120_v31, %v1119_v30 }
 0x1a2   : > { %1122 = vadd.xlane.f32.xlu1 %v1121_v32 }
 0x1a4   : > { %1108 = vadd.xlane.f32.xlu0 %v1107_v35 }
 0x1a6   : > { %1125 = vadd.xlane.f32.xlu1 %v1124_v36 }
 0x22d   : > { %v1106_v39 = vpop.xlane.xlu0 %1105 }
 0x22e   : > { %v1110_v40 = vadd.f32 %v1106_v39, %v1102_v37 }
 0x22f   : > { %v1123_v41 = vpop.xlane.xlu1 %1122 }
 0x230   : > { %v1127_v43 = vadd.f32 %v1123_v41, %v1115_v38  ;;  %1113 = vst.msk [vmem:[%s1584_s15] sm:$0xff] %vm1112_vm10, %v1110_v40 }
 0x231   : > { %v1109_v45 = vpop.xlane.xlu0 %1108 }
 0x232   : > { %1129 = vst.msk [vmem:[%s1589_s18] sm:$0xff] %vm1112_vm10, %v1127_v43  ;;  %v1111_v46 = vadd.f32 %v1109_v45, %v1103_v42 }
 0x233   : > { %v1126_v47 = vpop.xlane.xlu1 %1125 }
 0x234   : > { %v1128_v48 = vadd.f32 %v1126_v47, %v1116_v44  ;;  %1114 = vst.msk [vmem:[%s1584_s15 + $0x8] sm:$0xff] %vm1112_vm10, %v1111_v46 }
 0x236   : > { %1130 = vst.msk [vmem:[%s1589_s18 + $0x8] sm:$0xff] %vm1112_vm10, %v1128_v48 }
 0x237 PF: > { %s18_s28 = sadd.s32 1, %s1497_s28   ;;  %s1776_s24 = smov %s1489_s26 }
 0x238   : > { %p15_p8 = scmp.ge.s32.totalorder %s18_s28, 34   ;;  %s1777_s25 = smov %s1493_s27 }
 0x239   : > { %s1778_s26 = smov %s1781_s29  ;;  %s1779_s27 = smov %s1785_s30 }
 0x23a   :  { %17 = sbr.rel (!%p15_p8) target bundleno = 3 (0x3), region = 104 }

// kernel: localization_module_forward.5
= control target key start
LH: loop header
LB: loop body
LE: loop exit
PB: predicated region body
PF: predicated region fallthrough
CT: control target
= control target key end

     0   :  { %s541_s12 = smov 0   ;;  %s543_s13 = smov 0   ;;  %s602_s0 = inlined_call_operand.vmem [shape: f32[2,16,16,256], index: 0, kind: input, shape index: {}]   ;;  %s603_s1 = inlined_call_operand.vmem [shape: f32[2,16,1], index: 1, kind: input, shape index: {}]   ;;  %s604_s2 = inlined_call_operand.vmem [shape: f32[2,16,1], index: 2, kind: input, shape index: {}]   ;;  %s605_s3 = inlined_call_operand.vmem [shape: f32[2,16,16,256], index: 3, kind: output, shape index: {}]  }
   0x1   :  { %s545_s14 = smov 0   ;;  %s547_s15 = smov 0  }
   0x2   :  { %s549_s16 = smov 0  }
   0x3 LB: > { %s22_s17 = sadd.s32 1, %s510_s14  ;;  %s25_s18 = sadd.s32 1, %s514_s15  ;;  %s518_s16 = sphi %s549_s16, %s13_s16   ;;  %s514_s15 = sphi %s547_s15, %s609_s15   ;;  %s510_s14 = sphi %s545_s14, %s608_s14   ;;  %s506_s13 = sphi %s543_s13, %s607_s13   ;;  %s502_s12 = sphi %s541_s12, %s606_s12  }
   0x4   : > { %p23_p0 = scmp.ge.s32.totalorder %s22_s17, 16  ;;  %p422_p1 = scmp.ge.s32.totalorder %s518_s16, 1 }
   0x5   : > { %p177_p2 = scmp.lt.s32.totalorder %s518_s16, 33 }
   0x6   : > { %s611_s17 = smov (%p23_p0, %s22_s17), 0  ;;  %s613_s18 = smov (!%p23_p0, %s25_s18), %s514_s15 }
   0x7   : > { %p178_p3 = pnand %p422_p1, %p177_p2  ;;  %p27_p4 = scmp.ge.s32.totalorder %s613_s18, 2 }
   0x8   : > { %p219_p5 = scmp.lt.s32.totalorder (!%p178_p3), %s506_s13, 1  ;;  %v520_v0 = vmov (!%p178_p3), 0   ;;  %p221_p6 = scmp.lt.s32.totalorder (!%p178_p3), %s502_s12, 15 }
   0x9   : > { %s615_s18 = smov (%p27_p4, %s613_s18), 0  ;;  %181 = sbr.rel (%p178_p3) target bundleno = 162 (0xa2), region = 32 }
   0xa   : > { %479 = vset.pattern.permute.xlu1 (!%p178_p3), %v520_v0  ;;  %478 = vset.pattern.permute.xlu0 (!%p178_p3), %v520_v0 }
  0x10   : > { %s617_s13 = smov (!%p219_p5, %s506_s13), 1  ;;  %s619_s12 = smov (!%p221_p6, %s502_s12), 15 }
  0x11   : > { %s435_s19 = sshll.u32 %s617_s13, 4  ;;  %s423_s26 = sshll.u32 %s619_s12, 2 }
  0x12   : > { %s237_s22 = scalar_lea.vmem %s604_s2, %s435_s19  ;;  %s232_s25 = scalar_lea.vmem %s603_s1, %s435_s19 }
  0x13   : > { %v267_v1 = vld [vmem:[%s237_s22] sm:$0xff]  ;;  %v268_v3 = vld [vmem:[%s237_s22 + $0x8] sm:$0xff]  ;;  %s424_s27 = sshll.u32 %s617_s13, 6 }
  0x14   : > { %271 = vperm.xlu1 %479, %v267_v1   ;;  %v251_v2 = vld [vmem:[%s232_s25] sm:$0xff]  ;;  %v252_v4 = vld [vmem:[%s232_s25 + $0x8] sm:$0xff]  ;;  %s225_s28 = sadd.s32 %s424_s27, %s423_s26 }
  0x15   : > { %255 = vperm.xlu0 %478, %v251_v2   ;;  %s425_s29 = sshll.u32 %s225_s28, 3 }
  0x16   : > { %s227_s5 = scalar_lea.vmem %s602_s0, %s425_s29  ;;  %s246_s8 = scalar_lea.vmem %s605_s3, %s425_s29 }
  0x17   : > { %v247_v5 = vld [vmem:[%s227_s5] sm:$0xff]  ;;  %v248_v6 = vld [vmem:[%s227_s5 + $0x8] sm:$0xff]  ;;  %v249_v13 = vld [vmem:[%s227_s5 + $0x10] sm:$0xff] }
  0x18   : > { %276 = vperm.xlu1 %479, %v268_v3   ;;  %v250_v14 = vld [vmem:[%s227_s5 + $0x18] sm:$0xff] }
  0x19   : > { %260 = vperm.xlu0 %478, %v252_v4  }
  0x93   : > { %v272_v8 = vpop.permute.xlu1 %271 }
  0x94   : > { %v256_v7 = vpop.permute.xlu0 %255 }
  0x95   : > { %v263_v9 = vmul.f32 %v256_v7, %v247_v5  ;;  %v264_v10 = vmul.f32 %v256_v7, %v248_v6 }
  0x97   : > { %v279_v11 = vadd.f32 %v272_v8, %v263_v9  ;;  %v280_v12 = vadd.f32 %v272_v8, %v264_v10  ;;  %v277_v22 = vpop.permute.xlu1 %276 }
  0x98   : > { %v261_v15 = vpop.permute.xlu0 %260 }
  0x99   : > { %vm283_vm0 = vcmp.ge.f32.partialorder %v279_v11, 0.0  ;;  %vm284_vm1 = vcmp.ge.f32.partialorder %v280_v12, 0.0  ;;  %v287_v16 = vmul.f32 0.01, %v279_v11  ;;  %v288_v17 = vmul.f32 0.01, %v280_v12 }
  0x9a   : > { %v265_v18 = vmul.f32 %v261_v15, %v249_v13  ;;  %v266_v19 = vmul.f32 %v261_v15, %v250_v14 }
  0x9b   : > { %v291_v20 = vsel %vm283_vm0, %v279_v11, %v287_v16  ;;  %v292_v21 = vsel %vm284_vm1, %v280_v12, %v288_v17 }
  0x9c   : > { %295 = vst [vmem:[%s246_s8] sm:$0xff] %v291_v20  ;;  %296 = vst [vmem:[%s246_s8 + $0x8] sm:$0xff] %v292_v21  ;;  %v281_v23 = vadd.f32 %v277_v22, %v265_v18  ;;  %v282_v24 = vadd.f32 %v277_v22, %v266_v19 }
  0x9e   : > { %vm285_vm2 = vcmp.ge.f32.partialorder %v281_v23, 0.0  ;;  %vm286_vm3 = vcmp.ge.f32.partialorder %v282_v24, 0.0  ;;  %v289_v25 = vmul.f32 0.01, %v281_v23  ;;  %v290_v26 = vmul.f32 0.01, %v282_v24 }
  0xa0   : > { %v293_v27 = vsel %vm285_vm2, %v281_v23, %v289_v25  ;;  %v294_v28 = vsel %vm286_vm3, %v282_v24, %v290_v26 }
  0xa1   : > { %297 = vst [vmem:[%s246_s8 + $0x10] sm:$0xff] %v293_v27  ;;  %298 = vst [vmem:[%s246_s8 + $0x18] sm:$0xff] %v294_v28 }
  0xa2 PF: > { %s13_s16 = sadd.s32 1, %s518_s16   ;;  %s606_s12 = smov %s510_s14 }
  0xa3   : > { %p10_p7 = scmp.ge.s32.totalorder %s13_s16, 34   ;;  %s607_s13 = smov %s514_s15 }
  0xa4   : > { %s608_s14 = smov %s611_s17  ;;  %s609_s15 = smov %s615_s18 }
  0xa5   :  { %12 = sbr.rel (!%p10_p7) target bundleno = 3 (0x3), region = 68 }

// kernel: localization_module_forward.3
= control target key start
LH: loop header
LB: loop body
LE: loop exit
PB: predicated region body
PF: predicated region fallthrough
CT: control target
= control target key end

     0   :  { %s24285_s27 = smov 0   ;;  %s24287_s28 = smov 0   ;;  %s31123_s0 = inlined_call_operand.vmem [shape: f32[2,16,32,256], index: 0, kind: input, shape index: {}, may-alias: {0,1,2}]   ;;  %s31124_s1 = inlined_call_operand.vmem [shape: f32[2,16,32,256], index: 1, kind: input, shape index: {}, may-alias: {0,1,2}]   ;;  %s31125_s2 = inlined_call_operand.vmem [shape: f32[2,16,32,256], index: 2, kind: input, shape index: {}, may-alias: {0,1,2}]   ;;  %s31126_s3 = inlined_call_operand.vmem [shape: f32[27,32,32], index: 3, kind: input, shape index: {}]   ;;  %s31127_s4 = inlined_call_operand.vmem [shape: f32[32,1], index: 4, kind: input, shape index: {}]   ;;  %s31128_s5 = inlined_call_operand.vmem [shape: f32[9,256], index: 5, kind: input, shape index: {}]   ;;  %s31129_s6 = inlined_call_operand.vmem [shape: f32[2,16,32,256], index: 6, kind: output, shape index: {0}]   ;;  %s31130_s7 = inlined_call_operand.vmem [shape: f32[2,32,1], index: 7, kind: output, shape index: {1}]   ;;  %s31131_s8 = inlined_call_operand.vmem [shape: f32[2,32,1], index: 8, kind: output, shape index: {2}]  }
   0x1   :  { %s24289_s29 = smov 0   ;;  %s24291_s30 = smov 0  }
   0x2   :  { %s24293_s9 = smov 0  }
   0x3 LB: > { %s28_s10 = sadd.s32 1, %s24219_s29  ;;  %s31_s11 = sadd.s32 1, %s24223_s30  ;;  %s24227_s9 = sphi %s24293_s9, %s19_s9   ;;  %s24223_s30 = sphi %s24291_s30, %s32109_s30   ;;  %s24219_s29 = sphi %s24289_s29, %s32108_s29   ;;  %s24215_s28 = sphi %s24287_s28, %s32107_s28   ;;  %s24211_s27 = sphi %s24285_s27, %s32106_s27  }
   0x4   : > { %p29_p0 = scmp.ge.s32.totalorder %s28_s10, 16  ;;  %p21390_p1 = scmp.ge.s32.totalorder %s24227_s9, 1 }
   0x5   : > { %p359_p2 = scmp.lt.s32.totalorder %s24227_s9, 33 }
   0x6   : > { %s32111_s10 = smov (%p29_p0, %s28_s10), 0  ;;  %s32113_s11 = smov (!%p29_p0, %s31_s11), %s24223_s30 }
   0x7   : > { %p360_p3 = pnand %p21390_p1, %p359_p2  ;;  %p33_p4 = scmp.ge.s32.totalorder %s32113_s11, 2 }
   0x9   : > { %s32115_s11 = smov (%p33_p4, %s32113_s11), 0  ;;  %363 = sbr.rel (%p360_p3) target bundleno = 1847 (0x737), region = 44 }
  0x10   : > { %s21391_s12 = sadd.s32 4294967295, %s24211_s27  ;;  %p444_p5 = scmp.lt.s32.totalorder %s24215_s28, 1  ;;  %v31149_v0 = vmov 0.0   ;;  %v578_v1 = vlaneseq  ;;  %vm656_vm0 = vcmask 261120   ;;  %v21470_v2 = vld [vmem:[%s31126_s3 + $0x1a0] sm:$0xff]  ;;  %v24369_v12 = vld [vmem:[%s31128_s5 + $0x8] sm:$0xff] }
  0x11   : > { %p440_p6 = scmp.gt.s32.totalorder %s21391_s12, 0  ;;  %p21392_p7 = scmp.lt.s32.totalorder %s21391_s12, 15  ;;  %10927 = vmatprep.mubr.f32.mxu0 %v31149_v0  ;;  %741 = vmatprep.mubr.f32.mxu1 %v31149_v0  ;;  %v10481_v6 = vsel %vm656_vm0, %v21470_v2, 0  ;;  %31519 = vst [vmem:[#allocation5_spill] sm:$0xff] %v24369_v12  ;;  %v24374_v13 = vld [vmem:[%s31128_s5] sm:$0xff]  ;;  %v21471_v17 = vld [vmem:[%s31126_s3 + $0x1a8] sm:$0xff] }
  0x12   : > { %s32117_s28 = smov (!%p444_p5, %s24215_s28), 1  ;;  %p510_p9 = scmp.ge.s32.totalorder %s21391_s12, 0  ;;  %v24347_v5 = vshrl.u32 %v578_v1, 7  ;;  %v24383_v16 = vand.u32 4294901760, %v10481_v6  ;;  %v21472_v18 = vld [vmem:[%s31126_s3 + $0x1b0] sm:$0xff]  ;;  %v24405_v29 = vsel %vm656_vm0, %v21471_v17, 0 }
  0x13   : > { %s441_s13 = scalar_select %p440_p6, %s21391_s12, 0  ;;  %v24408_v30 = vsel %vm656_vm0, %v21472_v18, 0  ;;  %v24466_v57 = vand.u32 4294901760, %v24405_v29  ;;  %vm618_vm1 = vcmask 130048   ;;  %vm4344_vm2 = vcmask 1039360  }
  0x14   : > { %s21542_s14 = sshll.u32 %s32117_s28, 5  ;;  %s24330_s21 = sshll.u32 %s32117_s28, 7  ;;  %31515 = vst [vmem:[#allocation2_spill] sm:$0xff] %v24347_v5  ;;  %v3599_v15 = vsub.s32 4, %v24347_v5  ;;  %31520 = vst [vmem:[#allocation6_spill] sm:$0xff] %v24383_v16  ;;  %v24419_v37 = vsub.f32 %v10481_v6, %v24383_v16  ;;  %vm561_vm3 = vcmask 138240  }
  0x15   : > { %s32119_s13 = smov (!%p21392_p7, %s441_s13), 15  ;;  %s24323_s17 = scalar_lea.vmem %s31130_s7, %s21542_s14  ;;  %31538 = vst [vmem:[#allocation24_spill] sm:$0xff] %v24466_v57  ;;  %vm5112_vm4 = vcmask 924672   ;;  %vm2081_vm5 = vcmask 121856   ;;  %vm5880_vm6 = vcmask 916480   ;;  %vm2849_vm7 = vcmask 7168  }
  0x16   : > { %s24328_s20 = scalar_lea.vmem %s31131_s8, %s21542_s14  ;;  %p446_p8 = scmp.lt.s32.totalorder %s32119_s13, 15  ;;  %v24413_v35 = vrot.slane %v24369_v12, %v3599_v15  ;;  %v24416_v36 = vrot.slane %v24374_v13, %v3599_v15  ;;  %31526 = vst [vmem:[#allocation12_spill] sm:$0xff] %v24419_v37  ;;  %vm6648_vm8 = vcmask 908288  }
  0x17   : > { %p511_p10 = scmp.le.s32.totalorder %s21391_s12, 15  ;;  %p460_p12 = scmp.lt.s32.totalorder %s24211_s27, 15 }
  0x18   : > { %s32121_s13 = smov (!%p446_p8, %s32119_s13), 15  ;;  %p7400_p13 = scmp.ge.s32.totalorder %s24211_s27, 0  ;;  %31524 = vst [vmem:[#allocation10_spill] sm:$0xff] %v24413_v35  ;;  %31525 = vst [vmem:[#allocation11_spill] sm:$0xff] %v24416_v36 }
  0x19   : > { %s21397_s22 = sshll.u32 %s32121_s13, 3  ;;  %p512_p11 = pnand %p511_p10, %p510_p9 }
  0x1a   : > { %s450_s23 = sadd.s32 %s24330_s21, %s21397_s22  ;;  %p7401_p0 = scmp.le.s32.totalorder %s24211_s27, 15 }
  0x1b   : > { %s21399_s24 = sshll.u32 %s450_s23, 3  ;;  %s24230_s26 = smov 16  }
  0x1c   : > { %s24338_s14 = scalar_lea.vmem %s31123_s0, %s21399_s24  ;;  %p24351_p1 = pnand %p7401_p0, %p7400_p13 }
  0x1d   : > { %s21418_s28 = scalar_select %p512_p11, 0, 1  ;;  %v517_v3 = vld [vmem:[%s24338_s14 + $0x8] sm:$0xff]  ;;  %v516_v4 = vld [vmem:[%s24338_s14] sm:$0xff]  ;;  %v519_v8 = vld [vmem:[%s24338_s14 + $0x18] sm:$0xff] }
  0x1e   : > { %s461_s15 = scalar_select %p460_p12, %s24211_s27, 15  ;;  %v518_v9 = vld [vmem:[%s24338_s14 + $0x10] sm:$0xff]  ;;  %v521_v14 = vld [vmem:[%s24338_s14 + $0x28] sm:$0xff]  ;;  %v523_v21 = vld [vmem:[%s24338_s14 + $0x38] sm:$0xff] }
  0x1f   : > { %s515_s16 = scvt.s32.f32 %s21418_s28  ;;  %v520_v22 = vld [vmem:[%s24338_s14 + $0x20] sm:$0xff]  ;;  %v522_v23 = vld [vmem:[%s24338_s14 + $0x30] sm:$0xff]  ;;  %s24231_s13 = smov 127  }
  0x20   : > { %s21400_s18 = sshll.u32 %s461_s15, 3  ;;  %s24235_s24 = smov 112  }
  0x21   : > { %v524_v7 = vstv %s515_s16  ;;  %s24359_s22 = sadd.s32 %s21400_s18, %s24330_s21  ;;  %s31135_s16 = smov 113  }
  0x22   : > { %v24361_v10 = vmul.f32 %v524_v7, %v517_v3  ;;  %v24363_v11 = vmul.f32 %v524_v7, %v516_v4  ;;  %s31132_s23 = sshll.u32 %s24359_s22, 3  ;;  %v24395_v19 = vmul.f32 %v524_v7, %v519_v8  ;;  %v24397_v20 = vmul.f32 %v524_v7, %v518_v9  ;;  %s31133_s18 = smov 15  }
  0x23   : > { %s466_s15 = scalar_lea.vmem %s31124_s1, %s31132_s23  ;;  %v24410_v31 = vmul.f32 %v524_v7, %v521_v14  ;;  %v24425_v38 = vmul.f32 %v524_v7, %v523_v21  ;;  %v24427_v39 = vmul.f32 %v524_v7, %v520_v22  ;;  %v24429_v40 = vmul.f32 %v524_v7, %v522_v23  ;;  %s24236_s25 = smov 1  }
  0x24   : > { %31517 = vst [vmem:[#allocation3_spill] sm:$0xff] %v24361_v10  ;;  %31518 = vst [vmem:[#allocation4_spill] sm:$0xff] %v24363_v11  ;;  %598 = vrot.lane.b32.xlu0 %v24361_v10, %s24230_s26  ;;  %610 = vrot.lane.b32.xlu1 %v24363_v11, %s24230_s26  ;;  %s21453_s28 = scalar_select %p24351_p1, 0, 1  ;;  %v7406_v24 = vld [vmem:[%s466_s15] sm:$0xff]  ;;  %v7407_v25 = vld [vmem:[%s466_s15 + $0x8] sm:$0xff] }
  0x25   : > { %31521 = vst [vmem:[#allocation7_spill] sm:$0xff] %v24395_v19  ;;  %31522 = vst [vmem:[#allocation8_spill] sm:$0xff] %v24397_v20  ;;  %v7408_v26 = vld [vmem:[%s466_s15 + $0x10] sm:$0xff]  ;;  %v7409_v27 = vld [vmem:[%s466_s15 + $0x18] sm:$0xff]  ;;  %p21527_p8 = scmp.ne.s32.totalorder %s24211_s27, 0 }
  0x26   : > { %s7405_s12 = scvt.s32.f32 %s21453_s28  ;;  %v7410_v28 = vld [vmem:[%s466_s15 + $0x20] sm:$0xff]  ;;  %31523 = vst [vmem:[#allocation9_spill] sm:$0xff] %v24410_v31  ;;  %v7411_v32 = vld [vmem:[%s466_s15 + $0x28] sm:$0xff]  ;;  %v7412_v33 = vld [vmem:[%s466_s15 + $0x30] sm:$0xff]  ;;  %s24237_s28 = smov 111  }
  0x27   : > { %v7413_v34 = vld [vmem:[%s466_s15 + $0x38] sm:$0xff]  ;;  %31527 = vst [vmem:[#allocation13_spill] sm:$0xff] %v24425_v38  ;;  %31528 = vst [vmem:[#allocation14_spill] sm:$0xff] %v24427_v39  ;;  %s24232_s15 = smov 17  }
  0x28   : > { %600 = vrot.lane.b32.xlu0 %v24395_v19, %s24230_s26  ;;  %612 = vrot.lane.b32.xlu1 %v24397_v20, %s24230_s26  ;;  %31529 = vst [vmem:[#allocation15_spill] sm:$0xff] %v24429_v40  ;;  %v7414_v41 = vstv %s7405_s12 }
  0x29   : > { %v24431_v42 = vmul.f32 %v7414_v41, %v7406_v24  ;;  %v24433_v43 = vmul.f32 %v7414_v41, %v7407_v25  ;;  %v24435_v44 = vmul.f32 %v7414_v41, %v7408_v26  ;;  %v24437_v45 = vmul.f32 %v7414_v41, %v7409_v27 }
  0x2a   : > { %v24439_v46 = vmul.f32 %v7414_v41, %v7410_v28  ;;  %v24441_v47 = vmul.f32 %v7414_v41, %v7411_v32  ;;  %v24443_v48 = vmul.f32 %v7414_v41, %v7412_v33  ;;  %v24445_v49 = vmul.f32 %v7414_v41, %v7413_v34  ;;  %v21473_v28 = vld [vmem:[%s31126_s3 + $0x1b8] sm:$0xff] }
  0x2b   : > { %31530 = vst [vmem:[#allocation16_spill] sm:$0xff] %v24431_v42  ;;  %31531 = vst [vmem:[#allocation17_spill] sm:$0xff] %v24433_v43  ;;  %v10468_v50 = vmul.f32 %v24433_v43, %v24413_v35  ;;  %v10470_v51 = vmul.f32 %v24437_v45, %v24413_v35  ;;  %v10467_v52 = vmul.f32 %v24431_v42, %v24416_v36  ;;  %v31142_v41 = vand.u32 4294901760, %v24419_v37 }
  0x2c   : > { %31532 = vst [vmem:[#allocation18_spill] sm:$0xff] %v24435_v44  ;;  %31533 = vst [vmem:[#allocation19_spill] sm:$0xff] %v24437_v45  ;;  %v10469_v53 = vmul.f32 %v24435_v44, %v24416_v36  ;;  %602 = vrot.lane.b32.xlu0 %v24410_v31, %s24230_s26  ;;  %604 = vrot.lane.b32.xlu1 %v24425_v38, %s24230_s26  ;;  %v10472_v54 = vmul.f32 %v24441_v47, %v24413_v35 }
  0x2d   : > { %31534 = vst [vmem:[#allocation20_spill] sm:$0xff] %v24439_v46  ;;  %31535 = vst [vmem:[#allocation21_spill] sm:$0xff] %v24441_v47  ;;  %v10474_v55 = vmul.f32 %v24445_v49, %v24413_v35  ;;  %v10471_v56 = vmul.f32 %v24439_v46, %v24416_v36  ;;  %v10492_v58 = vand.u32 4294901760, %v10468_v50  ;;  %v10496_v59 = vand.u32 4294901760, %v10470_v51 }
  0x2e   : > { %31536 = vst [vmem:[#allocation22_spill] sm:$0xff] %v24443_v48  ;;  %31537 = vst [vmem:[#allocation23_spill] sm:$0xff] %v24445_v49  ;;  %v10494_v60 = vand.u32 4294901760, %v10467_v52  ;;  %v10498_v61 = vand.u32 4294901760, %v10469_v53  ;;  %v10500_v62 = vand.u32 4294901760, %v10472_v54  ;;  %v10473_v1 = vmul.f32 %v24443_v48, %v24416_v36 }
  0x2f   : > { %v10504_v63 = vand.u32 4294901760, %v10474_v55  ;;  %v10502_v2 = vand.u32 4294901760, %v10471_v56  ;;  %v24470_v3 = vpack.c.bf16 %v10496_v59, %v10492_v58  ;;  %v24472_v4 = vsub.f32 %v10468_v50, %v10492_v58 }
  0x30   : > { %v24474_v6 = vsub.f32 %v10470_v51, %v10496_v59  ;;  %v24476_v7 = vpack.c.bf16 %v10498_v61, %v10494_v60  ;;  %614 = vrot.lane.b32.xlu0 %v24427_v39, %s24230_s26  ;;  %616 = vrot.lane.b32.xlu1 %v24429_v40, %s24230_s26  ;;  %v24482_v8 = vsub.f32 %v10467_v52, %v10494_v60  ;;  %v10506_v15 = vand.u32 4294901760, %v10473_v1 }
  0x31   : > { %31539 = vst [vmem:[#allocation25_spill] sm:$0xff] %v24470_v3  ;;  %31540 = vst [vmem:[#allocation26_spill] sm:$0xff] %v24472_v4  ;;  %v24484_v9 = vsub.f32 %v10469_v53, %v10498_v61  ;;  %v24486_v14 = vpack.c.bf16 %v10504_v63, %v10500_v62  ;;  %22193 = vmatprep.subr.bf16.mxu0 %v24470_v3  ;;  %v24489_v17 = vsub.f32 %v10472_v54, %v10500_v62 }
  0x32   : > { %31541 = vst [vmem:[#allocation27_spill] sm:$0xff] %v24474_v6  ;;  %31542 = vst [vmem:[#allocation28_spill] sm:$0xff] %v24476_v7  ;;  %v24491_v18 = vsub.f32 %v10474_v55, %v10504_v63  ;;  %v24493_v21 = vsub.f32 %v10471_v56, %v10502_v2  ;;  %v31148_v22 = vand.u32 4294901760, %v24472_v4  ;;  %22195 = vmatpush1.bf16.msra.mxu0 %v24476_v7  ;;  %v31147_v25 = vand.u32 4294901760, %v24474_v6  ;;  %v21419_v63 = vld [vmem:[%s31126_s3 + $0x20] sm:$0xff] }
  0x33   : > { %31543 = vst [vmem:[#allocation29_spill] sm:$0xff] %v24482_v8  ;;  %31544 = vst [vmem:[#allocation30_spill] sm:$0xff] %v24484_v9  ;;  %v24497_v23 = vpack.c.bf16 %v10506_v15, %v10502_v2  ;;  %v24499_v24 = vsub.f32 %v10473_v1, %v10506_v15  ;;  %v31146_v26 = vand.u32 4294901760, %v24482_v8  ;;  %22197 = vmatprep.subr.bf16.mxu0 %v24486_v14  ;;  %v31145_v27 = vand.u32 4294901760, %v24484_v9  ;;  %v21420_v1 = vld [vmem:[%s31126_s3 + $0x28] sm:$0xff]  ;;  %v21421_v2 = vld [vmem:[%s31126_s3 + $0x30] sm:$0xff] }
  0x34   : > { %31545 = vst [vmem:[#allocation31_spill] sm:$0xff] %v24486_v14  ;;  %31546 = vst [vmem:[#allocation32_spill] sm:$0xff] %v24489_v17  ;;  %v31144_v32 = vand.u32 4294901760, %v24489_v17  ;;  %v31143_v33 = vand.u32 4294901760, %v24491_v18  ;;  %11190 = vrot.lane.b32.xlu0 %v24431_v42, %s24231_s13  ;;  %11192 = vrot.lane.b32.xlu1 %v24433_v43, %s24231_s13  ;;  %v22200_v34 = vpack.c.bf16 %v31147_v25, %v31148_v22  ;;  %v24524_v51 = vand.u32 4294901760, %v24408_v30  ;;  %v21422_v15 = vld [vmem:[%s31126_s3 + $0x38] sm:$0xff] }
  0x35   : > { %31547 = vst [vmem:[#allocation33_spill] sm:$0xff] %v24491_v18  ;;  %31548 = vst [vmem:[#allocation34_spill] sm:$0xff] %v24493_v21  ;;  %v24521_v50 = vsub.f32 %v24405_v29, %v24466_v57  ;;  %v22202_v52 = vpack.c.bf16 %v31145_v27, %v31146_v26  ;;  %v10490_v53 = vsel %vm656_vm0, %v21473_v28, 0  ;;  %v31141_v54 = vand.u32 4294901760, %v24493_v21  ;;  %v21477_v22 = vld [vmem:[%s31126_s3 + $0x1d8] sm:$0xff] }
  0x36   : > { %31549 = vst [vmem:[#allocation35_spill] sm:$0xff] %v24497_v23  ;;  %31550 = vst [vmem:[#allocation36_spill] sm:$0xff] %v24499_v24  ;;  %22199 = vmatpush1.bf16.msra.mxu0 %v24497_v23  ;;  %v31140_v55 = vand.u32 4294901760, %v24499_v24  ;;  %v22204_v29 = vpack.c.bf16 %v31143_v33, %v31144_v32  ;;  %v24547_v58 = vsub.f32 %v24408_v30, %v24524_v51  ;;  %v24549_v59 = vand.u32 4294901760, %v10490_v53  ;;  %v21476_v32 = vld [vmem:[%s31126_s3 + $0x1d0] sm:$0xff] }
  0x37   : > { %31551 = vst [vmem:[#allocation37_spill] sm:$0xff] %v24521_v50  ;;  %31552 = vst [vmem:[#allocation38_spill] sm:$0xff] %v24524_v51  ;;  %22201 = vmatprep.subr.bf16.mxu0 %v22200_v34  ;;  %v31139_v56 = vand.u32 4294901760, %v24521_v50  ;;  %v658_v28 = vsel %vm656_vm0, %v21419_v63, 0  ;;  %v661_v34 = vsel %vm656_vm0, %v21420_v1, 0  ;;  %v21475_v63 = vld [vmem:[%s31126_s3 + $0x1c8] sm:$0xff] }
  0x38   : > { %11194 = vrot.lane.b32.xlu0 %v24435_v44, %s24231_s13  ;;  %11196 = vrot.lane.b32.xlu1 %v24437_v45, %s24231_s13  ;;  %31553 = vst [vmem:[#allocation39_spill] sm:$0xff] %v24547_v58  ;;  %31554 = vst [vmem:[#allocation40_spill] sm:$0xff] %v24549_v59  ;;  %v22206_v60 = vpack.c.bf16 %v31140_v55, %v31141_v54  ;;  %v31138_v30 = vand.u32 4294901760, %v24547_v58  ;;  %v24564_v61 = vsub.f32 %v10490_v53, %v24549_v59  ;;  %v21474_v53 = vld [vmem:[%s31126_s3 + $0x1c0] sm:$0xff] }
  0x39   : > { %10931 = vmatmul.mubr.f32.vlgmr.msra.gmra.mrb[0].mxu0 %v31142_v41  ;;  %v637_v1 = vsub.s32 1, %v24347_v5  ;;  %v11249_v18 = vsel %vm656_vm0, %v21477_v22, 0 }
  0x3a   : > { %10936 = vmatprep.mubr.f32.mxu0 %v31149_v0  ;;  %22203 = vmatpush1.bf16.msra.mxu0 %v22202_v52  ;;  %31555 = vst [vmem:[#allocation41_spill] sm:$0xff] %v24564_v61  ;;  %v31137_v62 = vand.u32 4294901760, %v24564_v61  ;;  %v664_v52 = vsel %vm656_vm0, %v21421_v2, 0 }
  0x3b   : > { %22205 = vmatprep.subr.bf16.mxu0 %v22204_v29  ;;  %v667_v29 = vsel %vm656_vm0, %v21422_v15, 0  ;;  %v24716_v27 = vrot.slane %v24369_v12, %v637_v1 }
  0x3c   : > { %11198 = vrot.lane.b32.xlu0 %v24439_v46, %s24231_s13  ;;  %11200 = vrot.lane.b32.xlu1 %v24441_v47, %s24231_s13  ;;  %v24688_v55 = vand.u32 4294901760, %v667_v29 }
  0x3d   : > { %10940 = vmatmul.mubr.f32.gmra.mrb[2].mxu0 %v31139_v56  ;;  %v11240_v56 = vsel %vm656_vm0, %v21474_v53, 0  ;;  %v11243_v53 = vsel %vm656_vm0, %v21475_v63, 0  ;;  %31559 = vst [vmem:[#allocation45_spill] sm:$0xff] %v24716_v27 }
  0x3e   : > { %10945 = vmatprep.mubr.f32.mxu0 %v31149_v0  ;;  %22207 = vmatpush1.bf16.msra.mxu0 %v22206_v60  ;;  %v24681_v60 = vand.u32 4294901760, %v658_v28  ;;  %v24697_v15 = vand.u32 4294901760, %v11240_v56  ;;  %v24707_v33 = vsub.f32 %v667_v29, %v24688_v55  ;;  %v24723_v29 = vand.u32 4294901760, %v11243_v53 }
  0x3f   : > { %22209 = vmatprep.subr.bf16.mxu0 %v24470_v3 }
  0x40   : > { %11202 = vrot.lane.b32.xlu0 %v24443_v48, %s24231_s13  ;;  %11204 = vrot.lane.b32.xlu1 %v24445_v49, %s24231_s13  ;;  %v24695_v2 = vsub.f32 %v658_v28, %v24681_v60  ;;  %31557 = vst [vmem:[#allocation43_spill] sm:$0xff] %v24707_v33  ;;  %v24713_v28 = vrot.slane %v24374_v13, %v637_v1  ;;  %v31567_v21 = vand.u32 4294901760, %v24707_v33 }
  0x41   : > { %10949 = vmatmul.mubr.f32.gmra.mrb[4].mxu0 %v31138_v30  ;;  %v24685_v30 = vand.u32 4294901760, %v664_v52  ;;  %v24721_v63 = vsub.f32 %v11240_v56, %v24697_v15 }
  0x42   : > { %10954 = vmatprep.mubr.f32.mxu0 %v31149_v0  ;;  %31558 = vst [vmem:[#allocation44_spill] sm:$0xff] %v24713_v28  ;;  %v24765_v37 = vsub.f32 %v24707_v33, %v31567_v21  ;;  %v31576_v33 = vmov 0.0  }
  0x43   : > { %v24703_v41 = vsub.f32 %v664_v52, %v24685_v30  ;;  %31560 = vst [vmem:[#allocation46_spill] sm:$0xff] %v24721_v63 }
  0x44   : > { %537 = vrot.lane.b32.xlu0 %v24361_v10, %s24232_s15  ;;  %539 = vrot.lane.b32.xlu1 %v24395_v19, %s24232_s15 }
  0x45   : > { %10958 = vmatmul.mubr.f32.gmra.mrb[6].mxu0 %v31137_v62  ;;  %v24683_v62 = vand.u32 4294901760, %v661_v34  ;;  %31556 = vst [vmem:[#allocation42_spill] sm:$0xff] %v24703_v41  ;;  %v31566_v24 = vand.u32 4294901760, %v24703_v41 }
  0x46   : > { %11052 = vmatprep.mubr.f32.mxu0 %v31149_v0 }
  0x47   : > { %v24700_v54 = vsub.f32 %v661_v34, %v24683_v62  ;;  %v4367_v34 = vsub.s32 5, %v24347_v5 }
  0x48   : > { %553 = vrot.lane.b32.xlu0 %v24363_v11, %s24232_s15  ;;  %555 = vrot.lane.b32.xlu1 %v24397_v20, %s24232_s15 }
  0x49   : > { %11054 = vmatmul.mubr.f32.vlgmr.msra.gmra.mrb[0].mxu0 %v24383_v16  ;;  %v31565_v58 = vand.u32 4294901760, %v24700_v54 }
  0x4a   : > { %11059 = vmatprep.mubr.f32.mxu0 %v31149_v0  ;;  %22211 = vmatpush1.bf16.msra.mxu0 %v24476_v7 }
  0x4b   : > { %22213 = vmatprep.subr.bf16.mxu0 %v24486_v14  ;;  %v24753_v50 = vsub.f32 %v24700_v54, %v31565_v58 }
  0x4c   : > { %541 = vrot.lane.b32.xlu0 %v24410_v31, %s24232_s15  ;;  %543 = vrot.lane.b32.xlu1 %v24425_v38, %s24232_s15 }
  0x4d   : > { %11061 = vmatmul.mubr.f32.gmra.mrb[2].mxu0 %v24466_v57 }
  0x4e   : > { %11066 = vmatprep.mubr.f32.mxu0 %v31149_v0  ;;  %22215 = vmatpush1.bf16.msra.mxu0 %v24497_v23 }
  0x50   : > { %557 = vrot.lane.b32.xlu0 %v24427_v39, %s24232_s15  ;;  %559 = vrot.lane.b32.xlu1 %v24429_v40, %s24232_s15 }
  0x51   : > { %11068 = vmatmul.mubr.f32.gmra.mrb[4].mxu0 %v24524_v51 }
  0x52   : > { %11073 = vmatprep.mubr.f32.mxu0 %v31149_v0 }
  0x54   : > { %11949 = vrot.lane.b32.xlu0 %v24431_v42, %s31135_s16  ;;  %11951 = vrot.lane.b32.xlu1 %v24433_v43, %s31135_s16 }
  0x55   : > { %11075 = vmatmul.mubr.f32.gmra.mrb[6].mxu0 %v24549_v59 }
  0x56   : > { %11153 = vmatprep.mubr.f32.mxu0 %v31149_v0 }
  0x58   : > { %11953 = vrot.lane.b32.xlu0 %v24435_v44, %s31135_s16  ;;  %11955 = vrot.lane.b32.xlu1 %v24437_v45, %s31135_s16 }
  0x59   : > { %11155 = vmatmul.mubr.f32.vlgmr.msra.gmra.mrb[0].mxu0 %v24383_v16  ;;  %v24734_v16 = vrot.slane %v24374_v13, %v4367_v34 }
  0x5a   : > { %11160 = vmatprep.mubr.f32.mxu0 %v31149_v0 }
  0x5b   : > { %31561 = vst [vmem:[#allocation47_spill] sm:$0xff] %v24734_v16 }
  0x5c   : > { %11957 = vrot.lane.b32.xlu0 %v24439_v46, %s31135_s16  ;;  %11959 = vrot.lane.b32.xlu1 %v24441_v47, %s31135_s16 }
  0x5d   : > { %11162 = vmatmul.mubr.f32.gmra.mrb[2].mxu0 %v24466_v57 }
  0x5e   : > { %11167 = vmatprep.mubr.f32.mxu0 %v31149_v0 }
  0x60   : > { %11961 = vrot.lane.b32.xlu0 %v24443_v48, %s31135_s16  ;;  %11963 = vrot.lane.b32.xlu1 %v24445_v49, %s31135_s16 }
  0x61   : > { %11169 = vmatmul.mubr.f32.gmra.mrb[4].mxu0 %v24524_v51 }
  0x62   : > { %11174 = vmatprep.mubr.f32.mxu0 %v31149_v0 }
  0x64   : > { %2061 = vrot.lane.b32.xlu0 %v24361_v10, %s31133_s18  ;;  %2063 = vrot.lane.b32.xlu1 %v24395_v19, %s31133_s18 }
  0x65   : > { %11176 = vmatmul.mubr.f32.gmra.mrb[6].mxu0 %v24549_v59  ;;  %v11246_v59 = vsel %vm656_vm0, %v21476_v32, 0 }
  0x66   : > { %11323 = vmatprep.mubr.f32.mxu0 %v31149_v0  ;;  %v31562_v0 = vand.u32 4294901760, %v24695_v2 }
  0x68   : > { %2073 = vrot.lane.b32.xlu0 %v24363_v11, %s31133_s18  ;;  %2075 = vrot.lane.b32.xlu1 %v24397_v20, %s31133_s18  ;;  %v24742_v32 = vsub.f32 %v24695_v2, %v31562_v0  ;;  %v24758_v0 = vsub.f32 %v24703_v41, %v31566_v24  ;;  %v24773_v24 = vrot.slane %v24369_v12, %v4367_v34  ;;  %v24787_v34 = vand.u32 4294901760, %v11249_v18 }
  0x6a   : > { %31568 = vst [vmem:[#allocation50_spill] sm:$0xff] %v24773_v24  ;;  %31570 = vst [vmem:[#allocation51_spill] sm:$0xff] %v24787_v34 }
  0x6c   : > { %2065 = vrot.lane.b32.xlu0 %v24410_v31, %s31133_s18  ;;  %2067 = vrot.lane.b32.xlu1 %v24425_v38, %s31133_s18 }
  0x70   : > { %2077 = vrot.lane.b32.xlu0 %v24427_v39, %s31133_s18  ;;  %2079 = vrot.lane.b32.xlu1 %v24429_v40, %s31133_s18  ;;  %s467_s18 = sadd.s32 1, %s24211_s27 }
  0x71   : > { %p468_p2 = scmp.gt.s32.totalorder %s467_s18, 0  ;;  %p21403_p3 = scmp.lt.s32.totalorder %s467_s18, 15 }
  0x72   : > { %p14227_p4 = scmp.ge.s32.totalorder %s467_s18, 0  ;;  %p14228_p5 = scmp.le.s32.totalorder %s467_s18, 15 }
  0x73   : > { %s32123_s18 = smov (!%p468_p2, %s467_s18), 0 }
  0x74   : > { %12708 = vrot.lane.b32.xlu0 %v24431_v42, %s24235_s24  ;;  %12710 = vrot.lane.b32.xlu1 %v24433_v43, %s24235_s24  ;;  %p14229_p6 = pnand %p14228_p5, %p14227_p4  ;;  %s32125_s18 = smov (!%p21403_p3, %s32123_s18), 15 }
  0x75   : > { %p474_p7 = scmp.lt.s32.totalorder %s32125_s18, 15 }
  0x76   : > { %s21490_s12 = scalar_select %p14229_p6, 0, 1 }
  0x77   : > { %s32127_s18 = smov (!%p474_p7, %s32125_s18), 15 }
  0x78   : > { %12712 = vrot.lane.b32.xlu0 %v24435_v44, %s24235_s24  ;;  %12714 = vrot.lane.b32.xlu1 %v24437_v45, %s24235_s24  ;;  %s14232_s14 = scvt.s32.f32 %s21490_s12  ;;  %s21408_s19 = sshll.u32 %s32127_s18, 3 }
  0x79   : > { %s478_s23 = sadd.s32 %s21408_s19, %s24330_s21 }
  0x7a   : > { %s21410_s16 = sshll.u32 %s478_s23, 3  ;;  %s31701_s23 = smov 113  }
  0x7b   : > { %s25570_s12 = scalar_lea.vmem %s31125_s2, %s21410_s16 }
  0x7c   : > { %12716 = vrot.lane.b32.xlu0 %v24439_v46, %s24235_s24  ;;  %12718 = vrot.lane.b32.xlu1 %v24441_v47, %s24235_s24 }
  0x80   : > { %12720 = vrot.lane.b32.xlu0 %v24443_v48, %s24235_s24  ;;  %12722 = vrot.lane.b32.xlu1 %v24445_v49, %s24235_s24 }
  0x84   : > { %2829 = vrot.lane.b32.xlu0 %v24361_v10, %s24236_s25  ;;  %2831 = vrot.lane.b32.xlu1 %v24395_v19, %s24236_s25 }
  0x88   : > { %2841 = vrot.lane.b32.xlu0 %v24363_v11, %s24236_s25  ;;  %2843 = vrot.lane.b32.xlu1 %v24397_v20, %s24236_s25 }
  0x8c   : > { %2833 = vrot.lane.b32.xlu0 %v24410_v31, %s24236_s25  ;;  %2835 = vrot.lane.b32.xlu1 %v24425_v38, %s24236_s25 }
  0x90   : > { %2845 = vrot.lane.b32.xlu0 %v24427_v39, %s24236_s25  ;;  %2847 = vrot.lane.b32.xlu1 %v24429_v40, %s24236_s25 }
  0x96   : > { %v599_v26 = vpop.permute.xlu0 %598  ;;  %v611_v25 = vpop.permute.xlu1 %610 }
  0x97   : > { %v619_v1 = vsel %vm618_vm1, %v611_v25, %v599_v26  ;;  %v631_v51 = vsel %vm618_vm1, %v599_v26, %v611_v25  ;;  %v24746_v26 = vsub.f32 %v11243_v53, %v24723_v29 }
  0x98   : > { %v643_v52 = vmul.f32 %v24713_v28, %v631_v51  ;;  %v644_v56 = vmul.f32 %v24716_v27, %v619_v1  ;;  %v24748_v51 = vand.u32 4294901760, %v11246_v59 }
  0x99   : > { %31563 = vst [vmem:[#allocation48_spill] sm:$0xff] %v24746_v26 }
  0x9a   : > { %31564 = vst [vmem:[#allocation49_spill] sm:$0xff] %v24748_v51  ;;  %v601_v1 = vpop.permute.xlu0 %600  ;;  %v613_v57 = vpop.permute.xlu1 %612  ;;  %v669_v13 = vand.u32 4294901760, %v644_v56  ;;  %v671_v61 = vand.u32 4294901760, %v643_v52  ;;  %v24784_v22 = vsub.f32 %v11246_v59, %v24748_v51 }
  0x9b   : > { %v620_v25 = vsel %vm618_vm1, %v613_v57, %v601_v1  ;;  %v632_v53 = vsel %vm618_vm1, %v601_v1, %v613_v57  ;;  %v31569_v57 = vand.u32 4294901760, %v24721_v63 }
  0x9c   : > { %v645_v17 = vmul.f32 %v24713_v28, %v632_v53  ;;  %v646_v58 = vmul.f32 %v24716_v27, %v620_v25  ;;  %v24770_v23 = vsub.f32 %v644_v56, %v669_v13  ;;  %v24775_v9 = vsub.f32 %v643_v52, %v671_v61 }
  0x9d   : > { %v24780_v1 = vsub.f32 %v24721_v63, %v31569_v57  ;;  %v31571_v57 = vand.u32 4294901760, %v24746_v26 }
  0x9e   : > { %v603_v53 = vpop.permute.xlu0 %602  ;;  %v605_v25 = vpop.permute.xlu1 %604  ;;  %v673_v56 = vand.u32 4294901760, %v646_v58  ;;  %v675_v8 = vand.u32 4294901760, %v645_v17  ;;  %v31185_v14 = vand.u32 4294901760, %v24770_v23 }
  0x9f   : > { %v24809_v6 = vsub.f32 %v24746_v26, %v31571_v57 }
  0xa0   : > { %v24793_v21 = vpack.c.bf16 %v673_v56, %v669_v13  ;;  %v24795_v59 = vsub.f32 %v646_v58, %v673_v56  ;;  %v24797_v4 = vpack.c.bf16 %v675_v8, %v671_v61  ;;  %v24799_v3 = vsub.f32 %v645_v17, %v675_v8 }
  0xa1   : > { %v789_v36 = vsub.f32 %v24770_v23, %v31185_v14  ;;  %v24816_v56 = vsub.f32 %v11249_v18, %v24787_v34 }
  0xa2   : > { %v615_v13 = vpop.permute.xlu0 %614  ;;  %21545 = vmatprep.subr.bf16.mxu1 %v24793_v21  ;;  %v617_v61 = vpop.permute.xlu1 %616  ;;  %v31572_v49 = vand.u32 4294901760, %v24795_v59 }
  0xa3   : > { %v621_v14 = vsel %vm618_vm1, %v615_v13, %v603_v53  ;;  %v633_v7 = vsel %vm618_vm1, %v603_v53, %v615_v13  ;;  %v622_v57 = vsel %vm618_vm1, %v617_v61, %v605_v25  ;;  %v634_v52 = vsel %vm618_vm1, %v605_v25, %v617_v61  ;;  %21547 = vmatpush1.bf16.msra.mxu1 %v24797_v4 }
  0xa4   : > { %v647_v35 = vmul.f32 %v24713_v28, %v633_v7  ;;  %v648_v8 = vmul.f32 %v24716_v27, %v621_v14  ;;  %v649_v17 = vmul.f32 %v24713_v28, %v634_v52  ;;  %v650_v58 = vmul.f32 %v24716_v27, %v622_v57 }
  0xa5   : > { %v790_v18 = vand.u32 4294901760, %v789_v36  ;;  %v801_v48 = vsub.f32 %v24795_v59, %v31572_v49  ;;  %v31573_v53 = vand.u32 4294901760, %v24775_v9  ;;  %v31574_v25 = vand.u32 4294901760, %v24799_v3 }
  0xa6   : > { %v11191_v7 = vpop.permute.xlu0 %11190  ;;  %v11193_v47 = vpop.permute.xlu1 %11192  ;;  %v677_v14 = vand.u32 4294901760, %v648_v8  ;;  %v681_v46 = vand.u32 4294901760, %v650_v58  ;;  %v679_v52 = vand.u32 4294901760, %v647_v35  ;;  %v683_v28 = vand.u32 4294901760, %v649_v17 }
  0xa7   : > { %v795_v13 = vsub.f32 %v24775_v9, %v31573_v53  ;;  %v807_v61 = vsub.f32 %v24799_v3, %v31574_v25  ;;  %v11206_v36 = vsel %vm4344_vm2, %v11191_v7, %v11193_v47  ;;  %v11222_v57 = vsel %vm4344_vm2, %v11193_v47, %v11191_v7 }
  0xa8   : > { %v802_v27 = vand.u32 4294901760, %v801_v48  ;;  %v11226_v12 = vmul.f32 %v11206_v36, %v24734_v16  ;;  %v11227_v53 = vmul.f32 %v11222_v57, %v24773_v24  ;;  %v24840_v26 = vpack.c.bf16 %v681_v46, %v677_v14 }
  0xa9   : > { %v808_v49 = vand.u32 4294901760, %v807_v61  ;;  %v24842_v5 = vsub.f32 %v648_v8, %v677_v14  ;;  %v24844_v25 = vsub.f32 %v650_v58, %v681_v46  ;;  %v24846_v63 = vpack.c.bf16 %v683_v28, %v679_v52 }
  0xaa   : > { %v24848_v45 = vsub.f32 %v647_v35, %v679_v52  ;;  %v24850_v44 = vsub.f32 %v649_v17, %v683_v28  ;;  %v11253_v34 = vand.u32 4294901760, %v11226_v12  ;;  %v11195_v47 = vpop.permute.xlu0 %11194  ;;  %21549 = vmatprep.subr.bf16.mxu1 %v24840_v26  ;;  %v11197_v48 = vpop.permute.xlu1 %11196  ;;  %v21552_v61 = vpack.c.bf16 %v802_v27, %v790_v18 }
  0xab   : > { %v796_v7 = vand.u32 4294901760, %v795_v13  ;;  %v31213_v36 = vand.u32 4294901760, %v24842_v5  ;;  %v11207_v8 = vsel %vm4344_vm2, %v11195_v47, %v11197_v48  ;;  %v11223_v46 = vsel %vm4344_vm2, %v11197_v48, %v11195_v47  ;;  %21551 = vmatpush1.bf16.msra.mxu1 %v24846_v63 }
  0xac   : > { %v31214_v35 = vand.u32 4294901760, %v24844_v25  ;;  %v31217_v28 = vand.u32 4294901760, %v24848_v45  ;;  %v11228_v17 = vmul.f32 %v11207_v8, %v24734_v16  ;;  %v11229_v58 = vmul.f32 %v11223_v46, %v24773_v24  ;;  %21553 = vmatprep.subr.bf16.mxu1 %v21552_v61 }
  0xad   : > { %v21554_v14 = vpack.c.bf16 %v808_v49, %v796_v7  ;;  %v813_v27 = vsub.f32 %v24842_v5, %v31213_v36  ;;  %v11251_v57 = vand.u32 4294901760, %v11227_v53  ;;  %v24871_v47 = vsub.f32 %v11226_v12, %v11253_v34 }
  0xae   : > { %v825_v18 = vsub.f32 %v24844_v25, %v31214_v35  ;;  %v819_v13 = vsub.f32 %v24848_v45, %v31217_v28  ;;  %v11257_v48 = vand.u32 4294901760, %v11228_v17  ;;  %v11199_v61 = vpop.permute.xlu0 %11198  ;;  %v31575_v49 = vand.u32 4294901760, %v24742_v32  ;;  %v11201_v7 = vpop.permute.xlu1 %11200 }
  0xaf   : > { %v814_v8 = vand.u32 4294901760, %v813_v27  ;;  %v11255_v46 = vand.u32 4294901760, %v11229_v58  ;;  %v11208_v36 = vsel %vm4344_vm2, %v11199_v61, %v11201_v7  ;;  %v11224_v35 = vsel %vm4344_vm2, %v11201_v7, %v11199_v61 }
  0xb0   : > { %747 = vmatmul.mubr.f32.vlgmr.msra.gmra.mrb[0].mxu1 %v31575_v49  ;;  %v826_v28 = vand.u32 4294901760, %v825_v18  ;;  %v820_v52 = vand.u32 4294901760, %v819_v13  ;;  %v24878_v43 = vsub.f32 %v11228_v17, %v11257_v48  ;;  %v11230_v12 = vmul.f32 %v11208_v36, %v24734_v16 }
  0xb1   : > { %21555 = vmatpush1.bf16.msra.mxu1 %v21554_v14  ;;  %752 = vmatprep.mubr.f32.mxu1 %v31576_v33  ;;  %v11231_v42 = vmul.f32 %v11224_v35, %v24773_v24  ;;  %v31577_v32 = vand.u32 4294901760, %v24850_v44  ;;  %v24885_v51 = vpack.c.bf16 %v11255_v46, %v11251_v57  ;;  %v24887_v41 = vsub.f32 %v11227_v53, %v11251_v57 }
  0xb2   : > { %v21556_v49 = vpack.c.bf16 %v826_v28, %v814_v8  ;;  %v24889_v14 = vsub.f32 %v11229_v58, %v11255_v46  ;;  %v31226_v18 = vand.u32 4294901760, %v24871_v47  ;;  %v11261_v13 = vand.u32 4294901760, %v11230_v12  ;;  %v11203_v17 = vpop.permute.xlu0 %11202  ;;  %v11205_v36 = vpop.permute.xlu1 %11204 }
  0xb3   : > { %v831_v27 = vsub.f32 %v24850_v44, %v31577_v32  ;;  %v31578_v61 = vand.u32 4294901760, %v24753_v50  ;;  %v24894_v7 = vpack.c.bf16 %v11257_v48, %v11253_v34  ;;  %v31231_v32 = vand.u32 4294901760, %v24878_v43  ;;  %22217 = vmatprep.subr.bf16.mxu0 %v24885_v51 }
  0xb4   : > { %21557 = vmatprep.subr.bf16.mxu1 %v21556_v49  ;;  %v11209_v28 = vsel %vm4344_vm2, %v11203_v17, %v11205_v36  ;;  %v11225_v53 = vsel %vm4344_vm2, %v11205_v36, %v11203_v17  ;;  %v11259_v58 = vand.u32 4294901760, %v11231_v42  ;;  %v24900_v57 = vsub.f32 %v11230_v12, %v11261_v13 }
  0xb5   : > { %758 = vmatmul.mubr.f32.gmra.mrb[2].mxu1 %v31578_v61  ;;  %v832_v35 = vand.u32 4294901760, %v831_v27  ;;  %v11232_v8 = vmul.f32 %v11209_v28, %v24734_v16  ;;  %v11233_v50 = vmul.f32 %v11225_v53, %v24773_v24  ;;  %v21560_v34 = vpack.c.bf16 %v24795_v59, %v24770_v23  ;;  %22219 = vmatpush1.bf16.msra.mxu0 %v24894_v7 }
  0xb6   : > { %763 = vmatprep.mubr.f32.mxu1 %v31576_v33  ;;  %v24908_v48 = vsub.f32 %v11231_v42, %v11259_v58  ;;  %v31227_v27 = vand.u32 4294901760, %v24887_v41  ;;  %v31228_v49 = vand.u32 4294901760, %v24889_v14  ;;  %v31579_v36 = vand.u32 4294901760, %v24758_v0 }
  0xb7   : > { %v21558_v46 = vpack.c.bf16 %v832_v35, %v820_v52  ;;  %v11265_v17 = vand.u32 4294901760, %v11232_v8  ;;  %v11263_v61 = vand.u32 4294901760, %v11233_v50  ;;  %v11377_v52 = vsub.f32 %v24871_v47, %v31226_v18 }
  0xb8   : > { %v11371_v42 = vsub.f32 %v24887_v41, %v31227_v27  ;;  %v11383_v35 = vsub.f32 %v24889_v14, %v31228_v49  ;;  %v11389_v28 = vsub.f32 %v24878_v43, %v31231_v32  ;;  %v31229_v53 = vand.u32 4294901760, %v24908_v48 }
  0xb9   : > { %21559 = vmatpush1.bf16.msra.mxu1 %v21558_v46  ;;  %v24928_v46 = vsub.f32 %v11232_v8, %v11265_v17  ;;  %v24931_v0 = vpack.c.bf16 %v11263_v61, %v11259_v58  ;;  %v11378_v12 = vand.u32 4294901760, %v11377_v52  ;;  %v31234_v16 = vand.u32 4294901760, %v24816_v56 }
  0xba   : > { %21561 = vmatprep.subr.bf16.mxu1 %v21560_v34  ;;  %769 = vmatmul.mubr.f32.gmra.mrb[4].mxu1 %v31579_v36  ;;  %v24933_v34 = vsub.f32 %v11233_v50, %v11263_v61  ;;  %v24935_v36 = vpack.c.bf16 %v11265_v17, %v11261_v13  ;;  %v11372_v18 = vand.u32 4294901760, %v11371_v42  ;;  %v11384_v27 = vand.u32 4294901760, %v11383_v35 }
  0xbb   : > { %774 = vmatprep.mubr.f32.mxu1 %v31576_v33  ;;  %v11390_v49 = vand.u32 4294901760, %v11389_v28  ;;  %v31235_v8 = vand.u32 4294901760, %v24928_v46  ;;  %22221 = vmatprep.subr.bf16.mxu0 %v24931_v0  ;;  %v11395_v13 = vsub.f32 %v24908_v48, %v31229_v53  ;;  %v31580_v50 = vand.u32 4294901760, %v24900_v57 }
  0xbc   : > { %v31230_v58 = vand.u32 4294901760, %v24933_v34  ;;  %v31581_v61 = vand.u32 4294901760, %v24765_v37  ;;  %22223 = vmatpush1.bf16.msra.mxu0 %v24935_v36  ;;  %v22224_v52 = vpack.c.bf16 %v11384_v27, %v11372_v18  ;;  %v11339_v53 = vand.u32 4294901760, %v24809_v6 }
  0xbd   : > { %v11401_v17 = vsub.f32 %v24900_v57, %v31580_v50  ;;  %v11396_v42 = vand.u32 4294901760, %v11395_v13  ;;  %v11413_v28 = vsub.f32 %v24928_v46, %v31235_v8  ;;  %v22226_v50 = vpack.c.bf16 %v11390_v49, %v11378_v12  ;;  %v595_v8 = vld [vmem:[%s31126_s3 + $0x8] sm:$0xff] }
  0xbe   : > { %780 = vmatmul.mubr.f32.gmra.mrb[6].mxu1 %v31581_v61  ;;  %v11407_v35 = vsub.f32 %v24933_v34, %v31230_v58  ;;  %22225 = vmatprep.subr.bf16.mxu0 %v22224_v52  ;;  %v31582_v37 = vand.u32 4294901760, %v24784_v22  ;;  %v21562_v27 = vpack.c.bf16 %v24799_v3, %v24775_v9  ;;  %v31583_v13 = vand.u32 4294901760, %v24780_v1 }
  0xbf   : > { %890 = vmatprep.mubr.f32.mxu1 %v31576_v33  ;;  %v11402_v18 = vand.u32 4294901760, %v11401_v17  ;;  %v11414_v32 = vand.u32 4294901760, %v11413_v28  ;;  %v21564_v6 = vpack.c.bf16 %v24844_v25, %v24842_v5  ;;  %v21566_v12 = vpack.c.bf16 %v24850_v44, %v24848_v45 }
  0xc0   : > { %v11349_v61 = vsub.f32 %v24784_v22, %v31582_v37  ;;  %11329 = vmatmul.mubr.f32.vlgmr.msra.gmra.mrb[0].mxu0 %v31583_v13  ;;  %v11408_v58 = vand.u32 4294901760, %v11407_v35  ;;  %v11360_v52 = vsub.f32 %v24816_v56, %v31234_v16  ;;  %v22232_v35 = vpack.c.bf16 %v24889_v14, %v24887_v41  ;;  %v31589_v13 = vld [vmem:[#allocation17_spill] sm:$0xff] }
  0xc1   : > { %11334 = vmatprep.mubr.f32.mxu0 %v31576_v33  ;;  %22227 = vmatpush1.bf16.msra.mxu0 %v22226_v50  ;;  %v22230_v1 = vpack.c.bf16 %v11414_v32, %v11402_v18  ;;  %v31584_v28 = vand.u32 4294901760, %v24770_v23  ;;  %v31585_v50 = vand.u32 4294901760, %v24795_v59  ;;  %v31587_v18 = vld [vmem:[#allocation49_spill] sm:$0xff]  ;;  %v31588_v23 = vld [vmem:[#allocation16_spill] sm:$0xff]  ;;  %v25031_v59 = vpop.permute.xlu0 %537  ;;  %v31618_v24 = vand.u32 4294901760, %v24908_v48 }
  0xc2   : > { %892 = vmatmul.mubr.f32.vlgmr.msra.gmra.mrb[0].mxu1 %v24681_v60  ;;  %v22228_v49 = vpack.c.bf16 %v11408_v58, %v11396_v42  ;;  %v11350_v17 = vand.u32 4294901760, %v11349_v61  ;;  %v11361_v32 = vand.u32 4294901760, %v11360_v52  ;;  %v22236_v58 = vpack.c.bf16 %v24933_v34, %v24908_v48  ;;  %v31586_v61 = vld [vmem:[#allocation42_spill] sm:$0xff]  ;;  %13467 = vrot.lane.b32.xlu0 %v31588_v23, %s24237_s28 }
  0xc3   : > { %21563 = vmatpush1.bf16.msra.mxu1 %v21562_v27  ;;  %897 = vmatprep.mubr.f32.mxu1 %v31576_v33  ;;  %v22238_v42 = vpack.c.bf16 %v24928_v46, %v24900_v57  ;;  %v21576_v37 = vpack.c.bf16 %v31585_v50, %v31584_v28  ;;  %v25033_v27 = vpop.permute.xlu1 %539  ;;  %v31626_v23 = vand.u32 4294901760, %v24816_v56 }
  0xc4   : > { %21565 = vmatprep.subr.bf16.mxu1 %v21564_v6  ;;  %11340 = vmatmul.mubr.f32.gmra.mrb[2].mxu0 %v11339_v53  ;;  %v22234_v53 = vpack.c.bf16 %v24878_v43, %v24871_v47  ;;  %v31590_v6 = vld [vmem:[#allocation43_spill] sm:$0xff] }
  0xc5   : > { %22229 = vmatprep.subr.bf16.mxu0 %v22228_v49  ;;  %11345 = vmatprep.mubr.f32.mxu0 %v31576_v33  ;;  %v31591_v49 = vld [vmem:[#allocation51_spill] sm:$0xff] }
  0xc6   : > { %899 = vmatmul.mubr.f32.gmra.mrb[2].mxu1 %v24683_v62  ;;  %22231 = vmatpush1.bf16.msra.mxu0 %v22230_v1  ;;  %v31592_v1 = vld [vmem:[#allocation18_spill] sm:$0xff] }
  0xc7   : > { %21567 = vmatpush1.bf16.msra.mxu1 %v21566_v12  ;;  %904 = vmatprep.mubr.f32.mxu1 %v31576_v33  ;;  %v31593_v12 = vand.u32 4294901760, %v24775_v9  ;;  %v554_v9 = vpop.permute.xlu0 %553  ;;  %v556_v50 = vpop.permute.xlu1 %555 }
  0xc8   : > { %21569 = vmatprep.subr.bf16.mxu1 %v24793_v21  ;;  %11351 = vmatmul.mubr.f32.gmra.mrb[4].mxu0 %v11350_v17  ;;  %v31594_v17 = vand.u32 4294901760, %v24799_v3  ;;  %v31600_v3 = vld [vmem:[#allocation2_spill] sm:$0xff] }
  0xc9   : > { %22233 = vmatprep.subr.bf16.mxu0 %v22232_v35  ;;  %11356 = vmatprep.mubr.f32.mxu0 %v31576_v33  ;;  %v31595_v35 = vld [vmem:[#allocation19_spill] sm:$0xff] }
  0xca   : > { %906 = vmatmul.mubr.f32.gmra.mrb[4].mxu1 %v24685_v30  ;;  %13469 = vrot.lane.b32.xlu1 %v31589_v13, %s24237_s28  ;;  %v21578_v52 = vpack.c.bf16 %v31594_v17, %v31593_v12  ;;  %v31603_v12 = vand.u32 4294901760, %v24700_v54  ;;  %v31604_v17 = vld [vmem:[#allocation48_spill] sm:$0xff] }
  0xcb   : > { %911 = vmatprep.mubr.f32.mxu1 %v31576_v33  ;;  %13471 = vrot.lane.b32.xlu0 %v31592_v1, %s24237_s28 }
  0xcc   : > { %11362 = vmatmul.mubr.f32.gmra.mrb[6].mxu0 %v11361_v32  ;;  %v31596_v32 = vand.u32 4294901760, %v24695_v2 }
  0xcd   : > { %11472 = vmatprep.mubr.f32.mxu0 %v31576_v33 }
  0xce   : > { %913 = vmatmul.mubr.f32.gmra.mrb[6].mxu1 %v24688_v55  ;;  %13473 = vrot.lane.b32.xlu1 %v31595_v35, %s24237_s28 }
  0xcf   : > { %999 = vmatprep.mubr.f32.mxu1 %v31576_v33 }
  0xd0   : > { %11474 = vmatmul.mubr.f32.vlgmr.msra.gmra.mrb[0].mxu0 %v24697_v15 }
  0xd1   : > { %22235 = vmatpush1.bf16.msra.mxu0 %v22234_v53  ;;  %11479 = vmatprep.mubr.f32.mxu0 %v31576_v33  ;;  %v31597_v53 = vld [vmem:[#allocation46_spill] sm:$0xff] }
  0xd2   : > { %1002 = vmatmul.mubr.f32.vlgmr.msra.gmra.mrb[0].mxu1 %v24695_v2  ;;  %22237 = vmatprep.subr.bf16.mxu0 %v22236_v58  ;;  %v31598_v58 = vand.u32 4294901760, %v24842_v5  ;;  %v31601_v2 = vand.u32 4294901760, %v24848_v45  ;;  %v31602_v5 = vand.u32 4294901760, %v24850_v44  ;;  %v31607_v45 = vld [vmem:[#allocation5_spill] sm:$0xff] }
  0xd3   : > { %21571 = vmatpush1.bf16.msra.mxu1 %v24797_v4  ;;  %1007 = vmatprep.mubr.f32.mxu1 %v31576_v33 }
  0xd4   : > { %21573 = vmatprep.subr.bf16.mxu1 %v24840_v26  ;;  %11481 = vmatmul.mubr.f32.gmra.mrb[2].mxu0 %v24723_v29 }
  0xd5   : > { %22239 = vmatpush1.bf16.msra.mxu0 %v22238_v42  ;;  %11486 = vmatprep.mubr.f32.mxu0 %v31576_v33  ;;  %v31599_v42 = vand.u32 4294901760, %v24844_v25  ;;  %v21582_v25 = vpack.c.bf16 %v31602_v5, %v31601_v2  ;;  %v594_v5 = vld [vmem:[%s31126_s3] sm:$0xff] }
  0xd6   : > { %1010 = vmatmul.mubr.f32.gmra.mrb[2].mxu1 %v24700_v54  ;;  %22241 = vmatprep.subr.bf16.mxu0 %v24885_v51  ;;  %v563_v54 = vsel %vm561_vm3, %v556_v50, %v25033_v27 }
  0xd7   : > { %21575 = vmatpush1.bf16.msra.mxu1 %v24846_v63  ;;  %1015 = vmatprep.mubr.f32.mxu1 %v31576_v33  ;;  %v21580_v28 = vpack.c.bf16 %v31599_v42, %v31598_v58  ;;  %v544_v42 = vpop.permute.xlu1 %543 }
  0xd8   : > { %21577 = vmatprep.subr.bf16.mxu1 %v21576_v37  ;;  %11488 = vmatmul.mubr.f32.gmra.mrb[4].mxu0 %v31587_v18  ;;  %v580_v37 = vsub.s32 0, %v31600_v3 }
  0xd9   : > { %11493 = vmatprep.mubr.f32.mxu0 %v31576_v33 }
  0xda   : > { %1018 = vmatmul.mubr.f32.gmra.mrb[4].mxu1 %v31586_v61  ;;  %v25075_v44 = vrot.slane %v31607_v45, %v580_v37 }
  0xdb   : > { %1023 = vmatprep.mubr.f32.mxu1 %v31576_v33 }
  0xdc   : > { %11495 = vmatmul.mubr.f32.gmra.mrb[6].mxu0 %v31591_v49  ;;  %31608 = vst [vmem:[#allocation42_spill] sm:$0xff] %v25075_v44  ;;  %v589_v2 = vmul.f32 %v25075_v44, %v563_v54  ;;  %v31613_v54 = vld [vmem:[#allocation22_spill] sm:$0xff] }
  0xdd   : > { %11581 = vmatprep.mubr.f32.mxu0 %v31576_v33 }
  0xde   : > { %1026 = vmatmul.mubr.f32.gmra.mrb[6].mxu1 %v31590_v6 }
  0xdf   : > { %1104 = vmatprep.mubr.f32.mxu1 %v31576_v33 }
  0xe0   : > { %11584 = vmatmul.mubr.f32.vlgmr.msra.gmra.mrb[0].mxu0 %v31597_v53 }
  0xe1   : > { %22243 = vmatpush1.bf16.msra.mxu0 %v24894_v7  ;;  %11589 = vmatprep.mubr.f32.mxu0 %v31576_v33 }
  0xe2   : > { %1108 = vmatmul.mubr.f32.vlgmr.msra.gmra.mrb[0].mxu1 %v31596_v32  ;;  %22245 = vmatprep.subr.bf16.mxu0 %v24931_v0  ;;  %v31606_v32 = vand.u32 4294901760, %v24889_v14  ;;  %v542_v14 = vpop.permute.xlu0 %541 }
  0xe3   : > { %21579 = vmatpush1.bf16.msra.mxu1 %v21578_v52  ;;  %1113 = vmatprep.mubr.f32.mxu1 %v31576_v33  ;;  %v31605_v52 = vand.u32 4294901760, %v24887_v41  ;;  %v562_v41 = vsel %vm561_vm3, %v554_v9, %v25031_v59 }
  0xe4   : > { %21581 = vmatprep.subr.bf16.mxu1 %v21580_v28  ;;  %11592 = vmatmul.mubr.f32.gmra.mrb[2].mxu0 %v31604_v17  ;;  %v31609_v28 = vand.u32 4294901760, %v31586_v61  ;;  %v31611_v61 = vld [vmem:[#allocation21_spill] sm:$0xff] }
  0xe5   : > { %v22248_v58 = vpack.c.bf16 %v31606_v32, %v31605_v52  ;;  %22247 = vmatpush1.bf16.msra.mxu0 %v24935_v36  ;;  %11597 = vmatprep.mubr.f32.mxu0 %v31576_v33  ;;  %v560_v32 = vpop.permute.xlu1 %559 }
  0xe6   : > { %1117 = vmatmul.mubr.f32.gmra.mrb[2].mxu1 %v31603_v12  ;;  %13477 = vrot.lane.b32.xlu1 %v31611_v61, %s24237_s28  ;;  %v31612_v12 = vand.u32 4294901760, %v31590_v6  ;;  %v558_v52 = vpop.permute.xlu0 %557  ;;  %v31615_v6 = vand.u32 4294901760, %v24871_v47 }
  0xe7   : > { %21583 = vmatpush1.bf16.msra.mxu1 %v21582_v25  ;;  %22249 = vmatprep.subr.bf16.mxu0 %v22248_v58  ;;  %v31610_v25 = vld [vmem:[#allocation20_spill] sm:$0xff]  ;;  %v1360_v58 = vsel %vm656_vm0, %v594_v5, 0  ;;  %v31617_v5 = vand.u32 4294901760, %v31597_v53 }
  0xe8   : > { %21585 = vmatprep.subr.bf16.mxu1 %v24793_v21  ;;  %1122 = vmatprep.mubr.f32.mxu1 %v31576_v33  ;;  %v587_v21 = vmul.f32 %v25075_v44, %v562_v41  ;;  %v1375_v41 = vand.u32 4294901760, %v589_v2 }
  0xe9   : > { %11600 = vmatmul.mubr.f32.gmra.mrb[4].mxu0 %v24784_v22  ;;  %13475 = vrot.lane.b32.xlu0 %v31610_v25, %s24237_s28 }
  0xea   : > { %1126 = vmatmul.mubr.f32.gmra.mrb[4].mxu1 %v31609_v28  ;;  %11605 = vmatprep.mubr.f32.mxu0 %v31576_v33  ;;  %v1371_v45 = vand.u32 4294901760, %v587_v21  ;;  %v31614_v28 = vld [vmem:[#allocation23_spill] sm:$0xff]  ;;  %v25134_v48 = vpop.permute.xlu0 %11949 }
  0xeb   : > { %1131 = vmatprep.mubr.f32.mxu1 %v31576_v33  ;;  %13481 = vrot.lane.b32.xlu1 %v31614_v28, %s24237_s28  ;;  %v25121_v28 = vand.u32 4294901760, %v1360_v58 }
  0xec   : > { %v25141_v53 = vsub.f32 %v587_v21, %v1371_v45  ;;  %v565_v21 = vsel %vm561_vm3, %v560_v32, %v544_v42 }
  0xed   : > { %11608 = vmatmul.mubr.f32.gmra.mrb[6].mxu0 %v24816_v56  ;;  %13479 = vrot.lane.b32.xlu0 %v31613_v54, %s24237_s28  ;;  %v31619_v54 = vand.u32 4294901760, %v24933_v34  ;;  %v25136_v34 = vpop.permute.xlu1 %11951 }
  0xee   : > { %1135 = vmatmul.mubr.f32.gmra.mrb[6].mxu1 %v31612_v12  ;;  %11686 = vmatprep.mubr.f32.mxu0 %v31576_v33  ;;  %v31616_v12 = vand.u32 4294901760, %v24878_v43  ;;  %v25126_v43 = vld [vmem:[%s31128_s5] sm:$0xff] }
  0xef   : > { %1229 = vmatprep.mubr.f32.mxu1 %v31576_v33  ;;  %v22252_v25 = vpack.c.bf16 %v31619_v54, %v31618_v24  ;;  %v25129_v47 = vrot.slane %v25126_v43, %v580_v37  ;;  %v575_v24 = vsel %vm561_vm3, %v25033_v27, %v556_v50  ;;  %v25143_v37 = vsub.f32 %v589_v2, %v1375_v41 }
  0xf0   : > { %v22250_v16 = vpack.c.bf16 %v31616_v12, %v31615_v6  ;;  %v574_v6 = vsel %vm561_vm3, %v25031_v59, %v554_v9  ;;  %v1363_v54 = vsel %vm656_vm0, %v595_v8, 0  ;;  %v31622_v59 = vand.u32 4294901760, %v24928_v46 }
  0xf1   : > { %11690 = vmatmul.mubr.f32.vlgmr.msra.gmra.mrb[0].mxu0 %v31617_v5  ;;  %31620 = vst [vmem:[#allocation49_spill] sm:$0xff] %v25129_v47  ;;  %v25155_v27 = vpack.c.bf16 %v1375_v41, %v1371_v45  ;;  %v5135_v9 = vsub.s32 6, %v31600_v3  ;;  %v31623_v8 = vand.u32 4294901760, %v31604_v17  ;;  %v564_v50 = vsel %vm561_vm3, %v558_v52, %v542_v14 }
  0xf2   : > { %1231 = vmatmul.mubr.f32.vlgmr.msra.gmra.mrb[0].mxu1 %v24681_v60  ;;  %22251 = vmatpush1.bf16.msra.mxu0 %v22250_v16  ;;  %v596_v16 = vld [vmem:[%s31126_s3 + $0x10] sm:$0xff]  ;;  %v25164_v2 = vsub.f32 %v1360_v58, %v25121_v28  ;;  %v588_v46 = vmul.f32 %v25129_v47, %v575_v24  ;;  %v576_v45 = vsel %vm561_vm3, %v542_v14, %v558_v52  ;;  %v31238_v41 = vand.u32 4294901760, %v25141_v53  ;;  %v11956_v52 = vpop.permute.xlu1 %11955 }
  0xf3   : > { %21587 = vmatpush1.bf16.msra.mxu1 %v24797_v4  ;;  %22253 = vmatprep.subr.bf16.mxu0 %v22252_v25  ;;  %v31621_v4 = vand.u32 4294901760, %v24900_v57  ;;  %v586_v57 = vmul.f32 %v25129_v47, %v574_v6  ;;  %v25169_v25 = vand.u32 4294901760, %v1363_v54  ;;  %v1366_v17 = vsel %vm656_vm0, %v596_v16, 0 }
  0xf4   : > { %21589 = vmatprep.subr.bf16.mxu1 %v24840_v26  ;;  %1236 = vmatprep.mubr.f32.mxu1 %v31576_v33  ;;  %v577_v58 = vsel %vm561_vm3, %v544_v42, %v560_v32  ;;  %v31239_v12 = vand.u32 4294901760, %v25143_v37  ;;  %v593_v5 = vmul.f32 %v25075_v44, %v565_v21  ;;  %v11954_v42 = vpop.permute.xlu0 %11953  ;;  %v31625_v32 = vand.u32 4294901760, %v24784_v22 }
  0xf5   : > { %11695 = vmatprep.mubr.f32.mxu0 %v31576_v33  ;;  %v22254_v26 = vpack.c.bf16 %v31622_v59, %v31621_v4  ;;  %v11981_v6 = vsel %vm5112_vm4, %v25136_v34, %v25134_v48  ;;  %v11982_v24 = vsel %vm5112_vm4, %v11956_v52, %v11954_v42  ;;  %v25197_v16 = vand.u32 4294901760, %v1366_v17 }
  0xf6   : > { %1238 = vmatmul.mubr.f32.gmra.mrb[2].mxu1 %v24683_v62  ;;  %11699 = vmatmul.mubr.f32.gmra.mrb[2].mxu0 %v31623_v8  ;;  %v1373_v4 = vand.u32 4294901760, %v586_v57  ;;  %v590_v59 = vmul.f32 %v25129_v47, %v576_v45  ;;  %v597_v8 = vld [vmem:[%s31126_s3 + $0x18] sm:$0xff]  ;;  %v1491_v21 = vsub.f32 %v25141_v53, %v31238_v41  ;;  %v1503_v45 = vsub.f32 %v25143_v37, %v31239_v12 }
  0xf7   : > { %21591 = vmatpush1.bf16.msra.mxu1 %v24846_v63  ;;  %22255 = vmatpush1.bf16.msra.mxu0 %v22254_v26  ;;  %v591_v63 = vmul.f32 %v25075_v44, %v564_v50  ;;  %v592_v26 = vmul.f32 %v25129_v47, %v577_v58  ;;  %v1377_v50 = vand.u32 4294901760, %v588_v46  ;;  %v25214_v58 = vsub.f32 %v1363_v54, %v25169_v25 }
  0xf8   : > { %22257 = vmatprep.subr.bf16.mxu0 %v24885_v51  ;;  %1243 = vmatprep.mubr.f32.mxu1 %v31576_v33  ;;  %v25185_v51 = vld [vmem:[%s31128_s5 + $0x8] sm:$0xff]  ;;  %v1383_v61 = vand.u32 4294901760, %v593_v5  ;;  %v25226_v41 = vrot.slane %v25126_v43, %v5135_v9  ;;  %v25229_v12 = vsub.f32 %v1366_v17, %v25197_v16  ;;  %v1369_v54 = vsel %vm656_vm0, %v597_v8, 0  ;;  %v25240_v47 = vpop.permute.xlu0 %11957 }
  0xf9   : > { %11704 = vmatprep.mubr.f32.mxu0 %v31576_v33  ;;  %21593 = vmatprep.subr.bf16.mxu1 %v25155_v27  ;;  %v25188_v14 = vrot.slane %v25185_v51, %v5135_v9  ;;  %v25232_v35 = vsub.f32 %v586_v57, %v1373_v4  ;;  %v1385_v13 = vand.u32 4294901760, %v592_v26  ;;  %v25238_v56 = vsub.f32 %v588_v46, %v1377_v50  ;;  %v25247_v57 = vpop.permute.xlu1 %11959 }
  0xfa   : > { %1245 = vmatmul.mubr.f32.gmra.mrb[4].mxu1 %v24685_v30  ;;  %11708 = vmatmul.mubr.f32.gmra.mrb[4].mxu0 %v31625_v32  ;;  %v1379_v32 = vand.u32 4294901760, %v591_v63  ;;  %31627 = vst [vmem:[#allocation51_spill] sm:$0xff] %v25226_v41  ;;  %v1504_v9 = vand.u32 4294901760, %v1503_v45  ;;  %v31628_v17 = vand.u32 4294901760, %v25164_v2  ;;  %v31250_v45 = vand.u32 4294901760, %v25229_v12 }
  0xfb   : > { %31624 = vst [vmem:[#allocation43_spill] sm:$0xff] %v25188_v14  ;;  %1250 = vmatprep.mubr.f32.mxu1 %v31576_v33  ;;  %11713 = vmatprep.mubr.f32.mxu0 %v31576_v33  ;;  %v25217_v22 = vmul.f32 %v11981_v6, %v25188_v14  ;;  %v25220_v1 = vmul.f32 %v11982_v24, %v25188_v14  ;;  %v1381_v6 = vand.u32 4294901760, %v590_v59  ;;  %v31251_v40 = vand.u32 4294901760, %v25232_v35 }
  0xfc   : > { %v25236_v24 = vpack.c.bf16 %v1377_v50, %v1373_v4  ;;  %v25245_v8 = vsub.f32 %v25164_v2, %v31628_v17  ;;  %v25249_v44 = vpack.c.bf16 %v1383_v61, %v1379_v32  ;;  %v25256_v50 = vsub.f32 %v591_v63, %v1379_v32 }
  0xfd   : > { %v12010_v4 = vand.u32 4294901760, %v25217_v22  ;;  %v12014_v46 = vand.u32 4294901760, %v25220_v1  ;;  %v25261_v17 = vand.u32 4294901760, %v1369_v54  ;;  %v25264_v31 = vsub.f32 %v590_v59, %v1381_v6 }
  0xfe   : > { %1252 = vmatmul.mubr.f32.gmra.mrb[6].mxu1 %v24688_v55  ;;  %11717 = vmatmul.mubr.f32.gmra.mrb[6].mxu0 %v31626_v23  ;;  %v1492_v23 = vand.u32 4294901760, %v1491_v21  ;;  %v25258_v21 = vsub.f32 %v593_v5, %v1383_v61  ;;  %v25268_v38 = vpack.c.bf16 %v1385_v13, %v1381_v6  ;;  %v31252_v61 = vand.u32 4294901760, %v25238_v56 }
  0xff   : > { %1330 = vmatprep.mubr.f32.mxu1 %v31576_v33  ;;  %11811 = vmatprep.mubr.f32.mxu0 %v31576_v33  ;;  %v25274_v63 = vsub.f32 %v592_v26, %v1385_v13  ;;  %v11966_v59 = vsel %vm5112_vm4, %v11954_v42, %v11956_v52  ;;  %v31254_v13 = vand.u32 4294901760, %v25256_v50  ;;  %v11962_v42 = vpop.permute.xlu0 %11961  ;;  %v11964_v52 = vpop.permute.xlu1 %11963  ;;  %v25294_v26 = vsub.f32 %v1369_v54, %v25261_v17  ;;  %v21478_v54 = vld [vmem:[%s31126_s3 + $0x1e0] sm:$0xff] }
 0x100   : > { %v21600_v5 = vpack.c.bf16 %v1504_v9, %v1492_v23  ;;  %v31261_v6 = vand.u32 4294901760, %v25264_v31  ;;  %v11987_v23 = vmul.f32 %v11966_v59, %v25226_v41  ;;  %v25304_v9 = vsub.f32 %v25229_v12, %v31250_v45 }
 0x101   : > { %v11983_v59 = vsel %vm5112_vm4, %v25247_v57, %v25240_v47 }
 0x102   : > { %1332 = vmatmul.mubr.f32.vlgmr.msra.gmra.mrb[0].mxu1 %v24681_v60  ;;  %11813 = vmatmul.mubr.f32.vlgmr.msra.gmra.mrb[0].mxu0 %v24697_v15  ;;  %v11965_v60 = vsel %vm5112_vm4, %v25134_v48, %v25136_v34  ;;  %v25286_v48 = vpack.c.bf16 %v12014_v46, %v12010_v4  ;;  %v31253_v34 = vand.u32 4294901760, %v25258_v21 }
 0x103   : > { %21595 = vmatpush1.bf16.msra.mxu1 %v25236_v24  ;;  %22259 = vmatpush1.bf16.msra.mxu0 %v24894_v7  ;;  %v31629_v7 = vand.u32 4294901760, %v25214_v58 }
 0x104   : > { %22261 = vmatprep.subr.bf16.mxu0 %v24931_v0  ;;  %1337 = vmatprep.mubr.f32.mxu1 %v31576_v33  ;;  %v25325_v0 = vsub.f32 %v25217_v22, %v12010_v4  ;;  %v1527_v45 = vsub.f32 %v25258_v21, %v31253_v34  ;;  %v11999_v22 = vsel %vm656_vm0, %v21478_v54, 0  ;;  %v21479_v34 = vld [vmem:[%s31126_s3 + $0x1e8] sm:$0xff]  ;;  %v11990_v54 = vmul.f32 %v11983_v59, %v25188_v14 }
 0x105   : > { %21597 = vmatprep.subr.bf16.mxu1 %v25249_v44  ;;  %11818 = vmatprep.mubr.f32.mxu0 %v31576_v33  ;;  %v25284_v32 = vsub.f32 %v25214_v58, %v31629_v7  ;;  %v31630_v7 = vand.u32 4294901760, %v25274_v63  ;;  %v25361_v59 = vand.u32 4294901760, %v11999_v22  ;;  %v12002_v11 = vsel %vm656_vm0, %v21479_v34, 0  ;;  %v21480_v34 = vld [vmem:[%s31126_s3 + $0x1f0] sm:$0xff] }
 0x106   : > { %1339 = vmatmul.mubr.f32.gmra.mrb[2].mxu1 %v24683_v62  ;;  %11820 = vmatmul.mubr.f32.gmra.mrb[2].mxu0 %v24723_v29  ;;  %v11985_v62 = vmul.f32 %v11965_v60, %v25226_v41  ;;  %v1509_v60 = vsub.f32 %v25238_v56, %v31252_v61  ;;  %v1515_v61 = vsub.f32 %v25256_v50, %v31254_v13  ;;  %v1528_v10 = vand.u32 4294901760, %v1527_v45 }
 0x107   : > { %21599 = vmatpush1.bf16.msra.mxu1 %v25268_v38  ;;  %22263 = vmatpush1.bf16.msra.mxu0 %v24935_v36  ;;  %v1497_v36 = vsub.f32 %v25232_v35, %v31251_v40  ;;  %v25328_v40 = vsub.f32 %v25220_v1, %v12014_v46  ;;  %v11967_v1 = vsel %vm5112_vm4, %v25240_v47, %v25247_v57  ;;  %v31268_v57 = vand.u32 4294901760, %v25325_v0 }
 0x108   : > { %21601 = vmatprep.subr.bf16.mxu1 %v21600_v5  ;;  %1344 = vmatprep.mubr.f32.mxu1 %v31576_v33  ;;  %v11984_v5 = vsel %vm5112_vm4, %v11964_v52, %v11962_v42  ;;  %v12012_v4 = vand.u32 4294901760, %v11985_v62  ;;  %v1521_v46 = vsub.f32 %v25264_v31, %v31261_v6  ;;  %v1533_v39 = vsub.f32 %v25274_v63, %v31630_v7 }
 0x109   : > { %11825 = vmatprep.mubr.f32.mxu0 %v31576_v33  ;;  %22265 = vmatprep.subr.bf16.mxu0 %v25286_v48  ;;  %v1498_v13 = vand.u32 4294901760, %v1497_v36  ;;  %v11992_v19 = vmul.f32 %v11984_v5, %v25188_v14  ;;  %v1510_v20 = vand.u32 4294901760, %v1509_v60  ;;  %v11968_v47 = vsel %vm5112_vm4, %v11962_v42, %v11964_v52 }
 0x10a   : > { %1346 = vmatmul.mubr.f32.gmra.mrb[4].mxu1 %v24685_v30  ;;  %11827 = vmatmul.mubr.f32.gmra.mrb[4].mxu0 %v31587_v18  ;;  %v12016_v30 = vand.u32 4294901760, %v11987_v23  ;;  %v1516_v36 = vand.u32 4294901760, %v1515_v61  ;;  %v25364_v7 = vsub.f32 %v11985_v62, %v12012_v4  ;;  %v11989_v42 = vmul.f32 %v11967_v1, %v25226_v41 }
 0x10b   : > { %1351 = vmatprep.mubr.f32.mxu1 %v31576_v33  ;;  %11832 = vmatprep.mubr.f32.mxu0 %v31576_v33  ;;  %v1522_v52 = vand.u32 4294901760, %v1521_v46  ;;  %v11991_v60 = vmul.f32 %v11968_v47, %v25226_v41  ;;  %v12018_v61 = vand.u32 4294901760, %v11990_v54  ;;  %v12022_v45 = vand.u32 4294901760, %v11992_v19 }
 0x10c   : > { %v25366_v5 = vsub.f32 %v11987_v23, %v12016_v30  ;;  %v21602_v62 = vpack.c.bf16 %v1510_v20, %v1498_v13  ;;  %v25375_v6 = vpack.c.bf16 %v12016_v30, %v12012_v4  ;;  %v12130_v23 = vsub.f32 %v25325_v0, %v31268_v57 }
 0x10d   : > { %v31631_v14 = vand.u32 4294901760, %v25328_v40  ;;  %v21604_v46 = vpack.c.bf16 %v1528_v10, %v1516_v36  ;;  %v1470_v47 = vand.u32 4294901760, %v25304_v9  ;;  %v25388_v20 = vsub.f32 %v11999_v22, %v25361_v59 }
 0x10e   : > { %1353 = vmatmul.mubr.f32.gmra.mrb[6].mxu1 %v24688_v55  ;;  %11834 = vmatmul.mubr.f32.gmra.mrb[6].mxu0 %v31591_v49  ;;  %v1534_v55 = vand.u32 4294901760, %v1533_v39  ;;  %v31632_v39 = vand.u32 4294901760, %v25245_v8  ;;  %v25390_v13 = vand.u32 4294901760, %v12002_v11  ;;  %v12020_v30 = vand.u32 4294901760, %v11989_v42 }
 0x10f   : > { %1443 = vmatprep.mubr.f32.mxu1 %v31576_v33  ;;  %11912 = vmatprep.mubr.f32.mxu0 %v31576_v33  ;;  %v12142_v1 = vsub.f32 %v25328_v40, %v31631_v14  ;;  %v31633_v14 = vand.u32 4294901760, %v25294_v26  ;;  %v12024_v22 = vand.u32 4294901760, %v11991_v60  ;;  %v25400_v36 = vpack.c.bf16 %v12022_v45, %v12018_v61 }
 0x110   : > { %v21606_v9 = vpack.c.bf16 %v1534_v55, %v1522_v52  ;;  %v21608_v52 = vpack.c.bf16 %v25143_v37, %v25141_v53  ;;  %v12085_v55 = vand.u32 4294901760, %v25388_v20  ;;  %v25417_v10 = vsub.f32 %v12002_v11, %v25390_v13 }
 0x111   : > { %v1480_v8 = vsub.f32 %v25294_v26, %v31633_v14  ;;  %v25408_v14 = vsub.f32 %v11992_v19, %v12022_v45  ;;  %v12143_v57 = vand.u32 4294901760, %v12142_v1  ;;  %v31635_v11 = vand.u32 4294901760, %v25364_v7 }
 0x112   : > { %1449 = vmatmul.mubr.f32.vlgmr.msra.gmra.mrb[0].mxu1 %v31632_v39  ;;  %11914 = vmatmul.mubr.f32.vlgmr.msra.gmra.mrb[0].mxu0 %v24697_v15  ;;  %v12005_v15 = vsel %vm656_vm0, %v21480_v34, 0  ;;  %v25406_v39 = vsub.f32 %v11990_v54, %v12018_v61  ;;  %v12131_v34 = vand.u32 4294901760, %v12130_v23  ;;  %v25421_v54 = vsub.f32 %v11989_v42, %v12020_v30 }
 0x113   : > { %21603 = vmatpush1.bf16.msra.mxu1 %v21602_v62  ;;  %1454 = vmatprep.mubr.f32.mxu1 %v31576_v33  ;;  %v21481_v62 = vld [vmem:[%s31126_s3 + $0x1f8] sm:$0xff]  ;;  %v25419_v4 = vand.u32 4294901760, %v12005_v15  ;;  %v25428_v61 = vpack.c.bf16 %v12024_v22, %v12020_v30  ;;  %v12136_v45 = vsub.f32 %v25364_v7, %v31635_v11  ;;  %v31636_v23 = vand.u32 4294901760, %v25366_v5 }
 0x114   : > { %21605 = vmatprep.subr.bf16.mxu1 %v21604_v46  ;;  %11919 = vmatprep.mubr.f32.mxu0 %v31576_v33  ;;  %v31634_v46 = vand.u32 4294901760, %v25284_v32  ;;  %v12008_v19 = vsel %vm656_vm0, %v21481_v62, 0  ;;  %v25425_v32 = vsub.f32 %v11991_v60, %v12024_v22  ;;  %v22272_v42 = vpack.c.bf16 %v12143_v57, %v12131_v34 }
 0x115   : > { %22267 = vmatpush1.bf16.msra.mxu0 %v25375_v6  ;;  %v12148_v1 = vsub.f32 %v25366_v5, %v31636_v23  ;;  %v31272_v60 = vand.u32 4294901760, %v25406_v39  ;;  %v12086_v30 = vsub.f32 %v25388_v20, %v12085_v55  ;;  %v25445_v22 = vsub.f32 %v12005_v15, %v25419_v4 }
 0x116   : > { %1460 = vmatmul.mubr.f32.gmra.mrb[2].mxu1 %v31634_v46  ;;  %11921 = vmatmul.mubr.f32.gmra.mrb[2].mxu0 %v24723_v29  ;;  %v1481_v29 = vand.u32 4294901760, %v1480_v8  ;;  %v31269_v8 = vand.u32 4294901760, %v25417_v10  ;;  %v25447_v57 = vand.u32 4294901760, %v12008_v19  ;;  %v31271_v62 = vand.u32 4294901760, %v25421_v54 }
 0x117   : > { %21607 = vmatpush1.bf16.msra.mxu1 %v21606_v9  ;;  %1465 = vmatprep.mubr.f32.mxu1 %v31576_v33  ;;  %v31270_v9 = vand.u32 4294901760, %v25408_v14  ;;  %v12149_v34 = vand.u32 4294901760, %v12148_v1  ;;  %v12154_v15 = vsub.f32 %v25406_v39, %v31272_v60  ;;  %v21610_v23 = vpack.c.bf16 %v25238_v56, %v25232_v35 }
 0x118   : > { %21609 = vmatprep.subr.bf16.mxu1 %v21608_v52  ;;  %11926 = vmatprep.mubr.f32.mxu0 %v31576_v33  ;;  %v12087_v52 = vand.u32 4294901760, %v12086_v30  ;;  %v12097_v11 = vsub.f32 %v25417_v10, %v31269_v8 }
 0x119   : > { %22269 = vmatprep.subr.bf16.mxu0 %v25400_v36  ;;  %v12166_v46 = vsub.f32 %v25408_v14, %v31270_v9  ;;  %v12155_v30 = vand.u32 4294901760, %v12154_v15  ;;  %v21614_v15 = vpack.c.bf16 %v25274_v63, %v25264_v31 }
 0x11a   : > { %1471 = vmatmul.mubr.f32.gmra.mrb[4].mxu1 %v1470_v47  ;;  %11928 = vmatmul.mubr.f32.gmra.mrb[4].mxu0 %v31587_v18  ;;  %v12171_v47 = vand.u32 4294901760, %v25425_v32  ;;  %v12137_v18 = vand.u32 4294901760, %v12136_v45  ;;  %v25466_v45 = vsub.f32 %v12008_v19, %v25447_v57  ;;  %v21612_v19 = vpack.c.bf16 %v25258_v21, %v25256_v50 }
 0x11b   : > { %1476 = vmatprep.mubr.f32.mxu1 %v31576_v33  ;;  %11933 = vmatprep.mubr.f32.mxu0 %v31576_v33  ;;  %v12167_v8 = vand.u32 4294901760, %v12166_v46  ;;  %v12098_v9 = vand.u32 4294901760, %v12097_v11 }
 0x11c   : > { %22271 = vmatpush1.bf16.msra.mxu0 %v25428_v61  ;;  %v22274_v1 = vpack.c.bf16 %v12149_v34, %v12137_v18  ;;  %v12118_v60 = vand.u32 4294901760, %v25466_v45 }
 0x11d   : > { %22273 = vmatprep.subr.bf16.mxu0 %v22272_v42  ;;  %v12107_v42 = vand.u32 4294901760, %v25445_v22  ;;  %v22276_v46 = vpack.c.bf16 %v12167_v8, %v12155_v30  ;;  %v22280_v8 = vpack.c.bf16 %v25328_v40, %v25325_v0  ;;  %v31638_v30 = vand.u32 4294901760, %v25143_v37  ;;  %v25531_v37 = vpop.permute.xlu1 %2063 }
 0x11e   : > { %1482 = vmatmul.mubr.f32.gmra.mrb[6].mxu1 %v1481_v29  ;;  %11935 = vmatmul.mubr.f32.gmra.mrb[6].mxu0 %v31591_v49  ;;  %v12160_v29 = vsub.f32 %v25421_v54, %v31271_v62  ;;  %v12172_v49 = vsub.f32 %v25425_v32, %v12171_v47  ;;  %v12119_v11 = vsub.f32 %v25466_v45, %v12118_v60 }
 0x11f   : > { %1592 = vmatprep.mubr.f32.mxu1 %v31576_v33  ;;  %12082 = vmatprep.mubr.f32.mxu0 %v31576_v33  ;;  %v12108_v62 = vsub.f32 %v25445_v22, %v12107_v42 }
 0x120   : > { %v12161_v18 = vand.u32 4294901760, %v12160_v29  ;;  %v12173_v34 = vand.u32 4294901760, %v12172_v49  ;;  %v22284_v49 = vpack.c.bf16 %v25408_v14, %v25406_v39 }
 0x122   : > { %1594 = vmatmul.mubr.f32.vlgmr.msra.gmra.mrb[0].mxu1 %v25121_v28  ;;  %12088 = vmatmul.mubr.f32.vlgmr.msra.gmra.mrb[0].mxu0 %v12087_v52  ;;  %v12109_v52 = vand.u32 4294901760, %v12108_v62  ;;  %v22278_v29 = vpack.c.bf16 %v12173_v34, %v12161_v18  ;;  %v22282_v62 = vpack.c.bf16 %v25366_v5, %v25364_v7  ;;  %v31639_v18 = vand.u32 4294901760, %v25232_v35 }
 0x123   : > { %21611 = vmatpush1.bf16.msra.mxu1 %v21610_v23  ;;  %1599 = vmatprep.mubr.f32.mxu1 %v31576_v33  ;;  %v22286_v23 = vpack.c.bf16 %v25425_v32, %v25421_v54  ;;  %v31640_v34 = vand.u32 4294901760, %v25238_v56  ;;  %v31645_v56 = vand.u32 4294901760, %v25274_v63  ;;  %v14236_v63 = vld [vmem:[%s25570_s12 + $0x18] sm:$0xff] }
 0x124   : > { %21613 = vmatprep.subr.bf16.mxu1 %v21612_v19  ;;  %12093 = vmatprep.mubr.f32.mxu0 %v31576_v33 }
 0x125   : > { %22275 = vmatpush1.bf16.msra.mxu0 %v22274_v1  ;;  %v31637_v1 = vand.u32 4294901760, %v25141_v53  ;;  %v2062_v53 = vpop.permute.xlu0 %2061 }
 0x126   : > { %1601 = vmatmul.mubr.f32.gmra.mrb[2].mxu1 %v25169_v25  ;;  %12099 = vmatmul.mubr.f32.gmra.mrb[2].mxu0 %v12098_v9  ;;  %v12120_v9 = vand.u32 4294901760, %v12119_v11  ;;  %v31643_v11 = vand.u32 4294901760, %v25258_v21  ;;  %v25558_v21 = vstv %s14232_s14  ;;  %s31732_s14 = smov 15  }
 0x127   : > { %21615 = vmatpush1.bf16.msra.mxu1 %v21614_v15  ;;  %1606 = vmatprep.mubr.f32.mxu1 %v31576_v33  ;;  %v21624_v19 = vpack.c.bf16 %v31638_v30, %v31637_v1  ;;  %v21626_v15 = vpack.c.bf16 %v31640_v34, %v31639_v18  ;;  %v25584_v30 = vmul.f32 %v25558_v21, %v14236_v63  ;;  %v31659_v63 = vand.u32 4294901760, %v25406_v39 }
 0x128   : > { %21617 = vmatprep.subr.bf16.mxu1 %v25155_v27  ;;  %12104 = vmatprep.mubr.f32.mxu0 %v31576_v33 }
 0x129   : > { %22277 = vmatprep.subr.bf16.mxu0 %v22276_v46  ;;  %v31641_v46 = vand.u32 4294901760, %v25164_v2  ;;  %v2074_v35 = vpop.permute.xlu0 %2073  ;;  %31651 = vst [vmem:[#allocation5_spill] sm:$0xff] %v25584_v30  ;;  %14256 = vrot.lane.b32.xlu1 %v25584_v30, %s24232_s15 }
 0x12a   : > { %1608 = vmatmul.mubr.f32.gmra.mrb[4].mxu1 %v25197_v16  ;;  %12110 = vmatmul.mubr.f32.gmra.mrb[4].mxu0 %v12109_v52  ;;  %v31642_v52 = vand.u32 4294901760, %v25256_v50 }
 0x12b   : > { %1613 = vmatprep.mubr.f32.mxu1 %v31576_v33  ;;  %12115 = vmatprep.mubr.f32.mxu0 %v31576_v33 }
 0x12c   : > { %22279 = vmatpush1.bf16.msra.mxu0 %v22278_v29  ;;  %v21628_v29 = vpack.c.bf16 %v31643_v11, %v31642_v52  ;;  %v2094_v11 = vsel %vm2081_vm5, %v2062_v53, %v2074_v35 }
 0x12d   : > { %22281 = vmatprep.subr.bf16.mxu0 %v22280_v8  ;;  %v2100_v8 = vsub.s32 2, %v31600_v3  ;;  %v2066_v18 = vpop.permute.xlu0 %2065 }
 0x12e   : > { %1615 = vmatmul.mubr.f32.gmra.mrb[6].mxu1 %v25261_v17  ;;  %12121 = vmatmul.mubr.f32.gmra.mrb[6].mxu0 %v12120_v9  ;;  %v2076_v9 = vpop.permute.xlu1 %2075 }
 0x12f   : > { %1701 = vmatprep.mubr.f32.mxu1 %v31576_v33  ;;  %12231 = vmatprep.mubr.f32.mxu0 %v31576_v33  ;;  %v25596_v52 = vrot.slane %v25126_v43, %v2100_v8 }
 0x131   : > { %31653 = vst [vmem:[#allocation52_spill] sm:$0xff] %v25596_v52 }
 0x132   : > { %1704 = vmatmul.mubr.f32.vlgmr.msra.gmra.mrb[0].mxu1 %v25164_v2  ;;  %12233 = vmatmul.mubr.f32.vlgmr.msra.gmra.mrb[0].mxu0 %v25361_v59  ;;  %v31644_v2 = vand.u32 4294901760, %v25264_v31  ;;  %v25574_v31 = vrot.slane %v25185_v51, %v2100_v8  ;;  %v2068_v34 = vpop.permute.xlu1 %2067 }
 0x133   : > { %21619 = vmatpush1.bf16.msra.mxu1 %v25236_v24  ;;  %22283 = vmatpush1.bf16.msra.mxu0 %v22282_v62  ;;  %v31646_v62 = vand.u32 4294901760, %v25214_v58 }
 0x134   : > { %21621 = vmatprep.subr.bf16.mxu1 %v25249_v44  ;;  %1709 = vmatprep.mubr.f32.mxu1 %v31576_v33  ;;  %v21630_v50 = vpack.c.bf16 %v31645_v56, %v31644_v2  ;;  %31649 = vst [vmem:[#allocation46_spill] sm:$0xff] %v25574_v31  ;;  %v31656_v56 = vand.u32 4294901760, %v25294_v26 }
 0x135   : > { %12238 = vmatprep.mubr.f32.mxu0 %v31576_v33  ;;  %22285 = vmatprep.subr.bf16.mxu0 %v22284_v49  ;;  %v31647_v49 = vand.u32 4294901760, %v25325_v0 }
 0x136   : > { %1712 = vmatmul.mubr.f32.gmra.mrb[2].mxu1 %v25214_v58  ;;  %12240 = vmatmul.mubr.f32.gmra.mrb[2].mxu0 %v25390_v13  ;;  %v14234_v58 = vld [vmem:[%s25570_s12 + $0x8] sm:$0xff] }
 0x137   : > { %21623 = vmatpush1.bf16.msra.mxu1 %v25268_v38  ;;  %22287 = vmatpush1.bf16.msra.mxu0 %v22286_v23  ;;  %v31648_v23 = vand.u32 4294901760, %v25328_v40  ;;  %v2082_v40 = vsel %vm2081_vm5, %v2074_v35, %v2062_v53  ;;  %v25581_v0 = vmul.f32 %v25558_v21, %v14234_v58  ;;  %v25617_v53 = vmul.f32 %v25596_v52, %v2094_v11 }
 0x138   : > { %21625 = vmatprep.subr.bf16.mxu1 %v21624_v19  ;;  %22289 = vmatprep.subr.bf16.mxu0 %v25286_v48  ;;  %v2083_v19 = vsel %vm2081_vm5, %v2076_v9, %v25531_v37  ;;  %v2095_v35 = vsel %vm2081_vm5, %v25531_v37, %v2076_v9 }
 0x139   : > { %1717 = vmatprep.mubr.f32.mxu1 %v31576_v33  ;;  %12245 = vmatprep.mubr.f32.mxu0 %v31576_v33  ;;  %v22296_v1 = vpack.c.bf16 %v31648_v23, %v31647_v49  ;;  %31650 = vst [vmem:[#allocation48_spill] sm:$0xff] %v25581_v0  ;;  %v2109_v2 = vmul.f32 %v25574_v31, %v2083_v19  ;;  %v2133_v9 = vand.u32 4294901760, %v25617_v53 }
 0x13a   : > { %1720 = vmatmul.mubr.f32.gmra.mrb[4].mxu1 %v25229_v12  ;;  %12247 = vmatmul.mubr.f32.gmra.mrb[4].mxu0 %v25419_v4  ;;  %v25632_v37 = vmul.f32 %v25596_v52, %v2095_v35  ;;  %v31662_v35 = vand.u32 4294901760, %v25417_v10 }
 0x13b   : > { %1725 = vmatprep.mubr.f32.mxu1 %v31576_v33  ;;  %12252 = vmatprep.mubr.f32.mxu0 %v31576_v33  ;;  %v2135_v23 = vand.u32 4294901760, %v2109_v2 }
 0x13c   : > { %14254 = vrot.lane.b32.xlu0 %v25581_v0, %s24232_s15 }
 0x13e   : > { %1728 = vmatmul.mubr.f32.gmra.mrb[6].mxu1 %v25294_v26  ;;  %12254 = vmatmul.mubr.f32.gmra.mrb[6].mxu0 %v25447_v57  ;;  %v31657_v26 = vand.u32 4294901760, %v25364_v7 }
 0x13f   : > { %1806 = vmatprep.mubr.f32.mxu1 %v31576_v33  ;;  %12340 = vmatprep.mubr.f32.mxu0 %v31576_v33 }
 0x142   : > { %1810 = vmatmul.mubr.f32.vlgmr.msra.gmra.mrb[0].mxu1 %v31641_v46  ;;  %12343 = vmatmul.mubr.f32.vlgmr.msra.gmra.mrb[0].mxu0 %v25388_v20  ;;  %v31652_v46 = vand.u32 4294901760, %v25229_v12 }
 0x143   : > { %21627 = vmatpush1.bf16.msra.mxu1 %v21626_v15  ;;  %22291 = vmatpush1.bf16.msra.mxu0 %v25375_v6  ;;  %v14233_v15 = vld [vmem:[%s25570_s12] sm:$0xff] }
 0x144   : > { %21629 = vmatprep.subr.bf16.mxu1 %v21628_v29  ;;  %22293 = vmatprep.subr.bf16.mxu0 %v25400_v36  ;;  %v2107_v29 = vmul.f32 %v25574_v31, %v2082_v40  ;;  %v25608_v12 = vmul.f32 %v25558_v21, %v14233_v15  ;;  %v31660_v40 = vand.u32 4294901760, %v25408_v14  ;;  %v25653_v14 = vsub.f32 %v2109_v2, %v2135_v23  ;;  %v14240_v2 = vld [vmem:[%s25570_s12 + $0x38] sm:$0xff] }
 0x145   : > { %1815 = vmatprep.mubr.f32.mxu1 %v31576_v33  ;;  %12348 = vmatprep.mubr.f32.mxu0 %v31576_v33 }
 0x146   : > { %1819 = vmatmul.mubr.f32.gmra.mrb[2].mxu1 %v31646_v62  ;;  %12351 = vmatmul.mubr.f32.gmra.mrb[2].mxu0 %v25417_v10  ;;  %31654 = vst [vmem:[#allocation53_spill] sm:$0xff] %v25608_v12  ;;  %v2080_v62 = vpop.permute.xlu1 %2079  ;;  %v2131_v49 = vand.u32 4294901760, %v2107_v29  ;;  %v22300_v19 = vpack.c.bf16 %v31660_v40, %v31659_v63  ;;  %v14239_v63 = vld [vmem:[%s25570_s12 + $0x30] sm:$0xff] }
 0x147   : > { %21631 = vmatpush1.bf16.msra.mxu1 %v21630_v50  ;;  %22295 = vmatpush1.bf16.msra.mxu0 %v25428_v61  ;;  %v2078_v50 = vpop.permute.xlu0 %2077  ;;  %v2097_v39 = vsel %vm2081_vm5, %v2068_v34, %v2080_v62  ;;  %v2085_v11 = vsel %vm2081_vm5, %v2080_v62, %v2068_v34 }
 0x148   : > { %21633 = vmatprep.subr.bf16.mxu1 %v25155_v27  ;;  %22297 = vmatprep.subr.bf16.mxu0 %v22296_v1  ;;  %v14235_v27 = vld [vmem:[%s25570_s12 + $0x10] sm:$0xff]  ;;  %v31658_v1 = vand.u32 4294901760, %v25366_v5  ;;  %v2096_v7 = vsel %vm2081_vm5, %v2066_v18, %v2078_v50  ;;  %v25644_v5 = vsub.f32 %v2107_v29, %v2131_v49  ;;  %v2084_v20 = vsel %vm2081_vm5, %v2078_v50, %v2066_v18  ;;  %v14238_v29 = vld [vmem:[%s25570_s12 + $0x28] sm:$0xff] }
 0x149   : > { %1824 = vmatprep.mubr.f32.mxu1 %v31576_v33  ;;  %12356 = vmatprep.mubr.f32.mxu0 %v31576_v33  ;;  %v25611_v8 = vmul.f32 %v25558_v21, %v14235_v27  ;;  %v25664_v18 = vpack.c.bf16 %v2135_v23, %v2131_v49  ;;  %v2111_v32 = vmul.f32 %v25574_v31, %v2084_v20  ;;  %v31273_v50 = vand.u32 4294901760, %v25653_v14 }
 0x14a   : > { %1828 = vmatmul.mubr.f32.gmra.mrb[4].mxu1 %v31652_v46  ;;  %12359 = vmatmul.mubr.f32.gmra.mrb[4].mxu0 %v25445_v22  ;;  %v22298_v58 = vpack.c.bf16 %v31658_v1, %v31657_v26  ;;  %v25648_v27 = vpop.permute.xlu1 %12710  ;;  %v31661_v46 = vand.u32 4294901760, %v25421_v54  ;;  %v25677_v54 = vmul.f32 %v25596_v52, %v2096_v7  ;;  %v31274_v34 = vand.u32 4294901760, %v25644_v5 }
 0x14b   : > { %1833 = vmatprep.mubr.f32.mxu1 %v31576_v33  ;;  %12364 = vmatprep.mubr.f32.mxu0 %v31576_v33  ;;  %31655 = vst [vmem:[#allocation54_spill] sm:$0xff] %v25611_v8  ;;  %v25646_v15 = vpop.permute.xlu0 %12708  ;;  %v2113_v10 = vmul.f32 %v25574_v31, %v2085_v11  ;;  %v25693_v62 = vmul.f32 %v25558_v21, %v14238_v29  ;;  %v21424_v11 = vld [vmem:[%s31126_s3 + $0x48] sm:$0xff] }
 0x14c   : > { %14270 = vrot.lane.b32.xlu0 %v25608_v12, %s24232_s15  ;;  %14272 = vrot.lane.b32.xlu1 %v25611_v8, %s24232_s15  ;;  %v25696_v49 = vmul.f32 %v25558_v21, %v14240_v2  ;;  %v12740_v7 = vsel %vm5880_vm6, %v25648_v27, %v25646_v15  ;;  %v25740_v2 = vmul.f32 %v25558_v21, %v14239_v63 }
 0x14d   : > { %31663 = vst [vmem:[#allocation55_spill] sm:$0xff] %v25693_v62 }
 0x14e   : > { %1837 = vmatmul.mubr.f32.gmra.mrb[6].mxu1 %v31656_v56  ;;  %12367 = vmatmul.mubr.f32.gmra.mrb[6].mxu0 %v25466_v45  ;;  %v25671_v56 = vsub.f32 %v25617_v53, %v2133_v9  ;;  %31664 = vst [vmem:[#allocation56_spill] sm:$0xff] %v25696_v49  ;;  %v12715_v1 = vpop.permute.xlu1 %12714  ;;  %31667 = vst [vmem:[#allocation59_spill] sm:$0xff] %v25740_v2  ;;  %v21425_v53 = vld [vmem:[%s31126_s3 + $0x50] sm:$0xff] }
 0x14f   : > { %1931 = vmatprep.mubr.f32.mxu1 %v31576_v33  ;;  %12445 = vmatprep.mubr.f32.mxu0 %v31576_v33  ;;  %v12713_v26 = vpop.permute.xlu0 %12712 }
 0x150   : > { %14258 = vrot.lane.b32.xlu0 %v25693_v62, %s24232_s15  ;;  %14260 = vrot.lane.b32.xlu1 %v25696_v49, %s24232_s15 }
 0x152   : > { %1933 = vmatmul.mubr.f32.vlgmr.msra.gmra.mrb[0].mxu1 %v25121_v28  ;;  %12449 = vmatmul.mubr.f32.vlgmr.msra.gmra.mrb[0].mxu0 %v12085_v55  ;;  %v2137_v55 = vand.u32 4294901760, %v25632_v37  ;;  %v12719_v63 = vpop.permute.xlu1 %12718 }
 0x153   : > { %21635 = vmatpush1.bf16.msra.mxu1 %v25236_v24  ;;  %22299 = vmatpush1.bf16.msra.mxu0 %v22298_v58  ;;  %v5903_v24 = vsub.s32 7, %v31600_v3  ;;  %v14237_v58 = vld [vmem:[%s25570_s12 + $0x20] sm:$0xff] }
 0x154   : > { %21637 = vmatprep.subr.bf16.mxu1 %v25249_v44  ;;  %22301 = vmatprep.subr.bf16.mxu0 %v22300_v19  ;;  %v22302_v44 = vpack.c.bf16 %v12171_v47, %v31661_v46  ;;  %v25682_v47 = vmul.f32 %v25596_v52, %v2097_v39  ;;  %v2141_v19 = vand.u32 4294901760, %v25677_v54  ;;  %v2139_v39 = vand.u32 4294901760, %v2111_v32 }
 0x155   : > { %1938 = vmatprep.mubr.f32.mxu1 %v31576_v33  ;;  %12454 = vmatprep.mubr.f32.mxu0 %v31576_v33  ;;  %v25706_v23 = vrot.slane %v25185_v51, %v5903_v24  ;;  %v12741_v51 = vsel %vm5880_vm6, %v12715_v1, %v12713_v26  ;;  %v2251_v46 = vsub.f32 %v25644_v5, %v31274_v34 }
 0x156   : > { %1940 = vmatmul.mubr.f32.gmra.mrb[2].mxu1 %v25169_v25  ;;  %12458 = vmatmul.mubr.f32.gmra.mrb[2].mxu0 %v31662_v35  ;;  %v2145_v20 = vand.u32 4294901760, %v25682_v47  ;;  %v25737_v29 = vmul.f32 %v25558_v21, %v14237_v58  ;;  %v25753_v40 = vsub.f32 %v25677_v54, %v2141_v19  ;;  %v12724_v21 = vsel %vm5880_vm6, %v25646_v15, %v25648_v27 }
 0x157   : > { %21639 = vmatpush1.bf16.msra.mxu1 %v25268_v38  ;;  %22303 = vmatpush1.bf16.msra.mxu0 %v22302_v44  ;;  %v21423_v38 = vld [vmem:[%s31126_s3 + $0x40] sm:$0xff]  ;;  %31665 = vst [vmem:[#allocation57_spill] sm:$0xff] %v25706_v23  ;;  %v2263_v44 = vsub.f32 %v25653_v14, %v31273_v50  ;;  %v25747_v50 = vmul.f32 %v12740_v7, %v25706_v23  ;;  %v2123_v15 = vsel %vm656_vm0, %v21424_v11, 0 }
 0x158   : > { %22305 = vmatprep.subr.bf16.mxu0 %v25286_v48  ;;  %1945 = vmatprep.mubr.f32.mxu1 %v31576_v33  ;;  %v25701_v48 = vsub.f32 %v25632_v37, %v2137_v55  ;;  %v2120_v22 = vsel %vm656_vm0, %v21423_v38, 0  ;;  %31666 = vst [vmem:[#allocation58_spill] sm:$0xff] %v25737_v29  ;;  %v25744_v38 = vrot.slane %v25126_v43, %v5903_v24  ;;  %v25802_v7 = vand.u32 4294901760, %v2123_v15 }
 0x159   : > { %12463 = vmatprep.mubr.f32.mxu0 %v31576_v33  ;;  %21641 = vmatprep.subr.bf16.mxu1 %v25664_v18  ;;  %v25750_v34 = vmul.f32 %v12741_v51, %v25706_v23  ;;  %v12725_v43 = vsel %vm5880_vm6, %v12713_v26, %v12715_v1  ;;  %v25762_v24 = vand.u32 4294901760, %v2120_v22  ;;  %v25765_v58 = vsub.f32 %v25682_v47, %v2145_v20  ;;  %v12717_v1 = vpop.permute.xlu0 %12716 }
 0x15a   : > { %1947 = vmatmul.mubr.f32.gmra.mrb[4].mxu1 %v25197_v16  ;;  %12467 = vmatmul.mubr.f32.gmra.mrb[4].mxu0 %v12107_v42  ;;  %v2143_v42 = vand.u32 4294901760, %v2113_v10  ;;  %v31275_v35 = vand.u32 4294901760, %v25701_v48  ;;  %31668 = vst [vmem:[#allocation60_spill] sm:$0xff] %v25744_v38  ;;  %v25775_v45 = vsub.f32 %v2111_v32, %v2139_v39  ;;  %v2252_v47 = vand.u32 4294901760, %v2251_v46 }
 0x15b   : > { %1952 = vmatprep.mubr.f32.mxu1 %v31576_v33  ;;  %12472 = vmatprep.mubr.f32.mxu0 %v31576_v33  ;;  %v2264_v26 = vand.u32 4294901760, %v2263_v44  ;;  %v25790_v37 = vmul.f32 %v12724_v21, %v25744_v38  ;;  %v12773_v32 = vand.u32 4294901760, %v25750_v34  ;;  %v31670_v46 = vand.u32 4294901760, %v25671_v56 }
 0x15c   : > { %v25778_v27 = vpack.c.bf16 %v2143_v42, %v2139_v39  ;;  %v25780_v54 = vsub.f32 %v2113_v10, %v2143_v42  ;;  %14274 = vrot.lane.b32.xlu0 %v25737_v29, %s24232_s15  ;;  %14276 = vrot.lane.b32.xlu1 %v25740_v2, %s24232_s15  ;;  %v25800_v10 = vsub.f32 %v2120_v22, %v25762_v24  ;;  %v21426_v22 = vld [vmem:[%s31126_s3 + $0x58] sm:$0xff] }
 0x15d   : > { %v25807_v39 = vpack.c.bf16 %v2145_v20, %v2141_v19  ;;  %v25812_v42 = vsub.f32 %v25671_v56, %v31670_v46  ;;  %v21648_v44 = vpack.c.bf16 %v2264_v26, %v2252_v47  ;;  %v31277_v19 = vand.u32 4294901760, %v25775_v45  ;;  %v12721_v26 = vpop.permute.xlu0 %12720  ;;  %v12723_v46 = vpop.permute.xlu1 %12722 }
 0x15e   : > { %1954 = vmatmul.mubr.f32.gmra.mrb[6].mxu1 %v25261_v17  ;;  %12476 = vmatmul.mubr.f32.gmra.mrb[6].mxu0 %v12118_v60  ;;  %v25773_v60 = vpack.c.bf16 %v2137_v55, %v2133_v9  ;;  %v25793_v9 = vmul.f32 %v12725_v43, %v25744_v38  ;;  %v12769_v55 = vand.u32 4294901760, %v25747_v50  ;;  %v31278_v20 = vand.u32 4294901760, %v25780_v54 }
 0x15f   : > { %2032 = vmatprep.mubr.f32.mxu1 %v31576_v33  ;;  %12570 = vmatprep.mubr.f32.mxu0 %v31576_v33  ;;  %31669 = vst [vmem:[#allocation61_spill] sm:$0xff] %v25807_v39  ;;  %v2129_v11 = vsel %vm656_vm0, %v21426_v22, 0  ;;  %v2258_v51 = vand.u32 4294901760, %v25812_v42  ;;  %v12726_v47 = vsel %vm5880_vm6, %v12717_v1, %v12719_v63 }
 0x160   : > { %v31279_v21 = vand.u32 4294901760, %v25793_v9  ;;  %v25832_v43 = vpack.c.bf16 %v12773_v32, %v12769_v55  ;;  %v2287_v42 = vsub.f32 %v25780_v54, %v31278_v20  ;;  %v31673_v20 = vand.u32 4294901760, %v25800_v10 }
 0x161   : > { %v25886_v52 = vmul.f32 %v12726_v47, %v25744_v38 }
 0x162   : > { %2034 = vmatmul.mubr.f32.vlgmr.msra.gmra.mrb[0].mxu1 %v25121_v28  ;;  %12572 = vmatmul.mubr.f32.vlgmr.msra.gmra.mrb[0].mxu0 %v25361_v59  ;;  %v2126_v28 = vsel %vm656_vm0, %v21425_v53, 0  ;;  %31671 = vst [vmem:[#allocation62_spill] sm:$0xff] %v25832_v43  ;;  %v25838_v53 = vsub.f32 %v2123_v15, %v25802_v7  ;;  %v12742_v15 = vsel %vm5880_vm6, %v12719_v63, %v12717_v1  ;;  %v21482_v1 = vld [vmem:[%s31126_s3 + $0x200] sm:$0xff]  ;;  %v2288_v41 = vand.u32 4294901760, %v2287_v42 }
 0x163   : > { %21643 = vmatpush1.bf16.msra.mxu1 %v25773_v60  ;;  %22307 = vmatpush1.bf16.msra.mxu0 %v25375_v6  ;;  %v25823_v6 = vsub.f32 %v25701_v48, %v31275_v35  ;;  %v25840_v35 = vand.u32 4294901760, %v2126_v28  ;;  %v25857_v22 = vsub.f32 %v25793_v9, %v31279_v21  ;;  %v12743_v63 = vsel %vm5880_vm6, %v12723_v46, %v12721_v26 }
 0x164   : > { %22309 = vmatprep.subr.bf16.mxu0 %v25400_v36  ;;  %2039 = vmatprep.mubr.f32.mxu1 %v31576_v33  ;;  %v31276_v36 = vand.u32 4294901760, %v25790_v37  ;;  %31672 = vst [vmem:[#allocation63_spill] sm:$0xff] %v25838_v53  ;;  %v2207_v21 = vsub.f32 %v25800_v10, %v31673_v20  ;;  %v12758_v47 = vsel %vm656_vm0, %v21482_v1, 0  ;;  %v12751_v3 = vmul.f32 %v12743_v63, %v25706_v23 }
 0x165   : > { %21645 = vmatprep.subr.bf16.mxu1 %v25778_v27  ;;  %12577 = vmatprep.mubr.f32.mxu0 %v31576_v33  ;;  %v31678_v31 = vand.u32 4294901760, %v25838_v53 }
 0x166   : > { %2041 = vmatmul.mubr.f32.gmra.mrb[2].mxu1 %v25169_v25  ;;  %12579 = vmatmul.mubr.f32.gmra.mrb[2].mxu0 %v25390_v13  ;;  %v25848_v25 = vsub.f32 %v25790_v37, %v31276_v36  ;;  %v2275_v36 = vsub.f32 %v25775_v45, %v31277_v19  ;;  %v25878_v19 = vand.u32 4294901760, %v2129_v11  ;;  %v2208_v63 = vand.u32 4294901760, %v2207_v21 }
 0x167   : > { %21647 = vmatpush1.bf16.msra.mxu1 %v25807_v39  ;;  %22311 = vmatpush1.bf16.msra.mxu0 %v25428_v61  ;;  %v2270_v61 = vand.u32 4294901760, %v25823_v6  ;;  %v25876_v6 = vsub.f32 %v25750_v34, %v12773_v32  ;;  %v31674_v34 = vand.u32 4294901760, %v25753_v40  ;;  %v31675_v32 = vand.u32 4294901760, %v25765_v58 }
 0x168   : > { %21649 = vmatprep.subr.bf16.mxu1 %v21648_v44  ;;  %2046 = vmatprep.mubr.f32.mxu1 %v31576_v33  ;;  %v25873_v44 = vsub.f32 %v25747_v50, %v12769_v55  ;;  %v25890_v50 = vsub.f32 %v2126_v28, %v25840_v35  ;;  %v2276_v28 = vand.u32 4294901760, %v2275_v36  ;;  %v25913_v1 = vsub.f32 %v2129_v11, %v25878_v19 }
 0x169   : > { %12584 = vmatprep.mubr.f32.mxu0 %v31576_v33  ;;  %22313 = vmatprep.subr.bf16.mxu0 %v25832_v43  ;;  %v2281_v55 = vsub.f32 %v25753_v40, %v31674_v34  ;;  %v2293_v20 = vsub.f32 %v25765_v58, %v31675_v32  ;;  %v31676_v43 = vld [vmem:[#allocation4_spill] sm:$0xff]  ;;  %v31677_v34 = vld [vmem:[#allocation3_spill] sm:$0xff]  ;;  %v12727_v32 = vsel %vm5880_vm6, %v12721_v26, %v12723_v46  ;;  %v12781_v39 = vand.u32 4294901760, %v12751_v3 }
 0x16a   : > { %2048 = vmatmul.mubr.f32.gmra.mrb[4].mxu1 %v25197_v16  ;;  %12586 = vmatmul.mubr.f32.gmra.mrb[4].mxu0 %v25419_v4  ;;  %v12749_v16 = vmul.f32 %v12742_v15, %v25706_v23  ;;  %v21483_v15 = vld [vmem:[%s31126_s3 + $0x208] sm:$0xff]  ;;  %v2218_v23 = vsub.f32 %v25838_v53, %v31678_v31  ;;  %v21650_v11 = vpack.c.bf16 %v2270_v61, %v2258_v51  ;;  %v21484_v31 = vld [vmem:[%s31126_s3 + $0x210] sm:$0xff]  ;;  %v31681_v51 = vand.u32 4294901760, %v25790_v37 }
 0x16b   : > { %2053 = vmatprep.mubr.f32.mxu1 %v31576_v33  ;;  %12591 = vmatprep.mubr.f32.mxu0 %v31576_v33  ;;  %v2282_v26 = vand.u32 4294901760, %v2281_v55  ;;  %v2294_v46 = vand.u32 4294901760, %v2293_v20  ;;  %v21652_v42 = vpack.c.bf16 %v2288_v41, %v2276_v28  ;;  %v12750_v21 = vmul.f32 %v12727_v32, %v25744_v38  ;;  %v31680_v53 = vld [vmem:[#allocation7_spill] sm:$0xff] }
 0x16c   : > { %4328 = vrot.lane.b32.xlu0 %v31676_v43, %s24231_s13  ;;  %4330 = vrot.lane.b32.xlu1 %v31677_v34, %s24231_s13  ;;  %v25923_v43 = vand.u32 4294901760, %v12758_v47  ;;  %v12777_v36 = vand.u32 4294901760, %v12749_v16  ;;  %v31679_v34 = vld [vmem:[#allocation8_spill] sm:$0xff]  ;;  %v31682_v61 = vand.u32 4294901760, %v25793_v9  ;;  %v31684_v20 = vand.u32 4294901760, %v25873_v44 }
 0x16d   : > { %v2219_v38 = vand.u32 4294901760, %v2218_v23  ;;  %v31686_v37 = vand.u32 4294901760, %v25890_v50  ;;  %v12783_v23 = vand.u32 4294901760, %v12750_v21 }
 0x16e   : > { %2055 = vmatmul.mubr.f32.gmra.mrb[6].mxu1 %v25261_v17  ;;  %12593 = vmatmul.mubr.f32.gmra.mrb[6].mxu0 %v25447_v57  ;;  %v12761_v17 = vsel %vm656_vm0, %v21483_v15, 0  ;;  %v25940_v55 = vpack.c.bf16 %v31682_v61, %v31681_v51  ;;  %v12889_v28 = vsub.f32 %v25873_v44, %v31684_v20  ;;  %v31685_v15 = vand.u32 4294901760, %v25876_v6 }
 0x16f   : > { %2203 = vmatprep.mubr.f32.mxu1 %v31576_v33  ;;  %12671 = vmatprep.mubr.f32.mxu0 %v31576_v33  ;;  %v2229_v9 = vsub.f32 %v25890_v50, %v31686_v37  ;;  %v25954_v51 = vsub.f32 %v12758_v47, %v25923_v43  ;;  %v25956_v61 = vand.u32 4294901760, %v12761_v17  ;;  %v12779_v20 = vand.u32 4294901760, %v25886_v52 }
 0x170   : > { %4332 = vrot.lane.b32.xlu0 %v31679_v34, %s24231_s13  ;;  %4334 = vrot.lane.b32.xlu1 %v31680_v53, %s24231_s13  ;;  %31683 = vst [vmem:[#allocation64_spill] sm:$0xff] %v25940_v55  ;;  %v12901_v32 = vsub.f32 %v25876_v6, %v31685_v15  ;;  %v21656_v47 = vpack.c.bf16 %v25653_v14, %v25644_v5  ;;  %v31688_v53 = vld [vmem:[#allocation14_spill] sm:$0xff] }
 0x171   : > { %v25965_v15 = vpack.c.bf16 %v12781_v39, %v12777_v36  ;;  %v25967_v37 = vsub.f32 %v12749_v16, %v12777_v36  ;;  %v2230_v16 = vand.u32 4294901760, %v2229_v9  ;;  %v31299_v36 = vand.u32 4294901760, %v25954_v51 }
 0x172   : > { %2209 = vmatmul.mubr.f32.vlgmr.msra.gmra.mrb[0].mxu1 %v2208_v63  ;;  %12673 = vmatmul.mubr.f32.vlgmr.msra.gmra.mrb[0].mxu0 %v25361_v59  ;;  %v21654_v63 = vpack.c.bf16 %v2294_v46, %v2282_v26  ;;  %v12764_v59 = vsel %vm656_vm0, %v21484_v31, 0  ;;  %v31687_v26 = vand.u32 4294901760, %v25913_v1  ;;  %v25976_v46 = vsub.f32 %v12751_v3, %v12781_v39 }
 0x173   : > { %21651 = vmatpush1.bf16.msra.mxu1 %v21650_v11  ;;  %2214 = vmatprep.mubr.f32.mxu1 %v31576_v33  ;;  %v21485_v11 = vld [vmem:[%s31126_s3 + $0x218] sm:$0xff]  ;;  %v12890_v31 = vand.u32 4294901760, %v12889_v28  ;;  %v12902_v41 = vand.u32 4294901760, %v12901_v32  ;;  %v25983_v34 = vsub.f32 %v12761_v17, %v25956_v61  ;;  %v25990_v3 = vsub.f32 %v12750_v21, %v12783_v23 }
 0x174   : > { %21653 = vmatprep.subr.bf16.mxu1 %v21652_v42  ;;  %12678 = vmatprep.mubr.f32.mxu0 %v31576_v33  ;;  %v2240_v42 = vsub.f32 %v25913_v1, %v31687_v26  ;;  %v25988_v26 = vsub.f32 %v25886_v52, %v12779_v20  ;;  %v31689_v39 = vand.u32 4294901760, %v25848_v25  ;;  %v31690_v28 = vand.u32 4294901760, %v25857_v22 }
 0x175   : > { %22315 = vmatpush1.bf16.msra.mxu0 %v25940_v55  ;;  %4336 = vrot.lane.b32.xlu0 %v31688_v53, %s24231_s13  ;;  %v25985_v55 = vand.u32 4294901760, %v12764_v59  ;;  %v22320_v21 = vpack.c.bf16 %v12902_v41, %v12890_v31  ;;  %v31302_v9 = vand.u32 4294901760, %v25967_v37 }
 0x176   : > { %2220 = vmatmul.mubr.f32.gmra.mrb[2].mxu1 %v2219_v38  ;;  %12680 = vmatmul.mubr.f32.gmra.mrb[2].mxu0 %v25390_v13  ;;  %v12767_v38 = vsel %vm656_vm0, %v21485_v11, 0  ;;  %v25995_v13 = vpack.c.bf16 %v12783_v23, %v12779_v20  ;;  %v12895_v17 = vsub.f32 %v25848_v25, %v31689_v39  ;;  %v12907_v52 = vsub.f32 %v25857_v22, %v31690_v28 }
 0x177   : > { %21655 = vmatpush1.bf16.msra.mxu1 %v21654_v63  ;;  %2225 = vmatprep.mubr.f32.mxu1 %v31576_v33  ;;  %v2241_v32 = vand.u32 4294901760, %v2240_v42  ;;  %v31301_v63 = vand.u32 4294901760, %v25976_v46  ;;  %v12845_v20 = vsub.f32 %v25954_v51, %v31299_v36  ;;  %v31300_v23 = vand.u32 4294901760, %v25983_v34  ;;  %v31693_v36 = vld [vmem:[#allocation13_spill] sm:$0xff] }
 0x178   : > { %21657 = vmatprep.subr.bf16.mxu1 %v21656_v47  ;;  %12685 = vmatprep.mubr.f32.mxu0 %v31576_v33  ;;  %v31691_v47 = vld [vmem:[#allocation9_spill] sm:$0xff]  ;;  %v26014_v11 = vsub.f32 %v12764_v59, %v25985_v55  ;;  %v26016_v41 = vand.u32 4294901760, %v12767_v38  ;;  %v31303_v42 = vand.u32 4294901760, %v25988_v26  ;;  %v12908_v39 = vand.u32 4294901760, %v12907_v52 }
 0x179   : > { %22317 = vmatprep.subr.bf16.mxu0 %v25965_v15  ;;  %4338 = vrot.lane.b32.xlu1 %v31691_v47, %s24231_s13  ;;  %v12913_v59 = vsub.f32 %v25967_v37, %v31302_v9  ;;  %v12925_v28 = vsub.f32 %v25976_v46, %v31301_v63  ;;  %v12846_v31 = vand.u32 4294901760, %v12845_v20 }
 0x17a   : > { %2231 = vmatmul.mubr.f32.gmra.mrb[4].mxu1 %v2230_v16  ;;  %12687 = vmatmul.mubr.f32.gmra.mrb[4].mxu0 %v25419_v4  ;;  %v31692_v4 = vld [vmem:[#allocation15_spill] sm:$0xff]  ;;  %v12896_v16 = vand.u32 4294901760, %v12895_v17  ;;  %v12856_v17 = vsub.f32 %v25983_v34, %v31300_v23  ;;  %v21658_v23 = vpack.c.bf16 %v25701_v48, %v25671_v56 }
 0x17b   : > { %2236 = vmatprep.mubr.f32.mxu1 %v31576_v33  ;;  %12692 = vmatprep.mubr.f32.mxu0 %v31576_v33  ;;  %v12914_v63 = vand.u32 4294901760, %v12913_v59  ;;  %v12926_v9 = vand.u32 4294901760, %v12925_v28 }
 0x17c   : > { %22319 = vmatpush1.bf16.msra.mxu0 %v25995_v13  ;;  %4340 = vrot.lane.b32.xlu0 %v31692_v4, %s24231_s13  ;;  %v12857_v52 = vand.u32 4294901760, %v12856_v17  ;;  %v22332_v17 = vpack.c.bf16 %v25976_v46, %v25967_v37 }
 0x17d   : > { %22321 = vmatprep.subr.bf16.mxu0 %v22320_v21  ;;  %4342 = vrot.lane.b32.xlu1 %v31693_v36, %s24231_s13  ;;  %v26039_v21 = vsub.f32 %v12767_v38, %v26016_v41  ;;  %v22322_v38 = vpack.c.bf16 %v12908_v39, %v12896_v16  ;;  %v22324_v59 = vpack.c.bf16 %v12926_v9, %v12914_v63 }
 0x17e   : > { %2242 = vmatmul.mubr.f32.gmra.mrb[6].mxu1 %v2241_v32  ;;  %12694 = vmatmul.mubr.f32.gmra.mrb[6].mxu0 %v25447_v57  ;;  %v12919_v32 = vsub.f32 %v25988_v26, %v31303_v42  ;;  %v31694_v57 = vand.u32 4294901760, %v25990_v3  ;;  %v21660_v42 = vpack.c.bf16 %v25780_v54, %v25775_v45  ;;  %v22328_v9 = vpack.c.bf16 %v25876_v6, %v25873_v44 }
 0x17f   : > { %2352 = vmatprep.mubr.f32.mxu1 %v31576_v33  ;;  %12841 = vmatprep.mubr.f32.mxu0 %v31576_v33  ;;  %v31306_v36 = vand.u32 4294901760, %v26039_v21  ;;  %v22330_v63 = vpack.c.bf16 %v25857_v22, %v25848_v25 }
 0x180   : > { %v12931_v20 = vsub.f32 %v25990_v3, %v31694_v57  ;;  %15017 = vrot.lane.b32.xlu0 %v25581_v0, %s24230_s26  ;;  %v31695_v57 = vand.u32 4294901760, %v26014_v11  ;;  %v12920_v16 = vand.u32 4294901760, %v12919_v32  ;;  %v31696_v32 = vld [vmem:[#allocation63_spill] sm:$0xff] }
 0x181   : > { %15019 = vrot.lane.b32.xlu1 %v25584_v30, %s24230_s26 }
 0x182   : > { %2354 = vmatmul.mubr.f32.vlgmr.msra.gmra.mrb[0].mxu1 %v25762_v24  ;;  %12847 = vmatmul.mubr.f32.vlgmr.msra.gmra.mrb[0].mxu0 %v12846_v31  ;;  %v12867_v0 = vsub.f32 %v26014_v11, %v31695_v57  ;;  %v12932_v39 = vand.u32 4294901760, %v12931_v20  ;;  %v21662_v31 = vpack.c.bf16 %v25765_v58, %v25753_v40  ;;  %v31697_v20 = vand.u32 4294901760, %v25644_v5  ;;  %v31702_v5 = vld [vmem:[#allocation4_spill] sm:$0xff] }
 0x183   : > { %21659 = vmatpush1.bf16.msra.mxu1 %v21658_v23  ;;  %2359 = vmatprep.mubr.f32.mxu1 %v31576_v33  ;;  %v12878_v23 = vsub.f32 %v26039_v21, %v31306_v36 }
 0x184   : > { %21661 = vmatprep.subr.bf16.mxu1 %v21660_v42  ;;  %12852 = vmatprep.mubr.f32.mxu0 %v31576_v33  ;;  %v12868_v28 = vand.u32 4294901760, %v12867_v0  ;;  %v22326_v42 = vpack.c.bf16 %v12932_v39, %v12920_v16  ;;  %v31699_v16 = vld [vmem:[#allocation61_spill] sm:$0xff]  ;;  %v31700_v39 = vld [vmem:[#allocation62_spill] sm:$0xff] }
 0x185   : > { %22323 = vmatpush1.bf16.msra.mxu0 %v22322_v38  ;;  %15029 = vrot.lane.b32.xlu0 %v25608_v12, %s24230_s26  ;;  %v12879_v0 = vand.u32 4294901760, %v12878_v23  ;;  %v31698_v38 = vand.u32 4294901760, %v25653_v14  ;;  %v31703_v14 = vld [vmem:[#allocation3_spill] sm:$0xff] }
 0x186   : > { %2361 = vmatmul.mubr.f32.gmra.mrb[2].mxu1 %v25802_v7  ;;  %12858 = vmatmul.mubr.f32.gmra.mrb[2].mxu0 %v12857_v52  ;;  %v22334_v52 = vpack.c.bf16 %v25990_v3, %v25988_v26  ;;  %v31705_v23 = vld [vmem:[#allocation7_spill] sm:$0xff] }
 0x187   : > { %21663 = vmatpush1.bf16.msra.mxu1 %v21662_v31  ;;  %2366 = vmatprep.mubr.f32.mxu1 %v31576_v33  ;;  %v21672_v57 = vpack.c.bf16 %v31698_v38, %v31697_v20  ;;  %v2830_v31 = vpop.permute.xlu0 %2829  ;;  %v31711_v38 = vld [vmem:[#allocation64_spill] sm:$0xff] }
 0x188   : > { %21665 = vmatprep.subr.bf16.mxu1 %v25664_v18  ;;  %12863 = vmatprep.mubr.f32.mxu0 %v31576_v33 }
 0x189   : > { %22325 = vmatprep.subr.bf16.mxu0 %v22324_v59  ;;  %15031 = vrot.lane.b32.xlu1 %v25611_v8, %s24230_s26  ;;  %v2832_v59 = vpop.permute.xlu1 %2831 }
 0x18a   : > { %2368 = vmatmul.mubr.f32.gmra.mrb[4].mxu1 %v25840_v35  ;;  %12869 = vmatmul.mubr.f32.gmra.mrb[4].mxu0 %v12868_v28  ;;  %v31704_v28 = vld [vmem:[#allocation8_spill] sm:$0xff] }
 0x18b   : > { %2373 = vmatprep.mubr.f32.mxu1 %v31576_v33  ;;  %12874 = vmatprep.mubr.f32.mxu0 %v31576_v33 }
 0x18c   : > { %22327 = vmatpush1.bf16.msra.mxu0 %v22326_v42  ;;  %15021 = vrot.lane.b32.xlu0 %v25693_v62, %s24230_s26  ;;  %v31706_v42 = vand.u32 4294901760, %v25671_v56 }
 0x18d   : > { %22329 = vmatprep.subr.bf16.mxu0 %v22328_v9  ;;  %15023 = vrot.lane.b32.xlu1 %v25696_v49, %s24230_s26  ;;  %v31707_v9 = vand.u32 4294901760, %v25701_v48  ;;  %v2844_v56 = vpop.permute.xlu1 %2843  ;;  %v31713_v48 = vand.u32 4294901760, %v25753_v40  ;;  %v24183_v40 = vld [vmem:[%s31128_s5 + $0x8] sm:$0xff] }
 0x18e   : > { %2375 = vmatmul.mubr.f32.gmra.mrb[6].mxu1 %v25878_v19  ;;  %12880 = vmatmul.mubr.f32.gmra.mrb[6].mxu0 %v12879_v0 }
 0x18f   : > { %2461 = vmatprep.mubr.f32.mxu1 %v31576_v33  ;;  %12990 = vmatprep.mubr.f32.mxu0 %v31576_v33  ;;  %v21674_v0 = vpack.c.bf16 %v31707_v9, %v31706_v42  ;;  %v31716_v42 = vand.u32 4294901760, %v25873_v44  ;;  %v31717_v9 = vand.u32 4294901760, %v25876_v6  ;;  %v2851_v44 = vsel %vm2849_vm7, %v2844_v56, %v2832_v59 }
 0x190   : > { %15033 = vrot.lane.b32.xlu0 %v25737_v29, %s24230_s26 }
 0x191   : > { %15035 = vrot.lane.b32.xlu1 %v25740_v2, %s24230_s26 }
 0x192   : > { %2464 = vmatmul.mubr.f32.vlgmr.msra.gmra.mrb[0].mxu1 %v25800_v10  ;;  %12992 = vmatmul.mubr.f32.vlgmr.msra.gmra.mrb[0].mxu0 %v25923_v43 }
 0x193   : > { %21667 = vmatpush1.bf16.msra.mxu1 %v25773_v60  ;;  %22331 = vmatpush1.bf16.msra.mxu0 %v22330_v63  ;;  %v31708_v63 = vand.u32 4294901760, %v25800_v10  ;;  %v31715_v10 = vand.u32 4294901760, %v31696_v32 }
 0x194   : > { %21669 = vmatprep.subr.bf16.mxu1 %v25778_v27  ;;  %2469 = vmatprep.mubr.f32.mxu1 %v31576_v33 }
 0x195   : > { %12997 = vmatprep.mubr.f32.mxu0 %v31576_v33  ;;  %22333 = vmatprep.subr.bf16.mxu0 %v22332_v17  ;;  %v31709_v17 = vand.u32 4294901760, %v25775_v45  ;;  %v31714_v45 = vand.u32 4294901760, %v25765_v58 }
 0x196   : > { %2472 = vmatmul.mubr.f32.gmra.mrb[2].mxu1 %v31696_v32  ;;  %12999 = vmatmul.mubr.f32.gmra.mrb[2].mxu0 %v25956_v61 }
 0x197   : > { %21671 = vmatpush1.bf16.msra.mxu1 %v31699_v16  ;;  %22335 = vmatpush1.bf16.msra.mxu0 %v22334_v52  ;;  %v31710_v52 = vand.u32 4294901760, %v25780_v54  ;;  %v21678_v54 = vpack.c.bf16 %v31714_v45, %v31713_v48  ;;  %v2863_v48 = vsel %vm2849_vm7, %v2832_v59, %v2844_v56  ;;  %v31721_v45 = vand.u32 4294901760, %v25913_v1 }
 0x198   : > { %21673 = vmatprep.subr.bf16.mxu1 %v21672_v57  ;;  %22337 = vmatprep.subr.bf16.mxu0 %v31700_v39  ;;  %v31712_v57 = vld [vmem:[#allocation2_spill] sm:$0xff]  ;;  %v31723_v59 = vand.u32 4294901760, %v25848_v25 }
 0x199   : > { %2477 = vmatprep.mubr.f32.mxu1 %v31576_v33  ;;  %13004 = vmatprep.mubr.f32.mxu0 %v31576_v33  ;;  %v21676_v20 = vpack.c.bf16 %v31710_v52, %v31709_v17  ;;  %v2868_v36 = vsub.s32 3, %v31712_v57  ;;  %v31719_v17 = vand.u32 4294901760, %v25890_v50  ;;  %v24184_v52 = vld [vmem:[%s31128_s5] sm:$0xff] }
 0x19a   : > { %2480 = vmatmul.mubr.f32.gmra.mrb[4].mxu1 %v25890_v50  ;;  %13006 = vmatmul.mubr.f32.gmra.mrb[4].mxu0 %v25985_v55 }
 0x19b   : > { %2485 = vmatprep.mubr.f32.mxu1 %v31576_v33  ;;  %13011 = vmatprep.mubr.f32.mxu0 %v31576_v33  ;;  %v26162_v58 = vrot.slane %v24183_v40, %v2868_v36  ;;  %v31726_v40 = vand.u32 4294901760, %v25967_v37 }
 0x19c   : > { %5096 = vrot.lane.b32.xlu0 %v31702_v5, %s31701_s23  ;;  %5098 = vrot.lane.b32.xlu1 %v31703_v14, %s31701_s23 }
 0x19d   : > { %31718 = vst [vmem:[#allocation14_spill] sm:$0xff] %v26162_v58  ;;  %v2877_v57 = vmul.f32 %v26162_v58, %v2851_v44 }
 0x19e   : > { %2488 = vmatmul.mubr.f32.gmra.mrb[6].mxu1 %v25913_v1  ;;  %13013 = vmatmul.mubr.f32.gmra.mrb[6].mxu0 %v26016_v41  ;;  %v31722_v1 = vld [vmem:[#allocation13_spill] sm:$0xff] }
 0x19f   : > { %2566 = vmatprep.mubr.f32.mxu1 %v31576_v33  ;;  %13099 = vmatprep.mubr.f32.mxu0 %v31576_v33 }
 0x1a0   : > { %5100 = vrot.lane.b32.xlu0 %v31704_v28, %s31701_s23  ;;  %5102 = vrot.lane.b32.xlu1 %v31705_v23, %s31701_s23  ;;  %v2842_v23 = vpop.permute.xlu0 %2841 }
 0x1a1   : > { %v2850_v32 = vsel %vm2849_vm7, %v2842_v23, %v2830_v31  ;;  %v2862_v50 = vsel %vm2849_vm7, %v2830_v31, %v2842_v23  ;;  %v2903_v31 = vand.u32 4294901760, %v2877_v57  ;;  %v31724_v23 = vand.u32 4294901760, %v25857_v22 }
 0x1a2   : > { %2570 = vmatmul.mubr.f32.vlgmr.msra.gmra.mrb[0].mxu1 %v31708_v63  ;;  %13102 = vmatmul.mubr.f32.vlgmr.msra.gmra.mrb[0].mxu0 %v25954_v51  ;;  %v2836_v63 = vpop.permute.xlu1 %2835 }
 0x1a3   : > { %21675 = vmatpush1.bf16.msra.mxu1 %v21674_v0  ;;  %22339 = vmatpush1.bf16.msra.mxu0 %v31711_v38  ;;  %v22344_v0 = vpack.c.bf16 %v31717_v9, %v31716_v42  ;;  %v22346_v56 = vpack.c.bf16 %v31724_v23, %v31723_v59  ;;  %v21427_v59 = vld [vmem:[%s31126_s3 + $0x60] sm:$0xff] }
 0x1a4   : > { %21677 = vmatprep.subr.bf16.mxu1 %v21676_v20  ;;  %22341 = vmatprep.subr.bf16.mxu0 %v25965_v15  ;;  %v2834_v6 = vpop.permute.xlu0 %2833  ;;  %v26178_v20 = vrot.slane %v24184_v52, %v2868_v36 }
 0x1a5   : > { %2575 = vmatprep.mubr.f32.mxu1 %v31576_v33  ;;  %13107 = vmatprep.mubr.f32.mxu0 %v31576_v33 }
 0x1a6   : > { %2579 = vmatmul.mubr.f32.gmra.mrb[2].mxu1 %v31715_v10  ;;  %13110 = vmatmul.mubr.f32.gmra.mrb[2].mxu0 %v25983_v34  ;;  %31720 = vst [vmem:[#allocation9_spill] sm:$0xff] %v26178_v20  ;;  %v26193_v42 = vmul.f32 %v26178_v20, %v2862_v50  ;;  %v26196_v9 = vmul.f32 %v26178_v20, %v2863_v48 }
 0x1a7   : > { %21679 = vmatpush1.bf16.msra.mxu1 %v21678_v54  ;;  %22343 = vmatpush1.bf16.msra.mxu0 %v25995_v13  ;;  %v2848_v54 = vpop.permute.xlu1 %2847 }
 0x1a8   : > { %21681 = vmatprep.subr.bf16.mxu1 %v25664_v18  ;;  %22345 = vmatprep.subr.bf16.mxu0 %v22344_v0  ;;  %v2875_v18 = vmul.f32 %v26162_v58, %v2850_v32  ;;  %v2846_v36 = vpop.permute.xlu0 %2845  ;;  %v31725_v0 = vand.u32 4294901760, %v25954_v51  ;;  %v31727_v32 = vand.u32 4294901760, %v25976_v46  ;;  %v2901_v48 = vand.u32 4294901760, %v26193_v42 }
 0x1a9   : > { %2584 = vmatprep.mubr.f32.mxu1 %v31576_v33  ;;  %13115 = vmatprep.mubr.f32.mxu0 %v31576_v33  ;;  %v2864_v25 = vsel %vm2849_vm7, %v2834_v6, %v2846_v36  ;;  %v2905_v51 = vand.u32 4294901760, %v26196_v9  ;;  %v2853_v37 = vsel %vm2849_vm7, %v2848_v54, %v2836_v63  ;;  %v26222_v46 = vsub.f32 %v2877_v57, %v2903_v31 }
 0x1aa   : > { %2588 = vmatmul.mubr.f32.gmra.mrb[4].mxu1 %v31719_v17  ;;  %13118 = vmatmul.mubr.f32.gmra.mrb[4].mxu0 %v26014_v11  ;;  %v2899_v10 = vand.u32 4294901760, %v2875_v18  ;;  %v22348_v44 = vpack.c.bf16 %v31727_v32, %v31726_v40  ;;  %v2852_v17 = vsel %vm2849_vm7, %v2846_v36, %v2834_v6  ;;  %v31729_v6 = vand.u32 4294901760, %v25990_v3 }
 0x1ab   : > { %2593 = vmatprep.mubr.f32.mxu1 %v31576_v33  ;;  %13123 = vmatprep.mubr.f32.mxu0 %v31576_v33  ;;  %v13470_v50 = vpop.permute.xlu1 %13469  ;;  %v26236_v36 = vmul.f32 %v26178_v20, %v2864_v25  ;;  %v2879_v57 = vmul.f32 %v26162_v58, %v2852_v17 }
 0x1ac   : > { %5104 = vrot.lane.b32.xlu0 %v31688_v53, %s31701_s23  ;;  %5106 = vrot.lane.b32.xlu1 %v31691_v47, %s31701_s23  ;;  %v26216_v52 = vsub.f32 %v2875_v18, %v2899_v10  ;;  %v13468_v22 = vpop.permute.xlu0 %13467 }
 0x1ae   : > { %2597 = vmatmul.mubr.f32.gmra.mrb[6].mxu1 %v31721_v45  ;;  %13126 = vmatmul.mubr.f32.gmra.mrb[6].mxu0 %v26039_v21  ;;  %v26230_v45 = vpack.c.bf16 %v2903_v31, %v2899_v10  ;;  %v31308_v3 = vand.u32 4294901760, %v26216_v52  ;;  %v26249_v10 = vsub.f32 %v26196_v9, %v2905_v51  ;;  %v2865_v31 = vsel %vm2849_vm7, %v2836_v63, %v2848_v54  ;;  %v26265_v63 = vld [vmem:[%s31128_s5 + $0x18] ss:$0 sm:$0xff] }
 0x1af   : > { %2691 = vmatprep.mubr.f32.mxu1 %v31576_v33  ;;  %13204 = vmatprep.mubr.f32.mxu0 %v31576_v33  ;;  %v2907_v9 = vand.u32 4294901760, %v2879_v57  ;;  %v13499_v54 = vsel %vm6648_vm8, %v13470_v50, %v13468_v22  ;;  %v2880_v32 = vmul.f32 %v26178_v20, %v2865_v31 }
 0x1b0   : > { %5108 = vrot.lane.b32.xlu0 %v31692_v4, %s31701_s23  ;;  %5110 = vrot.lane.b32.xlu1 %v31722_v1, %s31701_s23  ;;  %v13472_v23 = vpop.permute.xlu0 %13471 }
 0x1b2   : > { %2693 = vmatmul.mubr.f32.vlgmr.msra.gmra.mrb[0].mxu1 %v25762_v24  ;;  %13208 = vmatmul.mubr.f32.vlgmr.msra.gmra.mrb[0].mxu0 %v31725_v0  ;;  %v2909_v0 = vand.u32 4294901760, %v26236_v36 }
 0x1b3   : > { %21683 = vmatpush1.bf16.msra.mxu1 %v25773_v60  ;;  %22347 = vmatpush1.bf16.msra.mxu0 %v22346_v56  ;;  %v31728_v60 = vand.u32 4294901760, %v25988_v26  ;;  %v2881_v26 = vmul.f32 %v26162_v58, %v2853_v37  ;;  %v13474_v56 = vpop.permute.xlu1 %13473  ;;  %v21430_v58 = vld [vmem:[%s31126_s3 + $0x78] sm:$0xff] }
 0x1b4   : > { %21685 = vmatprep.subr.bf16.mxu1 %v25778_v27  ;;  %22349 = vmatprep.subr.bf16.mxu0 %v22348_v44  ;;  %v31730_v27 = vand.u32 4294901760, %v25983_v34  ;;  %v26246_v34 = vsub.f32 %v26193_v42, %v2901_v48  ;;  %v2888_v42 = vsel %vm656_vm0, %v21427_v59, 0  ;;  %v13500_v40 = vsel %vm6648_vm8, %v13474_v56, %v13472_v23 }
 0x1b5   : > { %2698 = vmatprep.mubr.f32.mxu1 %v31576_v33  ;;  %13213 = vmatprep.mubr.f32.mxu0 %v31576_v33  ;;  %v22350_v18 = vpack.c.bf16 %v31729_v6, %v31728_v60  ;;  %v2911_v44 = vand.u32 4294901760, %v2881_v26  ;;  %v26280_v60 = vand.u32 4294901760, %v2888_v42  ;;  %v21428_v6 = vld [vmem:[%s31126_s3 + $0x68] sm:$0xff]  ;;  %v26292_v59 = vmul.f32 %v26265_v63, %v13499_v54 }
 0x1b6   : > { %2700 = vmatmul.mubr.f32.gmra.mrb[2].mxu1 %v25802_v7  ;;  %13217 = vmatmul.mubr.f32.gmra.mrb[2].mxu0 %v31730_v27  ;;  %v31309_v17 = vand.u32 4294901760, %v26246_v34  ;;  %v26289_v27 = vpack.c.bf16 %v2905_v51, %v2901_v48  ;;  %v26295_v31 = vmul.f32 %v26265_v63, %v13500_v40  ;;  %v26308_v48 = vld [vmem:[%s31128_s5 + $0x10] ss:$0 sm:$0xff]  ;;  %v13483_v51 = vsel %vm6648_vm8, %v13468_v22, %v13470_v50 }
 0x1b7   : > { %21687 = vmatpush1.bf16.msra.mxu1 %v31699_v16  ;;  %22351 = vmatpush1.bf16.msra.mxu0 %v22350_v18  ;;  %v31307_v16 = vand.u32 4294901760, %v26222_v46  ;;  %v31733_v18 = vld [vmem:[#allocation48_spill] sm:$0xff]  ;;  %v2913_v54 = vand.u32 4294901760, %v2880_v32  ;;  %v31737_v22 = vand.u32 4294901760, %v26249_v10 }
 0x1b8   : > { %22353 = vmatprep.subr.bf16.mxu0 %v31700_v39  ;;  %2705 = vmatprep.mubr.f32.mxu1 %v31576_v33  ;;  %v31731_v39 = vand.u32 4294901760, %v26014_v11  ;;  %v3019_v11 = vsub.f32 %v26216_v52, %v31308_v3  ;;  %31734 = vst [vmem:[#allocation15_spill] sm:$0xff] %v26289_v27  ;;  %v26303_v3 = vsub.f32 %v2879_v57, %v2907_v9 }
 0x1b9   : > { %13222 = vmatprep.mubr.f32.mxu0 %v31576_v33  ;;  %21689 = vmatprep.subr.bf16.mxu1 %v26230_v45  ;;  %v3031_v37 = vsub.f32 %v26222_v46, %v31307_v16  ;;  %v31735_v16 = vand.u32 4294901760, %v26039_v21  ;;  %v2891_v21 = vsel %vm656_vm0, %v21428_v6, 0  ;;  %v26317_v57 = vsub.f32 %v2888_v42, %v26280_v60  ;;  %v26339_v6 = vpop.permute.xlu1 %13477 }
 0x1ba   : > { %2707 = vmatmul.mubr.f32.gmra.mrb[4].mxu1 %v25840_v35  ;;  %13226 = vmatmul.mubr.f32.gmra.mrb[4].mxu0 %v31731_v39  ;;  %v26298_v39 = vsub.f32 %v26236_v36, %v2909_v0  ;;  %v26313_v36 = vsub.f32 %v2881_v26, %v2911_v44  ;;  %v3020_v40 = vand.u32 4294901760, %v3019_v11  ;;  %v3025_v25 = vsub.f32 %v26246_v34, %v31309_v17  ;;  %v21429_v26 = vld [vmem:[%s31126_s3 + $0x70] sm:$0xff] }
 0x1bb   : > { %2712 = vmatprep.mubr.f32.mxu1 %v31576_v33  ;;  %13231 = vmatprep.mubr.f32.mxu0 %v31576_v33  ;;  %31736 = vst [vmem:[#allocation63_spill] sm:$0xff] %v26317_v57  ;;  %v3037_v50 = vsub.f32 %v26249_v10, %v31737_v22  ;;  %v26332_v42 = vpack.c.bf16 %v2911_v44, %v2907_v9  ;;  %v13528_v22 = vand.u32 4294901760, %v26292_v59  ;;  %v13532_v17 = vand.u32 4294901760, %v26295_v31 }
 0x1bc   : > { %15776 = vrot.lane.b32.xlu0 %v31733_v18, %s31732_s14  ;;  %15778 = vrot.lane.b32.xlu1 %v25584_v30, %s31732_s14  ;;  %v26335_v11 = vmul.f32 %v26308_v48, %v13483_v51  ;;  %v13484_v9 = vsel %vm6648_vm8, %v13472_v23, %v13474_v56  ;;  %v26348_v51 = vand.u32 4294901760, %v2891_v21  ;;  %v26357_v20 = vpack.c.bf16 %v2913_v54, %v2909_v0 }
 0x1bd   : > { %31738 = vst [vmem:[#allocation61_spill] sm:$0xff] %v26332_v42  ;;  %v2894_v23 = vsel %vm656_vm0, %v21429_v26, 0  ;;  %v31322_v44 = vand.u32 4294901760, %v26317_v57  ;;  %v26368_v0 = vmul.f32 %v26308_v48, %v13484_v9 }
 0x1be   : > { %2714 = vmatmul.mubr.f32.gmra.mrb[6].mxu1 %v25878_v19  ;;  %13235 = vmatmul.mubr.f32.gmra.mrb[6].mxu0 %v31735_v16  ;;  %v3032_v16 = vand.u32 4294901760, %v3031_v37  ;;  %v26337_v37 = vpop.permute.xlu0 %13475  ;;  %31739 = vst [vmem:[#allocation62_spill] sm:$0xff] %v26357_v20 }
 0x1bf   : > { %2792 = vmatprep.mubr.f32.mxu1 %v31576_v33  ;;  %13329 = vmatprep.mubr.f32.mxu0 %v31576_v33 }
 0x1c0   : > { %15788 = vrot.lane.b32.xlu0 %v25608_v12, %s31732_s14  ;;  %15790 = vrot.lane.b32.xlu1 %v25611_v8, %s31732_s14  ;;  %v26353_v8 = vsub.f32 %v2880_v32, %v2913_v54  ;;  %v21696_v56 = vpack.c.bf16 %v3032_v16, %v3020_v40  ;;  %v3026_v12 = vand.u32 4294901760, %v3025_v25  ;;  %v3038_v32 = vand.u32 4294901760, %v3037_v50 }
 0x1c1   : > { %v26370_v54 = vpack.c.bf16 %v13532_v17, %v13528_v22  ;;  %v31741_v25 = vand.u32 4294901760, %v26303_v3  ;;  %v26379_v16 = vsub.f32 %v2891_v21, %v26348_v51  ;;  %v26381_v50 = vand.u32 4294901760, %v2894_v23  ;;  %v13482_v21 = vpop.permute.xlu1 %13481 }
 0x1c2   : > { %2794 = vmatmul.mubr.f32.vlgmr.msra.gmra.mrb[0].mxu1 %v25762_v24  ;;  %13331 = vmatmul.mubr.f32.vlgmr.msra.gmra.mrb[0].mxu0 %v25923_v43  ;;  %v31321_v24 = vand.u32 4294901760, %v26313_v36  ;;  %v13480_v9 = vpop.permute.xlu0 %13479  ;;  %v21698_v26 = vpack.c.bf16 %v3038_v32, %v3026_v12  ;;  %v26415_v12 = vsub.f32 %v26292_v59, %v13528_v22  ;;  %v26418_v32 = vsub.f32 %v26295_v31, %v13532_v17 }
 0x1c3   : > { %21691 = vmatpush1.bf16.msra.mxu1 %v26289_v27  ;;  %22355 = vmatpush1.bf16.msra.mxu0 %v31711_v38  ;;  %v31320_v38 = vand.u32 4294901760, %v26335_v11  ;;  %31740 = vst [vmem:[#allocation4_spill] sm:$0xff] %v26370_v54  ;;  %v3043_v40 = vsub.f32 %v26303_v3, %v31741_v25  ;;  %v2975_v25 = vsub.f32 %v26317_v57, %v31322_v44 }
 0x1c4   : > { %22357 = vmatprep.subr.bf16.mxu0 %v25965_v15  ;;  %2799 = vmatprep.mubr.f32.mxu1 %v31576_v33  ;;  %v2897_v15 = vsel %vm656_vm0, %v21430_v58, 0  ;;  %v3055_v58 = vsub.f32 %v26313_v36, %v31321_v24  ;;  %v21486_v24 = vld [vmem:[%s31126_s3 + $0x220] sm:$0xff]  ;;  %v13501_v44 = vsel %vm6648_vm8, %v26339_v6, %v26337_v37  ;;  %v13502_v27 = vsel %vm6648_vm8, %v13482_v21, %v13480_v9 }
 0x1c5   : > { %21693 = vmatprep.subr.bf16.mxu1 %v26332_v42  ;;  %13336 = vmatprep.mubr.f32.mxu0 %v31576_v33  ;;  %v26425_v57 = vsub.f32 %v2894_v23, %v26381_v50  ;;  %v13517_v22 = vsel %vm656_vm0, %v21486_v24, 0  ;;  %v13485_v23 = vsel %vm6648_vm8, %v26337_v37, %v26339_v6  ;;  %v13508_v42 = vmul.f32 %v26265_v63, %v13501_v44  ;;  %v21488_v37 = vld [vmem:[%s31126_s3 + $0x230] sm:$0xff] }
 0x1c6   : > { %2801 = vmatmul.mubr.f32.gmra.mrb[2].mxu1 %v25802_v7  ;;  %13338 = vmatmul.mubr.f32.gmra.mrb[2].mxu0 %v25956_v61  ;;  %v26389_v7 = vsub.f32 %v26335_v11, %v31320_v38  ;;  %v26403_v38 = vand.u32 4294901760, %v2897_v15  ;;  %v3056_v17 = vand.u32 4294901760, %v3055_v58  ;;  %v13486_v24 = vsel %vm6648_vm8, %v13480_v9, %v13482_v21 }
 0x1c7   : > { %21695 = vmatpush1.bf16.msra.mxu1 %v26357_v20  ;;  %22359 = vmatpush1.bf16.msra.mxu0 %v25995_v13  ;;  %v31742_v13 = vand.u32 4294901760, %v26298_v39  ;;  %v13510_v58 = vmul.f32 %v26265_v63, %v13502_v27  ;;  %v2976_v44 = vand.u32 4294901760, %v2975_v25  ;;  %v13507_v21 = vmul.f32 %v26308_v48, %v13485_v23 }
 0x1c8   : > { %21697 = vmatprep.subr.bf16.mxu1 %v21696_v56  ;;  %2806 = vmatprep.mubr.f32.mxu1 %v31576_v33  ;;  %v13534_v56 = vand.u32 4294901760, %v26368_v0  ;;  %v13509_v25 = vmul.f32 %v26308_v48, %v13486_v24  ;;  %v31746_v48 = vand.u32 4294901760, %v26415_v12  ;;  %v31748_v23 = vand.u32 4294901760, %v26425_v57 }
 0x1c9   : > { %v26401_v20 = vsub.f32 %v26298_v39, %v31742_v13  ;;  %13343 = vmatprep.mubr.f32.mxu0 %v31576_v33  ;;  %22361 = vmatprep.subr.bf16.mxu0 %v26370_v54  ;;  %v3044_v13 = vand.u32 4294901760, %v3043_v40  ;;  %v26442_v54 = vsub.f32 %v2897_v15, %v26403_v38  ;;  %v31744_v15 = vand.u32 4294901760, %v26379_v16 }
 0x1ca   : > { %2808 = vmatmul.mubr.f32.gmra.mrb[4].mxu1 %v25840_v35  ;;  %13345 = vmatmul.mubr.f32.gmra.mrb[4].mxu0 %v25985_v55  ;;  %v26430_v59 = vsub.f32 %v26368_v0, %v13534_v56  ;;  %v31743_v35 = vand.u32 4294901760, %v26353_v8  ;;  %v21487_v0 = vld [vmem:[%s31126_s3 + $0x228] sm:$0xff] }
 0x1cb   : > { %2813 = vmatprep.mubr.f32.mxu1 %v31576_v33  ;;  %13350 = vmatprep.mubr.f32.mxu0 %v31576_v33  ;;  %v21700_v63 = vpack.c.bf16 %v3056_v17, %v3044_v13  ;;  %v3050_v27 = vand.u32 4294901760, %v26401_v20  ;;  %v13536_v20 = vand.u32 4294901760, %v13508_v42  ;;  %v13540_v13 = vand.u32 4294901760, %v13510_v58 }
 0x1cc   : > { %v3061_v31 = vsub.f32 %v26353_v8, %v31743_v35  ;;  %15780 = vrot.lane.b32.xlu0 %v25693_v62, %s31732_s14  ;;  %15782 = vrot.lane.b32.xlu1 %v25696_v49, %s31732_s14  ;;  %v2986_v35 = vsub.f32 %v26379_v16, %v31744_v15  ;;  %v26461_v49 = vand.u32 4294901760, %v13517_v22  ;;  %v31745_v15 = vand.u32 4294901760, %v26335_v11 }
 0x1cd   : > { %v13648_v11 = vsub.f32 %v26415_v12, %v31746_v48 }
 0x1ce   : > { %2815 = vmatmul.mubr.f32.gmra.mrb[6].mxu1 %v25878_v19  ;;  %13352 = vmatmul.mubr.f32.gmra.mrb[6].mxu0 %v26016_v41  ;;  %v3062_v9 = vand.u32 4294901760, %v3061_v31  ;;  %v13520_v19 = vsel %vm656_vm0, %v21487_v0, 0  ;;  %v26471_v6 = vpack.c.bf16 %v13534_v56, %v31745_v15  ;;  %v31747_v56 = vand.u32 4294901760, %v26418_v32 }
 0x1cf   : > { %2971 = vmatprep.mubr.f32.mxu1 %v31576_v33  ;;  %13430 = vmatprep.mubr.f32.mxu0 %v31576_v33  ;;  %v2987_v31 = vand.u32 4294901760, %v2986_v35  ;;  %v2997_v0 = vsub.f32 %v26425_v57, %v31748_v23  ;;  %v26492_v24 = vsub.f32 %v13517_v22, %v26461_v49  ;;  %v26494_v15 = vand.u32 4294901760, %v13520_v19 }
 0x1d0   : > { %15792 = vrot.lane.b32.xlu0 %v25737_v29, %s31732_s14  ;;  %15794 = vrot.lane.b32.xlu1 %v25740_v2, %s31732_s14  ;;  %v13660_v17 = vsub.f32 %v26418_v32, %v31747_v56  ;;  %v21702_v48 = vpack.c.bf16 %v3062_v9, %v3050_v27  ;;  %v13538_v35 = vand.u32 4294901760, %v13507_v21  ;;  %v13542_v56 = vand.u32 4294901760, %v13509_v25 }
 0x1d1   : > { %v31749_v22 = vand.u32 4294901760, %v26442_v54  ;;  %v26505_v2 = vsub.f32 %v13508_v42, %v13536_v20  ;;  %v26511_v27 = vpack.c.bf16 %v13540_v13, %v13536_v20  ;;  %v2998_v40 = vand.u32 4294901760, %v2997_v0 }
 0x1d2   : > { %2977 = vmatmul.mubr.f32.vlgmr.msra.gmra.mrb[0].mxu1 %v2976_v44  ;;  %13432 = vmatmul.mubr.f32.vlgmr.msra.gmra.mrb[0].mxu0 %v25923_v43  ;;  %v21704_v44 = vpack.c.bf16 %v26222_v46, %v26216_v52  ;;  %v13523_v43 = vsel %vm656_vm0, %v21488_v37, 0  ;;  %v26513_v37 = vsub.f32 %v13510_v58, %v13540_v13  ;;  %v13661_v9 = vand.u32 4294901760, %v13660_v17 }
 0x1d3   : > { %21699 = vmatpush1.bf16.msra.mxu1 %v21698_v26  ;;  %2982 = vmatprep.mubr.f32.mxu1 %v31576_v33  ;;  %v3008_v23 = vsub.f32 %v26442_v54, %v31749_v22  ;;  %v21489_v26 = vld [vmem:[%s31126_s3 + $0x238] sm:$0xff]  ;;  %v13603_v22 = vand.u32 4294901760, %v26492_v24  ;;  %v26518_v42 = vsub.f32 %v13520_v19, %v26494_v15  ;;  %v26520_v29 = vand.u32 4294901760, %v13523_v43 }
 0x1d4   : > { %21701 = vmatprep.subr.bf16.mxu1 %v21700_v63  ;;  %13437 = vmatprep.mubr.f32.mxu0 %v31576_v33  ;;  %v13649_v63 = vand.u32 4294901760, %v13648_v11  ;;  %v26522_v62 = vsub.f32 %v13507_v21, %v13538_v35  ;;  %v13526_v58 = vsel %vm656_vm0, %v21489_v26, 0  ;;  %v26526_v20 = vsub.f32 %v13509_v25, %v13542_v56 }
 0x1d5   : > { %22363 = vmatpush1.bf16.msra.mxu0 %v26471_v6  ;;  %v26529_v13 = vpack.c.bf16 %v13542_v56, %v13538_v35  ;;  %v31750_v19 = vand.u32 4294901760, %v26389_v7  ;;  %v31751_v17 = vand.u32 4294901760, %v26430_v59  ;;  %v31343_v25 = vand.u32 4294901760, %v26505_v2  ;;  %5864 = vrot.lane.b32.xlu0 %v31702_v5, %s24235_s24 }
 0x1d6   : > { %2988 = vmatmul.mubr.f32.gmra.mrb[2].mxu1 %v2987_v31  ;;  %13439 = vmatmul.mubr.f32.gmra.mrb[2].mxu0 %v25956_v61  ;;  %v3009_v61 = vand.u32 4294901760, %v3008_v23  ;;  %v22368_v21 = vpack.c.bf16 %v13661_v9, %v13649_v63  ;;  %v31341_v0 = vand.u32 4294901760, %v26513_v37  ;;  %v26546_v35 = vsub.f32 %v13523_v43, %v26520_v29 }
 0x1d7   : > { %21703 = vmatpush1.bf16.msra.mxu1 %v21702_v48  ;;  %2993 = vmatprep.mubr.f32.mxu1 %v31576_v33  ;;  %v13654_v11 = vsub.f32 %v26389_v7, %v31750_v19  ;;  %v13666_v31 = vsub.f32 %v26430_v59, %v31751_v17  ;;  %v13604_v48 = vsub.f32 %v26492_v24, %v13603_v22  ;;  %v26548_v56 = vand.u32 4294901760, %v13526_v58 }
 0x1d8   : > { %21705 = vmatprep.subr.bf16.mxu1 %v21704_v44  ;;  %13444 = vmatprep.mubr.f32.mxu0 %v31576_v33  ;;  %v31339_v44 = vand.u32 4294901760, %v26518_v42  ;;  %v31340_v23 = vand.u32 4294901760, %v26522_v62  ;;  %v13672_v43 = vsub.f32 %v26505_v2, %v31343_v25  ;;  %v13684_v63 = vsub.f32 %v26513_v37, %v31341_v0 }
 0x1d9   : > { %22365 = vmatprep.subr.bf16.mxu0 %v26511_v27  ;;  %v13667_v26 = vand.u32 4294901760, %v13666_v31  ;;  %5866 = vrot.lane.b32.xlu1 %v31703_v14, %s24235_s24  ;;  %v13605_v9 = vand.u32 4294901760, %v13604_v48  ;;  %v21706_v17 = vpack.c.bf16 %v26249_v10, %v26246_v34 }
 0x1da   : > { %2999 = vmatmul.mubr.f32.gmra.mrb[4].mxu1 %v2998_v40  ;;  %13446 = vmatmul.mubr.f32.gmra.mrb[4].mxu0 %v25985_v55  ;;  %v31342_v40 = vand.u32 4294901760, %v26526_v20  ;;  %v13655_v55 = vand.u32 4294901760, %v13654_v11  ;;  %v13615_v19 = vsub.f32 %v26518_v42, %v31339_v44  ;;  %v13625_v11 = vand.u32 4294901760, %v26546_v35  ;;  %v31752_v44 = vld [vmem:[#allocation7_spill] sm:$0xff] }
 0x1db   : > { %3004 = vmatprep.mubr.f32.mxu1 %v31576_v33  ;;  %13451 = vmatprep.mubr.f32.mxu0 %v31576_v33  ;;  %v13673_v31 = vand.u32 4294901760, %v13672_v43  ;;  %v13685_v48 = vand.u32 4294901760, %v13684_v63  ;;  %v21710_v43 = vpack.c.bf16 %v26353_v8, %v26298_v39 }
 0x1dc   : > { %22367 = vmatpush1.bf16.msra.mxu0 %v26529_v13  ;;  %5868 = vrot.lane.b32.xlu0 %v31704_v28, %s24235_s24  ;;  %v13616_v0 = vand.u32 4294901760, %v13615_v19 }
 0x1dd   : > { %22369 = vmatprep.subr.bf16.mxu0 %v22368_v21  ;;  %v26571_v21 = vsub.f32 %v13526_v58, %v26548_v56  ;;  %v22370_v58 = vpack.c.bf16 %v13667_v26, %v13655_v55  ;;  %5870 = vrot.lane.b32.xlu1 %v31752_v44, %s24235_s24  ;;  %v22372_v63 = vpack.c.bf16 %v13685_v48, %v13673_v31  ;;  %v31755_v48 = vld [vmem:[#allocation61_spill] sm:$0xff] }
 0x1de   : > { %3010 = vmatmul.mubr.f32.gmra.mrb[6].mxu1 %v3009_v61  ;;  %13453 = vmatmul.mubr.f32.gmra.mrb[6].mxu0 %v26016_v41  ;;  %v13678_v61 = vsub.f32 %v26522_v62, %v31340_v23  ;;  %v13690_v41 = vsub.f32 %v26526_v20, %v31342_v40  ;;  %v21708_v23 = vpack.c.bf16 %v26313_v36, %v26303_v3 }
 0x1df   : > { %3120 = vmatprep.mubr.f32.mxu1 %v31576_v33  ;;  %13600 = vmatprep.mubr.f32.mxu0 %v31576_v33  ;;  %v13626_v40 = vsub.f32 %v26546_v35, %v13625_v11  ;;  %v13636_v25 = vand.u32 4294901760, %v26571_v21  ;;  %v22382_v31 = vpack.c.bf16 %v26526_v20, %v26522_v62 }
 0x1e0   : > { %v13679_v55 = vand.u32 4294901760, %v13678_v61  ;;  %v13691_v26 = vand.u32 4294901760, %v13690_v41  ;;  %5872 = vrot.lane.b32.xlu0 %v31688_v53, %s24235_s24  ;;  %v22376_v61 = vpack.c.bf16 %v26418_v32, %v26415_v12  ;;  %v22380_v41 = vpack.c.bf16 %v26513_v37, %v26505_v2 }
 0x1e1   : > { %5874 = vrot.lane.b32.xlu1 %v31691_v47, %s24235_s24 }
 0x1e2   : > { %3122 = vmatmul.mubr.f32.vlgmr.msra.gmra.mrb[0].mxu1 %v26280_v60  ;;  %13606 = vmatmul.mubr.f32.vlgmr.msra.gmra.mrb[0].mxu0 %v13605_v9  ;;  %v13627_v9 = vand.u32 4294901760, %v13626_v40  ;;  %v22374_v19 = vpack.c.bf16 %v13691_v26, %v13679_v55  ;;  %v22378_v40 = vpack.c.bf16 %v26430_v59, %v26389_v7  ;;  %v31756_v55 = vand.u32 4294901760, %v26216_v52  ;;  %v31760_v52 = vld [vmem:[#allocation53_spill] sm:$0xff] }
 0x1e3   : > { %21707 = vmatpush1.bf16.msra.mxu1 %v21706_v17  ;;  %3127 = vmatprep.mubr.f32.mxu1 %v31576_v33  ;;  %v31753_v17 = vld [vmem:[#allocation63_spill] sm:$0xff]  ;;  %v31757_v26 = vand.u32 4294901760, %v26222_v46  ;;  %v31761_v46 = vld [vmem:[#allocation54_spill] sm:$0xff] }
 0x1e4   : > { %21709 = vmatprep.subr.bf16.mxu1 %v21708_v23  ;;  %13611 = vmatprep.mubr.f32.mxu0 %v31576_v33  ;;  %v13637_v23 = vsub.f32 %v26571_v21, %v13636_v25 }
 0x1e5   : > { %22371 = vmatpush1.bf16.msra.mxu0 %v22370_v58  ;;  %5876 = vrot.lane.b32.xlu0 %v31692_v4, %s24235_s24  ;;  %v31754_v58 = vld [vmem:[#allocation15_spill] sm:$0xff] }
 0x1e6   : > { %3129 = vmatmul.mubr.f32.gmra.mrb[2].mxu1 %v26348_v51  ;;  %13617 = vmatmul.mubr.f32.gmra.mrb[2].mxu0 %v13616_v0  ;;  %v13638_v0 = vand.u32 4294901760, %v13637_v23  ;;  %v31762_v23 = vld [vmem:[#allocation55_spill] sm:$0xff] }
 0x1e7   : > { %21711 = vmatpush1.bf16.msra.mxu1 %v21710_v43  ;;  %3134 = vmatprep.mubr.f32.mxu1 %v31576_v33  ;;  %v21720_v43 = vpack.c.bf16 %v31757_v26, %v31756_v55  ;;  %v31768_v55 = vand.u32 4294901760, %v26313_v36  ;;  %v31772_v36 = vand.u32 4294901760, %v26415_v12 }
 0x1e8   : > { %21713 = vmatprep.subr.bf16.mxu1 %v26230_v45  ;;  %13622 = vmatprep.mubr.f32.mxu0 %v31576_v33 }
 0x1e9   : > { %22373 = vmatprep.subr.bf16.mxu0 %v22372_v63  ;;  %5878 = vrot.lane.b32.xlu1 %v31722_v1, %s24235_s24  ;;  %v31758_v63 = vld [vmem:[#allocation62_spill] sm:$0xff] }
 0x1ea   : > { %3136 = vmatmul.mubr.f32.gmra.mrb[4].mxu1 %v26381_v50  ;;  %13628 = vmatmul.mubr.f32.gmra.mrb[4].mxu0 %v13627_v9  ;;  %v31759_v9 = vld [vmem:[#allocation4_spill] sm:$0xff] }
 0x1eb   : > { %3141 = vmatprep.mubr.f32.mxu1 %v31576_v33  ;;  %13633 = vmatprep.mubr.f32.mxu0 %v31576_v33 }
 0x1ec   : > { %22375 = vmatpush1.bf16.msra.mxu0 %v22374_v19  ;;  %16535 = vrot.lane.b32.xlu0 %v31733_v18, %s24236_s25  ;;  %v31763_v19 = vld [vmem:[#allocation56_spill] sm:$0xff] }
 0x1ed   : > { %22377 = vmatprep.subr.bf16.mxu0 %v22376_v61  ;;  %16537 = vrot.lane.b32.xlu1 %v25584_v30, %s24236_s25  ;;  %v31764_v61 = vand.u32 4294901760, %v26246_v34  ;;  %v31769_v34 = vand.u32 4294901760, %v26298_v39  ;;  %v31775_v39 = vld [vmem:[#allocation58_spill] sm:$0xff] }
 0x1ee   : > { %3143 = vmatmul.mubr.f32.gmra.mrb[6].mxu1 %v26403_v38  ;;  %13639 = vmatmul.mubr.f32.gmra.mrb[6].mxu0 %v13638_v0  ;;  %v31765_v0 = vand.u32 4294901760, %v26249_v10  ;;  %v31770_v10 = vand.u32 4294901760, %v26353_v8  ;;  %v31774_v8 = vand.u32 4294901760, %v26425_v57 }
 0x1ef   : > { %3229 = vmatprep.mubr.f32.mxu1 %v31576_v33  ;;  %13749 = vmatprep.mubr.f32.mxu0 %v31576_v33 }
 0x1f0   : > { %16547 = vrot.lane.b32.xlu0 %v31760_v52, %s24236_s25 }
 0x1f1   : > { %16549 = vrot.lane.b32.xlu1 %v31761_v46, %s24236_s25 }
 0x1f2   : > { %3232 = vmatmul.mubr.f32.vlgmr.msra.gmra.mrb[0].mxu1 %v31753_v17  ;;  %13751 = vmatmul.mubr.f32.vlgmr.msra.gmra.mrb[0].mxu0 %v26461_v49 }
 0x1f3   : > { %21715 = vmatpush1.bf16.msra.mxu1 %v31754_v58  ;;  %22379 = vmatpush1.bf16.msra.mxu0 %v22378_v40  ;;  %v21722_v40 = vpack.c.bf16 %v31765_v0, %v31764_v61  ;;  %v31779_v0 = vld [vmem:[#allocation11_spill] sm:$0xff] }
 0x1f4   : > { %21717 = vmatprep.subr.bf16.mxu1 %v31755_v48  ;;  %3237 = vmatprep.mubr.f32.mxu1 %v31576_v33 }
 0x1f5   : > { %13756 = vmatprep.mubr.f32.mxu0 %v31576_v33  ;;  %22381 = vmatprep.subr.bf16.mxu0 %v22380_v41  ;;  %v31766_v41 = vand.u32 4294901760, %v31753_v17  ;;  %v21726_v17 = vpack.c.bf16 %v31770_v10, %v31769_v34  ;;  %v21431_v10 = vld [vmem:[%s31126_s3 + $0x80] sm:$0xff] }
 0x1f6   : > { %3240 = vmatmul.mubr.f32.gmra.mrb[2].mxu1 %v26379_v16  ;;  %13758 = vmatmul.mubr.f32.gmra.mrb[2].mxu0 %v26494_v15 }
 0x1f7   : > { %21719 = vmatpush1.bf16.msra.mxu1 %v31758_v63  ;;  %22383 = vmatpush1.bf16.msra.mxu0 %v22382_v31  ;;  %v31767_v31 = vand.u32 4294901760, %v26303_v3  ;;  %v31771_v3 = vand.u32 4294901760, %v26379_v16  ;;  %v31776_v16 = vld [vmem:[#allocation59_spill] sm:$0xff] }
 0x1f8   : > { %21721 = vmatprep.subr.bf16.mxu1 %v21720_v43  ;;  %22385 = vmatprep.subr.bf16.mxu0 %v31759_v9  ;;  %v31773_v43 = vand.u32 4294901760, %v26418_v32 }
 0x1f9   : > { %3245 = vmatprep.mubr.f32.mxu1 %v31576_v33  ;;  %13763 = vmatprep.mubr.f32.mxu0 %v31576_v33  ;;  %v21724_v26 = vpack.c.bf16 %v31768_v55, %v31767_v31  ;;  %v31781_v31 = vand.u32 4294901760, %v26430_v59 }
 0x1fa   : > { %3248 = vmatmul.mubr.f32.gmra.mrb[4].mxu1 %v26425_v57  ;;  %13765 = vmatmul.mubr.f32.gmra.mrb[4].mxu0 %v26520_v29  ;;  %v22392_v61 = vpack.c.bf16 %v31773_v43, %v31772_v36  ;;  %v31778_v57 = vand.u32 4294901760, %v26442_v54  ;;  %v26743_v36 = vpop.permute.xlu0 %14254  ;;  %v26745_v43 = vpop.permute.xlu1 %14256 }
 0x1fb   : > { %3253 = vmatprep.mubr.f32.mxu1 %v31576_v33  ;;  %13770 = vmatprep.mubr.f32.mxu0 %v31576_v33 }
 0x1fc   : > { %16539 = vrot.lane.b32.xlu0 %v31762_v23, %s24236_s25  ;;  %16541 = vrot.lane.b32.xlu1 %v31763_v19, %s24236_s25  ;;  %v31794_v23 = vld [vmem:[#allocation19_spill] sm:$0xff] }
 0x1fe   : > { %3256 = vmatmul.mubr.f32.gmra.mrb[6].mxu1 %v26442_v54  ;;  %13772 = vmatmul.mubr.f32.gmra.mrb[6].mxu0 %v26548_v56  ;;  %v31780_v54 = vand.u32 4294901760, %v26389_v7 }
 0x1ff   : > { %3334 = vmatprep.mubr.f32.mxu1 %v31576_v33  ;;  %13858 = vmatprep.mubr.f32.mxu0 %v31576_v33 }
 0x200   : > { %16551 = vrot.lane.b32.xlu0 %v31775_v39, %s24236_s25  ;;  %16553 = vrot.lane.b32.xlu1 %v31776_v16, %s24236_s25  ;;  %v22394_v55 = vpack.c.bf16 %v31781_v31, %v31780_v54  ;;  %v21432_v54 = vld [vmem:[%s31126_s3 + $0x88] sm:$0xff]  ;;  %v21433_v31 = vld [vmem:[%s31126_s3 + $0x90] sm:$0xff] }
 0x202   : > { %3338 = vmatmul.mubr.f32.vlgmr.msra.gmra.mrb[0].mxu1 %v31766_v41  ;;  %13861 = vmatmul.mubr.f32.vlgmr.msra.gmra.mrb[0].mxu0 %v26492_v24  ;;  %v26717_v41 = vmul.f32 %v31779_v0, %v31704_v28  ;;  %v31785_v24 = vand.u32 4294901760, %v26526_v20  ;;  %v31786_v20 = vand.u32 4294901760, %v26518_v42 }
 0x203   : > { %21723 = vmatpush1.bf16.msra.mxu1 %v21722_v40  ;;  %22387 = vmatpush1.bf16.msra.mxu0 %v26471_v6  ;;  %v26713_v40 = vmul.f32 %v31779_v0, %v31702_v5 }
 0x204   : > { %21725 = vmatprep.subr.bf16.mxu1 %v21724_v26  ;;  %22389 = vmatprep.subr.bf16.mxu0 %v26511_v27 }
 0x205   : > { %3343 = vmatprep.mubr.f32.mxu1 %v31576_v33  ;;  %13866 = vmatprep.mubr.f32.mxu0 %v31576_v33 }
 0x206   : > { %3347 = vmatmul.mubr.f32.gmra.mrb[2].mxu1 %v31771_v3  ;;  %13869 = vmatmul.mubr.f32.gmra.mrb[2].mxu0 %v26518_v42  ;;  %v31344_v3 = vand.u32 4294901760, %v26713_v40 }
 0x207   : > { %21727 = vmatpush1.bf16.msra.mxu1 %v21726_v17  ;;  %22391 = vmatpush1.bf16.msra.mxu0 %v26529_v13 }
 0x208   : > { %21729 = vmatprep.subr.bf16.mxu1 %v26230_v45  ;;  %22393 = vmatprep.subr.bf16.mxu0 %v22392_v61  ;;  %v31777_v45 = vld [vmem:[#allocation10_spill] sm:$0xff] }
 0x209   : > { %3352 = vmatprep.mubr.f32.mxu1 %v31576_v33  ;;  %13874 = vmatprep.mubr.f32.mxu0 %v31576_v33  ;;  %v3606_v12 = vmul.f32 %v31777_v45, %v31703_v14  ;;  %v3608_v32 = vmul.f32 %v31777_v45, %v31752_v44  ;;  %v3612_v42 = vmul.f32 %v31777_v45, %v31722_v1 }
 0x20a   : > { %3356 = vmatmul.mubr.f32.gmra.mrb[4].mxu1 %v31774_v8  ;;  %13877 = vmatmul.mubr.f32.gmra.mrb[4].mxu0 %v26546_v35 }
 0x20b   : > { %3361 = vmatprep.mubr.f32.mxu1 %v31576_v33  ;;  %13882 = vmatprep.mubr.f32.mxu0 %v31576_v33  ;;  %v3630_v26 = vand.u32 4294901760, %v3606_v12  ;;  %v3634_v34 = vand.u32 4294901760, %v3608_v32 }
 0x20c   : > { %6632 = vrot.lane.b32.xlu0 %v31702_v5, %s24237_s28  ;;  %6634 = vrot.lane.b32.xlu1 %v31703_v14, %s24237_s28  ;;  %v31782_v5 = vand.u32 4294901760, %v26505_v2  ;;  %v31783_v14 = vand.u32 4294901760, %v26513_v37  ;;  %v31784_v2 = vand.u32 4294901760, %v26522_v62  ;;  %v3610_v62 = vmul.f32 %v31777_v45, %v31691_v47 }
 0x20d   : > { %v26738_v7 = vsub.f32 %v3606_v12, %v3630_v26  ;;  %v26740_v59 = vsub.f32 %v3608_v32, %v3634_v34  ;;  %v26756_v61 = vpack.c.bf16 %v3634_v34, %v3630_v26  ;;  %v14273_v26 = vpop.permute.xlu1 %14272 }
 0x20e   : > { %3365 = vmatmul.mubr.f32.gmra.mrb[6].mxu1 %v31778_v57  ;;  %13885 = vmatmul.mubr.f32.gmra.mrb[6].mxu0 %v26571_v21  ;;  %v22396_v17 = vpack.c.bf16 %v31783_v14, %v31782_v5  ;;  %v22398_v37 = vpack.c.bf16 %v31785_v24, %v31784_v2  ;;  %v14279_v5 = vsel %vm561_vm3, %v14273_v26, %v26745_v43  ;;  %v3625_v24 = vsel %vm656_vm0, %v21433_v31, 0 }
 0x20f   : > { %3459 = vmatprep.mubr.f32.mxu1 %v31576_v33  ;;  %13963 = vmatprep.mubr.f32.mxu0 %v31576_v33  ;;  %v31345_v32 = vand.u32 4294901760, %v26738_v7  ;;  %v31346_v57 = vand.u32 4294901760, %v26740_v59 }
 0x210   : > { %6636 = vrot.lane.b32.xlu0 %v31704_v28, %s24237_s28  ;;  %6638 = vrot.lane.b32.xlu1 %v31752_v44, %s24237_s28 }
 0x211   : > { %v3750_v35 = vsub.f32 %v26738_v7, %v31345_v32 }
 0x212   : > { %3461 = vmatmul.mubr.f32.vlgmr.msra.gmra.mrb[0].mxu1 %v26280_v60  ;;  %13967 = vmatmul.mubr.f32.vlgmr.msra.gmra.mrb[0].mxu0 %v13603_v22  ;;  %v3636_v22 = vand.u32 4294901760, %v26717_v41 }
 0x213   : > { %21731 = vmatpush1.bf16.msra.mxu1 %v31754_v58  ;;  %22395 = vmatpush1.bf16.msra.mxu0 %v22394_v55  ;;  %v3619_v58 = vsel %vm656_vm0, %v21431_v10, 0  ;;  %v14271_v55 = vpop.permute.xlu0 %14270 }
 0x214   : > { %21733 = vmatprep.subr.bf16.mxu1 %v31755_v48  ;;  %22397 = vmatprep.subr.bf16.mxu0 %v22396_v17  ;;  %v26761_v48 = vsub.f32 %v26713_v40, %v31344_v3  ;;  %v26769_v8 = vsub.f32 %v26717_v41, %v3636_v22  ;;  %v26772_v12 = vand.u32 4294901760, %v3619_v58  ;;  %v3611_v41 = vmul.f32 %v31779_v0, %v31692_v4  ;;  %v31787_v3 = vld [vmem:[#allocation42_spill] sm:$0xff] }
 0x215   : > { %3466 = vmatprep.mubr.f32.mxu1 %v31576_v33  ;;  %13972 = vmatprep.mubr.f32.mxu0 %v31576_v33  ;;  %v14278_v10 = vsel %vm561_vm3, %v14271_v55, %v26743_v36  ;;  %v3622_v17 = vsel %vm656_vm0, %v21432_v54, 0  ;;  %v26825_v14 = vmul.f32 %v14279_v5, %v31787_v3  ;;  %v31789_v5 = vand.u32 4294901760, %v26713_v40 }
 0x216   : > { %3468 = vmatmul.mubr.f32.gmra.mrb[2].mxu1 %v26348_v51  ;;  %13976 = vmatmul.mubr.f32.gmra.mrb[2].mxu0 %v31786_v20  ;;  %v31347_v34 = vand.u32 4294901760, %v26761_v48  ;;  %v26807_v2 = vsub.f32 %v3619_v58, %v26772_v12  ;;  %v3644_v54 = vand.u32 4294901760, %v3611_v41  ;;  %v14295_v32 = vmul.f32 %v14278_v10, %v31787_v3 }
 0x217   : > { %21735 = vmatpush1.bf16.msra.mxu1 %v31758_v63  ;;  %22399 = vmatpush1.bf16.msra.mxu0 %v22398_v37  ;;  %v26785_v63 = vmul.f32 %v31779_v0, %v31688_v53  ;;  %v3642_v37 = vand.u32 4294901760, %v3612_v42  ;;  %v31788_v44 = vand.u32 4294901760, %v26769_v8  ;;  %v26840_v10 = vand.u32 4294901760, %v3625_v24 }
 0x218   : > { %22401 = vmatprep.subr.bf16.mxu0 %v31759_v9  ;;  %3473 = vmatprep.mubr.f32.mxu1 %v31576_v33  ;;  %v3638_v9 = vand.u32 4294901760, %v3610_v62  ;;  %v3756_v28 = vsub.f32 %v26761_v48, %v31347_v34  ;;  %v26846_v21 = vpack.c.bf16 %v3636_v22, %v31789_v5  ;;  %v31350_v34 = vand.u32 4294901760, %v26807_v2  ;;  %v31790_v5 = vld [vmem:[#allocation49_spill] sm:$0xff] }
 0x219   : > { %13981 = vmatprep.mubr.f32.mxu0 %v31576_v33  ;;  %21737 = vmatprep.subr.bf16.mxu1 %v26756_v61  ;;  %v3640_v20 = vand.u32 4294901760, %v26785_v63  ;;  %v26832_v31 = vsub.f32 %v3612_v42, %v3642_v37  ;;  %v26850_v42 = vpop.permute.xlu1 %14260  ;;  %v3751_v0 = vand.u32 4294901760, %v3750_v35  ;;  %v26858_v16 = vsub.f32 %v3611_v41, %v3644_v54 }
 0x21a   : > { %3475 = vmatmul.mubr.f32.gmra.mrb[4].mxu1 %v26381_v50  ;;  %13985 = vmatmul.mubr.f32.gmra.mrb[4].mxu0 %v13625_v11  ;;  %v3762_v11 = vsub.f32 %v26740_v59, %v31346_v57  ;;  %v26821_v58 = vsub.f32 %v3610_v62, %v3638_v9  ;;  %v26827_v57 = vand.u32 4294901760, %v3622_v17  ;;  %v3768_v62 = vsub.f32 %v26769_v8, %v31788_v44 }
 0x21b   : > { %3480 = vmatprep.mubr.f32.mxu1 %v31576_v33  ;;  %13990 = vmatprep.mubr.f32.mxu0 %v31576_v33  ;;  %v26853_v19 = vpack.c.bf16 %v3642_v37, %v3638_v9  ;;  %v26856_v44 = vsub.f32 %v26785_v63, %v3640_v20  ;;  %v14319_v35 = vand.u32 4294901760, %v14295_v32  ;;  %v14323_v9 = vand.u32 4294901760, %v26825_v14 }
 0x21c   : > { %v3763_v45 = vand.u32 4294901760, %v3762_v11  ;;  %6640 = vrot.lane.b32.xlu0 %v31688_v53, %s24237_s28  ;;  %6642 = vrot.lane.b32.xlu1 %v31691_v47, %s24237_s28  ;;  %v26865_v40 = vsub.f32 %v3622_v17, %v26827_v57  ;;  %v31351_v22 = vand.u32 4294901760, %v26821_v58  ;;  %v3757_v63 = vand.u32 4294901760, %v3756_v28  ;;  %v21434_v47 = vld [vmem:[%s31126_s3 + $0x98] sm:$0xff] }
 0x21d   : > { %v3769_v41 = vand.u32 4294901760, %v3768_v62  ;;  %v26872_v11 = vsub.f32 %v3625_v24, %v26840_v10  ;;  %v31356_v53 = vand.u32 4294901760, %v26832_v31  ;;  %v26880_v17 = vpack.c.bf16 %v3644_v54, %v3640_v20 }
 0x21e   : > { %3482 = vmatmul.mubr.f32.gmra.mrb[6].mxu1 %v26403_v38  ;;  %13994 = vmatmul.mubr.f32.gmra.mrb[6].mxu0 %v13636_v25  ;;  %v26848_v25 = vpop.permute.xlu0 %14258  ;;  %v21744_v37 = vpack.c.bf16 %v3763_v45, %v3751_v0  ;;  %v14290_v24 = vsel %vm561_vm3, %v26743_v36, %v14271_v55  ;;  %v31354_v28 = vand.u32 4294901760, %v26856_v44  ;;  %v31353_v20 = vand.u32 4294901760, %v26858_v16  ;;  %v14277_v45 = vpop.permute.xlu1 %14276 }
 0x21f   : > { %3560 = vmatprep.mubr.f32.mxu1 %v31576_v33  ;;  %14088 = vmatprep.mubr.f32.mxu0 %v31576_v33  ;;  %v26901_v0 = vsub.f32 %v26821_v58, %v31351_v22  ;;  %v26903_v36 = vpack.c.bf16 %v14323_v9, %v14319_v35  ;;  %v26908_v55 = vpack.c.bf16 %v3769_v41, %v3757_v63 }
 0x220   : > { %v3786_v62 = vsub.f32 %v26832_v31, %v31356_v53  ;;  %v26919_v22 = vsub.f32 %v14295_v32, %v14319_v35  ;;  %v26928_v41 = vsub.f32 %v26825_v14, %v14323_v9  ;;  %v21491_v32 = vld [vmem:[%s31126_s3 + $0x240] sm:$0xff]  ;;  %v3780_v14 = vsub.f32 %v26856_v44, %v31354_v28  ;;  %6644 = vrot.lane.b32.xlu0 %v31692_v4, %s24237_s28 }
 0x221   : > { %v3792_v9 = vsub.f32 %v26858_v16, %v31353_v20  ;;  %v14308_v28 = vsel %vm656_vm0, %v21491_v32, 0  ;;  %6646 = vrot.lane.b32.xlu1 %v31722_v1, %s24237_s28 }
 0x222   : > { %3562 = vmatmul.mubr.f32.vlgmr.msra.gmra.mrb[0].mxu1 %v26280_v60  ;;  %14090 = vmatmul.mubr.f32.vlgmr.msra.gmra.mrb[0].mxu0 %v26461_v49  ;;  %v26885_v60 = vsub.f32 %v26807_v2, %v31350_v34  ;;  %v14275_v54 = vpop.permute.xlu0 %14274  ;;  %v14294_v34 = vmul.f32 %v14290_v24, %v31790_v5  ;;  %v3781_v32 = vand.u32 4294901760, %v3780_v14 }
 0x223   : > { %22403 = vmatpush1.bf16.msra.mxu0 %v26471_v6  ;;  %21739 = vmatpush1.bf16.msra.mxu1 %v26846_v21  ;;  %v14291_v6 = vsel %vm561_vm3, %v26745_v43, %v14273_v26  ;;  %v3628_v43 = vsel %vm656_vm0, %v21434_v47, 0  ;;  %v31355_v26 = vand.u32 4294901760, %v26872_v11  ;;  %v14280_v63 = vsel %vm561_vm3, %v14275_v54, %v26848_v25 }
 0x224   : > { %22405 = vmatprep.subr.bf16.mxu0 %v26511_v27  ;;  %3567 = vmatprep.mubr.f32.mxu1 %v31576_v33  ;;  %v31352_v27 = vand.u32 4294901760, %v26865_v40  ;;  %v14296_v47 = vmul.f32 %v14291_v6, %v31790_v5  ;;  %v26930_v24 = vand.u32 4294901760, %v3628_v43  ;;  %v14293_v6 = vsel %vm561_vm3, %v26850_v42, %v14277_v45 }
 0x225   : > { %14095 = vmatprep.mubr.f32.mxu0 %v31576_v33  ;;  %21741 = vmatprep.subr.bf16.mxu1 %v26853_v19  ;;  %v3793_v53 = vand.u32 4294901760, %v3792_v9 }
 0x226   : > { %3569 = vmatmul.mubr.f32.gmra.mrb[2].mxu1 %v26348_v51  ;;  %14097 = vmatmul.mubr.f32.gmra.mrb[2].mxu0 %v26494_v15  ;;  %v3707_v51 = vand.u32 4294901760, %v26885_v60  ;;  %v26938_v35 = vsub.f32 %v26865_v40, %v31352_v27  ;;  %v3775_v60 = vand.u32 4294901760, %v26901_v0  ;;  %v26957_v0 = vsub.f32 %v26872_v11, %v31355_v26 }
 0x227   : > { %22407 = vmatpush1.bf16.msra.mxu0 %v26529_v13  ;;  %3574 = vmatprep.mubr.f32.mxu1 %v31576_v33  ;;  %v14281_v13 = vsel %vm561_vm3, %v14277_v45, %v26850_v42  ;;  %v3787_v27 = vand.u32 4294901760, %v3786_v62  ;;  %v14325_v45 = vand.u32 4294901760, %v14296_v47  ;;  %v26969_v62 = vsub.f32 %v3628_v43, %v26930_v24 }
 0x228   : > { %14102 = vmatprep.mubr.f32.mxu0 %v31576_v33  ;;  %21743 = vmatpush1.bf16.msra.mxu1 %v26880_v17  ;;  %v14301_v20 = vmul.f32 %v14281_v13, %v31787_v3  ;;  %v14300_v13 = vmul.f32 %v14293_v6, %v31790_v5  ;;  %v3718_v43 = vand.u32 4294901760, %v26938_v35  ;;  %v26983_v26 = vand.u32 4294901760, %v14308_v28 }
 0x229   : > { %21745 = vmatprep.subr.bf16.mxu1 %v21744_v37  ;;  %22409 = vmatprep.subr.bf16.mxu0 %v26903_v36  ;;  %v14292_v37 = vsel %vm561_vm3, %v26848_v25, %v14275_v54  ;;  %v21492_v25 = vld [vmem:[%s31126_s3 + $0x248] sm:$0xff]  ;;  %v14321_v54 = vand.u32 4294901760, %v14294_v34  ;;  %v21748_v9 = vpack.c.bf16 %v3787_v27, %v3775_v60  ;;  %v31792_v6 = vand.u32 4294901760, %v26928_v41 }
 0x22a   : > { %3576 = vmatmul.mubr.f32.gmra.mrb[4].mxu1 %v26381_v50  ;;  %14104 = vmatmul.mubr.f32.gmra.mrb[4].mxu0 %v26520_v29  ;;  %v14299_v50 = vmul.f32 %v14280_v63, %v31787_v3  ;;  %v14298_v63 = vmul.f32 %v14292_v37, %v31790_v5  ;;  %v14311_v4 = vsel %vm656_vm0, %v21492_v25, 0  ;;  %v26986_v3 = vsub.f32 %v14296_v47, %v14325_v45  ;;  %v21493_v25 = vld [vmem:[%s31126_s3 + $0x250] sm:$0xff]  ;;  %v31793_v5 = vld [vmem:[#allocation17_spill] sm:$0xff] }
 0x22b   : > { %3581 = vmatprep.mubr.f32.mxu1 %v31576_v33  ;;  %14109 = vmatprep.mubr.f32.mxu0 %v31576_v33  ;;  %v26978_v42 = vsub.f32 %v14294_v34, %v14321_v54  ;;  %v14331_v14 = vand.u32 4294901760, %v14301_v20  ;;  %v31791_v34 = vand.u32 4294901760, %v26919_v22  ;;  %v26993_v37 = vpack.c.bf16 %v14325_v45, %v14321_v54 }
 0x22c   : > { %v14327_v1 = vand.u32 4294901760, %v14299_v50  ;;  %v14451_v47 = vsub.f32 %v26928_v41, %v31792_v6  ;;  %7427 = vrot.lane.b32.xlu0 %v31793_v5, %s24232_s15  ;;  %7429 = vrot.lane.b32.xlu1 %v31794_v23, %s24232_s15  ;;  %v14333_v27 = vand.u32 4294901760, %v14300_v13  ;;  %v21750_v45 = vpack.c.bf16 %v3793_v53, %v3781_v32  ;;  %v21494_v32 = vld [vmem:[%s31126_s3 + $0x258] sm:$0xff] }
 0x22d   : > { %v27008_v54 = vsub.f32 %v14301_v20, %v14331_v14  ;;  %v21752_v6 = vpack.c.bf16 %v26740_v59, %v26738_v7  ;;  %v27014_v35 = vsub.f32 %v14308_v28, %v26983_v26  ;;  %v27016_v5 = vand.u32 4294901760, %v14311_v4 }
 0x22e   : > { %3583 = vmatmul.mubr.f32.gmra.mrb[6].mxu1 %v26403_v38  ;;  %14111 = vmatmul.mubr.f32.gmra.mrb[6].mxu0 %v26548_v56  ;;  %v14439_v38 = vsub.f32 %v26919_v22, %v31791_v34  ;;  %v14329_v34 = vand.u32 4294901760, %v14298_v63  ;;  %v27006_v60 = vsub.f32 %v14299_v50, %v14327_v1  ;;  %v31359_v23 = vand.u32 4294901760, %v26978_v42 }
 0x22f   : > { %3702 = vmatprep.mubr.f32.mxu1 %v31576_v33  ;;  %14189 = vmatprep.mubr.f32.mxu0 %v31576_v33  ;;  %v31362_v39 = vand.u32 4294901760, %v26986_v3  ;;  %v27028_v28 = vpack.c.bf16 %v14331_v14, %v14327_v1  ;;  %v14452_v50 = vand.u32 4294901760, %v14451_v47  ;;  %v31796_v1 = vld [vmem:[#allocation16_spill] sm:$0xff]  ;;  %v3729_v14 = vand.u32 4294901760, %v26957_v0 }
 0x230   : > { %v14440_v20 = vand.u32 4294901760, %v14439_v38  ;;  %v27024_v53 = vsub.f32 %v14298_v63, %v14329_v34  ;;  %v31361_v63 = vand.u32 4294901760, %v27006_v60  ;;  %7443 = vrot.lane.b32.xlu0 %v31796_v1, %s24232_s15  ;;  %v27047_v47 = vsub.f32 %v14311_v4, %v27016_v5 }
 0x232   : > { %14191 = vmatmul.mubr.f32.vlgmr.msra.gmra.mrb[0].mxu0 %v26461_v49  ;;  %3708 = vmatmul.mubr.f32.vlgmr.msra.gmra.mrb[0].mxu1 %v3707_v51  ;;  %v14314_v49 = vsel %vm656_vm0, %v21493_v25, 0  ;;  %v27026_v51 = vsub.f32 %v14300_v13, %v14333_v27  ;;  %v27037_v25 = vpack.c.bf16 %v14333_v27, %v14329_v34  ;;  %v31360_v13 = vand.u32 4294901760, %v27008_v54 }
 0x233   : > { %21747 = vmatpush1.bf16.msra.mxu1 %v26908_v55  ;;  %3713 = vmatprep.mubr.f32.mxu1 %v31576_v33  ;;  %v31795_v55 = vand.u32 4294901760, %v26969_v62  ;;  %v14445_v34 = vsub.f32 %v26978_v42, %v31359_v23  ;;  %v22416_v4 = vpack.c.bf16 %v14452_v50, %v14440_v20  ;;  %v14457_v27 = vsub.f32 %v26986_v3, %v31362_v39  ;;  %v31799_v50 = vld [vmem:[#allocation21_spill] sm:$0xff] }
 0x234   : > { %14196 = vmatprep.mubr.f32.mxu0 %v31576_v33  ;;  %21749 = vmatprep.subr.bf16.mxu1 %v21748_v9  ;;  %v31364_v0 = vand.u32 4294901760, %v27026_v51  ;;  %v14475_v23 = vsub.f32 %v27008_v54, %v31360_v13 }
 0x235   : > { %22411 = vmatpush1.bf16.msra.mxu0 %v26993_v37  ;;  %v3739_v38 = vsub.f32 %v26969_v62, %v31795_v55  ;;  %v27049_v55 = vand.u32 4294901760, %v14314_v49  ;;  %v14446_v13 = vand.u32 4294901760, %v14445_v34  ;;  %7431 = vrot.lane.b32.xlu0 %v31799_v50, %s24232_s15 }
 0x236   : > { %14198 = vmatmul.mubr.f32.gmra.mrb[2].mxu0 %v26494_v15  ;;  %3719 = vmatmul.mubr.f32.gmra.mrb[2].mxu1 %v3718_v43  ;;  %v14317_v15 = vsel %vm656_vm0, %v21494_v32, 0  ;;  %v31363_v43 = vand.u32 4294901760, %v27024_v53  ;;  %v14463_v32 = vsub.f32 %v27006_v60, %v31361_v63  ;;  %v14476_v39 = vand.u32 4294901760, %v14475_v23 }
 0x237   : > { %3724 = vmatprep.mubr.f32.mxu1 %v31576_v33  ;;  %14203 = vmatprep.mubr.f32.mxu0 %v31576_v33  ;;  %v3740_v9 = vand.u32 4294901760, %v3739_v38  ;;  %v27076_v38 = vsub.f32 %v14314_v49, %v27049_v55  ;;  %v31798_v49 = vld [vmem:[#allocation18_spill] sm:$0xff]  ;;  %v21754_v23 = vpack.c.bf16 %v26769_v8, %v26761_v48 }
 0x238   : > { %21751 = vmatpush1.bf16.msra.mxu1 %v21750_v45  ;;  %22413 = vmatprep.subr.bf16.mxu0 %v27028_v28  ;;  %v31797_v45 = vand.u32 4294901760, %v27014_v35  ;;  %v14464_v63 = vand.u32 4294901760, %v14463_v32 }
 0x239   : > { %22415 = vmatpush1.bf16.msra.mxu0 %v27037_v25  ;;  %21753 = vmatprep.subr.bf16.mxu1 %v21752_v6  ;;  %v27078_v6 = vand.u32 4294901760, %v14317_v15 }
 0x23a   : > { %3730 = vmatmul.mubr.f32.gmra.mrb[4].mxu1 %v3729_v14  ;;  %14205 = vmatmul.mubr.f32.gmra.mrb[4].mxu0 %v26520_v29  ;;  %v14395_v20 = vsub.f32 %v27014_v35, %v31797_v45  ;;  %v14458_v14 = vand.u32 4294901760, %v14457_v27  ;;  %v14469_v29 = vsub.f32 %v27024_v53, %v31363_v43  ;;  %v14481_v45 = vsub.f32 %v27026_v51, %v31364_v0 }
 0x23b   : > { %3735 = vmatprep.mubr.f32.mxu1 %v31576_v33  ;;  %14210 = vmatprep.mubr.f32.mxu0 %v31576_v33  ;;  %v27098_v0 = vsub.f32 %v14317_v15, %v27078_v6  ;;  %v22420_v43 = vpack.c.bf16 %v14476_v39, %v14464_v63  ;;  %v31802_v15 = vld [vmem:[#allocation20_spill] sm:$0xff]  ;;  %v21758_v39 = vpack.c.bf16 %v26858_v16, %v26856_v44 }
 0x23c   : > { %22417 = vmatprep.subr.bf16.mxu0 %v22416_v4  ;;  %7445 = vrot.lane.b32.xlu1 %v31798_v49, %s24232_s15  ;;  %v14396_v34 = vand.u32 4294901760, %v14395_v20  ;;  %v31800_v4 = vand.u32 4294901760, %v27047_v47  ;;  %v14470_v32 = vand.u32 4294901760, %v14469_v29  ;;  %v31801_v20 = vld [vmem:[#allocation23_spill] sm:$0xff]  ;;  %v31803_v49 = vand.u32 4294901760, %v27076_v38 }
 0x23d   : > { %7447 = vrot.lane.b32.xlu0 %v31802_v15, %s24232_s15  ;;  %v22424_v29 = vpack.c.bf16 %v26928_v41, %v26919_v22 }
 0x23e   : > { %3741 = vmatmul.mubr.f32.gmra.mrb[6].mxu1 %v3740_v9  ;;  %14212 = vmatmul.mubr.f32.gmra.mrb[6].mxu0 %v26548_v56  ;;  %v14406_v27 = vsub.f32 %v27047_v47, %v31800_v4  ;;  %v22418_v9 = vpack.c.bf16 %v14458_v14, %v14446_v13  ;;  %v14482_v56 = vand.u32 4294901760, %v14481_v45  ;;  %v21756_v4 = vpack.c.bf16 %v26832_v31, %v26821_v58 }
 0x23f   : > { %3851 = vmatprep.mubr.f32.mxu1 %v31576_v33  ;;  %14391 = vmatprep.mubr.f32.mxu0 %v31576_v33  ;;  %v14417_v13 = vsub.f32 %v27076_v38, %v31803_v49  ;;  %v14427_v14 = vand.u32 4294901760, %v27098_v0 }
 0x240   : > { %7433 = vrot.lane.b32.xlu1 %v31801_v20, %s24232_s15  ;;  %v14407_v50 = vand.u32 4294901760, %v14406_v27  ;;  %v22422_v63 = vpack.c.bf16 %v14482_v56, %v14470_v32  ;;  %v22428_v27 = vpack.c.bf16 %v27008_v54, %v27006_v60  ;;  %v31806_v32 = vand.u32 4294901760, %v26740_v59  ;;  %v4331_v59 = vpop.permute.xlu1 %4330 }
 0x241   : > { %v14418_v45 = vand.u32 4294901760, %v14417_v13  ;;  %v14428_v49 = vsub.f32 %v27098_v0, %v14427_v14  ;;  %18017 = vrot.lane.b32.xlu0 %v31760_v52, %s24231_s13  ;;  %v31808_v13 = vld [vmem:[#allocation55_spill] sm:$0xff] }
 0x242   : > { %3853 = vmatmul.mubr.f32.vlgmr.msra.gmra.mrb[0].mxu1 %v26772_v12  ;;  %14397 = vmatmul.mubr.f32.vlgmr.msra.gmra.mrb[0].mxu0 %v14396_v34  ;;  %v22426_v34 = vpack.c.bf16 %v26986_v3, %v26978_v42 }
 0x243   : > { %21755 = vmatpush1.bf16.msra.mxu1 %v21754_v23  ;;  %3858 = vmatprep.mubr.f32.mxu1 %v31576_v33  ;;  %v22430_v23 = vpack.c.bf16 %v27026_v51, %v27024_v53 }
 0x244   : > { %14402 = vmatprep.mubr.f32.mxu0 %v31576_v33  ;;  %22419 = vmatpush1.bf16.msra.mxu0 %v22418_v9  ;;  %v31805_v9 = vand.u32 4294901760, %v26738_v7  ;;  %v4329_v7 = vpop.permute.xlu0 %4328 }
 0x245   : > { %21757 = vmatprep.subr.bf16.mxu1 %v21756_v4  ;;  %22421 = vmatprep.subr.bf16.mxu0 %v22420_v43  ;;  %v14429_v43 = vand.u32 4294901760, %v14428_v49  ;;  %v31807_v4 = vld [vmem:[#allocation58_spill] sm:$0xff]  ;;  %v31812_v49 = vand.u32 4294901760, %v26821_v58  ;;  %v31816_v58 = vand.u32 4294901760, %v26856_v44 }
 0x246   : > { %3860 = vmatmul.mubr.f32.gmra.mrb[2].mxu1 %v26827_v57  ;;  %14408 = vmatmul.mubr.f32.gmra.mrb[2].mxu0 %v14407_v50  ;;  %v31804_v50 = vld [vmem:[#allocation22_spill] sm:$0xff]  ;;  %v21768_v56 = vpack.c.bf16 %v31806_v32, %v31805_v9  ;;  %v31818_v9 = vand.u32 4294901760, %v26865_v40  ;;  %v31819_v32 = vand.u32 4294901760, %v26919_v22  ;;  %v31822_v22 = vand.u32 4294901760, %v26872_v11 }
 0x247   : > { %3865 = vmatprep.mubr.f32.mxu1 %v31576_v33  ;;  %14413 = vmatprep.mubr.f32.mxu0 %v31576_v33 }
 0x248   : > { %21759 = vmatpush1.bf16.msra.mxu1 %v21758_v39  ;;  %22423 = vmatpush1.bf16.msra.mxu0 %v22422_v63  ;;  %v31809_v39 = vand.u32 4294901760, %v26761_v48  ;;  %v31810_v63 = vand.u32 4294901760, %v26769_v8  ;;  %v4333_v48 = vpop.permute.xlu0 %4332  ;;  %v4335_v8 = vpop.permute.xlu1 %4334 }
 0x249   : > { %22425 = vmatprep.subr.bf16.mxu0 %v22424_v29  ;;  %21761 = vmatprep.subr.bf16.mxu1 %v26756_v61  ;;  %v4362_v44 = vsel %vm4344_vm2, %v4335_v8, %v4333_v48 }
 0x24a   : > { %3867 = vmatmul.mubr.f32.gmra.mrb[4].mxu1 %v26840_v10  ;;  %14419 = vmatmul.mubr.f32.gmra.mrb[4].mxu0 %v14418_v45  ;;  %v21770_v29 = vpack.c.bf16 %v31810_v63, %v31809_v39  ;;  %v31811_v45 = vld [vmem:[#allocation59_spill] sm:$0xff] }
 0x24b   : > { %3872 = vmatprep.mubr.f32.mxu1 %v31576_v33  ;;  %14424 = vmatprep.mubr.f32.mxu0 %v31576_v33 }
 0x24c   : > { %7449 = vrot.lane.b32.xlu1 %v31804_v50, %s24232_s15  ;;  %18021 = vrot.lane.b32.xlu0 %v31761_v46, %s24231_s13  ;;  %v4339_v63 = vpop.permute.xlu1 %4338 }
 0x24e   : > { %3874 = vmatmul.mubr.f32.gmra.mrb[6].mxu1 %v26930_v24  ;;  %14430 = vmatmul.mubr.f32.gmra.mrb[6].mxu0 %v14429_v43  ;;  %v31813_v43 = vand.u32 4294901760, %v26832_v31  ;;  %v31817_v31 = vand.u32 4294901760, %v26858_v16  ;;  %v4361_v16 = vsel %vm4344_vm2, %v4331_v59, %v4329_v7 }
 0x24f   : > { %3960 = vmatprep.mubr.f32.mxu1 %v31576_v33  ;;  %14540 = vmatprep.mubr.f32.mxu0 %v31576_v33 }
 0x250   : > { %18019 = vrot.lane.b32.xlu1 %v31733_v18, %s24231_s13  ;;  %18025 = vrot.lane.b32.xlu0 %v31807_v4, %s24231_s13 }
 0x252   : > { %3963 = vmatmul.mubr.f32.vlgmr.msra.gmra.mrb[0].mxu1 %v26807_v2  ;;  %14542 = vmatmul.mubr.f32.vlgmr.msra.gmra.mrb[0].mxu0 %v26983_v26 }
 0x253   : > { %22427 = vmatpush1.bf16.msra.mxu0 %v22426_v34  ;;  %21763 = vmatpush1.bf16.msra.mxu1 %v26846_v21  ;;  %v21772_v34 = vpack.c.bf16 %v31813_v43, %v31812_v49 }
 0x254   : > { %3968 = vmatprep.mubr.f32.mxu1 %v31576_v33  ;;  %14547 = vmatprep.mubr.f32.mxu0 %v31576_v33 }
 0x255   : > { %22429 = vmatprep.subr.bf16.mxu0 %v22428_v27  ;;  %21765 = vmatprep.subr.bf16.mxu1 %v26853_v19  ;;  %v31814_v27 = vld [vmem:[#allocation56_spill] sm:$0xff] }
 0x256   : > { %3971 = vmatmul.mubr.f32.gmra.mrb[2].mxu1 %v26865_v40  ;;  %14549 = vmatmul.mubr.f32.gmra.mrb[2].mxu0 %v27016_v5  ;;  %v4337_v40 = vpop.permute.xlu0 %4336 }
 0x257   : > { %22431 = vmatpush1.bf16.msra.mxu0 %v22430_v23  ;;  %3976 = vmatprep.mubr.f32.mxu1 %v31576_v33  ;;  %v31815_v23 = vand.u32 4294901760, %v26807_v2  ;;  %v21774_v2 = vpack.c.bf16 %v31817_v31, %v31816_v58  ;;  %v4346_v58 = vsel %vm4344_vm2, %v4333_v48, %v4335_v8  ;;  %v4343_v31 = vpop.permute.xlu1 %4342 }
 0x258   : > { %22433 = vmatprep.subr.bf16.mxu0 %v26903_v36  ;;  %14554 = vmatprep.mubr.f32.mxu0 %v31576_v33 }
 0x259   : > { %21767 = vmatpush1.bf16.msra.mxu1 %v26880_v17  ;;  %18023 = vrot.lane.b32.xlu1 %v25584_v30, %s24231_s13 }
 0x25a   : > { %3979 = vmatmul.mubr.f32.gmra.mrb[4].mxu1 %v26872_v11  ;;  %14556 = vmatmul.mubr.f32.gmra.mrb[4].mxu0 %v27049_v55  ;;  %v4345_v11 = vsel %vm4344_vm2, %v4329_v7, %v4331_v59  ;;  %v31829_v59 = vand.u32 4294901760, %v26986_v3  ;;  %v4347_v3 = vsel %vm4344_vm2, %v4337_v40, %v4339_v63 }
 0x25b   : > { %3984 = vmatprep.mubr.f32.mxu1 %v31576_v33  ;;  %14561 = vmatprep.mubr.f32.mxu0 %v31576_v33 }
 0x25c   : > { %21769 = vmatprep.subr.bf16.mxu1 %v21768_v56  ;;  %18029 = vrot.lane.b32.xlu0 %v31811_v45, %s24231_s13  ;;  %v31820_v56 = vand.u32 4294901760, %v26928_v41  ;;  %v31823_v41 = vld [vmem:[#allocation50_spill] sm:$0xff] }
 0x25d   : > { %18027 = vrot.lane.b32.xlu1 %v31808_v13, %s24231_s13  ;;  %v4374_v49 = vmul.f32 %v31823_v41, %v4361_v16  ;;  %v4376_v43 = vmul.f32 %v31823_v41, %v4362_v44  ;;  %v31830_v16 = vld [vmem:[#allocation21_spill] sm:$0xff]  ;;  %v31831_v44 = vand.u32 4294901760, %v27014_v35 }
 0x25e   : > { %3987 = vmatmul.mubr.f32.gmra.mrb[6].mxu1 %v26969_v62  ;;  %14563 = vmatmul.mubr.f32.gmra.mrb[6].mxu0 %v27078_v6  ;;  %v22440_v39 = vpack.c.bf16 %v31820_v56, %v31819_v32  ;;  %v31826_v56 = vld [vmem:[#allocation18_spill] sm:$0xff] }
 0x25f   : > { %4065 = vmatprep.mubr.f32.mxu1 %v31576_v33  ;;  %14649 = vmatprep.mubr.f32.mxu0 %v31576_v33  ;;  %v4402_v32 = vand.u32 4294901760, %v4376_v43 }
 0x261   : > { %18031 = vrot.lane.b32.xlu1 %v31814_v27, %s24231_s13 }
 0x262   : > { %4069 = vmatmul.mubr.f32.vlgmr.msra.gmra.mrb[0].mxu1 %v31815_v23  ;;  %14652 = vmatmul.mubr.f32.vlgmr.msra.gmra.mrb[0].mxu0 %v27014_v35  ;;  %v31825_v23 = vand.u32 4294901760, %v26969_v62  ;;  %v31828_v62 = vand.u32 4294901760, %v26978_v42 }
 0x263   : > { %22435 = vmatpush1.bf16.msra.mxu0 %v26993_v37  ;;  %21771 = vmatpush1.bf16.msra.mxu1 %v21770_v29  ;;  %v31821_v29 = vld [vmem:[#allocation17_spill] sm:$0xff] }
 0x264   : > { %22437 = vmatprep.subr.bf16.mxu0 %v27028_v28  ;;  %4074 = vmatprep.mubr.f32.mxu1 %v31576_v33  ;;  %v22442_v48 = vpack.c.bf16 %v31829_v59, %v31828_v62  ;;  %v15020_v62 = vpop.permute.xlu1 %15019 }
 0x265   : > { %14657 = vmatprep.mubr.f32.mxu0 %v31576_v33  ;;  %21773 = vmatprep.subr.bf16.mxu1 %v21772_v34  ;;  %v31824_v34 = vld [vmem:[#allocation19_spill] sm:$0xff] }
 0x266   : > { %4078 = vmatmul.mubr.f32.gmra.mrb[2].mxu1 %v31818_v9  ;;  %14660 = vmatmul.mubr.f32.gmra.mrb[2].mxu0 %v27047_v47  ;;  %v4398_v9 = vand.u32 4294901760, %v4374_v49 }
 0x267   : > { %22439 = vmatpush1.bf16.msra.mxu0 %v27037_v25  ;;  %4083 = vmatprep.mubr.f32.mxu1 %v31576_v33 }
 0x268   : > { %22441 = vmatprep.subr.bf16.mxu0 %v22440_v39  ;;  %14665 = vmatprep.mubr.f32.mxu0 %v31576_v33  ;;  %v31827_v39 = vld [vmem:[#allocation47_spill] sm:$0xff]  ;;  %v27263_v59 = vsub.f32 %v4374_v49, %v4398_v9 }
 0x269   : > { %21775 = vmatpush1.bf16.msra.mxu1 %v21774_v2  ;;  %8190 = vrot.lane.b32.xlu0 %v31821_v29, %s24230_s26  ;;  %v4363_v2 = vsel %vm4344_vm2, %v4339_v63, %v4337_v40  ;;  %v27238_v7 = vmul.f32 %v31827_v39, %v4345_v11  ;;  %v27245_v8 = vmul.f32 %v31827_v39, %v4346_v58  ;;  %v31833_v11 = vand.u32 4294901760, %v27008_v54 }
 0x26a   : > { %4087 = vmatmul.mubr.f32.gmra.mrb[4].mxu1 %v31822_v22  ;;  %14668 = vmatmul.mubr.f32.gmra.mrb[4].mxu0 %v27076_v38  ;;  %v31832_v22 = vand.u32 4294901760, %v27006_v60  ;;  %v27259_v42 = vmul.f32 %v31823_v41, %v4363_v2  ;;  %v27265_v60 = vsub.f32 %v4376_v43, %v4402_v32  ;;  %v31834_v40 = vand.u32 4294901760, %v27024_v53 }
 0x26b   : > { %4092 = vmatprep.mubr.f32.mxu1 %v31576_v33  ;;  %14673 = vmatprep.mubr.f32.mxu0 %v31576_v33  ;;  %v4400_v54 = vand.u32 4294901760, %v27238_v7  ;;  %v31835_v63 = vand.u32 4294901760, %v27026_v51  ;;  %v27279_v49 = vmul.f32 %v31827_v39, %v4347_v3 }
 0x26c   : > { %21777 = vmatprep.subr.bf16.mxu1 %v26756_v61  ;;  %8192 = vrot.lane.b32.xlu1 %v31824_v34, %s24230_s26  ;;  %v4341_v61 = vpop.permute.xlu0 %4340  ;;  %v4406_v51 = vand.u32 4294901760, %v27259_v42 }
 0x26d   : > { %8202 = vrot.lane.b32.xlu0 %v31796_v1, %s24230_s26  ;;  %v4364_v35 = vsel %vm4344_vm2, %v4343_v31, %v4341_v61  ;;  %v22446_v2 = vpack.c.bf16 %v31835_v63, %v31834_v40  ;;  %v4348_v43 = vsel %vm4344_vm2, %v4341_v61, %v4343_v31  ;;  %v27295_v61 = vsub.f32 %v27238_v7, %v4400_v54  ;;  %v21436_v63 = vld [vmem:[%s31126_s3 + $0xa8] sm:$0xff] }
 0x26e   : > { %14676 = vmatmul.mubr.f32.gmra.mrb[6].mxu0 %v27098_v0  ;;  %4096 = vmatmul.mubr.f32.gmra.mrb[6].mxu1 %v31825_v23  ;;  %v22444_v23 = vpack.c.bf16 %v31833_v11, %v31832_v22  ;;  %v4380_v53 = vmul.f32 %v31823_v41, %v4364_v35  ;;  %v21435_v22 = vld [vmem:[%s31126_s3 + $0xa0] sm:$0xff]  ;;  %v4379_v11 = vmul.f32 %v31827_v39, %v4348_v43  ;;  %v4390_v0 = vsel %vm656_vm0, %v21436_v63, 0 }
 0x26f   : > { %4190 = vmatprep.mubr.f32.mxu1 %v31576_v33  ;;  %14754 = vmatprep.mubr.f32.mxu0 %v31576_v33  ;;  %v4387_v3 = vsel %vm656_vm0, %v21435_v22, 0  ;;  %v31844_v63 = vand.u32 4294901760, %v27295_v61 }
 0x270   : > { %8204 = vrot.lane.b32.xlu1 %v31826_v56, %s24230_s26  ;;  %v15018_v58 = vpop.permute.xlu0 %15017 }
 0x271   : > { %8194 = vrot.lane.b32.xlu0 %v31830_v16, %s24230_s26 }
 0x272   : > { %14758 = vmatmul.mubr.f32.vlgmr.msra.gmra.mrb[0].mxu0 %v31831_v44  ;;  %4192 = vmatmul.mubr.f32.vlgmr.msra.gmra.mrb[0].mxu1 %v26772_v12  ;;  %v31365_v44 = vand.u32 4294901760, %v27265_v60 }
 0x273   : > { %22443 = vmatpush1.bf16.msra.mxu0 %v22442_v48  ;;  %21779 = vmatpush1.bf16.msra.mxu1 %v26846_v21  ;;  %v4404_v21 = vand.u32 4294901760, %v27245_v8  ;;  %v31836_v48 = vand.u32 4294901760, %v27047_v47  ;;  %v31366_v47 = vand.u32 4294901760, %v27263_v59 }
 0x274   : > { %22445 = vmatprep.subr.bf16.mxu0 %v22444_v23  ;;  %4197 = vmatprep.mubr.f32.mxu1 %v31576_v33  ;;  %v4530_v40 = vsub.f32 %v27265_v60, %v31365_v44 }
 0x275   : > { %14763 = vmatprep.mubr.f32.mxu0 %v31576_v33  ;;  %21781 = vmatprep.subr.bf16.mxu1 %v26853_v19  ;;  %v27286_v19 = vpack.c.bf16 %v4402_v32, %v4398_v9  ;;  %v27298_v31 = vsub.f32 %v27245_v8, %v4404_v21  ;;  %v15032_v9 = vpop.permute.xlu1 %15031  ;;  %v31837_v32 = vand.u32 4294901760, %v27076_v38  ;;  %v4408_v8 = vand.u32 4294901760, %v27279_v49 }
 0x276   : > { %14767 = vmatmul.mubr.f32.gmra.mrb[2].mxu0 %v31836_v48  ;;  %4199 = vmatmul.mubr.f32.gmra.mrb[2].mxu1 %v26827_v57  ;;  %v15038_v23 = vsel %vm618_vm1, %v15032_v9, %v15020_v62  ;;  %v27315_v38 = vsub.f32 %v27259_v42, %v4406_v51  ;;  %v4518_v35 = vsub.f32 %v27263_v59, %v31366_v47  ;;  %v31838_v48 = vld [vmem:[#allocation45_spill] sm:$0xff]  ;;  %v27343_v42 = vand.u32 4294901760, %v4387_v3 }
 0x277   : > { %22447 = vmatpush1.bf16.msra.mxu0 %v22446_v2  ;;  %4204 = vmatprep.mubr.f32.mxu1 %v31576_v33  ;;  %v27334_v22 = vmul.f32 %v15038_v23, %v31838_v48  ;;  %v15050_v47 = vsel %vm618_vm1, %v15020_v62, %v15032_v9  ;;  %v27350_v23 = vpack.c.bf16 %v4404_v21, %v4400_v54  ;;  %v4531_v62 = vand.u32 4294901760, %v4530_v40  ;;  %v21437_v9 = vld [vmem:[%s31126_s3 + $0xb0] sm:$0xff] }
 0x278   : > { %22449 = vmatprep.subr.bf16.mxu0 %v26903_v36  ;;  %14772 = vmatprep.mubr.f32.mxu0 %v31576_v33  ;;  %v15030_v36 = vpop.permute.xlu0 %15029  ;;  %v31841_v54 = vld [vmem:[#allocation44_spill] sm:$0xff]  ;;  %v27382_v40 = vsub.f32 %v4387_v3, %v27343_v42  ;;  %v21438_v3 = vld [vmem:[%s31126_s3 + $0xb8] sm:$0xff] }
 0x279   : > { %21783 = vmatpush1.bf16.msra.mxu1 %v26880_v17  ;;  %8196 = vrot.lane.b32.xlu1 %v31801_v20, %s24230_s26  ;;  %v15037_v7 = vsel %vm618_vm1, %v15030_v36, %v15018_v58  ;;  %v4410_v17 = vand.u32 4294901760, %v4380_v53  ;;  %v15049_v44 = vsel %vm618_vm1, %v15018_v58, %v15030_v36  ;;  %31839 = vst [vmem:[#allocation3_spill] sm:$0xff] %v27350_v23  ;;  %v4519_v58 = vand.u32 4294901760, %v4518_v35  ;;  %v27359_v36 = vpop.permute.xlu1 %15023 }
 0x27a   : > { %14776 = vmatmul.mubr.f32.gmra.mrb[4].mxu0 %v31837_v32  ;;  %4206 = vmatmul.mubr.f32.gmra.mrb[4].mxu1 %v26840_v10  ;;  %v27331_v43 = vmul.f32 %v15037_v7, %v31838_v48  ;;  %v4412_v32 = vand.u32 4294901760, %v4379_v11  ;;  %v27346_v7 = vsub.f32 %v27279_v49, %v4408_v8  ;;  %v27368_v21 = vmul.f32 %v15049_v44, %v31841_v54 }
 0x27b   : > { %4211 = vmatprep.mubr.f32.mxu1 %v31576_v33  ;;  %14781 = vmatprep.mubr.f32.mxu0 %v31576_v33  ;;  %v27352_v2 = vsub.f32 %v4380_v53, %v4410_v17  ;;  %v27371_v53 = vmul.f32 %v15050_v47, %v31841_v54  ;;  %31842 = vst [vmem:[#allocation64_spill] sm:$0xff] %v27382_v40  ;;  %v27384_v44 = vand.u32 4294901760, %v4390_v0 }
 0x27c   : > { %21785 = vmatprep.subr.bf16.mxu1 %v27286_v19  ;;  %8206 = vrot.lane.b32.xlu0 %v31802_v15, %s24230_s26  ;;  %v27354_v41 = vpop.permute.xlu0 %15021  ;;  %v27377_v35 = vsub.f32 %v4379_v11, %v4412_v32  ;;  %v27388_v47 = vpack.c.bf16 %v4412_v32, %v4408_v8  ;;  %v4524_v11 = vsub.f32 %v27295_v61, %v31844_v63  ;;  %v31846_v32 = vand.u32 4294901760, %v27315_v38 }
 0x27d   : > { %8208 = vrot.lane.b32.xlu1 %v31804_v50, %s24230_s26  ;;  %v21792_v39 = vpack.c.bf16 %v4531_v62, %v4519_v58 }
 0x27e   : > { %4213 = vmatmul.mubr.f32.gmra.mrb[6].mxu1 %v26930_v24  ;;  %14785 = vmatmul.mubr.f32.gmra.mrb[6].mxu0 %v14427_v14  ;;  %v27357_v14 = vpack.c.bf16 %v4410_v17, %v4406_v51  ;;  %v15078_v51 = vand.u32 4294901760, %v27331_v43  ;;  %v15082_v17 = vand.u32 4294901760, %v27334_v22  ;;  %31843 = vst [vmem:[#allocation2_spill] sm:$0xff] %v27388_v47  ;;  %v27406_v63 = vsub.f32 %v27315_v38, %v31846_v32  ;;  %v15036_v32 = vpop.permute.xlu1 %15035 }
 0x27f   : > { %4291 = vmatprep.mubr.f32.mxu1 %v31576_v33  ;;  %14879 = vmatprep.mubr.f32.mxu0 %v31576_v33 }
 0x280   : > { %31840 = vst [vmem:[#allocation8_spill] sm:$0xff] %v27357_v14  ;;  %18776 = vrot.lane.b32.xlu0 %v31760_v52, %s31701_s23  ;;  %v15034_v58 = vpop.permute.xlu0 %15033  ;;  %v27413_v62 = vpack.c.bf16 %v15082_v17, %v15078_v51 }
 0x281   : > { %18778 = vrot.lane.b32.xlu1 %v31733_v18, %s31701_s23  ;;  %v31849_v18 = vand.u32 4294901760, %v27352_v2  ;;  %v15051_v50 = vsel %vm618_vm1, %v27354_v41, %v15034_v58 }
 0x282   : > { %4293 = vmatmul.mubr.f32.vlgmr.msra.gmra.mrb[0].mxu1 %v26772_v12  ;;  %14881 = vmatmul.mubr.f32.vlgmr.msra.gmra.mrb[0].mxu0 %v26983_v26  ;;  %v4393_v12 = vsel %vm656_vm0, %v21437_v9, 0  ;;  %31847 = vst [vmem:[#allocation13_spill] sm:$0xff] %v27413_v62  ;;  %v27419_v9 = vsub.f32 %v4390_v0, %v27384_v44 }
 0x283   : > { %21787 = vmatpush1.bf16.msra.mxu1 %v27350_v23  ;;  %22451 = vmatpush1.bf16.msra.mxu0 %v26993_v37  ;;  %v31845_v37 = vand.u32 4294901760, %v27298_v31  ;;  %v4396_v23 = vsel %vm656_vm0, %v21438_v3, 0  ;;  %v4554_v0 = vsub.f32 %v27352_v2, %v31849_v18  ;;  %v31850_v3 = vand.u32 4294901760, %v27371_v53 }
 0x284   : > { %22453 = vmatprep.subr.bf16.mxu0 %v27028_v28  ;;  %4298 = vmatprep.mubr.f32.mxu1 %v31576_v33  ;;  %v15040_v18 = vsel %vm618_vm1, %v15036_v32, %v27359_v36 }
 0x285   : > { %v4536_v8 = vsub.f32 %v27298_v31, %v31845_v37  ;;  %21789 = vmatprep.subr.bf16.mxu1 %v27357_v14  ;;  %14886 = vmatprep.mubr.f32.mxu0 %v31576_v33  ;;  %v27421_v14 = vand.u32 4294901760, %v4393_v12  ;;  %v4525_v37 = vand.u32 4294901760, %v4524_v11  ;;  %v27439_v28 = vsub.f32 %v27371_v53, %v31850_v3  ;;  %v21495_v11 = vld [vmem:[%s31126_s3 + $0x260] sm:$0xff] }
 0x286   : > { %4300 = vmatmul.mubr.f32.gmra.mrb[2].mxu1 %v26827_v57  ;;  %14888 = vmatmul.mubr.f32.gmra.mrb[2].mxu0 %v27016_v5  ;;  %v31848_v57 = vand.u32 4294901760, %v27368_v21  ;;  %v31851_v3 = vand.u32 4294901760, %v27382_v40 }
 0x287   : > { %21791 = vmatpush1.bf16.msra.mxu1 %v27388_v47  ;;  %22455 = vmatpush1.bf16.msra.mxu0 %v27037_v25  ;;  %v4537_v47 = vand.u32 4294901760, %v4536_v8  ;;  %v4543_v25 = vand.u32 4294901760, %v27406_v63  ;;  %v27455_v8 = vsub.f32 %v27334_v22, %v15082_v17  ;;  %v27457_v63 = vand.u32 4294901760, %v4396_v23 }
 0x288   : > { %v27430_v49 = vsub.f32 %v27368_v21, %v31848_v57  ;;  %21793 = vmatprep.subr.bf16.mxu1 %v21792_v39  ;;  %4305 = vmatprep.mubr.f32.mxu1 %v31576_v33  ;;  %v15039_v57 = vsel %vm618_vm1, %v15034_v58, %v27354_v41  ;;  %v27452_v39 = vsub.f32 %v27331_v43, %v15078_v51  ;;  %v4555_v22 = vand.u32 4294901760, %v4554_v0  ;;  %v21496_v0 = vld [vmem:[%s31126_s3 + $0x268] sm:$0xff] }
 0x289   : > { %14893 = vmatprep.mubr.f32.mxu0 %v31576_v33  ;;  %22457 = vmatprep.subr.bf16.mxu0 %v27413_v62  ;;  %v4474_v52 = vsub.f32 %v27382_v40, %v31851_v3  ;;  %v27468_v43 = vsub.f32 %v4393_v12, %v27421_v14  ;;  %v15058_v51 = vmul.f32 %v15039_v57, %v31838_v48  ;;  %v15067_v17 = vsel %vm656_vm0, %v21495_v11, 0 }
 0x28a   : > { %14895 = vmatmul.mubr.f32.gmra.mrb[4].mxu0 %v27049_v55  ;;  %4307 = vmatmul.mubr.f32.gmra.mrb[4].mxu1 %v26840_v10  ;;  %v15052_v10 = vsel %vm618_vm1, %v27359_v36, %v15036_v32  ;;  %v15060_v41 = vmul.f32 %v15040_v18, %v31838_v48  ;;  %v31852_v58 = vand.u32 4294901760, %v27346_v7  ;;  %v31853_v62 = vand.u32 4294901760, %v27377_v35 }
 0x28b   : > { %4312 = vmatprep.mubr.f32.mxu1 %v31576_v33  ;;  %14900 = vmatprep.mubr.f32.mxu0 %v31576_v33  ;;  %v21794_v36 = vpack.c.bf16 %v4537_v47, %v4525_v37  ;;  %v27492_v32 = vsub.f32 %v4396_v23, %v27457_v63  ;;  %v31854_v18 = vand.u32 4294901760, %v27419_v9  ;;  %v27502_v48 = vand.u32 4294901760, %v15067_v17 }
 0x28c   : > { %v4548_v12 = vsub.f32 %v27346_v7, %v31852_v58  ;;  %v4560_v40 = vsub.f32 %v27377_v35, %v31853_v62  ;;  %18780 = vrot.lane.b32.xlu0 %v31761_v46, %s31701_s23  ;;  %18782 = vrot.lane.b32.xlu1 %v25584_v30, %s31701_s23  ;;  %v4475_v62 = vand.u32 4294901760, %v4474_v52  ;;  %v21796_v23 = vpack.c.bf16 %v4555_v22, %v4543_v25 }
 0x28d   : > { %v4485_v58 = vsub.f32 %v27419_v9, %v31854_v18  ;;  %v15057_v47 = vmul.f32 %v15051_v50, %v31841_v54  ;;  %v15059_v37 = vmul.f32 %v15052_v10, %v31841_v54  ;;  %v15086_v57 = vand.u32 4294901760, %v15058_v51  ;;  %v21497_v18 = vld [vmem:[%s31126_s3 + $0x270] sm:$0xff] }
 0x28e   : > { %14902 = vmatmul.mubr.f32.gmra.mrb[6].mxu0 %v27078_v6  ;;  %4314 = vmatmul.mubr.f32.gmra.mrb[6].mxu1 %v26930_v24  ;;  %v15070_v24 = vsel %vm656_vm0, %v21496_v0, 0  ;;  %v4549_v52 = vand.u32 4294901760, %v4548_v12  ;;  %v4561_v11 = vand.u32 4294901760, %v4560_v40  ;;  %v15090_v30 = vand.u32 4294901760, %v15060_v41 }
 0x28f   : > { %4470 = vmatprep.mubr.f32.mxu1 %v31576_v33  ;;  %14980 = vmatprep.mubr.f32.mxu0 %v31576_v33  ;;  %v31855_v50 = vand.u32 4294901760, %v27368_v21  ;;  %v31856_v25 = vand.u32 4294901760, %v27371_v53  ;;  %v31858_v10 = vand.u32 4294901760, %v27452_v39  ;;  %v31859_v0 = vand.u32 4294901760, %v27455_v8 }
 0x290   : > { %18784 = vrot.lane.b32.xlu0 %v31807_v4, %s31701_s23  ;;  %18786 = vrot.lane.b32.xlu1 %v31808_v13, %s31701_s23  ;;  %v4486_v54 = vand.u32 4294901760, %v4485_v58  ;;  %v31860_v21 = vand.u32 4294901760, %v27468_v43  ;;  %v15092_v58 = vand.u32 4294901760, %v15059_v37  ;;  %v31861_v40 = vand.u32 4294901760, %v27492_v32 }
 0x291   : > { %v27520_v22 = vpack.c.bf16 %v31856_v25, %v31855_v50  ;;  %v15198_v12 = vsub.f32 %v27452_v39, %v31858_v10  ;;  %v15210_v3 = vsub.f32 %v27455_v8, %v31859_v0  ;;  %v27534_v50 = vsub.f32 %v15067_v17, %v27502_v48 }
 0x292   : > { %14982 = vmatmul.mubr.f32.vlgmr.msra.gmra.mrb[0].mxu0 %v26983_v26  ;;  %4476 = vmatmul.mubr.f32.vlgmr.msra.gmra.mrb[0].mxu1 %v4475_v62  ;;  %v4496_v53 = vsub.f32 %v27468_v43, %v31860_v21  ;;  %v27536_v25 = vand.u32 4294901760, %v15070_v24  ;;  %v15088_v10 = vand.u32 4294901760, %v15057_v47  ;;  %v21800_v26 = vpack.c.bf16 %v27265_v60, %v27263_v59 }
 0x293   : > { %31857 = vst [vmem:[#allocation7_spill] sm:$0xff] %v27520_v22  ;;  %21795 = vmatpush1.bf16.msra.mxu1 %v21794_v36  ;;  %4481 = vmatprep.mubr.f32.mxu1 %v31576_v33  ;;  %v15073_v62 = vsel %vm656_vm0, %v21497_v18, 0  ;;  %v21798_v0 = vpack.c.bf16 %v4561_v11, %v4549_v52  ;;  %v27544_v17 = vpack.c.bf16 %v15090_v30, %v15086_v57  ;;  %v21498_v36 = vld [vmem:[%s31126_s3 + $0x278] sm:$0xff]  ;;  %v15211_v4 = vand.u32 4294901760, %v15210_v3 }
 0x294   : > { %21797 = vmatprep.subr.bf16.mxu1 %v21796_v23  ;;  %14987 = vmatprep.mubr.f32.mxu0 %v31576_v33  ;;  %v27546_v21 = vsub.f32 %v15058_v51, %v15086_v57  ;;  %v4507_v13 = vsub.f32 %v27492_v32, %v31861_v40  ;;  %v27555_v18 = vsub.f32 %v15060_v41, %v15090_v30  ;;  %v15199_v23 = vand.u32 4294901760, %v15198_v12 }
 0x295   : > { %22459 = vmatpush1.bf16.msra.mxu0 %v27520_v22  ;;  %18788 = vrot.lane.b32.xlu0 %v31811_v45, %s31701_s23  ;;  %v4497_v51 = vand.u32 4294901760, %v4496_v53  ;;  %v31397_v57 = vand.u32 4294901760, %v27534_v50  ;;  %v27562_v11 = vsub.f32 %v15070_v24, %v27536_v25  ;;  %v27564_v52 = vand.u32 4294901760, %v15073_v62 }
 0x296   : > { %14989 = vmatmul.mubr.f32.gmra.mrb[2].mxu0 %v27016_v5  ;;  %4487 = vmatmul.mubr.f32.gmra.mrb[2].mxu1 %v4486_v54  ;;  %v27566_v22 = vsub.f32 %v15057_v47, %v15088_v10  ;;  %v27568_v30 = vsub.f32 %v15059_v37, %v15092_v58  ;;  %v15076_v3 = vsel %vm656_vm0, %v21498_v36, 0  ;;  %v27573_v5 = vpack.c.bf16 %v15092_v58, %v15088_v10 }
 0x297   : > { %21799 = vmatpush1.bf16.msra.mxu1 %v21798_v0  ;;  %4492 = vmatprep.mubr.f32.mxu1 %v31576_v33  ;;  %v31862_v54 = vand.u32 4294901760, %v27430_v49  ;;  %v31863_v24 = vand.u32 4294901760, %v27439_v28  ;;  %v4508_v37 = vand.u32 4294901760, %v4507_v13  ;;  %v22464_v40 = vpack.c.bf16 %v15211_v4, %v15199_v23 }
 0x298   : > { %21801 = vmatprep.subr.bf16.mxu1 %v21800_v26  ;;  %14994 = vmatprep.mubr.f32.mxu0 %v31576_v33  ;;  %v31396_v12 = vand.u32 4294901760, %v27546_v21  ;;  %v31393_v53 = vand.u32 4294901760, %v27555_v18  ;;  %v15154_v10 = vsub.f32 %v27534_v50, %v31397_v57  ;;  %v31390_v26 = vand.u32 4294901760, %v27562_v11 }
 0x299   : > { %v15204_v41 = vsub.f32 %v27430_v49, %v31862_v54  ;;  %v15216_v47 = vsub.f32 %v27439_v28, %v31863_v24  ;;  %22461 = vmatprep.subr.bf16.mxu0 %v27544_v17  ;;  %18790 = vrot.lane.b32.xlu1 %v31814_v27, %s31701_s23  ;;  %v27592_v13 = vsub.f32 %v15073_v62, %v27564_v52  ;;  %v27594_v4 = vand.u32 4294901760, %v15076_v3 }
 0x29a   : > { %4498 = vmatmul.mubr.f32.gmra.mrb[4].mxu1 %v4497_v51  ;;  %14996 = vmatmul.mubr.f32.gmra.mrb[4].mxu0 %v27049_v55  ;;  %v31391_v58 = vand.u32 4294901760, %v27566_v22  ;;  %v31392_v0 = vand.u32 4294901760, %v27568_v30  ;;  %v15222_v62 = vsub.f32 %v27546_v21, %v31396_v12  ;;  %v15234_v23 = vsub.f32 %v27555_v18, %v31393_v53  ;;  %v31882_v57 = vld [vmem:[#allocation7_spill] sm:$0xff] }
 0x29b   : > { %4503 = vmatprep.mubr.f32.mxu1 %v31576_v33  ;;  %15001 = vmatprep.mubr.f32.mxu0 %v31576_v33  ;;  %v15205_v55 = vand.u32 4294901760, %v15204_v41  ;;  %v15217_v36 = vand.u32 4294901760, %v15216_v47  ;;  %v15155_v51 = vand.u32 4294901760, %v15154_v10  ;;  %v15165_v54 = vsub.f32 %v27562_v11, %v31390_v26 }
 0x29c   : > { %22463 = vmatpush1.bf16.msra.mxu0 %v27573_v5  ;;  %8949 = vrot.lane.b32.xlu0 %v31821_v29, %s31732_s14  ;;  %v31395_v41 = vand.u32 4294901760, %v27592_v13  ;;  %v27617_v24 = vsub.f32 %v15076_v3, %v27594_v4  ;;  %v15228_v47 = vsub.f32 %v27566_v22, %v31391_v58  ;;  %v15235_v10 = vand.u32 4294901760, %v15234_v23 }
 0x29d   : > { %22465 = vmatprep.subr.bf16.mxu0 %v22464_v40  ;;  %8951 = vrot.lane.b32.xlu1 %v31824_v34, %s31732_s14  ;;  %v22466_v3 = vpack.c.bf16 %v15217_v36, %v15205_v55  ;;  %v15223_v40 = vand.u32 4294901760, %v15222_v62  ;;  %v21804_v26 = vpack.c.bf16 %v27352_v2, %v27315_v38  ;;  %v15166_v58 = vand.u32 4294901760, %v15165_v54 }
 0x29e   : > { %4509 = vmatmul.mubr.f32.gmra.mrb[6].mxu1 %v4508_v37  ;;  %15003 = vmatmul.mubr.f32.gmra.mrb[6].mxu0 %v27078_v6  ;;  %v15240_v6 = vsub.f32 %v27568_v30, %v31392_v0  ;;  %v21802_v37 = vpack.c.bf16 %v27298_v31, %v27295_v61  ;;  %v15176_v0 = vsub.f32 %v27592_v13, %v31395_v41  ;;  %v31394_v53 = vand.u32 4294901760, %v27617_v24 }
 0x29f   : > { %4619 = vmatprep.mubr.f32.mxu1 %v31576_v33  ;;  %15150 = vmatprep.mubr.f32.mxu0 %v31576_v33  ;;  %v15229_v55 = vand.u32 4294901760, %v15228_v47  ;;  %v21806_v62 = vpack.c.bf16 %v27377_v35, %v27346_v7  ;;  %v22468_v23 = vpack.c.bf16 %v15235_v10, %v15223_v40  ;;  %v22472_v47 = vpack.c.bf16 %v27455_v8, %v27452_v39  ;;  %v31866_v40 = vld [vmem:[#allocation48_spill] sm:$0xff] }
 0x2a0   : > { %8961 = vrot.lane.b32.xlu0 %v31796_v1, %s31732_s14  ;;  %v15241_v36 = vand.u32 4294901760, %v15240_v6  ;;  %v22474_v6 = vpack.c.bf16 %v27439_v28, %v27430_v49  ;;  %v31867_v10 = vld [vmem:[#allocation64_spill] sm:$0xff]  ;;  %v31881_v41 = vand.u32 4294901760, %v27352_v2  ;;  %v31885_v2 = vand.u32 4294901760, %v27419_v9 }
 0x2a1   : > { %8963 = vrot.lane.b32.xlu1 %v31826_v56, %s31732_s14 }
 0x2a2   : > { %4621 = vmatmul.mubr.f32.vlgmr.msra.gmra.mrb[0].mxu1 %v27343_v42  ;;  %15156 = vmatmul.mubr.f32.vlgmr.msra.gmra.mrb[0].mxu0 %v15155_v51  ;;  %v15177_v51 = vand.u32 4294901760, %v15176_v0  ;;  %v22470_v54 = vpack.c.bf16 %v15241_v36, %v15229_v55  ;;  %v31864_v0 = vld [vmem:[#allocation22_spill] sm:$0xff]  ;;  %v31868_v55 = vld [vmem:[#allocation3_spill] sm:$0xff]  ;;  %v22478_v36 = vpack.c.bf16 %v27568_v30, %v27566_v22 }
 0x2a3   : > { %21803 = vmatpush1.bf16.msra.mxu1 %v21802_v37  ;;  %4626 = vmatprep.mubr.f32.mxu1 %v31576_v33  ;;  %v31865_v37 = vld [vmem:[#allocation53_spill] sm:$0xff] }
 0x2a4   : > { %21805 = vmatprep.subr.bf16.mxu1 %v21804_v26  ;;  %15161 = vmatprep.mubr.f32.mxu0 %v31576_v33  ;;  %v15187_v26 = vsub.f32 %v27617_v24, %v31394_v53  ;;  %v31880_v53 = vand.u32 4294901760, %v27315_v38 }
 0x2a5   : > { %22467 = vmatpush1.bf16.msra.mxu0 %v22466_v3  ;;  %8953 = vrot.lane.b32.xlu0 %v31830_v16, %s31732_s14  ;;  %v22476_v3 = vpack.c.bf16 %v27555_v18, %v27546_v21 }
 0x2a6   : > { %4628 = vmatmul.mubr.f32.gmra.mrb[2].mxu1 %v27384_v44  ;;  %15167 = vmatmul.mubr.f32.gmra.mrb[2].mxu0 %v15166_v58  ;;  %v15188_v58 = vand.u32 4294901760, %v15187_v26  ;;  %v21820_v12 = vpack.c.bf16 %v31881_v41, %v31880_v53  ;;  %v31886_v53 = vand.u32 4294901760, %v27452_v39  ;;  %v31888_v39 = vand.u32 4294901760, %v27468_v43 }
 0x2a7   : > { %21807 = vmatpush1.bf16.msra.mxu1 %v21806_v62  ;;  %4633 = vmatprep.mubr.f32.mxu1 %v31576_v33  ;;  %v31869_v62 = vld [vmem:[#allocation8_spill] sm:$0xff] }
 0x2a8   : > { %21809 = vmatprep.subr.bf16.mxu1 %v27286_v19  ;;  %15172 = vmatprep.mubr.f32.mxu0 %v31576_v33 }
 0x2a9   : > { %22469 = vmatprep.subr.bf16.mxu0 %v22468_v23  ;;  %8955 = vrot.lane.b32.xlu1 %v31801_v20, %s31732_s14  ;;  %v31870_v23 = vand.u32 4294901760, %v27263_v59  ;;  %v31874_v59 = vld [vmem:[#allocation5_spill] sm:$0xff] }
 0x2aa   : > { %4635 = vmatmul.mubr.f32.gmra.mrb[4].mxu1 %v27421_v14  ;;  %15178 = vmatmul.mubr.f32.gmra.mrb[4].mxu0 %v15177_v51  ;;  %v31871_v51 = vand.u32 4294901760, %v27265_v60  ;;  %v5097_v60 = vpop.permute.xlu0 %5096 }
 0x2ab   : > { %4640 = vmatprep.mubr.f32.mxu1 %v31576_v33  ;;  %15183 = vmatprep.mubr.f32.mxu0 %v31576_v33 }
 0x2ac   : > { %22471 = vmatpush1.bf16.msra.mxu0 %v22470_v54  ;;  %8965 = vrot.lane.b32.xlu0 %v31802_v15, %s31732_s14  ;;  %v21816_v26 = vpack.c.bf16 %v31871_v51, %v31870_v23  ;;  %v31872_v54 = vld [vmem:[#allocation2_spill] sm:$0xff]  ;;  %v31878_v23 = vand.u32 4294901760, %v27298_v31  ;;  %v31884_v31 = vand.u32 4294901760, %v27377_v35 }
 0x2ad   : > { %22473 = vmatprep.subr.bf16.mxu0 %v22472_v47  ;;  %8967 = vrot.lane.b32.xlu1 %v31864_v0, %s31732_s14  ;;  %v31873_v47 = vld [vmem:[#allocation13_spill] sm:$0xff] }
 0x2ae   : > { %4642 = vmatmul.mubr.f32.gmra.mrb[6].mxu1 %v27457_v63  ;;  %15189 = vmatmul.mubr.f32.gmra.mrb[6].mxu0 %v15188_v58  ;;  %v5099_v58 = vpop.permute.xlu1 %5098 }
 0x2af   : > { %4728 = vmatprep.mubr.f32.mxu1 %v31576_v33  ;;  %15299 = vmatprep.mubr.f32.mxu0 %v31576_v33 }
 0x2b0   : > { %19535 = vrot.lane.b32.xlu0 %v31865_v37, %s24235_s24 }
 0x2b1   : > { %19537 = vrot.lane.b32.xlu1 %v31866_v40, %s24235_s24 }
 0x2b2   : > { %4731 = vmatmul.mubr.f32.vlgmr.msra.gmra.mrb[0].mxu1 %v31867_v10  ;;  %15301 = vmatmul.mubr.f32.vlgmr.msra.gmra.mrb[0].mxu0 %v27502_v48 }
 0x2b3   : > { %21811 = vmatpush1.bf16.msra.mxu1 %v31868_v55  ;;  %22475 = vmatpush1.bf16.msra.mxu0 %v22474_v6  ;;  %v31875_v6 = vld [vmem:[#allocation58_spill] sm:$0xff] }
 0x2b4   : > { %21813 = vmatprep.subr.bf16.mxu1 %v31869_v62  ;;  %4736 = vmatprep.mubr.f32.mxu1 %v31576_v33 }
 0x2b5   : > { %15306 = vmatprep.mubr.f32.mxu0 %v31576_v33  ;;  %22477 = vmatprep.subr.bf16.mxu0 %v22476_v3  ;;  %v31876_v3 = vld [vmem:[#allocation55_spill] sm:$0xff] }
 0x2b6   : > { %4739 = vmatmul.mubr.f32.gmra.mrb[2].mxu1 %v27419_v9  ;;  %15308 = vmatmul.mubr.f32.gmra.mrb[2].mxu0 %v27536_v25 }
 0x2b7   : > { %21815 = vmatpush1.bf16.msra.mxu1 %v31872_v54  ;;  %22479 = vmatpush1.bf16.msra.mxu0 %v22478_v36  ;;  %v31877_v36 = vand.u32 4294901760, %v27295_v61  ;;  %v31883_v61 = vand.u32 4294901760, %v27346_v7  ;;  %v5129_v7 = vsel %vm5112_vm4, %v5099_v58, %v5097_v60 }
 0x2b8   : > { %21817 = vmatprep.subr.bf16.mxu1 %v21816_v26  ;;  %22481 = vmatprep.subr.bf16.mxu0 %v31873_v47  ;;  %v31879_v26 = vand.u32 4294901760, %v31867_v10 }
 0x2b9   : > { %4744 = vmatprep.mubr.f32.mxu1 %v31576_v33  ;;  %15313 = vmatprep.mubr.f32.mxu0 %v31576_v33  ;;  %v21818_v51 = vpack.c.bf16 %v31878_v23, %v31877_v36  ;;  %v21822_v38 = vpack.c.bf16 %v31884_v31, %v31883_v61  ;;  %v5113_v23 = vsel %vm5112_vm4, %v5097_v60, %v5099_v58  ;;  %v31891_v31 = vld [vmem:[#allocation51_spill] sm:$0xff]  ;;  %v31893_v60 = vand.u32 4294901760, %v27439_v28 }
 0x2ba   : > { %4747 = vmatmul.mubr.f32.gmra.mrb[4].mxu1 %v27468_v43  ;;  %15315 = vmatmul.mubr.f32.gmra.mrb[4].mxu0 %v27564_v52  ;;  %v31890_v43 = vand.u32 4294901760, %v27492_v32 }
 0x2bb   : > { %4752 = vmatprep.mubr.f32.mxu1 %v31576_v33  ;;  %15320 = vmatprep.mubr.f32.mxu0 %v31576_v33 }
 0x2bc   : > { %19539 = vrot.lane.b32.xlu0 %v31761_v46, %s24235_s24  ;;  %19541 = vrot.lane.b32.xlu1 %v31874_v59, %s24235_s24 }
 0x2be   : > { %4755 = vmatmul.mubr.f32.gmra.mrb[6].mxu1 %v27492_v32  ;;  %15322 = vmatmul.mubr.f32.gmra.mrb[6].mxu0 %v27594_v4  ;;  %v31892_v32 = vand.u32 4294901760, %v27430_v49 }
 0x2bf   : > { %4833 = vmatprep.mubr.f32.mxu1 %v31576_v33  ;;  %15408 = vmatprep.mubr.f32.mxu0 %v31576_v33 }
 0x2c0   : > { %19543 = vrot.lane.b32.xlu0 %v31875_v6, %s24235_s24  ;;  %19545 = vrot.lane.b32.xlu1 %v31876_v3, %s24235_s24  ;;  %v5101_v6 = vpop.permute.xlu0 %5100  ;;  %v5103_v3 = vpop.permute.xlu1 %5102  ;;  %v22490_v58 = vpack.c.bf16 %v31893_v60, %v31892_v32 }
 0x2c1   : > { %v5130_v35 = vsel %vm5112_vm4, %v5103_v3, %v5101_v6 }
 0x2c2   : > { %4837 = vmatmul.mubr.f32.vlgmr.msra.gmra.mrb[0].mxu1 %v31879_v26  ;;  %15411 = vmatmul.mubr.f32.vlgmr.msra.gmra.mrb[0].mxu0 %v27534_v50 }
 0x2c3   : > { %21819 = vmatpush1.bf16.msra.mxu1 %v21818_v51  ;;  %22483 = vmatpush1.bf16.msra.mxu0 %v31882_v57  ;;  %v5114_v51 = vsel %vm5112_vm4, %v5101_v6, %v5103_v3  ;;  %v31894_v3 = vand.u32 4294901760, %v27534_v50 }
 0x2c4   : > { %21821 = vmatprep.subr.bf16.mxu1 %v21820_v12  ;;  %22485 = vmatprep.subr.bf16.mxu0 %v27544_v17  ;;  %v31887_v12 = vand.u32 4294901760, %v27455_v8  ;;  %v5105_v9 = vpop.permute.xlu0 %5104  ;;  %v5107_v10 = vpop.permute.xlu1 %5106  ;;  %v27771_v6 = vmul.f32 %v31891_v31, %v5114_v51  ;;  %v21439_v51 = vld [vmem:[%s31126_s3 + $0xc0] sm:$0xff] }
 0x2c5   : > { %4842 = vmatprep.mubr.f32.mxu1 %v31576_v33  ;;  %15416 = vmatprep.mubr.f32.mxu0 %v31576_v33  ;;  %v5131_v50 = vsel %vm5112_vm4, %v5107_v10, %v5105_v9 }
 0x2c6   : > { %4846 = vmatmul.mubr.f32.gmra.mrb[2].mxu1 %v31885_v2  ;;  %15419 = vmatmul.mubr.f32.gmra.mrb[2].mxu0 %v27562_v11  ;;  %v22488_v41 = vpack.c.bf16 %v31887_v12, %v31886_v53  ;;  %v31895_v12 = vand.u32 4294901760, %v27546_v21 }
 0x2c7   : > { %21823 = vmatpush1.bf16.msra.mxu1 %v21822_v38  ;;  %22487 = vmatpush1.bf16.msra.mxu0 %v27573_v5  ;;  %v27760_v38 = vmul.f32 %v31891_v31, %v5113_v23 }
 0x2c8   : > { %21825 = vmatprep.subr.bf16.mxu1 %v27286_v19  ;;  %22489 = vmatprep.subr.bf16.mxu0 %v22488_v41  ;;  %v31889_v19 = vld [vmem:[#allocation43_spill] sm:$0xff]  ;;  %v5109_v26 = vpop.permute.xlu0 %5108  ;;  %v5111_v61 = vpop.permute.xlu1 %5110 }
 0x2c9   : > { %4851 = vmatprep.mubr.f32.mxu1 %v31576_v33  ;;  %15424 = vmatprep.mubr.f32.mxu0 %v31576_v33  ;;  %v5142_v8 = vmul.f32 %v31889_v19, %v5129_v7  ;;  %v5144_v36 = vmul.f32 %v31889_v19, %v5130_v35  ;;  %v5168_v7 = vand.u32 4294901760, %v27760_v38 }
 0x2ca   : > { %4855 = vmatmul.mubr.f32.gmra.mrb[4].mxu1 %v31888_v39  ;;  %15427 = vmatmul.mubr.f32.gmra.mrb[4].mxu0 %v27592_v13  ;;  %v31898_v39 = vand.u32 4294901760, %v27568_v30 }
 0x2cb   : > { %4860 = vmatprep.mubr.f32.mxu1 %v31576_v33  ;;  %15432 = vmatprep.mubr.f32.mxu0 %v31576_v33  ;;  %v5166_v2 = vand.u32 4294901760, %v5142_v8  ;;  %v5170_v53 = vand.u32 4294901760, %v5144_v36 }
 0x2cc   : > { %19547 = vrot.lane.b32.xlu0 %v31811_v45, %s24235_s24  ;;  %19549 = vrot.lane.b32.xlu1 %v31814_v27, %s24235_s24  ;;  %v15777_v49 = vpop.permute.xlu0 %15776  ;;  %v15779_v28 = vpop.permute.xlu1 %15778  ;;  %s32105_s24 = sshll.u32 %s24359_s22, 3 }
 0x2cd   : > { %v27785_v35 = vsub.f32 %v5142_v8, %v5166_v2  ;;  %v27787_v21 = vsub.f32 %v5144_v36, %v5170_v53  ;;  %v5146_v8 = vmul.f32 %v31889_v19, %v5131_v50  ;;  %v31901_v50 = vld [vmem:[#allocation46_spill] sm:$0xff]  ;;  %s31057_s14 = scalar_lea.vmem %s31129_s6, %s32105_s24 }
 0x2ce   : > { %15435 = vmatmul.mubr.f32.gmra.mrb[6].mxu0 %v27617_v24  ;;  %4864 = vmatmul.mubr.f32.gmra.mrb[6].mxu1 %v31890_v43  ;;  %v27797_v43 = vpack.c.bf16 %v5170_v53, %v5166_v2  ;;  %v27817_v2 = vsub.f32 %v27760_v38, %v5168_v7 }
 0x2cf   : > { %4958 = vmatprep.mubr.f32.mxu1 %v31576_v33  ;;  %15513 = vmatprep.mubr.f32.mxu0 %v31576_v33  ;;  %v31400_v36 = vand.u32 4294901760, %v27787_v21 }
 0x2d0   : > { %9708 = vrot.lane.b32.xlu0 %v31821_v29, %s24236_s25  ;;  %9710 = vrot.lane.b32.xlu1 %v31824_v34, %s24236_s25  ;;  %v31896_v29 = vand.u32 4294901760, %v27555_v18  ;;  %v5115_v34 = vsel %vm5112_vm4, %v5105_v9, %v5107_v10  ;;  %v5172_v18 = vand.u32 4294901760, %v27771_v6  ;;  %v31899_v9 = vand.u32 4294901760, %v27562_v11 }
 0x2d1   : > { %v27803_v10 = vmul.f32 %v31891_v31, %v5115_v34  ;;  %v31401_v11 = vand.u32 4294901760, %v27785_v35  ;;  %v31399_v34 = vand.u32 4294901760, %v27817_v2 }
 0x2d2   : > { %15517 = vmatmul.mubr.f32.vlgmr.msra.gmra.mrb[0].mxu0 %v31894_v3  ;;  %4960 = vmatmul.mubr.f32.vlgmr.msra.gmra.mrb[0].mxu1 %v27343_v42  ;;  %v22492_v41 = vpack.c.bf16 %v31896_v29, %v31895_v12  ;;  %v5298_v12 = vsub.f32 %v27787_v21, %v31400_v36 }
 0x2d3   : > { %22491 = vmatpush1.bf16.msra.mxu0 %v22490_v58  ;;  %21827 = vmatpush1.bf16.msra.mxu1 %v31868_v55  ;;  %v31897_v55 = vand.u32 4294901760, %v27566_v22  ;;  %v5116_v22 = vsel %vm5112_vm4, %v5109_v26, %v5111_v61  ;;  %v5176_v60 = vand.u32 4294901760, %v27803_v10  ;;  %v5174_v58 = vand.u32 4294901760, %v5146_v8 }
 0x2d4   : > { %21829 = vmatprep.subr.bf16.mxu1 %v31869_v62  ;;  %22493 = vmatprep.subr.bf16.mxu0 %v22492_v41  ;;  %v5132_v62 = vsel %vm5112_vm4, %v5111_v61, %v5109_v26  ;;  %v15791_v26 = vpop.permute.xlu1 %15790  ;;  %v31900_v61 = vand.u32 4294901760, %v27592_v13  ;;  %v5147_v53 = vmul.f32 %v31891_v31, %v5116_v22  ;;  %v5286_v13 = vsub.f32 %v27785_v35, %v31401_v11  ;;  %v21440_v41 = vld [vmem:[%s31126_s3 + $0xc8] sm:$0xff] }
 0x2d5   : > { %4965 = vmatprep.mubr.f32.mxu1 %v31576_v33  ;;  %15522 = vmatprep.mubr.f32.mxu0 %v31576_v33  ;;  %v22494_v23 = vpack.c.bf16 %v31898_v39, %v31897_v55  ;;  %v5148_v30 = vmul.f32 %v31889_v19, %v5132_v62  ;;  %v15797_v38 = vsel %vm2081_vm5, %v15791_v26, %v15779_v28 }
 0x2d6   : > { %15526 = vmatmul.mubr.f32.gmra.mrb[2].mxu0 %v31899_v9  ;;  %4967 = vmatmul.mubr.f32.gmra.mrb[2].mxu1 %v27384_v44  ;;  %v15815_v39 = vmul.f32 %v15797_v38, %v31901_v50  ;;  %v5180_v62 = vand.u32 4294901760, %v5147_v53  ;;  %v15809_v9 = vsel %vm2081_vm5, %v15779_v28, %v15791_v26  ;;  %v27862_v22 = vsub.f32 %v5146_v8, %v5174_v58 }
 0x2d7   : > { %22495 = vmatpush1.bf16.msra.mxu0 %v22494_v23  ;;  %21831 = vmatpush1.bf16.msra.mxu1 %v31872_v54  ;;  %v27820_v54 = vsub.f32 %v27771_v6, %v5172_v18  ;;  %v5155_v6 = vsel %vm656_vm0, %v21439_v51, 0  ;;  %v5178_v3 = vand.u32 4294901760, %v5148_v30  ;;  %v31903_v51 = vld [vmem:[#allocation52_spill] sm:$0xff]  ;;  %v5287_v26 = vand.u32 4294901760, %v5286_v13 }
 0x2d8   : > { %22497 = vmatprep.subr.bf16.mxu0 %v31873_v47  ;;  %4972 = vmatprep.mubr.f32.mxu1 %v31576_v33  ;;  %v15789_v47 = vpop.permute.xlu0 %15788  ;;  %v5299_v38 = vand.u32 4294901760, %v5298_v12  ;;  %v15814_v8 = vmul.f32 %v15809_v9, %v31903_v51  ;;  %v27887_v13 = vsub.f32 %v5147_v53, %v5180_v62  ;;  %v31403_v53 = vand.u32 4294901760, %v27862_v22 }
 0x2d9   : > { %15531 = vmatprep.mubr.f32.mxu0 %v31576_v33  ;;  %21833 = vmatprep.subr.bf16.mxu1 %v27797_v43  ;;  %v15796_v32 = vsel %vm2081_vm5, %v15789_v47, %v15777_v49  ;;  %v15808_v29 = vsel %vm2081_vm5, %v15777_v49, %v15789_v47  ;;  %v31398_v23 = vand.u32 4294901760, %v27820_v54  ;;  %v31902_v49 = vand.u32 4294901760, %v27617_v24 }
 0x2da   : > { %15535 = vmatmul.mubr.f32.gmra.mrb[4].mxu0 %v31900_v61  ;;  %4974 = vmatmul.mubr.f32.gmra.mrb[4].mxu1 %v27421_v14  ;;  %v15813_v55 = vmul.f32 %v15796_v32, %v31901_v50  ;;  %v27865_v47 = vmul.f32 %v15808_v29, %v31903_v51  ;;  %v5158_v24 = vsel %vm656_vm0, %v21440_v41, 0  ;;  %v27871_v32 = vsub.f32 %v27803_v10, %v5176_v60 }
 0x2db   : > { %4979 = vmatprep.mubr.f32.mxu1 %v31576_v33  ;;  %15540 = vmatprep.mubr.f32.mxu0 %v31576_v33  ;;  %v27873_v28 = vsub.f32 %v5148_v30, %v5178_v3  ;;  %v15841_v30 = vand.u32 4294901760, %v15815_v39  ;;  %v27894_v29 = vand.u32 4294901760, %v5158_v24  ;;  %v5310_v41 = vsub.f32 %v27862_v22, %v31403_v53 }
 0x2dc   : > { %9720 = vrot.lane.b32.xlu0 %v31796_v1, %s24236_s25  ;;  %9722 = vrot.lane.b32.xlu1 %v31826_v56, %s24236_s25  ;;  %v27856_v1 = vand.u32 4294901760, %v5155_v6  ;;  %v27860_v56 = vpack.c.bf16 %v5172_v18, %v5168_v7  ;;  %v27867_v61 = vpop.permute.xlu0 %15780  ;;  %v21441_v7 = vld [vmem:[%s31126_s3 + $0xd0] sm:$0xff]  ;;  %v27884_v18 = vpack.c.bf16 %v5178_v3, %v5174_v58  ;;  %v15837_v10 = vand.u32 4294901760, %v15813_v55 }
 0x2dd   : > { %v5161_v58 = vsel %vm656_vm0, %v21441_v7, 0  ;;  %v31402_v3 = vand.u32 4294901760, %v27873_v28  ;;  %v5311_v53 = vand.u32 4294901760, %v5310_v41  ;;  %v21500_v41 = vld [vmem:[%s31126_s3 + $0x288] sm:$0xff] }
 0x2de   : > { %4981 = vmatmul.mubr.f32.gmra.mrb[6].mxu1 %v27457_v63  ;;  %15544 = vmatmul.mubr.f32.gmra.mrb[6].mxu0 %v31902_v49  ;;  %v27875_v49 = vpop.permute.xlu1 %15782  ;;  %v27892_v12 = vsub.f32 %v5155_v6, %v27856_v1  ;;  %v21840_v6 = vpack.c.bf16 %v5299_v38, %v5287_v26  ;;  %v27925_v26 = vpack.c.bf16 %v15841_v30, %v15837_v10 }
 0x2df   : > { %5059 = vmatprep.mubr.f32.mxu1 %v31576_v33  ;;  %15638 = vmatprep.mubr.f32.mxu0 %v31576_v33  ;;  %v27939_v11 = vsub.f32 %v15813_v55, %v15837_v10  ;;  %v21499_v55 = vld [vmem:[%s31126_s3 + $0x280] sm:$0xff] }
 0x2e0   : > { %9712 = vrot.lane.b32.xlu0 %v31830_v16, %s24236_s25  ;;  %9714 = vrot.lane.b32.xlu1 %v31801_v20, %s24236_s25  ;;  %v27898_v20 = vpack.c.bf16 %v5180_v62, %v5176_v60  ;;  %v15839_v16 = vand.u32 4294901760, %v27865_v47  ;;  %v27916_v60 = vsub.f32 %v27820_v54, %v31398_v23  ;;  %v15843_v62 = vand.u32 4294901760, %v15814_v8  ;;  %v15793_v9 = vpop.permute.xlu0 %15792 }
 0x2e1   : > { %v31404_v38 = vand.u32 4294901760, %v27892_v12  ;;  %v27931_v23 = vsub.f32 %v5158_v24, %v27894_v29 }
 0x2e2   : > { %5061 = vmatmul.mubr.f32.vlgmr.msra.gmra.mrb[0].mxu1 %v27343_v42  ;;  %15640 = vmatmul.mubr.f32.vlgmr.msra.gmra.mrb[0].mxu0 %v27502_v48  ;;  %v21442_v42 = vld [vmem:[%s31126_s3 + $0xd8] sm:$0xff]  ;;  %v15795_v7 = vpop.permute.xlu1 %15794  ;;  %v27959_v10 = vpack.c.bf16 %v15843_v62, %v15839_v16 }
 0x2e3   : > { %21835 = vmatpush1.bf16.msra.mxu1 %v27860_v56  ;;  %22499 = vmatpush1.bf16.msra.mxu0 %v31882_v57  ;;  %v27911_v57 = vsub.f32 %v27817_v2, %v31399_v34  ;;  %v27933_v34 = vand.u32 4294901760, %v5161_v58  ;;  %v5164_v36 = vsel %vm656_vm0, %v21442_v42, 0  ;;  %v5305_v42 = vand.u32 4294901760, %v27916_v60 }
 0x2e4   : > { %22501 = vmatprep.subr.bf16.mxu0 %v27544_v17  ;;  %5066 = vmatprep.mubr.f32.mxu1 %v31576_v33  ;;  %v27923_v17 = vsub.f32 %v27865_v47, %v15839_v16  ;;  %v5322_v47 = vsub.f32 %v27873_v28, %v31402_v3  ;;  %v5242_v60 = vsub.f32 %v27892_v12, %v31404_v38 }
 0x2e5   : > { %21837 = vmatprep.subr.bf16.mxu1 %v27884_v18  ;;  %15645 = vmatprep.mubr.f32.mxu0 %v31576_v33  ;;  %v5293_v24 = vand.u32 4294901760, %v27911_v57  ;;  %v27968_v57 = vsub.f32 %v15814_v8, %v15843_v62  ;;  %v27975_v3 = vsub.f32 %v5161_v58, %v27933_v34  ;;  %v15826_v8 = vsel %vm656_vm0, %v21499_v55, 0 }
 0x2e6   : > { %5068 = vmatmul.mubr.f32.gmra.mrb[2].mxu1 %v27384_v44  ;;  %15647 = vmatmul.mubr.f32.gmra.mrb[2].mxu0 %v27536_v25  ;;  %v27941_v44 = vsub.f32 %v15815_v39, %v15841_v30  ;;  %v15799_v30 = vsel %vm2081_vm5, %v15795_v7, %v27875_v49  ;;  %v15810_v39 = vsel %vm2081_vm5, %v27867_v61, %v15793_v9  ;;  %v5323_v62 = vand.u32 4294901760, %v5322_v47 }
 0x2e7   : > { %21839 = vmatpush1.bf16.msra.mxu1 %v27898_v20  ;;  %22503 = vmatpush1.bf16.msra.mxu0 %v27573_v5  ;;  %v15798_v5 = vsel %vm2081_vm5, %v15793_v9, %v27867_v61  ;;  %v15811_v38 = vsel %vm2081_vm5, %v27875_v49, %v15795_v7  ;;  %v15819_v16 = vmul.f32 %v15799_v30, %v31901_v50  ;;  %v31904_v58 = vand.u32 4294901760, %v27871_v32 }
 0x2e8   : > { %21841 = vmatprep.subr.bf16.mxu1 %v21840_v6  ;;  %5073 = vmatprep.mubr.f32.mxu1 %v31576_v33  ;;  %v27964_v6 = vand.u32 4294901760, %v5164_v36  ;;  %v31905_v61 = vand.u32 4294901760, %v27887_v13  ;;  %v31408_v55 = vand.u32 4294901760, %v27975_v3  ;;  %v28010_v30 = vand.u32 4294901760, %v15826_v8 }
 0x2e9   : > { %15652 = vmatprep.mubr.f32.mxu0 %v31576_v33  ;;  %22505 = vmatprep.subr.bf16.mxu0 %v27925_v26  ;;  %v5316_v31 = vsub.f32 %v27871_v32, %v31904_v58  ;;  %v15816_v58 = vmul.f32 %v15810_v39, %v31903_v51  ;;  %v15829_v47 = vsel %vm656_vm0, %v21500_v41, 0  ;;  %v15849_v7 = vand.u32 4294901760, %v15819_v16 }
 0x2ea   : > { %15654 = vmatmul.mubr.f32.gmra.mrb[4].mxu0 %v27564_v52  ;;  %5075 = vmatmul.mubr.f32.gmra.mrb[4].mxu1 %v27421_v14  ;;  %v15817_v14 = vmul.f32 %v15798_v5, %v31901_v50  ;;  %v5328_v49 = vsub.f32 %v27887_v13, %v31905_v61  ;;  %v28000_v9 = vsub.f32 %v5164_v36, %v27964_v6  ;;  %v5243_v5 = vand.u32 4294901760, %v5242_v60 }
 0x2eb   : > { %5080 = vmatprep.mubr.f32.mxu1 %v31576_v33  ;;  %15659 = vmatprep.mubr.f32.mxu0 %v31576_v33  ;;  %v21842_v36 = vpack.c.bf16 %v5305_v42, %v5293_v24  ;;  %v15818_v60 = vmul.f32 %v15811_v38, %v31903_v51  ;;  %v5317_v50 = vand.u32 4294901760, %v5316_v31  ;;  %v31907_v39 = vand.u32 4294901760, %v27939_v11 }
 0x2ec   : > { %9724 = vrot.lane.b32.xlu0 %v31802_v15, %s24236_s25  ;;  %9726 = vrot.lane.b32.xlu1 %v31864_v0, %s24236_s25  ;;  %v31906_v15 = vand.u32 4294901760, %v27931_v23  ;;  %v15845_v61 = vand.u32 4294901760, %v15817_v14  ;;  %v5329_v24 = vand.u32 4294901760, %v5328_v49  ;;  %v31908_v38 = vand.u32 4294901760, %v27941_v44 }
 0x2ed   : > { %v5264_v41 = vsub.f32 %v27975_v3, %v31408_v55  ;;  %v28036_v49 = vsub.f32 %v15826_v8, %v28010_v30  ;;  %v28038_v42 = vand.u32 4294901760, %v15829_v47  ;;  %v21848_v8 = vpack.c.bf16 %v27787_v21, %v27785_v35 }
 0x2ee   : > { %15661 = vmatmul.mubr.f32.gmra.mrb[6].mxu0 %v27594_v4  ;;  %5082 = vmatmul.mubr.f32.gmra.mrb[6].mxu1 %v27457_v63  ;;  %v5253_v0 = vsub.f32 %v27931_v23, %v31906_v15  ;;  %v21844_v63 = vpack.c.bf16 %v5323_v62, %v5311_v53  ;;  %v21501_v15 = vld [vmem:[%s31126_s3 + $0x290] sm:$0xff]  ;;  %v15957_v53 = vsub.f32 %v27939_v11, %v31907_v39  ;;  %v15847_v39 = vand.u32 4294901760, %v15816_v58 }
 0x2ef   : > { %5238 = vmatprep.mubr.f32.mxu1 %v31576_v33  ;;  %15739 = vmatprep.mubr.f32.mxu0 %v31576_v33  ;;  %v15969_v31 = vsub.f32 %v27941_v44, %v31908_v38  ;;  %v28042_v38 = vsub.f32 %v15817_v14, %v15845_v61  ;;  %v28050_v55 = vpack.c.bf16 %v15849_v7, %v15845_v61  ;;  %v31909_v14 = vand.u32 4294901760, %v28000_v9 }
 0x2f0   : > { %20294 = vrot.lane.b32.xlu0 %v31865_v37, %s24237_s28  ;;  %20296 = vrot.lane.b32.xlu1 %v31866_v40, %s24237_s28  ;;  %v5254_v62 = vand.u32 4294901760, %v5253_v0  ;;  %v28046_v0 = vsub.f32 %v15819_v16, %v15849_v7  ;;  %v21846_v51 = vpack.c.bf16 %v5329_v24, %v5317_v50  ;;  %v5265_v16 = vand.u32 4294901760, %v5264_v41 }
 0x2f1   : > { %v15970_v19 = vand.u32 4294901760, %v15969_v31  ;;  %v28064_v61 = vsub.f32 %v15829_v47, %v28038_v42  ;;  %v31910_v24 = vand.u32 4294901760, %v27923_v17 }
 0x2f2   : > { %15741 = vmatmul.mubr.f32.vlgmr.msra.gmra.mrb[0].mxu0 %v27502_v48  ;;  %5244 = vmatmul.mubr.f32.vlgmr.msra.gmra.mrb[0].mxu1 %v5243_v5  ;;  %v15832_v48 = vsel %vm656_vm0, %v21501_v15, 0  ;;  %v15851_v5 = vand.u32 4294901760, %v15818_v60  ;;  %v15958_v15 = vand.u32 4294901760, %v15957_v53  ;;  %v31911_v53 = vand.u32 4294901760, %v27968_v57 }
 0x2f3   : > { %21843 = vmatpush1.bf16.msra.mxu1 %v21842_v36  ;;  %5249 = vmatprep.mubr.f32.mxu1 %v31576_v33  ;;  %v21502_v36 = vld [vmem:[%s31126_s3 + $0x298] sm:$0xff]  ;;  %v28066_v50 = vand.u32 4294901760, %v15832_v48 }
 0x2f4   : > { %21845 = vmatprep.subr.bf16.mxu1 %v21844_v63  ;;  %15746 = vmatprep.mubr.f32.mxu0 %v31576_v33  ;;  %v5275_v63 = vsub.f32 %v28000_v9, %v31909_v14  ;;  %v15963_v14 = vsub.f32 %v27923_v17, %v31910_v24  ;;  %v15975_v31 = vsub.f32 %v27968_v57, %v31911_v53  ;;  %v31412_v53 = vand.u32 4294901760, %v28042_v38 }
 0x2f5   : > { %22507 = vmatpush1.bf16.msra.mxu0 %v27959_v10  ;;  %20298 = vrot.lane.b32.xlu0 %v31761_v46, %s24237_s28  ;;  %v28078_v41 = vpack.c.bf16 %v15851_v5, %v15847_v39  ;;  %v28080_v47 = vsub.f32 %v15818_v60, %v15851_v5  ;;  %v22512_v24 = vpack.c.bf16 %v15970_v19, %v15958_v15 }
 0x2f6   : > { %15748 = vmatmul.mubr.f32.gmra.mrb[2].mxu0 %v27536_v25  ;;  %5255 = vmatmul.mubr.f32.gmra.mrb[2].mxu1 %v5254_v62  ;;  %v15835_v25 = vsel %vm656_vm0, %v21502_v36, 0  ;;  %v28076_v62 = vsub.f32 %v15816_v58, %v15847_v39  ;;  %v5276_v7 = vand.u32 4294901760, %v5275_v63  ;;  %v31912_v58 = vand.u32 4294901760, %v28036_v49 }
 0x2f7   : > { %21847 = vmatpush1.bf16.msra.mxu1 %v21846_v51  ;;  %5260 = vmatprep.mubr.f32.mxu1 %v31576_v33  ;;  %v31411_v51 = vand.u32 4294901760, %v28046_v0  ;;  %v31410_v39 = vand.u32 4294901760, %v28064_v61  ;;  %v28094_v5 = vsub.f32 %v15832_v48, %v28066_v50  ;;  %v28096_v19 = vand.u32 4294901760, %v15835_v25 }
 0x2f8   : > { %21849 = vmatprep.subr.bf16.mxu1 %v21848_v8  ;;  %15753 = vmatprep.mubr.f32.mxu0 %v31576_v33  ;;  %v15913_v60 = vsub.f32 %v28036_v49, %v31912_v58  ;;  %v31413_v8 = vand.u32 4294901760, %v28076_v62  ;;  %v15964_v63 = vand.u32 4294901760, %v15963_v14  ;;  %v15976_v15 = vand.u32 4294901760, %v15975_v31  ;;  %v31914_v58 = vld [vmem:[#allocation55_spill] sm:$0xff] }
 0x2f9   : > { %22509 = vmatprep.subr.bf16.mxu0 %v28050_v55  ;;  %20300 = vrot.lane.b32.xlu1 %v31874_v59, %s24237_s28  ;;  %v15981_v48 = vsub.f32 %v28042_v38, %v31412_v53  ;;  %v15924_v14 = vsub.f32 %v28064_v61, %v31410_v39  ;;  %v21850_v39 = vpack.c.bf16 %v27820_v54, %v27817_v2 }
 0x2fa   : > { %5266 = vmatmul.mubr.f32.gmra.mrb[4].mxu1 %v5265_v16  ;;  %15755 = vmatmul.mubr.f32.gmra.mrb[4].mxu0 %v27564_v52  ;;  %v31913_v52 = vld [vmem:[#allocation58_spill] sm:$0xff]  ;;  %v15993_v16 = vsub.f32 %v28046_v0, %v31411_v51  ;;  %v15914_v36 = vand.u32 4294901760, %v15913_v60 }
 0x2fb   : > { %5271 = vmatprep.mubr.f32.mxu1 %v31576_v33  ;;  %15760 = vmatprep.mubr.f32.mxu0 %v31576_v33  ;;  %v15982_v51 = vand.u32 4294901760, %v15981_v48  ;;  %v15925_v31 = vand.u32 4294901760, %v15924_v14  ;;  %v22524_v14 = vpack.c.bf16 %v28046_v0, %v28042_v38 }
 0x2fc   : > { %22511 = vmatpush1.bf16.msra.mxu0 %v28078_v41  ;;  %20302 = vrot.lane.b32.xlu0 %v31913_v52, %s24237_s28  ;;  %v15994_v53 = vand.u32 4294901760, %v15993_v16 }
 0x2fd   : > { %22513 = vmatprep.subr.bf16.mxu0 %v22512_v24  ;;  %20304 = vrot.lane.b32.xlu1 %v31914_v58, %s24237_s28  ;;  %v28119_v24 = vsub.f32 %v15835_v25, %v28096_v19  ;;  %v22514_v25 = vpack.c.bf16 %v15976_v15, %v15964_v63 }
 0x2fe   : > { %5277 = vmatmul.mubr.f32.gmra.mrb[6].mxu1 %v5276_v7  ;;  %15762 = vmatmul.mubr.f32.gmra.mrb[6].mxu0 %v27594_v4  ;;  %v15987_v7 = vsub.f32 %v28076_v62, %v31413_v8  ;;  %v31915_v4 = vand.u32 4294901760, %v28080_v47  ;;  %v21852_v8 = vpack.c.bf16 %v27873_v28, %v27862_v22  ;;  %v22516_v48 = vpack.c.bf16 %v15994_v53, %v15982_v51 }
 0x2ff   : > { %5387 = vmatprep.mubr.f32.mxu1 %v31576_v33  ;;  %15909 = vmatprep.mubr.f32.mxu0 %v31576_v33  ;;  %v15945_v52 = vand.u32 4294901760, %v28119_v24  ;;  %v22520_v53 = vpack.c.bf16 %v27941_v44, %v27939_v11  ;;  %v22522_v51 = vpack.c.bf16 %v27968_v57, %v27923_v17 }
 0x300   : > { %v15999_v60 = vsub.f32 %v28080_v47, %v31915_v4  ;;  %20306 = vrot.lane.b32.xlu0 %v31811_v45, %s24237_s28  ;;  %v31916_v4 = vand.u32 4294901760, %v28094_v5  ;;  %v15988_v63 = vand.u32 4294901760, %v15987_v7  ;;  %v31917_v7 = vand.u32 4294901760, %v27785_v35  ;;  %v5865_v35 = vpop.permute.xlu0 %5864 }
 0x301   : > { %20308 = vrot.lane.b32.xlu1 %v31814_v27, %s24237_s28 }
 0x302   : > { %5389 = vmatmul.mubr.f32.vlgmr.msra.gmra.mrb[0].mxu1 %v27856_v1  ;;  %15915 = vmatmul.mubr.f32.vlgmr.msra.gmra.mrb[0].mxu0 %v15914_v36  ;;  %v15935_v45 = vsub.f32 %v28094_v5, %v31916_v4  ;;  %v16000_v15 = vand.u32 4294901760, %v15999_v60  ;;  %v21854_v36 = vpack.c.bf16 %v27887_v13, %v27871_v32  ;;  %v31918_v60 = vand.u32 4294901760, %v27787_v21  ;;  %v5867_v21 = vpop.permute.xlu1 %5866 }
 0x303   : > { %21851 = vmatpush1.bf16.msra.mxu1 %v21850_v39  ;;  %5394 = vmatprep.mubr.f32.mxu1 %v31576_v33  ;;  %v15946_v39 = vsub.f32 %v28119_v24, %v15945_v52  ;;  %v31919_v4 = vand.u32 4294901760, %v27817_v2  ;;  %v31924_v2 = vand.u32 4294901760, %v27871_v32  ;;  %v5897_v32 = vsel %vm5880_vm6, %v5867_v21, %v5865_v35 }
 0x304   : > { %21853 = vmatprep.subr.bf16.mxu1 %v21852_v8  ;;  %15920 = vmatprep.mubr.f32.mxu0 %v31576_v33  ;;  %v15936_v16 = vand.u32 4294901760, %v15935_v45  ;;  %v22518_v8 = vpack.c.bf16 %v16000_v15, %v15988_v63  ;;  %v31920_v63 = vand.u32 4294901760, %v27820_v54  ;;  %v31925_v54 = vand.u32 4294901760, %v27887_v13 }
 0x305   : > { %22515 = vmatpush1.bf16.msra.mxu0 %v22514_v25  ;;  %v15947_v45 = vand.u32 4294901760, %v15946_v39  ;;  %v21864_v25 = vpack.c.bf16 %v31918_v60, %v31917_v7 }
 0x306   : > { %5396 = vmatmul.mubr.f32.gmra.mrb[2].mxu1 %v27894_v29  ;;  %15926 = vmatmul.mubr.f32.gmra.mrb[2].mxu0 %v15925_v31  ;;  %v22526_v31 = vpack.c.bf16 %v28080_v47, %v28076_v62  ;;  %v21866_v15 = vpack.c.bf16 %v31920_v63, %v31919_v4 }
 0x307   : > { %21855 = vmatpush1.bf16.msra.mxu1 %v21854_v36  ;;  %5401 = vmatprep.mubr.f32.mxu1 %v31576_v33  ;;  %v31921_v36 = vand.u32 4294901760, %v27892_v12 }
 0x308   : > { %21857 = vmatprep.subr.bf16.mxu1 %v27797_v43  ;;  %15931 = vmatprep.mubr.f32.mxu0 %v31576_v33 }
 0x309   : > { %22517 = vmatprep.subr.bf16.mxu0 %v22516_v48  ;;  %v31922_v48 = vand.u32 4294901760, %v27862_v22  ;;  %v21870_v22 = vpack.c.bf16 %v31925_v54, %v31924_v2  ;;  %v31937_v2 = vand.u32 4294901760, %v28046_v0 }
 0x30a   : > { %5403 = vmatmul.mubr.f32.gmra.mrb[4].mxu1 %v27933_v34  ;;  %15937 = vmatmul.mubr.f32.gmra.mrb[4].mxu0 %v15936_v16  ;;  %v31923_v16 = vand.u32 4294901760, %v27873_v28  ;;  %v31926_v28 = vand.u32 4294901760, %v27931_v23 }
 0x30b   : > { %5408 = vmatprep.mubr.f32.mxu1 %v31576_v33  ;;  %15942 = vmatprep.mubr.f32.mxu0 %v31576_v33 }
 0x30c   : > { %22519 = vmatpush1.bf16.msra.mxu0 %v22518_v8  ;;  %v21868_v39 = vpack.c.bf16 %v31923_v16, %v31922_v48  ;;  %v5869_v8 = vpop.permute.xlu0 %5868  ;;  %v31933_v16 = vand.u32 4294901760, %v27923_v17  ;;  %v31938_v17 = vand.u32 4294901760, %v28076_v62 }
 0x30d   : > { %22521 = vmatprep.subr.bf16.mxu0 %v22520_v53  ;;  %v5871_v53 = vpop.permute.xlu1 %5870 }
 0x30e   : > { %5410 = vmatmul.mubr.f32.gmra.mrb[6].mxu1 %v27964_v6  ;;  %15948 = vmatmul.mubr.f32.gmra.mrb[6].mxu0 %v15947_v45  ;;  %v31928_v45 = vand.u32 4294901760, %v27941_v44  ;;  %v5881_v44 = vsel %vm5880_vm6, %v5865_v35, %v5867_v21  ;;  %v5882_v7 = vsel %vm5880_vm6, %v5869_v8, %v5871_v53 }
 0x30f   : > { %5496 = vmatprep.mubr.f32.mxu1 %v31576_v33  ;;  %16058 = vmatprep.mubr.f32.mxu0 %v31576_v33 }
 0x310   : > { %v5873_v13 = vpop.permute.xlu0 %5872 }
 0x312   : > { %5499 = vmatmul.mubr.f32.vlgmr.msra.gmra.mrb[0].mxu1 %v27892_v12  ;;  %16060 = vmatmul.mubr.f32.vlgmr.msra.gmra.mrb[0].mxu0 %v28010_v30  ;;  %v31927_v12 = vand.u32 4294901760, %v27939_v11  ;;  %v31929_v11 = vand.u32 4294901760, %v27975_v3 }
 0x313   : > { %21859 = vmatpush1.bf16.msra.mxu1 %v27860_v56  ;;  %22523 = vmatpush1.bf16.msra.mxu0 %v22522_v51 }
 0x314   : > { %21861 = vmatprep.subr.bf16.mxu1 %v27884_v18  ;;  %5504 = vmatprep.mubr.f32.mxu1 %v31576_v33  ;;  %v22536_v51 = vpack.c.bf16 %v31928_v45, %v31927_v12  ;;  %v5877_v21 = vpop.permute.xlu0 %5876 }
 0x315   : > { %16065 = vmatprep.mubr.f32.mxu0 %v31576_v33  ;;  %22525 = vmatprep.subr.bf16.mxu0 %v22524_v14  ;;  %v5875_v14 = vpop.permute.xlu1 %5874 }
 0x316   : > { %5507 = vmatmul.mubr.f32.gmra.mrb[2].mxu1 %v27931_v23  ;;  %16067 = vmatmul.mubr.f32.gmra.mrb[2].mxu0 %v28038_v42  ;;  %v5898_v23 = vsel %vm5880_vm6, %v5871_v53, %v5869_v8  ;;  %v31936_v53 = vand.u32 4294901760, %v28042_v38  ;;  %v5883_v12 = vsel %vm5880_vm6, %v5873_v13, %v5875_v14  ;;  %v5899_v0 = vsel %vm5880_vm6, %v5875_v14, %v5873_v13 }
 0x317   : > { %21863 = vmatpush1.bf16.msra.mxu1 %v27898_v20  ;;  %22527 = vmatpush1.bf16.msra.mxu0 %v22526_v31 }
 0x318   : > { %21865 = vmatprep.subr.bf16.mxu1 %v21864_v25  ;;  %22529 = vmatprep.subr.bf16.mxu0 %v27925_v26  ;;  %v31931_v25 = vld [vmem:[#allocation60_spill] sm:$0xff]  ;;  %v22540_v54 = vpack.c.bf16 %v31937_v2, %v31936_v53  ;;  %v16536_v45 = vpop.permute.xlu0 %16535  ;;  %v31942_v2 = vld [vmem:[#allocation14_spill] sm:$0xff] }
 0x319   : > { %5512 = vmatprep.mubr.f32.mxu1 %v31576_v33  ;;  %16072 = vmatprep.mubr.f32.mxu0 %v31576_v33  ;;  %v28233_v4 = vmul.f32 %v31931_v25, %v5881_v44  ;;  %v28241_v35 = vmul.f32 %v31931_v25, %v5882_v7  ;;  %v21443_v7 = vld [vmem:[%s31126_s3 + $0xe0] sm:$0xff] }
 0x31a   : > { %5515 = vmatmul.mubr.f32.gmra.mrb[4].mxu1 %v27975_v3  ;;  %16074 = vmatmul.mubr.f32.gmra.mrb[4].mxu0 %v28066_v50  ;;  %v31932_v3 = vand.u32 4294901760, %v28000_v9 }
 0x31b   : > { %5520 = vmatprep.mubr.f32.mxu1 %v31576_v33  ;;  %16079 = vmatprep.mubr.f32.mxu0 %v31576_v33  ;;  %v5936_v48 = vand.u32 4294901760, %v28233_v4 }
 0x31e   : > { %5523 = vmatmul.mubr.f32.gmra.mrb[6].mxu1 %v28000_v9  ;;  %16081 = vmatmul.mubr.f32.gmra.mrb[6].mxu0 %v28096_v19  ;;  %v31935_v9 = vand.u32 4294901760, %v28036_v49 }
 0x31f   : > { %5601 = vmatprep.mubr.f32.mxu1 %v31576_v33  ;;  %16167 = vmatprep.mubr.f32.mxu0 %v31576_v33 }
 0x322   : > { %5605 = vmatmul.mubr.f32.vlgmr.msra.gmra.mrb[0].mxu1 %v31921_v36  ;;  %16170 = vmatmul.mubr.f32.vlgmr.msra.gmra.mrb[0].mxu0 %v28036_v49 }
 0x323   : > { %21867 = vmatpush1.bf16.msra.mxu1 %v21866_v15  ;;  %22531 = vmatpush1.bf16.msra.mxu0 %v27959_v10  ;;  %v5879_v15 = vpop.permute.xlu1 %5878 }
 0x324   : > { %21869 = vmatprep.subr.bf16.mxu1 %v21868_v39  ;;  %22533 = vmatprep.subr.bf16.mxu0 %v28050_v55  ;;  %v31934_v39 = vand.u32 4294901760, %v27968_v57  ;;  %v31939_v57 = vand.u32 4294901760, %v28080_v47  ;;  %v5900_v62 = vsel %vm5880_vm6, %v5879_v15, %v5877_v21 }
 0x325   : > { %5610 = vmatprep.mubr.f32.mxu1 %v31576_v33  ;;  %16175 = vmatprep.mubr.f32.mxu0 %v31576_v33 }
 0x326   : > { %5614 = vmatmul.mubr.f32.gmra.mrb[2].mxu1 %v31926_v28  ;;  %16178 = vmatmul.mubr.f32.gmra.mrb[2].mxu0 %v28064_v61  ;;  %v22538_v8 = vpack.c.bf16 %v31934_v39, %v31933_v16  ;;  %v5940_v28 = vand.u32 4294901760, %v28241_v35  ;;  %v22542_v49 = vpack.c.bf16 %v31939_v57, %v31938_v17  ;;  %v5923_v16 = vsel %vm656_vm0, %v21443_v7, 0  ;;  %v31943_v7 = vld [vmem:[#allocation9_spill] sm:$0xff] }
 0x327   : > { %21871 = vmatpush1.bf16.msra.mxu1 %v21870_v22  ;;  %22535 = vmatpush1.bf16.msra.mxu0 %v28078_v41 }
 0x328   : > { %21873 = vmatprep.subr.bf16.mxu1 %v27797_v43  ;;  %22537 = vmatprep.subr.bf16.mxu0 %v22536_v51  ;;  %v31930_v43 = vld [vmem:[#allocation57_spill] sm:$0xff]  ;;  %v28264_v51 = vpop.permute.xlu1 %16537  ;;  %v28286_v13 = vsub.f32 %v28241_v35, %v5940_v28  ;;  %v28333_v57 = vpack.c.bf16 %v5940_v28, %v5936_v48 }
 0x329   : > { %5619 = vmatprep.mubr.f32.mxu1 %v31576_v33  ;;  %16183 = vmatprep.mubr.f32.mxu0 %v31576_v33  ;;  %v5910_v31 = vmul.f32 %v31930_v43, %v5897_v32  ;;  %v5912_v60 = vmul.f32 %v31930_v43, %v5898_v23  ;;  %v5884_v32 = vsel %vm5880_vm6, %v5877_v21, %v5879_v15  ;;  %v31940_v23 = vand.u32 4294901760, %v28064_v61 }
 0x32a   : > { %5623 = vmatmul.mubr.f32.gmra.mrb[4].mxu1 %v31929_v11  ;;  %16186 = vmatmul.mubr.f32.gmra.mrb[4].mxu0 %v28094_v5  ;;  %v5914_v14 = vmul.f32 %v31930_v43, %v5899_v0  ;;  %v5915_v11 = vmul.f32 %v31931_v25, %v5884_v32  ;;  %v5916_v61 = vmul.f32 %v31930_v43, %v5900_v62  ;;  %v31415_v21 = vand.u32 4294901760, %v28286_v13 }
 0x32b   : > { %5628 = vmatprep.mubr.f32.mxu1 %v31576_v33  ;;  %16191 = vmatprep.mubr.f32.mxu0 %v31576_v33  ;;  %v5934_v63 = vand.u32 4294901760, %v5910_v31  ;;  %v5938_v36 = vand.u32 4294901760, %v5912_v60  ;;  %v28342_v0 = vand.u32 4294901760, %v5923_v16 }
 0x32c   : > { %v5942_v15 = vand.u32 4294901760, %v5914_v14  ;;  %v5946_v39 = vand.u32 4294901760, %v5916_v61  ;;  %v28347_v32 = vsub.f32 %v28286_v13, %v31415_v21 }
 0x32d   : > { %v28255_v22 = vsub.f32 %v5910_v31, %v5934_v63  ;;  %v28266_v38 = vsub.f32 %v5912_v60, %v5938_v36  ;;  %v28277_v47 = vpack.c.bf16 %v5938_v36, %v5934_v63  ;;  %v5948_v36 = vand.u32 4294901760, %v5915_v11 }
 0x32e   : > { %16194 = vmatmul.mubr.f32.gmra.mrb[6].mxu0 %v28119_v24  ;;  %5632 = vmatmul.mubr.f32.gmra.mrb[6].mxu1 %v31932_v3  ;;  %v31941_v3 = vand.u32 4294901760, %v28094_v5  ;;  %v28349_v62 = vsub.f32 %v5914_v14, %v5942_v15  ;;  %v21445_v14 = vld [vmem:[%s31126_s3 + $0xf0] sm:$0xff] }
 0x32f   : > { %5726 = vmatprep.mubr.f32.mxu1 %v31576_v33  ;;  %16272 = vmatprep.mubr.f32.mxu0 %v31576_v33  ;;  %v31423_v44 = vand.u32 4294901760, %v28255_v22  ;;  %v31422_v31 = vand.u32 4294901760, %v28266_v38 }
 0x331   : > { %v6054_v5 = vsub.f32 %v28255_v22, %v31423_v44 }
 0x332   : > { %16276 = vmatmul.mubr.f32.vlgmr.msra.gmra.mrb[0].mxu0 %v31935_v9  ;;  %5728 = vmatmul.mubr.f32.vlgmr.msra.gmra.mrb[0].mxu1 %v27856_v1  ;;  %v21444_v9 = vld [vmem:[%s31126_s3 + $0xe8] sm:$0xff] }
 0x333   : > { %22539 = vmatpush1.bf16.msra.mxu0 %v22538_v8  ;;  %21875 = vmatpush1.bf16.msra.mxu1 %v27860_v56  ;;  %v28272_v56 = vsub.f32 %v28233_v4, %v5936_v48  ;;  %v6066_v8 = vsub.f32 %v28266_v38, %v31422_v31  ;;  %v28351_v48 = vsub.f32 %v5915_v11, %v5948_v36  ;;  %v5926_v24 = vsel %vm656_vm0, %v21444_v9, 0 }
 0x334   : > { %21877 = vmatprep.subr.bf16.mxu1 %v27884_v18  ;;  %22541 = vmatprep.subr.bf16.mxu0 %v22540_v54  ;;  %v28282_v18 = vmul.f32 %v31931_v25, %v5883_v12  ;;  %v6055_v28 = vand.u32 4294901760, %v6054_v5  ;;  %v28365_v11 = vpack.c.bf16 %v5946_v39, %v5942_v15  ;;  %v21504_v25 = vld [vmem:[%s31126_s3 + $0x2a8] sm:$0xff] }
 0x335   : > { %5733 = vmatprep.mubr.f32.mxu1 %v31576_v33  ;;  %16281 = vmatprep.mubr.f32.mxu0 %v31576_v33  ;;  %v31418_v60 = vand.u32 4294901760, %v28272_v56 }
 0x336   : > { %16285 = vmatmul.mubr.f32.gmra.mrb[2].mxu0 %v31940_v23  ;;  %5735 = vmatmul.mubr.f32.gmra.mrb[2].mxu1 %v27894_v29  ;;  %v5944_v4 = vand.u32 4294901760, %v28282_v18 }
 0x337   : > { %22543 = vmatpush1.bf16.msra.mxu0 %v22542_v49  ;;  %21879 = vmatpush1.bf16.msra.mxu1 %v27898_v20  ;;  %v16548_v20 = vpop.permute.xlu0 %16547  ;;  %v28325_v53 = vsub.f32 %v28272_v56, %v31418_v60 }
 0x338   : > { %22545 = vmatprep.subr.bf16.mxu0 %v27925_v26  ;;  %5740 = vmatprep.mubr.f32.mxu1 %v31576_v33  ;;  %v16550_v26 = vpop.permute.xlu1 %16549  ;;  %v16555_v63 = vsel %vm2849_vm7, %v16548_v20, %v16536_v45  ;;  %v28336_v49 = vsub.f32 %v28282_v18, %v5944_v4  ;;  %v16567_v12 = vsel %vm2849_vm7, %v16536_v45, %v16548_v20  ;;  %v6067_v45 = vand.u32 4294901760, %v6066_v8 }
 0x339   : > { %16290 = vmatprep.mubr.f32.mxu0 %v31576_v33  ;;  %21881 = vmatprep.subr.bf16.mxu1 %v28277_v47  ;;  %v16556_v35 = vsel %vm2849_vm7, %v16550_v26, %v28264_v51  ;;  %v28328_v54 = vmul.f32 %v16555_v63, %v31942_v2  ;;  %v16568_v23 = vsel %vm2849_vm7, %v28264_v51, %v16550_v26  ;;  %v28380_v26 = vand.u32 4294901760, %v5926_v24 }
 0x33a   : > { %16294 = vmatmul.mubr.f32.gmra.mrb[4].mxu0 %v31941_v3  ;;  %5742 = vmatmul.mubr.f32.gmra.mrb[4].mxu1 %v27933_v34  ;;  %v28331_v17 = vmul.f32 %v16556_v35, %v31942_v2  ;;  %v28368_v20 = vmul.f32 %v16567_v12, %v31943_v7  ;;  %v31416_v35 = vand.u32 4294901760, %v28336_v49  ;;  %v28378_v51 = vsub.f32 %v5923_v16, %v28342_v0  ;;  %v21446_v16 = vld [vmem:[%s31126_s3 + $0xf8] sm:$0xff] }
 0x33b   : > { %5747 = vmatprep.mubr.f32.mxu1 %v31576_v33  ;;  %16299 = vmatprep.mubr.f32.mxu0 %v31576_v33  ;;  %v28360_v18 = vpop.permute.xlu0 %16539  ;;  %v16596_v3 = vand.u32 4294901760, %v28328_v54  ;;  %v28382_v15 = vpack.c.bf16 %v5948_v36, %v5944_v4  ;;  %v28388_v5 = vmul.f32 %v16568_v23, %v31943_v7  ;;  %v21888_v4 = vpack.c.bf16 %v6067_v45, %v6055_v28 }
 0x33c   : > { %v28372_v63 = vpop.permute.xlu1 %16541  ;;  %v31420_v36 = vand.u32 4294901760, %v28349_v62  ;;  %v6061_v9 = vand.u32 4294901760, %v28325_v53  ;;  %v6073_v12 = vand.u32 4294901760, %v28347_v32  ;;  %v28409_v45 = vsub.f32 %v5926_v24, %v28380_v26 }
 0x33d   : > { %v5932_v21 = vsel %vm656_vm0, %v21446_v16, 0  ;;  %v28417_v53 = vsub.f32 %v28336_v49, %v31416_v35  ;;  %v16602_v24 = vand.u32 4294901760, %v28388_v5  ;;  %v28432_v35 = vsub.f32 %v28328_v54, %v16596_v3 }
 0x33e   : > { %5749 = vmatmul.mubr.f32.gmra.mrb[6].mxu1 %v27964_v6  ;;  %16303 = vmatmul.mubr.f32.gmra.mrb[6].mxu0 %v15945_v52  ;;  %v28356_v52 = vsub.f32 %v5916_v61, %v5946_v39  ;;  %v16600_v61 = vand.u32 4294901760, %v28331_v17  ;;  %v31417_v39 = vand.u32 4294901760, %v28351_v48  ;;  %v21890_v60 = vpack.c.bf16 %v6073_v12, %v6061_v9 }
 0x33f   : > { %5827 = vmatprep.mubr.f32.mxu1 %v31576_v33  ;;  %16397 = vmatprep.mubr.f32.mxu0 %v31576_v33  ;;  %v16552_v28 = vpop.permute.xlu0 %16551 }
 0x340   : > { %v31419_v8 = vand.u32 4294901760, %v28356_v52  ;;  %v28403_v23 = vpack.c.bf16 %v16600_v61, %v16596_v3  ;;  %v16554_v16 = vpop.permute.xlu1 %16553  ;;  %v16557_v54 = vsel %vm2849_vm7, %v16552_v28, %v28360_v18  ;;  %v28450_v3 = vand.u32 4294901760, %v5932_v21 }
 0x342   : > { %5829 = vmatmul.mubr.f32.vlgmr.msra.gmra.mrb[0].mxu1 %v27856_v1  ;;  %16399 = vmatmul.mubr.f32.vlgmr.msra.gmra.mrb[0].mxu0 %v28010_v30  ;;  %v5929_v1 = vsel %vm656_vm0, %v21445_v14, 0 }
 0x343   : > { %21883 = vmatpush1.bf16.msra.mxu1 %v28333_v57  ;;  %22547 = vmatpush1.bf16.msra.mxu0 %v27959_v10  ;;  %v16598_v10 = vand.u32 4294901760, %v28368_v20  ;;  %v28411_v14 = vand.u32 4294901760, %v5929_v1 }
 0x344   : > { %22549 = vmatprep.subr.bf16.mxu0 %v28050_v55  ;;  %5834 = vmatprep.mubr.f32.mxu1 %v31576_v33  ;;  %v31421_v55 = vand.u32 4294901760, %v28378_v51 }
 0x345   : > { %21885 = vmatprep.subr.bf16.mxu1 %v28365_v11  ;;  %16404 = vmatprep.mubr.f32.mxu0 %v31576_v33  ;;  %v28427_v32 = vsub.f32 %v28368_v20, %v16598_v10  ;;  %v21503_v20 = vld [vmem:[%s31126_s3 + $0x2a0] sm:$0xff]  ;;  %v28461_v9 = vsub.f32 %v5929_v1, %v28411_v14  ;;  %v16570_v1 = vsel %vm2849_vm7, %v28372_v63, %v16554_v16 }
 0x346   : > { %5836 = vmatmul.mubr.f32.gmra.mrb[2].mxu1 %v27894_v29  ;;  %16406 = vmatmul.mubr.f32.gmra.mrb[2].mxu0 %v28038_v42  ;;  %v28422_v29 = vsub.f32 %v28351_v48, %v31417_v39  ;;  %v6078_v39 = vsub.f32 %v28349_v62, %v31420_v36  ;;  %v28466_v36 = vpack.c.bf16 %v16602_v24, %v16598_v10 }
 0x347   : > { %21887 = vmatpush1.bf16.msra.mxu1 %v28382_v15  ;;  %22551 = vmatpush1.bf16.msra.mxu0 %v28078_v41  ;;  %v6090_v41 = vsub.f32 %v28356_v52, %v31419_v8  ;;  %v6010_v8 = vsub.f32 %v28378_v51, %v31421_v55  ;;  %v16585_v55 = vsel %vm656_vm0, %v21503_v20, 0  ;;  %v28479_v10 = vsub.f32 %v5932_v21, %v28450_v3 }
 0x348   : > { %21889 = vmatprep.subr.bf16.mxu1 %v21888_v4  ;;  %5841 = vmatprep.mubr.f32.mxu1 %v31576_v33  ;;  %v28445_v4 = vsub.f32 %v28331_v17, %v16600_v61  ;;  %v16558_v17 = vsel %vm2849_vm7, %v16554_v16, %v28372_v63  ;;  %v6079_v31 = vand.u32 4294901760, %v6078_v39  ;;  %v16576_v61 = vmul.f32 %v16557_v54, %v31942_v2 }
 0x349   : > { %16411 = vmatprep.mubr.f32.mxu0 %v31576_v33  ;;  %22553 = vmatprep.subr.bf16.mxu0 %v28403_v23  ;;  %v6091_v44 = vand.u32 4294901760, %v6090_v41  ;;  %v16578_v12 = vmul.f32 %v16558_v17, %v31942_v2  ;;  %v6011_v39 = vand.u32 4294901760, %v6010_v8  ;;  %v31944_v63 = vand.u32 4294901760, %v28409_v45 }
 0x34a   : > { %16413 = vmatmul.mubr.f32.gmra.mrb[4].mxu0 %v28066_v50  ;;  %5843 = vmatmul.mubr.f32.gmra.mrb[4].mxu1 %v27933_v34  ;;  %v16569_v34 = vsel %vm2849_vm7, %v28360_v18, %v16552_v28  ;;  %v28489_v20 = vand.u32 4294901760, %v16585_v55  ;;  %v28492_v21 = vsub.f32 %v28388_v5, %v16602_v24  ;;  %v16588_v8 = vsel %vm656_vm0, %v21504_v25, 0  ;;  %v21505_v5 = vld [vmem:[%s31126_s3 + $0x2b0] sm:$0xff] }
 0x34b   : > { %5848 = vmatprep.mubr.f32.mxu1 %v31576_v33  ;;  %16418 = vmatprep.mubr.f32.mxu0 %v31576_v33  ;;  %v6021_v16 = vsub.f32 %v28409_v45, %v31944_v63  ;;  %v16575_v54 = vmul.f32 %v16569_v34, %v31943_v7  ;;  %v21892_v17 = vpack.c.bf16 %v6091_v44, %v6079_v31  ;;  %v16604_v28 = vand.u32 4294901760, %v16576_v61 }
 0x34c   : > { %v16577_v63 = vmul.f32 %v16570_v1, %v31943_v7  ;;  %v6097_v41 = vand.u32 4294901760, %v28422_v29  ;;  %v16608_v24 = vand.u32 4294901760, %v16578_v12  ;;  %v31945_v2 = vand.u32 4294901760, %v28432_v35 }
 0x34d   : > { %v6022_v44 = vand.u32 4294901760, %v6021_v16  ;;  %v31947_v31 = vand.u32 4294901760, %v28461_v9  ;;  %v28516_v1 = vsub.f32 %v16585_v55, %v28489_v20  ;;  %v28518_v18 = vand.u32 4294901760, %v16588_v8 }
 0x34e   : > { %16420 = vmatmul.mubr.f32.gmra.mrb[6].mxu0 %v28096_v19  ;;  %5850 = vmatmul.mubr.f32.gmra.mrb[6].mxu1 %v27964_v6  ;;  %v6085_v6 = vand.u32 4294901760, %v28417_v53  ;;  %v16716_v34 = vsub.f32 %v28432_v35, %v31945_v2  ;;  %v31946_v53 = vand.u32 4294901760, %v28445_v4  ;;  %v16606_v2 = vand.u32 4294901760, %v16575_v54 }
 0x34f   : > { %6006 = vmatprep.mubr.f32.mxu1 %v31576_v33  ;;  %16498 = vmatprep.mubr.f32.mxu0 %v31576_v33  ;;  %v6032_v29 = vsub.f32 %v28461_v9, %v31947_v31  ;;  %v28526_v16 = vsub.f32 %v16578_v12, %v16608_v24  ;;  %v21896_v31 = vpack.c.bf16 %v28266_v38, %v28255_v22  ;;  %v31949_v58 = vand.u32 4294901760, %v28427_v32 }
 0x350   : > { %v16728_v25 = vsub.f32 %v28445_v4, %v31946_v53  ;;  %v28522_v53 = vsub.f32 %v16576_v61, %v16604_v28  ;;  %v21894_v55 = vpack.c.bf16 %v6097_v41, %v6085_v6  ;;  %v31948_v61 = vand.u32 4294901760, %v28479_v10 }
 0x351   : > { %v16717_v7 = vand.u32 4294901760, %v16716_v34  ;;  %v6033_v12 = vand.u32 4294901760, %v6032_v29  ;;  %v16671_v41 = vand.u32 4294901760, %v28516_v1  ;;  %v28542_v6 = vsub.f32 %v16588_v8, %v28518_v18 }
 0x352   : > { %16500 = vmatmul.mubr.f32.vlgmr.msra.gmra.mrb[0].mxu0 %v28010_v30  ;;  %6012 = vmatmul.mubr.f32.vlgmr.msra.gmra.mrb[0].mxu1 %v6011_v39  ;;  %v16591_v30 = vsel %vm656_vm0, %v21505_v5, 0  ;;  %v16610_v39 = vand.u32 4294901760, %v16577_v63  ;;  %v6043_v5 = vsub.f32 %v28479_v10, %v31948_v61  ;;  %v16729_v43 = vand.u32 4294901760, %v16728_v25 }
 0x353   : > { %21891 = vmatpush1.bf16.msra.mxu1 %v21890_v60  ;;  %6017 = vmatprep.mubr.f32.mxu1 %v31576_v33  ;;  %v21506_v60 = vld [vmem:[%s31126_s3 + $0x2b8] sm:$0xff]  ;;  %v28544_v27 = vand.u32 4294901760, %v16591_v30  ;;  %v16722_v46 = vsub.f32 %v28427_v32, %v31949_v58  ;;  %v28554_v34 = vsub.f32 %v16575_v54, %v16606_v2  ;;  %v16739_v29 = vand.u32 4294901760, %v28522_v53 }
 0x354   : > { %21893 = vmatprep.subr.bf16.mxu1 %v21892_v17  ;;  %16505 = vmatprep.mubr.f32.mxu0 %v31576_v33  ;;  %v28537_v17 = vpack.c.bf16 %v16608_v24, %v16604_v28  ;;  %v31950_v28 = vand.u32 4294901760, %v28492_v21  ;;  %v28556_v25 = vpack.c.bf16 %v16610_v39, %v16606_v2  ;;  %v28558_v8 = vsub.f32 %v16577_v63, %v16610_v39 }
 0x355   : > { %22555 = vmatpush1.bf16.msra.mxu0 %v28466_v36  ;;  %v22560_v58 = vpack.c.bf16 %v16729_v43, %v16717_v7  ;;  %v16672_v54 = vsub.f32 %v28516_v1, %v16671_v41  ;;  %v31430_v63 = vand.u32 4294901760, %v28542_v6  ;;  %v28570_v2 = vsub.f32 %v16591_v30, %v28544_v27 }
 0x356   : > { %16507 = vmatmul.mubr.f32.gmra.mrb[2].mxu0 %v28038_v42  ;;  %6023 = vmatmul.mubr.f32.gmra.mrb[2].mxu1 %v6022_v44  ;;  %v16734_v24 = vsub.f32 %v28492_v21, %v31950_v28  ;;  %v16594_v42 = vsel %vm656_vm0, %v21506_v60, 0  ;;  %v6044_v44 = vand.u32 4294901760, %v6043_v5  ;;  %v31431_v43 = vand.u32 4294901760, %v28554_v34 }
 0x357   : > { %21895 = vmatpush1.bf16.msra.mxu1 %v21894_v55  ;;  %6028 = vmatprep.mubr.f32.mxu1 %v31576_v33  ;;  %v31432_v55 = vand.u32 4294901760, %v28526_v16  ;;  %v28572_v39 = vand.u32 4294901760, %v16594_v42  ;;  %v16757_v7 = vand.u32 4294901760, %v28558_v8  ;;  %v16740_v30 = vsub.f32 %v28522_v53, %v16739_v29 }
 0x358   : > { %21897 = vmatprep.subr.bf16.mxu1 %v21896_v31  ;;  %16512 = vmatprep.mubr.f32.mxu0 %v31576_v33  ;;  %v16735_v31 = vand.u32 4294901760, %v16734_v24  ;;  %v16673_v61 = vand.u32 4294901760, %v16672_v54  ;;  %v16683_v5 = vsub.f32 %v28542_v6, %v31430_v63  ;;  %v16746_v28 = vsub.f32 %v28554_v34, %v31431_v43 }
 0x359   : > { %22557 = vmatprep.subr.bf16.mxu0 %v28537_v17  ;;  %v16752_v60 = vsub.f32 %v28526_v16, %v31432_v55  ;;  %v21898_v24 = vpack.c.bf16 %v28286_v13, %v28272_v56 }
 0x35a   : > { %6034 = vmatmul.mubr.f32.gmra.mrb[4].mxu1 %v6033_v12  ;;  %16514 = vmatmul.mubr.f32.gmra.mrb[4].mxu0 %v28066_v50  ;;  %v16723_v50 = vand.u32 4294901760, %v16722_v46  ;;  %v16693_v12 = vand.u32 4294901760, %v28570_v2  ;;  %v28591_v46 = vsub.f32 %v16594_v42, %v28572_v39  ;;  %v21900_v42 = vpack.c.bf16 %v28356_v52, %v28349_v62 }
 0x35b   : > { %6039 = vmatprep.mubr.f32.mxu1 %v31576_v33  ;;  %16519 = vmatprep.mubr.f32.mxu0 %v31576_v33  ;;  %v16753_v54 = vand.u32 4294901760, %v16752_v60  ;;  %v16684_v63 = vand.u32 4294901760, %v16683_v5 }
 0x35c   : > { %22559 = vmatpush1.bf16.msra.mxu0 %v28556_v25  ;;  %v16694_v43 = vsub.f32 %v28570_v2, %v16693_v12  ;;  %v16704_v55 = vand.u32 4294901760, %v28591_v46 }
 0x35d   : > { %22561 = vmatprep.subr.bf16.mxu0 %v22560_v58  ;;  %v16741_v58 = vand.u32 4294901760, %v16740_v30  ;;  %v21902_v30 = vpack.c.bf16 %v28351_v48, %v28336_v49 }
 0x35e   : > { %6045 = vmatmul.mubr.f32.gmra.mrb[6].mxu1 %v6044_v44  ;;  %16521 = vmatmul.mubr.f32.gmra.mrb[6].mxu0 %v28096_v19  ;;  %v16758_v19 = vsub.f32 %v28558_v8, %v16757_v7  ;;  %v22562_v44 = vpack.c.bf16 %v16735_v31, %v16723_v50  ;;  %v16747_v50 = vand.u32 4294901760, %v16746_v28  ;;  %v16705_v5 = vsub.f32 %v28591_v46, %v16704_v55 }
 0x35f   : > { %6155 = vmatprep.mubr.f32.mxu1 %v31576_v33  ;;  %16668 = vmatprep.mubr.f32.mxu0 %v31576_v33  ;;  %v22564_v60 = vpack.c.bf16 %v16753_v54, %v16741_v58  ;;  %v31951_v58 = vand.u32 4294901760, %v28255_v22  ;;  %v31952_v54 = vand.u32 4294901760, %v28266_v38  ;;  %v6633_v22 = vpop.permute.xlu0 %6632  ;;  %v6635_v38 = vpop.permute.xlu1 %6634 }
 0x360   : > { %v16759_v31 = vand.u32 4294901760, %v16758_v19  ;;  %v22568_v19 = vpack.c.bf16 %v28445_v4, %v28432_v35 }
 0x362   : > { %6157 = vmatmul.mubr.f32.vlgmr.msra.gmra.mrb[0].mxu1 %v28342_v0  ;;  %16674 = vmatmul.mubr.f32.vlgmr.msra.gmra.mrb[0].mxu0 %v16673_v61  ;;  %v16695_v61 = vand.u32 4294901760, %v16694_v43  ;;  %v22566_v28 = vpack.c.bf16 %v16759_v31, %v16747_v50  ;;  %v22570_v43 = vpack.c.bf16 %v28492_v21, %v28427_v32  ;;  %v31953_v50 = vand.u32 4294901760, %v28272_v56 }
 0x363   : > { %21899 = vmatpush1.bf16.msra.mxu1 %v21898_v24  ;;  %6162 = vmatprep.mubr.f32.mxu1 %v31576_v33  ;;  %v22572_v24 = vpack.c.bf16 %v28526_v16, %v28522_v53  ;;  %v31954_v31 = vand.u32 4294901760, %v28286_v13  ;;  %v31958_v56 = vand.u32 4294901760, %v28336_v49  ;;  %v31959_v13 = vand.u32 4294901760, %v28351_v48 }
 0x364   : > { %21901 = vmatprep.subr.bf16.mxu1 %v21900_v42  ;;  %16679 = vmatprep.mubr.f32.mxu0 %v31576_v33  ;;  %v21912_v42 = vpack.c.bf16 %v31952_v54, %v31951_v58  ;;  %v6665_v49 = vsel %vm6648_vm8, %v6635_v38, %v6633_v22  ;;  %v6649_v58 = vsel %vm6648_vm8, %v6633_v22, %v6635_v38  ;;  %v31965_v38 = vand.u32 4294901760, %v28427_v32 }
 0x365   : > { %22563 = vmatpush1.bf16.msra.mxu0 %v22562_v44  ;;  %v22574_v44 = vpack.c.bf16 %v28558_v8, %v28554_v34 }
 0x366   : > { %6164 = vmatmul.mubr.f32.gmra.mrb[2].mxu1 %v28380_v26  ;;  %16685 = vmatmul.mubr.f32.gmra.mrb[2].mxu0 %v16684_v63  ;;  %v16706_v63 = vand.u32 4294901760, %v16705_v5  ;;  %v31957_v5 = vand.u32 4294901760, %v28356_v52  ;;  %v31960_v52 = vand.u32 4294901760, %v28409_v45 }
 0x367   : > { %21903 = vmatpush1.bf16.msra.mxu1 %v21902_v30  ;;  %6169 = vmatprep.mubr.f32.mxu1 %v31576_v33  ;;  %v21914_v30 = vpack.c.bf16 %v31954_v31, %v31953_v50  ;;  %v24186_v50 = vld [vmem:[%s31128_s5 + $0x10] ss:$0 sm:$0xff] }
 0x368   : > { %21905 = vmatprep.subr.bf16.mxu1 %v28277_v47  ;;  %16690 = vmatprep.mubr.f32.mxu0 %v31576_v33  ;;  %v6677_v31 = vmul.f32 %v24186_v50, %v6649_v58  ;;  %v31970_v58 = vld [vmem:[#allocation10_spill] sm:$0xff] }
 0x369   : > { %22565 = vmatprep.subr.bf16.mxu0 %v22564_v60  ;;  %v31955_v60 = vand.u32 4294901760, %v28378_v51 }
 0x36a   : > { %6171 = vmatmul.mubr.f32.gmra.mrb[4].mxu1 %v28411_v14  ;;  %16696 = vmatmul.mubr.f32.gmra.mrb[4].mxu0 %v16695_v61  ;;  %v31956_v61 = vand.u32 4294901760, %v28349_v62  ;;  %v6639_v62 = vpop.permute.xlu1 %6638 }
 0x36b   : > { %6176 = vmatprep.mubr.f32.mxu1 %v31576_v33  ;;  %16701 = vmatprep.mubr.f32.mxu0 %v31576_v33 }
 0x36c   : > { %22567 = vmatpush1.bf16.msra.mxu0 %v22566_v28  ;;  %v21916_v28 = vpack.c.bf16 %v31957_v5, %v31956_v61  ;;  %v31966_v61 = vand.u32 4294901760, %v28492_v21 }
 0x36d   : > { %22569 = vmatprep.subr.bf16.mxu0 %v22568_v19  ;;  %v6637_v19 = vpop.permute.xlu0 %6636 }
 0x36e   : > { %6178 = vmatmul.mubr.f32.gmra.mrb[6].mxu1 %v28450_v3  ;;  %16707 = vmatmul.mubr.f32.gmra.mrb[6].mxu0 %v16706_v63  ;;  %v31961_v63 = vand.u32 4294901760, %v28432_v35  ;;  %v6666_v48 = vsel %vm6648_vm8, %v6639_v62, %v6637_v19  ;;  %v22586_v5 = vpack.c.bf16 %v31966_v61, %v31965_v38  ;;  %v21451_v61 = vld [vmem:[%s31126_s3 + $0x110] sm:$0xff] }
 0x36f   : > { %6264 = vmatprep.mubr.f32.mxu1 %v31576_v33  ;;  %16817 = vmatprep.mubr.f32.mxu0 %v31576_v33 }
 0x372   : > { %6267 = vmatmul.mubr.f32.vlgmr.msra.gmra.mrb[0].mxu1 %v28378_v51  ;;  %16819 = vmatmul.mubr.f32.vlgmr.msra.gmra.mrb[0].mxu0 %v28489_v20  ;;  %v21918_v51 = vpack.c.bf16 %v31959_v13, %v31958_v56  ;;  %v31967_v56 = vand.u32 4294901760, %v28526_v16 }
 0x373   : > { %21907 = vmatpush1.bf16.msra.mxu1 %v28333_v57  ;;  %22571 = vmatpush1.bf16.msra.mxu0 %v22570_v43  ;;  %v31962_v43 = vand.u32 4294901760, %v28445_v4  ;;  %v6641_v4 = vpop.permute.xlu0 %6640 }
 0x374   : > { %21909 = vmatprep.subr.bf16.mxu1 %v28365_v11  ;;  %6272 = vmatprep.mubr.f32.mxu1 %v31576_v33  ;;  %v22588_v13 = vpack.c.bf16 %v31967_v56, %v16739_v29 }
 0x375   : > { %16824 = vmatprep.mubr.f32.mxu0 %v31576_v33  ;;  %22573 = vmatprep.subr.bf16.mxu0 %v22572_v24  ;;  %v22584_v24 = vpack.c.bf16 %v31962_v43, %v31961_v63 }
 0x376   : > { %6275 = vmatmul.mubr.f32.gmra.mrb[2].mxu1 %v28409_v45  ;;  %16826 = vmatmul.mubr.f32.gmra.mrb[2].mxu0 %v28518_v18  ;;  %v31963_v45 = vand.u32 4294901760, %v28461_v9 }
 0x377   : > { %21911 = vmatpush1.bf16.msra.mxu1 %v28382_v15  ;;  %22575 = vmatpush1.bf16.msra.mxu0 %v22574_v44  ;;  %v6643_v44 = vpop.permute.xlu1 %6642 }
 0x378   : > { %21913 = vmatprep.subr.bf16.mxu1 %v21912_v42  ;;  %22577 = vmatprep.subr.bf16.mxu0 %v28403_v23  ;;  %v6650_v42 = vsel %vm6648_vm8, %v6637_v19, %v6639_v62  ;;  %v6651_v32 = vsel %vm6648_vm8, %v6641_v4, %v6643_v44  ;;  %v6667_v21 = vsel %vm6648_vm8, %v6643_v44, %v6641_v4  ;;  %v21450_v44 = vld [vmem:[%s31126_s3 + $0x108] sm:$0xff] }
 0x379   : > { %6280 = vmatprep.mubr.f32.mxu1 %v31576_v33  ;;  %16831 = vmatprep.mubr.f32.mxu0 %v31576_v33 }
 0x37a   : > { %6283 = vmatmul.mubr.f32.gmra.mrb[4].mxu1 %v28461_v9  ;;  %16833 = vmatmul.mubr.f32.gmra.mrb[4].mxu0 %v28544_v27  ;;  %v31964_v9 = vand.u32 4294901760, %v28479_v10 }
 0x37b   : > { %6288 = vmatprep.mubr.f32.mxu1 %v31576_v33  ;;  %16838 = vmatprep.mubr.f32.mxu0 %v31576_v33 }
 0x37e   : > { %6291 = vmatmul.mubr.f32.gmra.mrb[6].mxu1 %v28479_v10  ;;  %16840 = vmatmul.mubr.f32.gmra.mrb[6].mxu0 %v28572_v39  ;;  %v6647_v10 = vpop.permute.xlu1 %6646 }
 0x37f   : > { %6369 = vmatprep.mubr.f32.mxu1 %v31576_v33  ;;  %16926 = vmatprep.mubr.f32.mxu0 %v31576_v33 }
 0x382   : > { %6373 = vmatmul.mubr.f32.vlgmr.msra.gmra.mrb[0].mxu1 %v31955_v60  ;;  %16929 = vmatmul.mubr.f32.vlgmr.msra.gmra.mrb[0].mxu0 %v28516_v1  ;;  %v6679_v60 = vmul.f32 %v24186_v50, %v6650_v42  ;;  %v17297_v42 = vmul.f32 %v31874_v59, %v31970_v58 }
 0x383   : > { %21915 = vmatpush1.bf16.msra.mxu1 %v21914_v30  ;;  %22579 = vmatpush1.bf16.msra.mxu0 %v28466_v36 }
 0x384   : > { %21917 = vmatprep.subr.bf16.mxu1 %v21916_v28  ;;  %22581 = vmatprep.subr.bf16.mxu0 %v28537_v17  ;;  %v6645_v28 = vpop.permute.xlu0 %6644  ;;  %v6708_v62 = vand.u32 4294901760, %v6679_v60 }
 0x385   : > { %6378 = vmatprep.mubr.f32.mxu1 %v31576_v33  ;;  %16934 = vmatprep.mubr.f32.mxu0 %v31576_v33  ;;  %v6652_v53 = vsel %vm6648_vm8, %v6645_v28, %v6647_v10  ;;  %v6668_v16 = vsel %vm6648_vm8, %v6647_v10, %v6645_v28  ;;  %v17323_v10 = vand.u32 4294901760, %v17297_v42 }
 0x386   : > { %6382 = vmatmul.mubr.f32.gmra.mrb[2].mxu1 %v31960_v52  ;;  %16937 = vmatmul.mubr.f32.gmra.mrb[2].mxu0 %v28542_v6  ;;  %v31969_v52 = vand.u32 4294901760, %v28542_v6  ;;  %v6683_v43 = vmul.f32 %v24186_v50, %v6652_v53 }
 0x387   : > { %21919 = vmatpush1.bf16.msra.mxu1 %v21918_v51  ;;  %22583 = vmatpush1.bf16.msra.mxu0 %v28556_v25  ;;  %v6704_v51 = vand.u32 4294901760, %v6677_v31 }
 0x388   : > { %21921 = vmatprep.subr.bf16.mxu1 %v28277_v47  ;;  %22585 = vmatprep.subr.bf16.mxu0 %v22584_v24  ;;  %v24185_v47 = vld [vmem:[%s31128_s5 + $0x18] ss:$0 sm:$0xff] }
 0x389   : > { %6387 = vmatprep.mubr.f32.mxu1 %v31576_v33  ;;  %16942 = vmatprep.mubr.f32.mxu0 %v31576_v33  ;;  %v6678_v35 = vmul.f32 %v24185_v47, %v6665_v49  ;;  %v6680_v54 = vmul.f32 %v24185_v47, %v6666_v48  ;;  %v6682_v63 = vmul.f32 %v24185_v47, %v6667_v21  ;;  %v21452_v21 = vld [vmem:[%s31126_s3 + $0x118] sm:$0xff] }
 0x38a   : > { %6391 = vmatmul.mubr.f32.gmra.mrb[4].mxu1 %v31963_v45  ;;  %16945 = vmatmul.mubr.f32.gmra.mrb[4].mxu0 %v28570_v2  ;;  %v6684_v24 = vmul.f32 %v24185_v47, %v6668_v16  ;;  %v28742_v49 = vsub.f32 %v6677_v31, %v6704_v51  ;;  %v6716_v45 = vand.u32 4294901760, %v6683_v43  ;;  %v6697_v16 = vsel %vm656_vm0, %v21451_v61, 0 }
 0x38b   : > { %6396 = vmatprep.mubr.f32.mxu1 %v31576_v33  ;;  %16950 = vmatprep.mubr.f32.mxu0 %v31576_v33  ;;  %v6702_v30 = vand.u32 4294901760, %v6678_v35  ;;  %v6706_v22 = vand.u32 4294901760, %v6680_v54 }
 0x38c   : > { %v6714_v48 = vand.u32 4294901760, %v6684_v24 }
 0x38d   : > { %v28720_v19 = vsub.f32 %v6678_v35, %v6702_v30  ;;  %v28725_v1 = vsub.f32 %v6680_v54, %v6706_v22  ;;  %v28736_v29 = vpack.c.bf16 %v6706_v22, %v6702_v30  ;;  %v6827_v35 = vand.u32 4294901760, %v28742_v49 }
 0x38e   : > { %16953 = vmatmul.mubr.f32.gmra.mrb[6].mxu0 %v28591_v46  ;;  %6400 = vmatmul.mubr.f32.gmra.mrb[6].mxu1 %v31964_v9  ;;  %v17295_v54 = vmul.f32 %v31866_v40, %v31970_v58  ;;  %v28776_v9 = vpack.c.bf16 %v6708_v62, %v6704_v51  ;;  %v28789_v22 = vsub.f32 %v6683_v43, %v6716_v45  ;;  %v6694_v40 = vsel %vm656_vm0, %v21450_v44, 0  ;;  %v31972_v44 = vld [vmem:[#allocation54_spill] sm:$0xff] }
 0x38f   : > { %6494 = vmatprep.mubr.f32.mxu1 %v31576_v33  ;;  %17031 = vmatprep.mubr.f32.mxu0 %v31576_v33  ;;  %v6821_v6 = vand.u32 4294901760, %v28720_v19  ;;  %v6833_v8 = vand.u32 4294901760, %v28725_v1  ;;  %v6828_v59 = vsub.f32 %v28742_v49, %v6827_v35  ;;  %v21944_v61 = vpack.c.bf16 %v28725_v1, %v28720_v19 }
 0x390   : > { %v17319_v28 = vand.u32 4294901760, %v17295_v54 }
 0x391   : > { %v6822_v2 = vsub.f32 %v28720_v19, %v6821_v6  ;;  %v7428_v19 = vpop.permute.xlu0 %7427 }
 0x392   : > { %17035 = vmatmul.mubr.f32.vlgmr.msra.gmra.mrb[0].mxu0 %v16671_v41  ;;  %6496 = vmatmul.mubr.f32.vlgmr.msra.gmra.mrb[0].mxu1 %v28342_v0 }
 0x393   : > { %22587 = vmatpush1.bf16.msra.mxu0 %v22586_v5  ;;  %21923 = vmatpush1.bf16.msra.mxu1 %v28333_v57  ;;  %v31968_v57 = vand.u32 4294901760, %v28554_v34  ;;  %v28744_v34 = vsub.f32 %v6679_v60, %v6708_v62  ;;  %v28787_v60 = vsub.f32 %v6684_v24, %v6714_v48  ;;  %v6823_v46 = vand.u32 4294901760, %v6822_v2 }
 0x394   : > { %21925 = vmatprep.subr.bf16.mxu1 %v28365_v11  ;;  %22589 = vmatprep.subr.bf16.mxu0 %v22588_v13  ;;  %v6681_v11 = vmul.f32 %v24186_v50, %v6651_v32  ;;  %v28813_v32 = vand.u32 4294901760, %v6694_v40  ;;  %v31433_v62 = vand.u32 4294901760, %v28789_v22  ;;  %v28842_v24 = vand.u32 4294901760, %v6697_v16 }
 0x395   : > { %6501 = vmatprep.mubr.f32.mxu1 %v31576_v33  ;;  %17040 = vmatprep.mubr.f32.mxu0 %v31576_v33  ;;  %v22590_v41 = vpack.c.bf16 %v16757_v7, %v31968_v57  ;;  %v21449_v7 = vld [vmem:[%s31126_s3 + $0x100] sm:$0xff]  ;;  %v31439_v4 = vand.u32 4294901760, %v28744_v34  ;;  %v28867_v2 = vsub.f32 %v17295_v54, %v17319_v28 }
 0x396   : > { %17044 = vmatmul.mubr.f32.gmra.mrb[2].mxu0 %v31969_v52  ;;  %6503 = vmatmul.mubr.f32.gmra.mrb[2].mxu1 %v28380_v26  ;;  %v6691_v47 = vsel %vm656_vm0, %v21449_v7, 0  ;;  %v28840_v43 = vsub.f32 %v6694_v40, %v28813_v32  ;;  %v28847_v7 = vsub.f32 %v28789_v22, %v31433_v62  ;;  %v28881_v54 = vsub.f32 %v6697_v16, %v28842_v24  ;;  %v31974_v16 = vld [vmem:[#allocation56_spill] sm:$0xff] }
 0x397   : > { %22591 = vmatpush1.bf16.msra.mxu0 %v22590_v41  ;;  %21927 = vmatpush1.bf16.msra.mxu1 %v28382_v15  ;;  %v6712_v15 = vand.u32 4294901760, %v6681_v11  ;;  %v28783_v31 = vand.u32 4294901760, %v6691_v47  ;;  %v6829_v41 = vand.u32 4294901760, %v6828_v59 }
 0x398   : > { %22593 = vmatprep.subr.bf16.mxu0 %v28403_v23  ;;  %6508 = vmatprep.mubr.f32.mxu1 %v31576_v33  ;;  %v6710_v23 = vand.u32 4294901760, %v6682_v63  ;;  %v31435_v59 = vand.u32 4294901760, %v28840_v43 }
 0x399   : > { %17049 = vmatprep.mubr.f32.mxu0 %v31576_v33  ;;  %21929 = vmatprep.subr.bf16.mxu1 %v28736_v29  ;;  %v28778_v50 = vsub.f32 %v6681_v11, %v6712_v15  ;;  %v28806_v13 = vpack.c.bf16 %v6716_v45, %v6712_v15  ;;  %v28811_v51 = vsub.f32 %v6691_v47, %v28783_v31 }
 0x39a   : > { %17053 = vmatmul.mubr.f32.gmra.mrb[4].mxu0 %v16693_v12  ;;  %6510 = vmatmul.mubr.f32.gmra.mrb[4].mxu1 %v28411_v14  ;;  %v6834_v12 = vsub.f32 %v28725_v1, %v6833_v8  ;;  %v28785_v30 = vsub.f32 %v6682_v63, %v6710_v23  ;;  %v28803_v5 = vpack.c.bf16 %v6714_v48, %v6710_v23  ;;  %v31971_v48 = vld [vmem:[#allocation11_spill] sm:$0xff]  ;;  %v7430_v1 = vpop.permute.xlu1 %7429 }
 0x39b   : > { %6515 = vmatprep.mubr.f32.mxu1 %v31576_v33  ;;  %17058 = vmatprep.mubr.f32.mxu0 %v31576_v33  ;;  %v31434_v56 = vand.u32 4294901760, %v28778_v50  ;;  %v28828_v11 = vpack.c.bf16 %v17323_v10, %v17319_v28  ;;  %v17294_v45 = vmul.f32 %v31865_v37, %v31971_v48  ;;  %v17296_v40 = vmul.f32 %v31972_v44, %v31971_v48 }
 0x39c   : > { %v6835_v38 = vand.u32 4294901760, %v6834_v12  ;;  %v31437_v53 = vand.u32 4294901760, %v28785_v30  ;;  %v28869_v12 = vsub.f32 %v17297_v42, %v17323_v10  ;;  %v31973_v10 = vld [vmem:[#allocation55_spill] sm:$0xff] }
 0x39d   : > { %v28834_v63 = vsub.f32 %v28778_v50, %v31434_v56 }
 0x39e   : > { %6517 = vmatmul.mubr.f32.gmra.mrb[6].mxu1 %v28450_v3  ;;  %17062 = vmatmul.mubr.f32.gmra.mrb[6].mxu0 %v16704_v55  ;;  %v6840_v55 = vsub.f32 %v28744_v34, %v31439_v4  ;;  %v21936_v57 = vpack.c.bf16 %v6835_v38, %v6823_v46 }
 0x39f   : > { %6595 = vmatprep.mubr.f32.mxu1 %v31576_v33  ;;  %17156 = vmatprep.mubr.f32.mxu0 %v31576_v33 }
 0x3a0   : > { %v6841_v52 = vand.u32 4294901760, %v6840_v55  ;;  %v6853_v55 = vand.u32 4294901760, %v28834_v63  ;;  %v17325_v63 = vand.u32 4294901760, %v17296_v40 }
 0x3a2   : > { %6597 = vmatmul.mubr.f32.vlgmr.msra.gmra.mrb[0].mxu1 %v28342_v0  ;;  %17158 = vmatmul.mubr.f32.vlgmr.msra.gmra.mrb[0].mxu0 %v28489_v20  ;;  %v31436_v0 = vand.u32 4294901760, %v28787_v60  ;;  %v21938_v23 = vpack.c.bf16 %v6841_v52, %v6829_v41  ;;  %v21508_v41 = vld [vmem:[%s31126_s3 + $0x2c8] sm:$0xff]  ;;  %v17321_v52 = vand.u32 4294901760, %v17294_v45 }
 0x3a3   : > { %21931 = vmatpush1.bf16.msra.mxu1 %v28776_v9  ;;  %22595 = vmatpush1.bf16.msra.mxu0 %v28466_v36  ;;  %v6700_v36 = vsel %vm656_vm0, %v21452_v21, 0  ;;  %v17299_v21 = vmul.f32 %v31973_v10, %v31970_v58  ;;  %v31975_v10 = vld [vmem:[#allocation58_spill] sm:$0xff] }
 0x3a4   : > { %22597 = vmatprep.subr.bf16.mxu0 %v28537_v17  ;;  %6602 = vmatprep.mubr.f32.mxu1 %v31576_v33  ;;  %v31438_v17 = vand.u32 4294901760, %v28811_v51  ;;  %v6858_v15 = vsub.f32 %v28787_v60, %v31436_v0  ;;  %v28860_v47 = vand.u32 4294901760, %v6700_v36  ;;  %v28916_v56 = vsub.f32 %v17294_v45, %v17321_v52 }
 0x3a5   : > { %21933 = vmatprep.subr.bf16.mxu1 %v28803_v5  ;;  %17163 = vmatprep.mubr.f32.mxu0 %v31576_v33  ;;  %v17327_v0 = vand.u32 4294901760, %v17299_v21  ;;  %v28922_v4 = vpack.c.bf16 %v17325_v63, %v17321_v52 }
 0x3a6   : > { %6604 = vmatmul.mubr.f32.gmra.mrb[2].mxu1 %v28380_v26  ;;  %17165 = vmatmul.mubr.f32.gmra.mrb[2].mxu0 %v28518_v18  ;;  %v6846_v26 = vsub.f32 %v28785_v30, %v31437_v53  ;;  %v6778_v37 = vsub.f32 %v28811_v51, %v31438_v17  ;;  %v6859_v46 = vand.u32 4294901760, %v6858_v15  ;;  %v28890_v28 = vsub.f32 %v6700_v36, %v28860_v47  ;;  %v21509_v17 = vld [vmem:[%s31126_s3 + $0x2d0] sm:$0xff] }
 0x3a7   : > { %21935 = vmatpush1.bf16.msra.mxu1 %v28806_v13  ;;  %22599 = vmatpush1.bf16.msra.mxu0 %v28556_v25  ;;  %v21507_v25 = vld [vmem:[%s31126_s3 + $0x2c0] sm:$0xff]  ;;  %v6789_v15 = vsub.f32 %v28840_v43, %v31435_v59 }
 0x3a8   : > { %21937 = vmatprep.subr.bf16.mxu1 %v21936_v57  ;;  %6609 = vmatprep.mubr.f32.mxu1 %v31576_v33  ;;  %v6847_v42 = vand.u32 4294901760, %v6846_v26  ;;  %v17308_v38 = vsel %vm656_vm0, %v21507_v25, 0  ;;  %v17301_v57 = vmul.f32 %v31974_v16, %v31970_v58  ;;  %v31442_v26 = vand.u32 4294901760, %v28869_v12 }
 0x3a9   : > { %17170 = vmatprep.mubr.f32.mxu0 %v31576_v33  ;;  %22601 = vmatprep.subr.bf16.mxu0 %v28828_v11  ;;  %v6779_v36 = vand.u32 4294901760, %v6778_v37  ;;  %v31440_v58 = vand.u32 4294901760, %v28881_v54  ;;  %v28907_v25 = vand.u32 4294901760, %v17308_v38  ;;  %v17298_v16 = vmul.f32 %v31975_v10, %v31971_v48 }
 0x3aa   : > { %6611 = vmatmul.mubr.f32.gmra.mrb[4].mxu1 %v28411_v14  ;;  %17172 = vmatmul.mubr.f32.gmra.mrb[4].mxu0 %v28544_v27  ;;  %v6865_v14 = vand.u32 4294901760, %v28847_v7  ;;  %v17438_v7 = vand.u32 4294901760, %v28867_v2  ;;  %v21940_v44 = vpack.c.bf16 %v6859_v46, %v6847_v42  ;;  %v17311_v37 = vsel %vm656_vm0, %v21508_v41, 0 }
 0x3ab   : > { %6616 = vmatprep.mubr.f32.mxu1 %v31576_v33  ;;  %17177 = vmatprep.mubr.f32.mxu0 %v31576_v33  ;;  %v31441_v59 = vand.u32 4294901760, %v28890_v28  ;;  %v17331_v53 = vand.u32 4294901760, %v17301_v57  ;;  %v28924_v42 = vsub.f32 %v17296_v40, %v17325_v63  ;;  %v17451_v45 = vsub.f32 %v28869_v12, %v31442_v26 }
 0x3ac   : > { %v6790_v46 = vand.u32 4294901760, %v6789_v15  ;;  %v6800_v41 = vsub.f32 %v28881_v54, %v31440_v58  ;;  %v28937_v52 = vsub.f32 %v17308_v38, %v28907_v25  ;;  %v28939_v40 = vand.u32 4294901760, %v17311_v37 }
 0x3ad   : > { %v21942_v63 = vpack.c.bf16 %v6865_v14, %v6853_v55  ;;  %v17329_v10 = vand.u32 4294901760, %v17298_v16  ;;  %v28947_v15 = vpack.c.bf16 %v17331_v53, %v17327_v0  ;;  %v28949_v38 = vsub.f32 %v17299_v21, %v17327_v0  ;;  %v21510_v55 = vld [vmem:[%s31126_s3 + $0x2d8] sm:$0xff] }
 0x3ae   : > { %6618 = vmatmul.mubr.f32.gmra.mrb[6].mxu1 %v28450_v3  ;;  %17179 = vmatmul.mubr.f32.gmra.mrb[6].mxu0 %v28572_v39  ;;  %v31976_v3 = vld [vmem:[#allocation59_spill] sm:$0xff]  ;;  %v31448_v58 = vand.u32 4294901760, %v28924_v42  ;;  %v31443_v0 = vand.u32 4294901760, %v28937_v52  ;;  %v28962_v21 = vsub.f32 %v17311_v37, %v28939_v40 }
 0x3af   : > { %6774 = vmatprep.mubr.f32.mxu1 %v31576_v33  ;;  %17257 = vmatprep.mubr.f32.mxu0 %v31576_v33  ;;  %v17300_v62 = vmul.f32 %v31976_v3, %v31971_v48  ;;  %v17439_v48 = vsub.f32 %v28867_v2, %v17438_v7 }
 0x3b1   : > { %v17333_v3 = vand.u32 4294901760, %v17300_v62  ;;  %v17440_v14 = vand.u32 4294901760, %v17439_v48  ;;  %v28974_v48 = vsub.f32 %v17298_v16, %v17329_v10  ;;  %v31444_v16 = vand.u32 4294901760, %v28962_v21 }
 0x3b2   : > { %6780 = vmatmul.mubr.f32.vlgmr.msra.gmra.mrb[0].mxu1 %v6779_v36  ;;  %17259 = vmatmul.mubr.f32.vlgmr.msra.gmra.mrb[0].mxu0 %v28489_v20  ;;  %v17314_v36 = vsel %vm656_vm0, %v21509_v17, 0  ;;  %v6811_v20 = vsub.f32 %v28890_v28, %v31441_v59  ;;  %v28956_v17 = vsub.f32 %v17301_v57, %v17331_v53  ;;  %v6801_v59 = vand.u32 4294901760, %v6800_v41 }
 0x3b3   : > { %21939 = vmatpush1.bf16.msra.mxu1 %v21938_v23  ;;  %6785 = vmatprep.mubr.f32.mxu1 %v31576_v33  ;;  %v17444_v23 = vand.u32 4294901760, %v28916_v56  ;;  %v28964_v26 = vand.u32 4294901760, %v17314_v36  ;;  %v28967_v53 = vpack.c.bf16 %v17333_v3, %v17329_v10  ;;  %v17317_v57 = vsel %vm656_vm0, %v21510_v55, 0 }
 0x3b4   : > { %21941 = vmatprep.subr.bf16.mxu1 %v21940_v44  ;;  %17264 = vmatprep.mubr.f32.mxu0 %v31576_v33  ;;  %v17452_v44 = vand.u32 4294901760, %v17451_v45  ;;  %v28976_v37 = vsub.f32 %v17300_v62, %v17333_v3  ;;  %v17457_v41 = vsub.f32 %v28924_v42, %v31448_v58  ;;  %v17395_v62 = vsub.f32 %v28937_v52, %v31443_v0 }
 0x3b5   : > { %22603 = vmatpush1.bf16.msra.mxu0 %v28922_v4  ;;  %v17445_v45 = vsub.f32 %v28916_v56, %v17444_v23  ;;  %v28993_v10 = vsub.f32 %v17314_v36, %v28964_v26  ;;  %v28995_v3 = vand.u32 4294901760, %v17317_v57  ;;  %v17406_v0 = vsub.f32 %v28962_v21, %v31444_v16 }
 0x3b6   : > { %6791 = vmatmul.mubr.f32.gmra.mrb[2].mxu1 %v6790_v46  ;;  %17266 = vmatmul.mubr.f32.gmra.mrb[2].mxu0 %v28518_v18  ;;  %v6812_v18 = vand.u32 4294901760, %v6811_v20  ;;  %v22608_v46 = vpack.c.bf16 %v17452_v44, %v17440_v14  ;;  %v17458_v55 = vand.u32 4294901760, %v17457_v41  ;;  %v17396_v44 = vand.u32 4294901760, %v17395_v62 }
 0x3b7   : > { %21943 = vmatpush1.bf16.msra.mxu1 %v21942_v63  ;;  %6796 = vmatprep.mubr.f32.mxu1 %v31576_v33  ;;  %v31445_v63 = vand.u32 4294901760, %v28956_v17  ;;  %v17446_v20 = vand.u32 4294901760, %v17445_v45  ;;  %v29014_v45 = vsub.f32 %v17317_v57, %v28995_v3  ;;  %v21946_v41 = vpack.c.bf16 %v28744_v34, %v28742_v49 }
 0x3b8   : > { %21945 = vmatprep.subr.bf16.mxu1 %v21944_v61  ;;  %17271 = vmatprep.mubr.f32.mxu0 %v31576_v33  ;;  %v31446_v61 = vand.u32 4294901760, %v28949_v38  ;;  %v21948_v57 = vpack.c.bf16 %v28787_v60, %v28785_v30  ;;  %v31981_v49 = vand.u32 4294901760, %v28778_v50 }
 0x3b9   : > { %22605 = vmatprep.subr.bf16.mxu0 %v28947_v15  ;;  %v17475_v14 = vsub.f32 %v28956_v17, %v31445_v63  ;;  %v22610_v62 = vpack.c.bf16 %v17458_v55, %v17446_v20  ;;  %v17427_v58 = vand.u32 4294901760, %v29014_v45 }
 0x3ba   : > { %6802 = vmatmul.mubr.f32.gmra.mrb[4].mxu1 %v6801_v59  ;;  %17273 = vmatmul.mubr.f32.gmra.mrb[4].mxu0 %v28544_v27  ;;  %v31447_v59 = vand.u32 4294901760, %v28974_v48  ;;  %v17480_v27 = vand.u32 4294901760, %v28976_v37  ;;  %v17463_v36 = vsub.f32 %v28949_v38, %v31446_v61  ;;  %v17407_v61 = vand.u32 4294901760, %v17406_v0 }
 0x3bb   : > { %6807 = vmatprep.mubr.f32.mxu1 %v31576_v33  ;;  %17278 = vmatprep.mubr.f32.mxu0 %v31576_v33  ;;  %v17476_v63 = vand.u32 4294901760, %v17475_v14 }
 0x3bc   : > { %22607 = vmatpush1.bf16.msra.mxu0 %v28967_v53  ;;  %v17464_v16 = vand.u32 4294901760, %v17463_v36  ;;  %v21950_v36 = vpack.c.bf16 %v28789_v22, %v28778_v50 }
 0x3bd   : > { %22609 = vmatprep.subr.bf16.mxu0 %v22608_v46  ;;  %v17416_v46 = vand.u32 4294901760, %v28993_v10 }
 0x3be   : > { %6813 = vmatmul.mubr.f32.gmra.mrb[6].mxu1 %v6812_v18  ;;  %17280 = vmatmul.mubr.f32.gmra.mrb[6].mxu0 %v28572_v39  ;;  %v17469_v18 = vsub.f32 %v28974_v48, %v31447_v59  ;;  %v17481_v39 = vsub.f32 %v28976_v37, %v17480_v27  ;;  %v22612_v14 = vpack.c.bf16 %v17476_v63, %v17464_v16 }
 0x3bf   : > { %6923 = vmatprep.mubr.f32.mxu1 %v31576_v33  ;;  %17391 = vmatprep.mubr.f32.mxu0 %v31576_v33  ;;  %v17417_v59 = vsub.f32 %v28993_v10, %v17416_v46  ;;  %v22616_v63 = vpack.c.bf16 %v28869_v12, %v28867_v2  ;;  %v22618_v16 = vpack.c.bf16 %v28924_v42, %v28916_v56  ;;  %v31987_v2 = vand.u32 4294901760, %v28890_v28 }
 0x3c0   : > { %v17470_v20 = vand.u32 4294901760, %v17469_v18  ;;  %v17482_v55 = vand.u32 4294901760, %v17481_v39  ;;  %v21960_v39 = vpack.c.bf16 %v6833_v8, %v6821_v6  ;;  %v31977_v6 = vand.u32 4294901760, %v28744_v34 }
 0x3c1   : > { %v17418_v0 = vand.u32 4294901760, %v17417_v59  ;;  %v22620_v59 = vpack.c.bf16 %v28956_v17, %v28949_v38  ;;  %v31982_v34 = vand.u32 4294901760, %v28789_v22 }
 0x3c2   : > { %6925 = vmatmul.mubr.f32.vlgmr.msra.gmra.mrb[0].mxu1 %v28783_v31  ;;  %17397 = vmatmul.mubr.f32.vlgmr.msra.gmra.mrb[0].mxu0 %v17396_v44  ;;  %v17428_v44 = vsub.f32 %v29014_v45, %v17427_v58  ;;  %v22614_v18 = vpack.c.bf16 %v17482_v55, %v17470_v20  ;;  %v21962_v8 = vpack.c.bf16 %v31977_v6, %v6827_v35  ;;  %v31980_v20 = vand.u32 4294901760, %v28787_v60 }
 0x3c3   : > { %21947 = vmatpush1.bf16.msra.mxu1 %v21946_v41  ;;  %6930 = vmatprep.mubr.f32.mxu1 %v31576_v33  ;;  %v22622_v41 = vpack.c.bf16 %v28976_v37, %v28974_v48  ;;  %v21966_v35 = vpack.c.bf16 %v31982_v34, %v31981_v49  ;;  %v31989_v6 = vand.u32 4294901760, %v28924_v42 }
 0x3c4   : > { %21949 = vmatprep.subr.bf16.mxu1 %v21948_v57  ;;  %17402 = vmatprep.mubr.f32.mxu0 %v31576_v33  ;;  %v31979_v57 = vand.u32 4294901760, %v28785_v30  ;;  %v31983_v30 = vand.u32 4294901760, %v28840_v43 }
 0x3c5   : > { %22611 = vmatpush1.bf16.msra.mxu0 %v22610_v62  ;;  %v31978_v62 = vand.u32 4294901760, %v28811_v51 }
 0x3c6   : > { %6932 = vmatmul.mubr.f32.gmra.mrb[2].mxu1 %v28813_v32  ;;  %17408 = vmatmul.mubr.f32.gmra.mrb[2].mxu0 %v17407_v61  ;;  %v17429_v61 = vand.u32 4294901760, %v17428_v44  ;;  %v21964_v55 = vpack.c.bf16 %v31980_v20, %v31979_v57 }
 0x3c7   : > { %21951 = vmatpush1.bf16.msra.mxu1 %v21950_v36  ;;  %6937 = vmatprep.mubr.f32.mxu1 %v31576_v33  ;;  %v7444_v36 = vpop.permute.xlu0 %7443 }
 0x3c8   : > { %21953 = vmatprep.subr.bf16.mxu1 %v28736_v29  ;;  %17413 = vmatprep.mubr.f32.mxu0 %v31576_v33  ;;  %v7451_v50 = vsel %vm561_vm3, %v7444_v36, %v7428_v19 }
 0x3c9   : > { %22613 = vmatprep.subr.bf16.mxu0 %v22612_v14 }
 0x3ca   : > { %6939 = vmatmul.mubr.f32.gmra.mrb[4].mxu1 %v28842_v24  ;;  %17419 = vmatmul.mubr.f32.gmra.mrb[4].mxu0 %v17418_v0  ;;  %v31985_v0 = vand.u32 4294901760, %v28881_v54 }
 0x3cb   : > { %6944 = vmatprep.mubr.f32.mxu1 %v31576_v33  ;;  %17424 = vmatprep.mubr.f32.mxu0 %v31576_v33  ;;  %v7432_v22 = vpop.permute.xlu0 %7431 }
 0x3cc   : > { %22615 = vmatpush1.bf16.msra.mxu0 %v22614_v18 }
 0x3cd   : > { %22617 = vmatprep.subr.bf16.mxu0 %v22616_v63 }
 0x3ce   : > { %6946 = vmatmul.mubr.f32.gmra.mrb[6].mxu1 %v28860_v47  ;;  %17430 = vmatmul.mubr.f32.gmra.mrb[6].mxu0 %v17429_v61 }
 0x3cf   : > { %7032 = vmatprep.mubr.f32.mxu1 %v31576_v33  ;;  %17540 = vmatprep.mubr.f32.mxu0 %v31576_v33 }
 0x3d2   : > { %7035 = vmatmul.mubr.f32.vlgmr.msra.gmra.mrb[0].mxu1 %v28811_v51  ;;  %17542 = vmatmul.mubr.f32.vlgmr.msra.gmra.mrb[0].mxu0 %v28907_v25  ;;  %v7446_v51 = vpop.permute.xlu1 %7445 }
 0x3d3   : > { %21955 = vmatpush1.bf16.msra.mxu1 %v28776_v9  ;;  %7040 = vmatprep.mubr.f32.mxu1 %v31576_v33  ;;  %v7452_v60 = vsel %vm561_vm3, %v7446_v51, %v7430_v1 }
 0x3d4   : > { %21957 = vmatprep.subr.bf16.mxu1 %v28803_v5  ;;  %17547 = vmatprep.mubr.f32.mxu0 %v31576_v33 }
 0x3d5   : > { %22619 = vmatpush1.bf16.msra.mxu0 %v22618_v16  ;;  %v7448_v16 = vpop.permute.xlu0 %7447 }
 0x3d6   : > { %7043 = vmatmul.mubr.f32.gmra.mrb[2].mxu1 %v28840_v43  ;;  %17549 = vmatmul.mubr.f32.gmra.mrb[2].mxu0 %v28939_v40  ;;  %v31984_v43 = vand.u32 4294901760, %v28869_v12  ;;  %v7434_v63 = vpop.permute.xlu1 %7433  ;;  %v7463_v12 = vsel %vm561_vm3, %v7428_v19, %v7444_v36  ;;  %v7453_v56 = vsel %vm561_vm3, %v7448_v16, %v7432_v22  ;;  %v31992_v36 = vand.u32 4294901760, %v28956_v17 }
 0x3d7   : > { %21959 = vmatpush1.bf16.msra.mxu1 %v28806_v13  ;;  %7048 = vmatprep.mubr.f32.mxu1 %v31576_v33  ;;  %v31994_v17 = vand.u32 4294901760, %v28974_v48 }
 0x3d8   : > { %21961 = vmatprep.subr.bf16.mxu1 %v21960_v39  ;;  %17554 = vmatprep.mubr.f32.mxu0 %v31576_v33  ;;  %v22632_v14 = vpack.c.bf16 %v31984_v43, %v17438_v7  ;;  %v7464_v7 = vsel %vm561_vm3, %v7430_v1, %v7446_v51  ;;  %v31993_v51 = vand.u32 4294901760, %v28962_v21 }
 0x3d9   : > { %22621 = vmatprep.subr.bf16.mxu0 %v22620_v59  ;;  %v31988_v59 = vld [vmem:[#allocation49_spill] sm:$0xff]  ;;  %v18018_v34 = vpop.permute.xlu0 %18017 }
 0x3da   : > { %7051 = vmatmul.mubr.f32.gmra.mrb[4].mxu1 %v28881_v54  ;;  %17556 = vmatmul.mubr.f32.gmra.mrb[4].mxu0 %v28964_v26  ;;  %v7467_v39 = vmul.f32 %v7463_v12, %v31988_v59  ;;  %v7469_v19 = vmul.f32 %v7464_v7, %v31988_v59 }
 0x3db   : > { %7056 = vmatprep.mubr.f32.mxu1 %v31576_v33  ;;  %17561 = vmatprep.mubr.f32.mxu0 %v31576_v33 }
 0x3dc   : > { %22623 = vmatpush1.bf16.msra.mxu0 %v22622_v41  ;;  %v7450_v41 = vpop.permute.xlu1 %7449  ;;  %v7494_v20 = vand.u32 4294901760, %v7467_v39 }
 0x3dd   : > { %22625 = vmatprep.subr.bf16.mxu0 %v28828_v11  ;;  %v7454_v42 = vsel %vm561_vm3, %v7450_v41, %v7434_v63 }
 0x3de   : > { %7059 = vmatmul.mubr.f32.gmra.mrb[6].mxu1 %v28890_v28  ;;  %17563 = vmatmul.mubr.f32.gmra.mrb[6].mxu0 %v28995_v3  ;;  %v22634_v28 = vpack.c.bf16 %v31989_v6, %v17444_v23  ;;  %v29177_v43 = vsub.f32 %v7467_v39, %v7494_v20 }
 0x3df   : > { %7137 = vmatprep.mubr.f32.mxu1 %v31576_v33  ;;  %17649 = vmatprep.mubr.f32.mxu0 %v31576_v33 }
 0x3e0   : > { %v31456_v12 = vand.u32 4294901760, %v29177_v43 }
 0x3e2   : > { %7141 = vmatmul.mubr.f32.vlgmr.msra.gmra.mrb[0].mxu1 %v31978_v62  ;;  %17652 = vmatmul.mubr.f32.vlgmr.msra.gmra.mrb[0].mxu0 %v28937_v52  ;;  %v7465_v62 = vsel %vm561_vm3, %v7432_v22, %v7448_v16  ;;  %v21454_v22 = vld [vmem:[%s31126_s3 + $0x120] sm:$0xff] }
 0x3e3   : > { %21963 = vmatpush1.bf16.msra.mxu1 %v21962_v8  ;;  %7146 = vmatprep.mubr.f32.mxu1 %v31576_v33  ;;  %v31990_v8 = vand.u32 4294901760, %v28937_v52  ;;  %v7466_v52 = vsel %vm561_vm3, %v7434_v63, %v7450_v41  ;;  %v7481_v63 = vsel %vm656_vm0, %v21454_v22, 0 }
 0x3e4   : > { %21965 = vmatprep.subr.bf16.mxu1 %v21964_v55  ;;  %17657 = vmatprep.mubr.f32.mxu0 %v31576_v33  ;;  %v29152_v55 = vmul.f32 %v7465_v62, %v31988_v59  ;;  %v29214_v6 = vand.u32 4294901760, %v7481_v63 }
 0x3e5   : > { %22627 = vmatpush1.bf16.msra.mxu0 %v28922_v4 }
 0x3e6   : > { %7150 = vmatmul.mubr.f32.gmra.mrb[2].mxu1 %v31983_v30  ;;  %17660 = vmatmul.mubr.f32.gmra.mrb[2].mxu0 %v28962_v21  ;;  %v22638_v21 = vpack.c.bf16 %v17480_v27, %v31994_v17  ;;  %v21457_v17 = vld [vmem:[%s31126_s3 + $0x138] sm:$0xff] }
 0x3e7   : > { %21967 = vmatpush1.bf16.msra.mxu1 %v21966_v35  ;;  %7155 = vmatprep.mubr.f32.mxu1 %v31576_v33  ;;  %v7498_v35 = vand.u32 4294901760, %v7469_v19 }
 0x3e8   : > { %21969 = vmatprep.subr.bf16.mxu1 %v28736_v29  ;;  %17665 = vmatprep.mubr.f32.mxu0 %v31576_v33  ;;  %v31986_v29 = vld [vmem:[#allocation42_spill] sm:$0xff] }
 0x3e9   : > { %22629 = vmatprep.subr.bf16.mxu0 %v28947_v15  ;;  %v7468_v44 = vmul.f32 %v7451_v50, %v31986_v29  ;;  %v7470_v18 = vmul.f32 %v7452_v60, %v31986_v29  ;;  %v7472_v30 = vmul.f32 %v7453_v56, %v31986_v29  ;;  %v7473_v50 = vmul.f32 %v7466_v52, %v31988_v59 }
 0x3ea   : > { %7159 = vmatmul.mubr.f32.gmra.mrb[4].mxu1 %v31985_v0  ;;  %17668 = vmatmul.mubr.f32.gmra.mrb[4].mxu0 %v28993_v10  ;;  %v29180_v0 = vsub.f32 %v7469_v19, %v7498_v35 }
 0x3eb   : > { %7164 = vmatprep.mubr.f32.mxu1 %v31576_v33  ;;  %17673 = vmatprep.mubr.f32.mxu0 %v31576_v33  ;;  %v7492_v54 = vand.u32 4294901760, %v7468_v44  ;;  %v7496_v61 = vand.u32 4294901760, %v7470_v18  ;;  %v7500_v37 = vand.u32 4294901760, %v7472_v30 }
 0x3ec   : > { %22631 = vmatpush1.bf16.msra.mxu0 %v28967_v53  ;;  %v31455_v59 = vand.u32 4294901760, %v29180_v0 }
 0x3ed   : > { %22633 = vmatprep.subr.bf16.mxu0 %v22632_v14  ;;  %v29138_v1 = vsub.f32 %v7468_v44, %v7492_v54  ;;  %v29140_v57 = vsub.f32 %v7470_v18, %v7496_v61  ;;  %v29149_v23 = vpack.c.bf16 %v7496_v61, %v7492_v54  ;;  %v7502_v14 = vand.u32 4294901760, %v29152_v55  ;;  %v18022_v44 = vpop.permute.xlu0 %18021  ;;  %v31995_v61 = vld [vmem:[#allocation47_spill] sm:$0xff] }
 0x3ee   : > { %17676 = vmatmul.mubr.f32.gmra.mrb[6].mxu0 %v29014_v45  ;;  %7168 = vmatmul.mubr.f32.gmra.mrb[6].mxu1 %v31987_v2  ;;  %v21455_v2 = vld [vmem:[%s31126_s3 + $0x128] sm:$0xff]  ;;  %v29199_v54 = vpack.c.bf16 %v7498_v35, %v7494_v20  ;;  %v31996_v20 = vld [vmem:[#allocation50_spill] sm:$0xff]  ;;  %v29240_v35 = vsub.f32 %v7481_v63, %v29214_v6 }
 0x3ef   : > { %7262 = vmatprep.mubr.f32.mxu1 %v31576_v33  ;;  %17754 = vmatprep.mubr.f32.mxu0 %v31576_v33  ;;  %v7611_v60 = vand.u32 4294901760, %v29138_v1  ;;  %v29202_v7 = vsub.f32 %v29152_v55, %v7502_v14  ;;  %v7484_v19 = vsel %vm656_vm0, %v21455_v2, 0 }
 0x3f1   : > { %v7612_v10 = vsub.f32 %v29138_v1, %v7611_v60  ;;  %v31450_v52 = vand.u32 4294901760, %v29202_v7 }
 0x3f2   : > { %17758 = vmatmul.mubr.f32.vlgmr.msra.gmra.mrb[0].mxu0 %v31990_v8  ;;  %7264 = vmatmul.mubr.f32.vlgmr.msra.gmra.mrb[0].mxu1 %v28783_v31 }
 0x3f3   : > { %21971 = vmatpush1.bf16.msra.mxu1 %v28776_v9  ;;  %7269 = vmatprep.mubr.f32.mxu1 %v31576_v33  ;;  %v31991_v9 = vand.u32 4294901760, %v28949_v38  ;;  %v7474_v38 = vmul.f32 %v7454_v42, %v31986_v29  ;;  %v7506_v29 = vand.u32 4294901760, %v7473_v50  ;;  %v21456_v42 = vld [vmem:[%s31126_s3 + $0x130] sm:$0xff] }
 0x3f4   : > { %21973 = vmatprep.subr.bf16.mxu1 %v28803_v5  ;;  %17763 = vmatprep.mubr.f32.mxu0 %v31576_v33  ;;  %v18020_v5 = vpop.permute.xlu1 %18019 }
 0x3f5   : > { %22635 = vmatpush1.bf16.msra.mxu0 %v22634_v28  ;;  %v22636_v49 = vpack.c.bf16 %v31992_v36, %v31991_v9  ;;  %v18033_v48 = vsel %vm4344_vm2, %v18018_v34, %v18020_v5  ;;  %v7504_v27 = vand.u32 4294901760, %v7474_v38  ;;  %v18049_v39 = vsel %vm4344_vm2, %v18020_v5, %v18018_v34 }
 0x3f6   : > { %17767 = vmatmul.mubr.f32.gmra.mrb[2].mxu0 %v31993_v51  ;;  %7271 = vmatmul.mubr.f32.gmra.mrb[2].mxu1 %v28813_v32  ;;  %v29206_v16 = vmul.f32 %v18033_v48, %v31995_v61  ;;  %v29216_v28 = vsub.f32 %v7472_v30, %v7500_v37  ;;  %v18054_v55 = vmul.f32 %v18049_v39, %v31996_v20  ;;  %v29242_v51 = vand.u32 4294901760, %v7484_v19 }
 0x3f7   : > { %21975 = vmatpush1.bf16.msra.mxu1 %v28806_v13  ;;  %7276 = vmatprep.mubr.f32.mxu1 %v31576_v33  ;;  %v7623_v13 = vand.u32 4294901760, %v29140_v57  ;;  %v29218_v8 = vsub.f32 %v7474_v38, %v7504_v27  ;;  %v29225_v45 = vpack.c.bf16 %v7504_v27, %v7500_v37  ;;  %v29235_v5 = vpack.c.bf16 %v7506_v29, %v7502_v14 }
 0x3f8   : > { %17772 = vmatprep.mubr.f32.mxu0 %v31576_v33  ;;  %21977 = vmatprep.subr.bf16.mxu1 %v29149_v23  ;;  %v18024_v18 = vpop.permute.xlu1 %18023  ;;  %v18080_v9 = vand.u32 4294901760, %v29206_v16  ;;  %v31452_v14 = vand.u32 4294901760, %v29216_v28  ;;  %v29267_v37 = vsub.f32 %v29180_v0, %v31455_v59  ;;  %v29272_v27 = vsub.f32 %v29202_v7, %v31450_v52 }
 0x3f9   : > { %22637 = vmatprep.subr.bf16.mxu0 %v22636_v49  ;;  %v18050_v41 = vsel %vm4344_vm2, %v18024_v18, %v18022_v44  ;;  %v18034_v56 = vsel %vm4344_vm2, %v18022_v44, %v18024_v18  ;;  %v18026_v49 = vpop.permute.xlu0 %18025  ;;  %v31451_v48 = vand.u32 4294901760, %v29218_v8  ;;  %v31453_v18 = vand.u32 4294901760, %v29240_v35 }
 0x3fa   : > { %17776 = vmatmul.mubr.f32.gmra.mrb[4].mxu0 %v17416_v46  ;;  %7278 = vmatmul.mubr.f32.gmra.mrb[4].mxu1 %v28842_v24  ;;  %v7624_v46 = vsub.f32 %v29140_v57, %v7623_v13  ;;  %v18056_v36 = vmul.f32 %v18050_v41, %v31996_v20  ;;  %v18055_v38 = vmul.f32 %v18034_v56, %v31995_v61 }
 0x3fb   : > { %7283 = vmatprep.mubr.f32.mxu1 %v31576_v33  ;;  %17781 = vmatprep.mubr.f32.mxu0 %v31576_v33  ;;  %v29279_v63 = vsub.f32 %v7484_v19, %v29242_v51  ;;  %v7648_v56 = vsub.f32 %v29218_v8, %v31451_v48 }
 0x3fc   : > { %22639 = vmatpush1.bf16.msra.mxu0 %v22638_v21  ;;  %v7625_v62 = vand.u32 4294901760, %v7624_v46  ;;  %v18028_v34 = vpop.permute.xlu1 %18027  ;;  %v29258_v21 = vsub.f32 %v29177_v43, %v31456_v12  ;;  %v18082_v44 = vand.u32 4294901760, %v18056_v36  ;;  %v7490_v46 = vsel %vm656_vm0, %v21457_v17, 0 }
 0x3fd   : > { %22641 = vmatprep.subr.bf16.mxu0 %v28828_v11  ;;  %v29220_v11 = vsub.f32 %v7473_v50, %v7506_v29  ;;  %v29248_v50 = vsub.f32 %v29206_v16, %v18080_v9  ;;  %v18078_v29 = vand.u32 4294901760, %v18054_v55  ;;  %v18084_v16 = vand.u32 4294901760, %v18055_v38  ;;  %v18030_v39 = vpop.permute.xlu0 %18029 }
 0x3fe   : > { %7285 = vmatmul.mubr.f32.gmra.mrb[6].mxu1 %v28860_v47  ;;  %17785 = vmatmul.mubr.f32.gmra.mrb[6].mxu0 %v17427_v58  ;;  %v7613_v58 = vand.u32 4294901760, %v7612_v10  ;;  %v18035_v19 = vsel %vm4344_vm2, %v18026_v49, %v18028_v34  ;;  %v18051_v17 = vsel %vm4344_vm2, %v18028_v34, %v18026_v49 }
 0x3ff   : > { %7363 = vmatprep.mubr.f32.mxu1 %v31576_v33  ;;  %17879 = vmatprep.mubr.f32.mxu0 %v31576_v33  ;;  %v31449_v30 = vand.u32 4294901760, %v29220_v11  ;;  %v29326_v49 = vpack.c.bf16 %v18084_v16, %v18080_v9  ;;  %v29328_v34 = vsub.f32 %v18055_v38, %v18084_v16 }
 0x400   : > { %v21984_v22 = vpack.c.bf16 %v7625_v62, %v7613_v58  ;;  %v18032_v41 = vpop.permute.xlu1 %18031  ;;  %v7619_v58 = vand.u32 4294901760, %v29258_v21  ;;  %v7636_v62 = vsub.f32 %v29216_v28, %v31452_v14  ;;  %v29312_v21 = vand.u32 4294901760, %v7490_v46 }
 0x401   : > { %v29287_v2 = vsub.f32 %v29220_v11, %v31449_v30  ;;  %v7568_v30 = vsub.f32 %v29240_v35, %v31453_v18  ;;  %v18052_v52 = vsel %vm4344_vm2, %v18032_v41, %v18030_v39  ;;  %v7649_v14 = vand.u32 4294901760, %v7648_v56  ;;  %v21512_v18 = vld [vmem:[%s31126_s3 + $0x2e8] sm:$0xff] }
 0x402   : > { %7365 = vmatmul.mubr.f32.vlgmr.msra.gmra.mrb[0].mxu1 %v28783_v31  ;;  %17881 = vmatmul.mubr.f32.vlgmr.msra.gmra.mrb[0].mxu0 %v28907_v25  ;;  %v7487_v31 = vsel %vm656_vm0, %v21456_v42, 0  ;;  %v21511_v42 = vld [vmem:[%s31126_s3 + $0x2e0] sm:$0xff]  ;;  %v7637_v48 = vand.u32 4294901760, %v7636_v62  ;;  %v18060_v9 = vmul.f32 %v18052_v52, %v31996_v20  ;;  %v29341_v38 = vsub.f32 %v7490_v46, %v29312_v21 }
 0x403   : > { %21979 = vmatpush1.bf16.msra.mxu1 %v29199_v54  ;;  %7370 = vmatprep.mubr.f32.mxu1 %v31576_v33  ;;  %v29281_v10 = vand.u32 4294901760, %v7487_v31  ;;  %v7569_v16 = vand.u32 4294901760, %v7568_v30  ;;  %v18057_v46 = vmul.f32 %v18035_v19, %v31995_v61  ;;  %v7643_v62 = vand.u32 4294901760, %v29272_v27 }
 0x404   : > { %21981 = vmatprep.subr.bf16.mxu1 %v29225_v45  ;;  %17886 = vmatprep.mubr.f32.mxu0 %v31576_v33  ;;  %v21988_v56 = vpack.c.bf16 %v7649_v14, %v7637_v48  ;;  %v18090_v59 = vand.u32 4294901760, %v18060_v9  ;;  %v7600_v12 = vand.u32 4294901760, %v29341_v38 }
 0x405   : > { %22643 = vmatpush1.bf16.msra.mxu0 %v28922_v4  ;;  %v29291_v4 = vsub.f32 %v18054_v55, %v18078_v29  ;;  %v29307_v55 = vsub.f32 %v18056_v36, %v18082_v44  ;;  %v29322_v36 = vsub.f32 %v7487_v31, %v29281_v10  ;;  %v18036_v31 = vsel %vm4344_vm2, %v18030_v39, %v18032_v41 }
 0x406   : > { %7372 = vmatmul.mubr.f32.gmra.mrb[2].mxu1 %v28813_v32  ;;  %17888 = vmatmul.mubr.f32.gmra.mrb[2].mxu0 %v28939_v40  ;;  %v18203_v32 = vand.u32 4294901760, %v29248_v50 }
 0x407   : > { %21983 = vmatpush1.bf16.msra.mxu1 %v29235_v5  ;;  %7377 = vmatprep.mubr.f32.mxu1 %v31576_v33  ;;  %v31457_v52 = vand.u32 4294901760, %v29322_v36 }
 0x408   : > { %21985 = vmatprep.subr.bf16.mxu1 %v21984_v22  ;;  %17893 = vmatprep.mubr.f32.mxu0 %v31576_v33  ;;  %v29310_v22 = vpack.c.bf16 %v18082_v44, %v18078_v29  ;;  %v18067_v29 = vsel %vm656_vm0, %v21511_v42, 0  ;;  %v18058_v44 = vmul.f32 %v18051_v17, %v31996_v20  ;;  %v18059_v42 = vmul.f32 %v18036_v31, %v31995_v61 }
 0x409   : > { %22645 = vmatprep.subr.bf16.mxu0 %v28947_v15  ;;  %v31454_v15 = vand.u32 4294901760, %v29279_v63  ;;  %v29351_v20 = vand.u32 4294901760, %v18067_v29  ;;  %v7655_v17 = vand.u32 4294901760, %v29287_v2  ;;  %v7590_v14 = vsub.f32 %v29322_v36, %v31457_v52 }
 0x40a   : > { %17895 = vmatmul.mubr.f32.gmra.mrb[4].mxu0 %v28964_v26  ;;  %7379 = vmatmul.mubr.f32.gmra.mrb[4].mxu1 %v28842_v24  ;;  %v7631_v24 = vand.u32 4294901760, %v29267_v37  ;;  %v31459_v37 = vand.u32 4294901760, %v29291_v4  ;;  %v18086_v30 = vand.u32 4294901760, %v18058_v44  ;;  %v18215_v2 = vand.u32 4294901760, %v29328_v34 }
 0x40b   : > { %7384 = vmatprep.mubr.f32.mxu1 %v31576_v33  ;;  %17900 = vmatprep.mubr.f32.mxu0 %v31576_v33  ;;  %v7579_v39 = vsub.f32 %v29279_v63, %v31454_v15  ;;  %v21513_v15 = vld [vmem:[%s31126_s3 + $0x2f0] sm:$0xff]  ;;  %v29375_v48 = vsub.f32 %v18067_v29, %v29351_v20  ;;  %v18092_v31 = vand.u32 4294901760, %v18059_v42  ;;  %v21990_v29 = vpack.c.bf16 %v7655_v17, %v7643_v62 }
 0x40c   : > { %22647 = vmatpush1.bf16.msra.mxu0 %v28967_v53  ;;  %v31458_v53 = vand.u32 4294901760, %v29307_v55  ;;  %v21986_v41 = vpack.c.bf16 %v7631_v24, %v7619_v58  ;;  %v18198_v19 = vsub.f32 %v29291_v4, %v31459_v37  ;;  %v18088_v58 = vand.u32 4294901760, %v18057_v46 }
 0x40d   : > { %22649 = vmatprep.subr.bf16.mxu0 %v29310_v22  ;;  %v7580_v61 = vand.u32 4294901760, %v7579_v39  ;;  %v29380_v24 = vsub.f32 %v18058_v44, %v18086_v30  ;;  %v21992_v39 = vpack.c.bf16 %v29140_v57, %v29138_v1  ;;  %v21514_v44 = vld [vmem:[%s31126_s3 + $0x2f8] sm:$0xff]  ;;  %v31464_v62 = vand.u32 4294901760, %v29375_v48  ;;  %v8191_v1 = vpop.permute.xlu0 %8190  ;;  %v8193_v57 = vpop.permute.xlu1 %8192 }
 0x40e   : > { %17902 = vmatmul.mubr.f32.gmra.mrb[6].mxu0 %v28995_v3  ;;  %7386 = vmatmul.mubr.f32.gmra.mrb[6].mxu1 %v28860_v47  ;;  %v18070_v47 = vsel %vm656_vm0, %v21512_v18, 0  ;;  %v18210_v27 = vsub.f32 %v29307_v55, %v31458_v53  ;;  %v18204_v37 = vsub.f32 %v29248_v50, %v18203_v32 }
 0x40f   : > { %7564 = vmatprep.mubr.f32.mxu1 %v31576_v33  ;;  %17980 = vmatprep.mubr.f32.mxu0 %v31576_v33  ;;  %v29377_v18 = vand.u32 4294901760, %v18070_v47 }
 0x410   : > { %v18211_v52 = vand.u32 4294901760, %v18210_v27 }
 0x411   : > { %v29401_v17 = vsub.f32 %v18070_v47, %v29377_v18  ;;  %v29417_v47 = vsub.f32 %v18059_v42, %v18092_v31 }
 0x412   : > { %17982 = vmatmul.mubr.f32.vlgmr.msra.gmra.mrb[0].mxu0 %v28907_v25  ;;  %7570 = vmatmul.mubr.f32.vlgmr.msra.gmra.mrb[0].mxu1 %v7569_v16  ;;  %v18073_v25 = vsel %vm656_vm0, %v21513_v15, 0  ;;  %v29385_v16 = vsub.f32 %v18060_v9, %v18090_v59  ;;  %v7601_v15 = vsub.f32 %v29341_v38, %v7600_v12  ;;  %v7591_v9 = vand.u32 4294901760, %v7590_v14 }
 0x413   : > { %21987 = vmatpush1.bf16.msra.mxu1 %v21986_v41  ;;  %7575 = vmatprep.mubr.f32.mxu1 %v31576_v33  ;;  %v29396_v41 = vpack.c.bf16 %v18090_v59, %v18086_v30  ;;  %v29403_v53 = vand.u32 4294901760, %v18073_v25  ;;  %v18216_v59 = vsub.f32 %v29328_v34, %v18215_v2  ;;  %v29413_v30 = vsub.f32 %v18057_v46, %v18088_v58 }
 0x414   : > { %21989 = vmatprep.subr.bf16.mxu1 %v21988_v56  ;;  %17987 = vmatprep.mubr.f32.mxu0 %v31576_v33  ;;  %v18199_v56 = vand.u32 4294901760, %v18198_v19  ;;  %v29415_v19 = vpack.c.bf16 %v18092_v31, %v18088_v58  ;;  %v7602_v27 = vand.u32 4294901760, %v7601_v15  ;;  %v31462_v14 = vand.u32 4294901760, %v29380_v24 }
 0x415   : > { %22651 = vmatpush1.bf16.msra.mxu0 %v29326_v49  ;;  %v18154_v46 = vsub.f32 %v29375_v48, %v31464_v62  ;;  %v31460_v42 = vand.u32 4294901760, %v29401_v17  ;;  %v29429_v58 = vsub.f32 %v18073_v25, %v29403_v53 }
 0x416   : > { %17989 = vmatmul.mubr.f32.gmra.mrb[2].mxu0 %v28939_v40  ;;  %7581 = vmatmul.mubr.f32.gmra.mrb[2].mxu1 %v7580_v61  ;;  %v18076_v40 = vsel %vm656_vm0, %v21514_v44, 0  ;;  %v22656_v61 = vpack.c.bf16 %v18211_v52, %v18199_v56  ;;  %v31463_v52 = vand.u32 4294901760, %v29413_v30  ;;  %v18217_v44 = vand.u32 4294901760, %v18216_v59 }
 0x417   : > { %21991 = vmatpush1.bf16.msra.mxu1 %v21990_v29  ;;  %7586 = vmatprep.mubr.f32.mxu1 %v31576_v33  ;;  %v31461_v29 = vand.u32 4294901760, %v29385_v16  ;;  %v29431_v31 = vand.u32 4294901760, %v18076_v40  ;;  %v18222_v25 = vsub.f32 %v29380_v24, %v31462_v14  ;;  %v18155_v56 = vand.u32 4294901760, %v18154_v46 }
 0x418   : > { %21993 = vmatprep.subr.bf16.mxu1 %v21992_v39  ;;  %17994 = vmatprep.mubr.f32.mxu0 %v31576_v33  ;;  %v18239_v39 = vand.u32 4294901760, %v29417_v47  ;;  %v18228_v59 = vsub.f32 %v29413_v30, %v31463_v52 }
 0x419   : > { %22653 = vmatprep.subr.bf16.mxu0 %v29396_v41  ;;  %v18234_v15 = vsub.f32 %v29385_v16, %v31461_v29 }
 0x41a   : > { %7592 = vmatmul.mubr.f32.gmra.mrb[4].mxu1 %v7591_v9  ;;  %17996 = vmatmul.mubr.f32.gmra.mrb[4].mxu0 %v28964_v26  ;;  %v18205_v26 = vand.u32 4294901760, %v18204_v37  ;;  %v18165_v9 = vsub.f32 %v29401_v17, %v31460_v42  ;;  %v29450_v37 = vsub.f32 %v18076_v40, %v29431_v31  ;;  %v18223_v42 = vand.u32 4294901760, %v18222_v25 }
 0x41b   : > { %7597 = vmatprep.mubr.f32.mxu1 %v31576_v33  ;;  %18001 = vmatprep.mubr.f32.mxu0 %v31576_v33  ;;  %v18235_v29 = vand.u32 4294901760, %v18234_v15  ;;  %v21996_v40 = vpack.c.bf16 %v29218_v8, %v29216_v28  ;;  %v21998_v25 = vpack.c.bf16 %v29220_v11, %v29202_v7 }
 0x41c   : > { %22655 = vmatpush1.bf16.msra.mxu0 %v29415_v19  ;;  %v22658_v46 = vpack.c.bf16 %v18217_v44, %v18205_v26  ;;  %v18166_v14 = vand.u32 4294901760, %v18165_v9  ;;  %v18186_v62 = vand.u32 4294901760, %v29450_v37  ;;  %v18229_v26 = vand.u32 4294901760, %v18228_v59 }
 0x41d   : > { %22657 = vmatprep.subr.bf16.mxu0 %v22656_v61  ;;  %v18175_v61 = vand.u32 4294901760, %v29429_v58  ;;  %v22660_v15 = vpack.c.bf16 %v18235_v29, %v18223_v42  ;;  %v22664_v29 = vpack.c.bf16 %v29307_v55, %v29291_v4  ;;  %v22666_v42 = vpack.c.bf16 %v29328_v34, %v29248_v50 }
 0x41e   : > { %7603 = vmatmul.mubr.f32.gmra.mrb[6].mxu1 %v7602_v27  ;;  %18003 = vmatmul.mubr.f32.gmra.mrb[6].mxu0 %v28995_v3  ;;  %v18240_v3 = vsub.f32 %v29417_v47, %v18239_v39  ;;  %v21994_v27 = vpack.c.bf16 %v29180_v0, %v29177_v43  ;;  %v18187_v9 = vsub.f32 %v29450_v37, %v18186_v62  ;;  %v32013_v50 = vand.u32 4294901760, %v29413_v30 }
 0x41f   : > { %7713 = vmatprep.mubr.f32.mxu1 %v31576_v33  ;;  %18150 = vmatprep.mubr.f32.mxu0 %v31576_v33  ;;  %v18176_v52 = vsub.f32 %v29429_v58, %v18175_v61 }
 0x420   : > { %v18241_v44 = vand.u32 4294901760, %v18240_v3  ;;  %v22670_v3 = vpack.c.bf16 %v29417_v47, %v29413_v30 }
 0x422   : > { %7715 = vmatmul.mubr.f32.vlgmr.msra.gmra.mrb[0].mxu1 %v29214_v6  ;;  %18156 = vmatmul.mubr.f32.vlgmr.msra.gmra.mrb[0].mxu0 %v18155_v56  ;;  %v18177_v56 = vand.u32 4294901760, %v18176_v52  ;;  %v22662_v59 = vpack.c.bf16 %v18241_v44, %v18229_v26  ;;  %v22668_v52 = vpack.c.bf16 %v29385_v16, %v29380_v24  ;;  %v32000_v26 = vand.u32 4294901760, %v29216_v28 }
 0x423   : > { %21995 = vmatpush1.bf16.msra.mxu1 %v21994_v27  ;;  %7720 = vmatprep.mubr.f32.mxu1 %v31576_v33  ;;  %v22008_v27 = vpack.c.bf16 %v7623_v13, %v7611_v60  ;;  %v31997_v60 = vand.u32 4294901760, %v29177_v43  ;;  %v31998_v13 = vand.u32 4294901760, %v29180_v0  ;;  %v32001_v44 = vand.u32 4294901760, %v29218_v8 }
 0x424   : > { %21997 = vmatprep.subr.bf16.mxu1 %v21996_v40  ;;  %18161 = vmatprep.mubr.f32.mxu0 %v31576_v33  ;;  %v31999_v40 = vand.u32 4294901760, %v29240_v35  ;;  %v32002_v43 = vand.u32 4294901760, %v29202_v7  ;;  %v32003_v0 = vand.u32 4294901760, %v29220_v11  ;;  %v32004_v8 = vand.u32 4294901760, %v29279_v63 }
 0x425   : > { %22659 = vmatpush1.bf16.msra.mxu0 %v22658_v46  ;;  %v22010_v46 = vpack.c.bf16 %v31998_v13, %v31997_v60  ;;  %v22682_v13 = vpack.c.bf16 %v18215_v2, %v18203_v32  ;;  %v22686_v32 = vpack.c.bf16 %v18239_v39, %v32013_v50 }
 0x426   : > { %7722 = vmatmul.mubr.f32.gmra.mrb[2].mxu1 %v29242_v51  ;;  %18167 = vmatmul.mubr.f32.gmra.mrb[2].mxu0 %v18166_v14  ;;  %v18188_v14 = vand.u32 4294901760, %v18187_v9  ;;  %v22014_v28 = vpack.c.bf16 %v32003_v0, %v32002_v43  ;;  %v32006_v9 = vand.u32 4294901760, %v29307_v55  ;;  %v32008_v55 = vld [vmem:[#allocation45_spill] sm:$0xff] }
 0x427   : > { %21999 = vmatpush1.bf16.msra.mxu1 %v21998_v25  ;;  %7727 = vmatprep.mubr.f32.mxu1 %v31576_v33  ;;  %v22012_v25 = vpack.c.bf16 %v32001_v44, %v32000_v26  ;;  %v32012_v26 = vand.u32 4294901760, %v29385_v16 }
 0x428   : > { %22001 = vmatprep.subr.bf16.mxu1 %v29149_v23  ;;  %18172 = vmatprep.mubr.f32.mxu0 %v31576_v33 }
 0x429   : > { %22661 = vmatprep.subr.bf16.mxu0 %v22660_v15  ;;  %v8203_v15 = vpop.permute.xlu0 %8202 }
 0x42a   : > { %7729 = vmatmul.mubr.f32.gmra.mrb[4].mxu1 %v29281_v10  ;;  %18178 = vmatmul.mubr.f32.gmra.mrb[4].mxu0 %v18177_v56  ;;  %v8205_v56 = vpop.permute.xlu1 %8204  ;;  %v8210_v7 = vsel %vm618_vm1, %v8203_v15, %v8191_v1 }
 0x42b   : > { %7734 = vmatprep.mubr.f32.mxu1 %v31576_v33  ;;  %18183 = vmatprep.mubr.f32.mxu0 %v31576_v33  ;;  %v8211_v11 = vsel %vm618_vm1, %v8205_v56, %v8193_v57 }
 0x42c   : > { %22663 = vmatpush1.bf16.msra.mxu0 %v22662_v59 }
 0x42d   : > { %22665 = vmatprep.subr.bf16.mxu0 %v22664_v29 }
 0x42e   : > { %7736 = vmatmul.mubr.f32.gmra.mrb[6].mxu1 %v29312_v21  ;;  %18189 = vmatmul.mubr.f32.gmra.mrb[6].mxu0 %v18188_v14  ;;  %v8197_v29 = vpop.permute.xlu1 %8196  ;;  %v8227_v14 = vmul.f32 %v8210_v7, %v32008_v55 }
 0x42f   : > { %7822 = vmatprep.mubr.f32.mxu1 %v31576_v33  ;;  %18299 = vmatprep.mubr.f32.mxu0 %v31576_v33 }
 0x432   : > { %7825 = vmatmul.mubr.f32.vlgmr.msra.gmra.mrb[0].mxu1 %v29240_v35  ;;  %18301 = vmatmul.mubr.f32.vlgmr.msra.gmra.mrb[0].mxu0 %v29351_v20  ;;  %v32005_v35 = vand.u32 4294901760, %v29291_v4  ;;  %v32007_v4 = vand.u32 4294901760, %v29322_v36  ;;  %v8209_v60 = vpop.permute.xlu1 %8208 }
 0x433   : > { %22003 = vmatpush1.bf16.msra.mxu1 %v29199_v54  ;;  %22667 = vmatpush1.bf16.msra.mxu0 %v22666_v42  ;;  %v8229_v42 = vmul.f32 %v8211_v11, %v32008_v55  ;;  %v8225_v16 = vsel %vm618_vm1, %v8197_v29, %v8209_v60  ;;  %v8213_v30 = vsel %vm618_vm1, %v8209_v60, %v8197_v29 }
 0x434   : > { %22005 = vmatprep.subr.bf16.mxu1 %v29225_v45  ;;  %7830 = vmatprep.mubr.f32.mxu1 %v31576_v33  ;;  %v22680_v59 = vpack.c.bf16 %v32006_v9, %v32005_v35  ;;  %v8233_v0 = vmul.f32 %v8213_v30, %v32008_v55 }
 0x435   : > { %18306 = vmatprep.mubr.f32.mxu0 %v31576_v33  ;;  %22669 = vmatprep.subr.bf16.mxu0 %v22668_v52  ;;  %v32009_v52 = vld [vmem:[#allocation44_spill] sm:$0xff] }
 0x436   : > { %7833 = vmatmul.mubr.f32.gmra.mrb[2].mxu1 %v29279_v63  ;;  %18308 = vmatmul.mubr.f32.gmra.mrb[2].mxu0 %v29377_v18  ;;  %v8195_v63 = vpop.permute.xlu0 %8194  ;;  %v18779_v2 = vpop.permute.xlu1 %18778  ;;  %v8232_v43 = vmul.f32 %v8225_v16, %v32009_v52 }
 0x437   : > { %22007 = vmatpush1.bf16.msra.mxu1 %v29235_v5  ;;  %22671 = vmatpush1.bf16.msra.mxu0 %v22670_v3  ;;  %v8251_v3 = vand.u32 4294901760, %v8227_v14 }
 0x438   : > { %22009 = vmatprep.subr.bf16.mxu1 %v22008_v27  ;;  %22673 = vmatprep.subr.bf16.mxu0 %v29310_v22  ;;  %v8265_v29 = vand.u32 4294901760, %v8232_v43 }
 0x439   : > { %7838 = vmatprep.mubr.f32.mxu1 %v31576_v33  ;;  %18313 = vmatprep.mubr.f32.mxu0 %v31576_v33 }
 0x43a   : > { %7841 = vmatmul.mubr.f32.gmra.mrb[4].mxu1 %v29322_v36  ;;  %18315 = vmatmul.mubr.f32.gmra.mrb[4].mxu0 %v29403_v53  ;;  %v8207_v27 = vpop.permute.xlu0 %8206  ;;  %v18783_v9 = vpop.permute.xlu1 %18782 }
 0x43b   : > { %7846 = vmatprep.mubr.f32.mxu1 %v31576_v33  ;;  %18320 = vmatprep.mubr.f32.mxu0 %v31576_v33  ;;  %v8224_v34 = vsel %vm618_vm1, %v8195_v63, %v8207_v27 }
 0x43e   : > { %7849 = vmatmul.mubr.f32.gmra.mrb[6].mxu1 %v29341_v38  ;;  %18322 = vmatmul.mubr.f32.gmra.mrb[6].mxu0 %v29431_v31  ;;  %v8223_v38 = vsel %vm618_vm1, %v8193_v57, %v8205_v56 }
 0x43f   : > { %7927 = vmatprep.mubr.f32.mxu1 %v31576_v33  ;;  %18408 = vmatprep.mubr.f32.mxu0 %v31576_v33 }
 0x442   : > { %7931 = vmatmul.mubr.f32.vlgmr.msra.gmra.mrb[0].mxu1 %v31999_v40  ;;  %18411 = vmatmul.mubr.f32.vlgmr.msra.gmra.mrb[0].mxu0 %v29375_v48  ;;  %v32011_v40 = vand.u32 4294901760, %v29380_v24  ;;  %v8212_v24 = vsel %vm618_vm1, %v8207_v27, %v8195_v63 }
 0x443   : > { %22011 = vmatpush1.bf16.msra.mxu1 %v22010_v46  ;;  %22675 = vmatpush1.bf16.msra.mxu0 %v29326_v49  ;;  %v8231_v56 = vmul.f32 %v8212_v24, %v32008_v55  ;;  %v8263_v55 = vand.u32 4294901760, %v8233_v0 }
 0x444   : > { %22013 = vmatprep.subr.bf16.mxu1 %v22012_v25  ;;  %22677 = vmatprep.subr.bf16.mxu0 %v29396_v41  ;;  %v22684_v44 = vpack.c.bf16 %v32012_v26, %v32011_v40  ;;  %v29579_v25 = vsub.f32 %v8227_v14, %v8251_v3  ;;  %v21459_v14 = vld [vmem:[%s31126_s3 + $0x148] sm:$0xff] }
 0x445   : > { %7936 = vmatprep.mubr.f32.mxu1 %v31576_v33  ;;  %18416 = vmatprep.mubr.f32.mxu0 %v31576_v33  ;;  %v8259_v63 = vand.u32 4294901760, %v8231_v56 }
 0x446   : > { %7940 = vmatmul.mubr.f32.gmra.mrb[2].mxu1 %v32004_v8  ;;  %18419 = vmatmul.mubr.f32.gmra.mrb[2].mxu0 %v29401_v17  ;;  %v21458_v8 = vld [vmem:[%s31126_s3 + $0x140] sm:$0xff] }
 0x447   : > { %22015 = vmatpush1.bf16.msra.mxu1 %v22014_v28  ;;  %22679 = vmatpush1.bf16.msra.mxu0 %v29415_v19  ;;  %v29668_v26 = vsub.f32 %v8231_v56, %v8259_v63 }
 0x448   : > { %22017 = vmatprep.subr.bf16.mxu1 %v29149_v23  ;;  %22681 = vmatprep.subr.bf16.mxu0 %v22680_v59  ;;  %v8222_v23 = vsel %vm618_vm1, %v8191_v1, %v8203_v15  ;;  %v8255_v1 = vand.u32 4294901760, %v8229_v42  ;;  %v29607_v15 = vmul.f32 %v8224_v34, %v32009_v52 }
 0x449   : > { %7945 = vmatprep.mubr.f32.mxu1 %v31576_v33  ;;  %18424 = vmatprep.mubr.f32.mxu0 %v31576_v33  ;;  %v29562_v36 = vmul.f32 %v8222_v23, %v32009_v52  ;;  %v8240_v23 = vsel %vm656_vm0, %v21458_v8, 0 }
 0x44a   : > { %7949 = vmatmul.mubr.f32.gmra.mrb[4].mxu1 %v32007_v4  ;;  %18427 = vmatmul.mubr.f32.gmra.mrb[4].mxu0 %v29429_v58  ;;  %v29587_v57 = vsub.f32 %v8229_v42, %v8255_v1  ;;  %v29596_v47 = vpack.c.bf16 %v8255_v1, %v8251_v3  ;;  %v8261_v59 = vand.u32 4294901760, %v29607_v15 }
 0x44b   : > { %7954 = vmatprep.mubr.f32.mxu1 %v31576_v33  ;;  %18432 = vmatprep.mubr.f32.mxu0 %v31576_v33  ;;  %v8253_v46 = vand.u32 4294901760, %v29562_v36 }
 0x44c   : > { %v8382_v28 = vand.u32 4294901760, %v29587_v57  ;;  %v29654_v1 = vsub.f32 %v29607_v15, %v8261_v59 }
 0x44d   : > { %v29601_v39 = vsub.f32 %v29562_v36, %v8253_v46  ;;  %v21460_v36 = vld [vmem:[%s31126_s3 + $0x150] sm:$0xff] }
 0x44e   : > { %18435 = vmatmul.mubr.f32.gmra.mrb[6].mxu0 %v29450_v37  ;;  %7958 = vmatmul.mubr.f32.gmra.mrb[6].mxu1 %v7600_v12  ;;  %v32010_v12 = vand.u32 4294901760, %v29375_v48  ;;  %v18777_v48 = vpop.permute.xlu0 %18776  ;;  %v8243_v37 = vsel %vm656_vm0, %v21459_v14, 0  ;;  %v31466_v30 = vand.u32 4294901760, %v29654_v1 }
 0x44f   : > { %8052 = vmatprep.mubr.f32.mxu1 %v31576_v33  ;;  %18513 = vmatprep.mubr.f32.mxu0 %v31576_v33  ;;  %v18808_v7 = vsel %vm5112_vm4, %v18779_v2, %v18777_v48  ;;  %v18792_v4 = vsel %vm5112_vm4, %v18777_v48, %v18779_v2  ;;  %v29682_v48 = vpack.c.bf16 %v8263_v55, %v8259_v63  ;;  %v29692_v56 = vand.u32 4294901760, %v8243_v37 }
 0x451   : > { %v29722_v63 = vsub.f32 %v8243_v37, %v29692_v56 }
 0x452   : > { %18517 = vmatmul.mubr.f32.vlgmr.msra.gmra.mrb[0].mxu0 %v32010_v12  ;;  %8054 = vmatmul.mubr.f32.vlgmr.msra.gmra.mrb[0].mxu1 %v29214_v6 }
 0x453   : > { %22683 = vmatpush1.bf16.msra.mxu0 %v22682_v13  ;;  %22019 = vmatpush1.bf16.msra.mxu1 %v29199_v54  ;;  %v8228_v54 = vmul.f32 %v8223_v38, %v32009_v52  ;;  %v32015_v52 = vld [vmem:[#allocation43_spill] sm:$0xff]  ;;  %v29662_v38 = vand.u32 4294901760, %v8240_v23 }
 0x454   : > { %22021 = vmatprep.subr.bf16.mxu1 %v29225_v45  ;;  %22685 = vmatprep.subr.bf16.mxu0 %v22684_v44  ;;  %v32014_v45 = vand.u32 4294901760, %v29401_v17  ;;  %v8370_v17 = vand.u32 4294901760, %v29579_v25  ;;  %v18813_v3 = vmul.f32 %v18808_v7, %v32015_v52  ;;  %v32016_v13 = vld [vmem:[#allocation51_spill] sm:$0xff]  ;;  %v29670_v44 = vsub.f32 %v8232_v43, %v8265_v29 }
 0x455   : > { %8059 = vmatprep.mubr.f32.mxu1 %v31576_v33  ;;  %18522 = vmatprep.mubr.f32.mxu0 %v31576_v33  ;;  %v8257_v35 = vand.u32 4294901760, %v8228_v54  ;;  %v29660_v12 = vmul.f32 %v18792_v4, %v32016_v13  ;;  %v29690_v15 = vsub.f32 %v8240_v23, %v29662_v38  ;;  %v29694_v43 = vpack.c.bf16 %v8265_v29, %v8261_v59 }
 0x456   : > { %18526 = vmatmul.mubr.f32.gmra.mrb[2].mxu0 %v32014_v45  ;;  %8061 = vmatmul.mubr.f32.gmra.mrb[2].mxu1 %v29242_v51  ;;  %v8371_v58 = vsub.f32 %v29579_v25, %v8370_v17  ;;  %v18837_v2 = vand.u32 4294901760, %v18813_v3  ;;  %v31468_v59 = vand.u32 4294901760, %v29668_v26  ;;  %v29730_v23 = vsub.f32 %v29654_v1, %v31466_v30 }
 0x457   : > { %22687 = vmatpush1.bf16.msra.mxu0 %v22686_v32  ;;  %22023 = vmatpush1.bf16.msra.mxu1 %v29235_v5  ;;  %v18781_v5 = vpop.permute.xlu0 %18780  ;;  %v29642_v42 = vsub.f32 %v8228_v54, %v8257_v35  ;;  %v29666_v40 = vpack.c.bf16 %v8257_v35, %v8253_v46  ;;  %v18787_v54 = vpop.permute.xlu1 %18786  ;;  %v18839_v45 = vand.u32 4294901760, %v29660_v12  ;;  %v21461_v35 = vld [vmem:[%s31126_s3 + $0x158] sm:$0xff] }
 0x458   : > { %22689 = vmatprep.subr.bf16.mxu0 %v29310_v22  ;;  %8066 = vmatprep.mubr.f32.mxu1 %v31576_v33  ;;  %v31472_v22 = vand.u32 4294901760, %v29601_v39  ;;  %v18809_v11 = vsel %vm5112_vm4, %v18783_v9, %v18781_v5  ;;  %v8372_v50 = vand.u32 4294901760, %v8371_v58  ;;  %v18793_v34 = vsel %vm5112_vm4, %v18781_v5, %v18783_v9 }
 0x459   : > { %18531 = vmatprep.mubr.f32.mxu0 %v31576_v33  ;;  %22025 = vmatprep.subr.bf16.mxu1 %v29596_v47  ;;  %v29646_v27 = vmul.f32 %v18809_v11, %v32015_v52  ;;  %v31471_v46 = vand.u32 4294901760, %v29642_v42  ;;  %v18814_v8 = vmul.f32 %v18793_v34, %v32016_v13  ;;  %v29707_v9 = vsub.f32 %v29660_v12, %v18839_v45 }
 0x45a   : > { %18535 = vmatmul.mubr.f32.gmra.mrb[4].mxu0 %v18175_v61  ;;  %8068 = vmatmul.mubr.f32.gmra.mrb[4].mxu1 %v29281_v10  ;;  %v8383_v61 = vsub.f32 %v29587_v57, %v8382_v28  ;;  %v29651_v60 = vsub.f32 %v29601_v39, %v31472_v22  ;;  %v8249_v4 = vsel %vm656_vm0, %v21461_v35, 0 }
 0x45b   : > { %8073 = vmatprep.mubr.f32.mxu1 %v31576_v33  ;;  %18540 = vmatprep.mubr.f32.mxu0 %v31576_v33  ;;  %v18841_v24 = vand.u32 4294901760, %v29646_v27  ;;  %v18785_v16 = vpop.permute.xlu0 %18784  ;;  %v8389_v7 = vsub.f32 %v29642_v42, %v31471_v46  ;;  %v18843_v58 = vand.u32 4294901760, %v18814_v8  ;;  %v18791_v14 = vpop.permute.xlu1 %18790  ;;  %v18962_v12 = vand.u32 4294901760, %v29707_v9 }
 0x45c   : > { %v8384_v32 = vand.u32 4294901760, %v8383_v61  ;;  %v8378_v37 = vand.u32 4294901760, %v29651_v60  ;;  %v18794_v34 = vsel %vm5112_vm4, %v18785_v16, %v18787_v54  ;;  %v18810_v60 = vsel %vm5112_vm4, %v18787_v54, %v18785_v16 }
 0x45d   : > { %v29716_v11 = vpack.c.bf16 %v18841_v24, %v18837_v2  ;;  %v29774_v16 = vpack.c.bf16 %v18843_v58, %v18839_v45  ;;  %v29776_v54 = vsub.f32 %v18814_v8, %v18843_v58 }
 0x45e   : > { %8075 = vmatmul.mubr.f32.gmra.mrb[6].mxu1 %v29312_v21  ;;  %18544 = vmatmul.mubr.f32.gmra.mrb[6].mxu0 %v18186_v62  ;;  %v29675_v62 = vsub.f32 %v8233_v0, %v8263_v55  ;;  %v31465_v0 = vand.u32 4294901760, %v29670_v44  ;;  %v22032_v5 = vpack.c.bf16 %v8384_v32, %v8372_v50  ;;  %v29739_v55 = vsub.f32 %v18813_v3, %v18837_v2  ;;  %v21515_v3 = vld [vmem:[%s31126_s3 + $0x300] sm:$0xff] }
 0x45f   : > { %8153 = vmatprep.mubr.f32.mxu1 %v31576_v33  ;;  %18638 = vmatprep.mubr.f32.mxu0 %v31576_v33  ;;  %v18789_v61 = vpop.permute.xlu0 %18788  ;;  %v8395_v50 = vsub.f32 %v29668_v26, %v31468_v59  ;;  %v29755_v32 = vsub.f32 %v29646_v27, %v18841_v24  ;;  %v31470_v27 = vand.u32 4294901760, %v29722_v63 }
 0x460   : > { %v18811_v35 = vsel %vm5112_vm4, %v18791_v14, %v18789_v61  ;;  %v18795_v59 = vsel %vm5112_vm4, %v18789_v61, %v18791_v14  ;;  %v31475_v8 = vand.u32 4294901760, %v29739_v55 }
 0x461   : > { %v8396_v30 = vand.u32 4294901760, %v8395_v50  ;;  %v8338_v61 = vsub.f32 %v29722_v63, %v31470_v27  ;;  %v21517_v27 = vld [vmem:[%s31126_s3 + $0x310] sm:$0xff] }
 0x462   : > { %8155 = vmatmul.mubr.f32.vlgmr.msra.gmra.mrb[0].mxu1 %v29214_v6  ;;  %18640 = vmatmul.mubr.f32.vlgmr.msra.gmra.mrb[0].mxu0 %v29351_v20  ;;  %v8246_v6 = vsel %vm656_vm0, %v21460_v36, 0  ;;  %v29760_v36 = vand.u32 4294901760, %v8249_v4 }
 0x463   : > { %22027 = vmatpush1.bf16.msra.mxu1 %v29666_v40  ;;  %22691 = vmatpush1.bf16.msra.mxu0 %v29326_v49  ;;  %v31467_v49 = vand.u32 4294901760, %v29675_v62  ;;  %v29724_v29 = vand.u32 4294901760, %v8246_v6 }
 0x464   : > { %22693 = vmatprep.subr.bf16.mxu0 %v29396_v41  ;;  %8160 = vmatprep.mubr.f32.mxu1 %v31576_v33  ;;  %v31469_v41 = vand.u32 4294901760, %v29690_v15  ;;  %v29786_v45 = vsub.f32 %v8249_v4, %v29760_v36 }
 0x465   : > { %22029 = vmatprep.subr.bf16.mxu1 %v29682_v48  ;;  %18645 = vmatprep.mubr.f32.mxu0 %v31576_v33  ;;  %v29770_v24 = vsub.f32 %v8246_v6, %v29724_v29  ;;  %v21516_v6 = vld [vmem:[%s31126_s3 + $0x308] sm:$0xff] }
 0x466   : > { %8162 = vmatmul.mubr.f32.gmra.mrb[2].mxu1 %v29242_v51  ;;  %18647 = vmatmul.mubr.f32.gmra.mrb[2].mxu0 %v29377_v18  ;;  %v29735_v51 = vsub.f32 %v29670_v44, %v31465_v0  ;;  %v8327_v2 = vsub.f32 %v29690_v15, %v31469_v41  ;;  %v18817_v0 = vmul.f32 %v18810_v60, %v32015_v52  ;;  %v8359_v22 = vand.u32 4294901760, %v29786_v45 }
 0x467   : > { %22031 = vmatpush1.bf16.msra.mxu1 %v29694_v43  ;;  %22695 = vmatpush1.bf16.msra.mxu0 %v29415_v19  ;;  %v8407_v19 = vsub.f32 %v29675_v62, %v31467_v49  ;;  %v18819_v41 = vmul.f32 %v18811_v35, %v32015_v52  ;;  %v31473_v14 = vand.u32 4294901760, %v29770_v24  ;;  %v18816_v52 = vmul.f32 %v18794_v34, %v32016_v13 }
 0x468   : > { %22033 = vmatprep.subr.bf16.mxu1 %v22032_v5  ;;  %8167 = vmatprep.mubr.f32.mxu1 %v31576_v33  ;;  %v18826_v5 = vsel %vm656_vm0, %v21515_v3, 0  ;;  %v8328_v58 = vand.u32 4294901760, %v8327_v2  ;;  %v18845_v3 = vand.u32 4294901760, %v18817_v0  ;;  %v18818_v2 = vmul.f32 %v18795_v59, %v32016_v13 }
 0x469   : > { %18652 = vmatprep.mubr.f32.mxu0 %v31576_v33  ;;  %22697 = vmatprep.subr.bf16.mxu0 %v29716_v11  ;;  %v8408_v49 = vand.u32 4294901760, %v8407_v19  ;;  %v29796_v50 = vand.u32 4294901760, %v18826_v5  ;;  %v8402_v19 = vand.u32 4294901760, %v29730_v23  ;;  %v8414_v35 = vand.u32 4294901760, %v29735_v51 }
 0x46a   : > { %18654 = vmatmul.mubr.f32.gmra.mrb[4].mxu0 %v29403_v53  ;;  %8169 = vmatmul.mubr.f32.gmra.mrb[4].mxu1 %v29281_v10  ;;  %v8390_v10 = vand.u32 4294901760, %v8389_v7  ;;  %v31474_v7 = vand.u32 4294901760, %v29755_v32  ;;  %v18849_v46 = vand.u32 4294901760, %v18819_v41  ;;  %v8339_v13 = vand.u32 4294901760, %v8338_v61 }
 0x46b   : > { %8174 = vmatprep.mubr.f32.mxu1 %v31576_v33  ;;  %18659 = vmatprep.mubr.f32.mxu0 %v31576_v33  ;;  %v22036_v60 = vpack.c.bf16 %v8408_v49, %v8396_v30  ;;  %v8349_v30 = vsub.f32 %v29770_v24, %v31473_v14  ;;  %v29820_v59 = vsub.f32 %v18826_v5, %v29796_v50  ;;  %v18974_v51 = vand.u32 4294901760, %v29776_v54 }
 0x46c   : > { %v22034_v4 = vpack.c.bf16 %v8390_v10, %v8378_v37  ;;  %v18957_v37 = vsub.f32 %v29739_v55, %v31475_v8  ;;  %v18969_v23 = vsub.f32 %v29755_v32, %v31474_v7  ;;  %v18847_v34 = vand.u32 4294901760, %v18816_v52 }
 0x46d   : > { %v29825_v10 = vsub.f32 %v18817_v0, %v18845_v3  ;;  %v22038_v5 = vpack.c.bf16 %v8414_v35, %v8402_v19  ;;  %v22040_v61 = vpack.c.bf16 %v29587_v57, %v29579_v25  ;;  %v21518_v0 = vld [vmem:[%s31126_s3 + $0x318] sm:$0xff]  ;;  %v31480_v19 = vand.u32 4294901760, %v29820_v59  ;;  %v8950_v25 = vpop.permute.xlu0 %8949  ;;  %v8952_v57 = vpop.permute.xlu1 %8951 }
 0x46e   : > { %18661 = vmatmul.mubr.f32.gmra.mrb[6].mxu0 %v29431_v31  ;;  %8176 = vmatmul.mubr.f32.gmra.mrb[6].mxu1 %v29312_v21  ;;  %v18829_v21 = vsel %vm656_vm0, %v21516_v6, 0  ;;  %v18851_v6 = vand.u32 4294901760, %v18818_v2  ;;  %v18970_v14 = vand.u32 4294901760, %v18969_v23  ;;  %v18963_v8 = vsub.f32 %v29707_v9, %v18962_v12 }
 0x46f   : > { %8323 = vmatprep.mubr.f32.mxu1 %v31576_v33  ;;  %18739 = vmatprep.mubr.f32.mxu0 %v31576_v33  ;;  %v29822_v49 = vand.u32 4294901760, %v18829_v21 }
 0x471   : > { %v29846_v35 = vsub.f32 %v18829_v21, %v29822_v49  ;;  %v29862_v21 = vsub.f32 %v18818_v2, %v18851_v6 }
 0x472   : > { %18741 = vmatmul.mubr.f32.vlgmr.msra.gmra.mrb[0].mxu0 %v29351_v20  ;;  %8329 = vmatmul.mubr.f32.vlgmr.msra.gmra.mrb[0].mxu1 %v8328_v58  ;;  %v18832_v20 = vsel %vm656_vm0, %v21517_v27, 0  ;;  %v29830_v58 = vsub.f32 %v18819_v41, %v18849_v46  ;;  %v8360_v27 = vsub.f32 %v29786_v45, %v8359_v22  ;;  %v8350_v41 = vand.u32 4294901760, %v8349_v30 }
 0x473   : > { %22035 = vmatpush1.bf16.msra.mxu1 %v22034_v4  ;;  %8334 = vmatprep.mubr.f32.mxu1 %v31576_v33  ;;  %v29841_v4 = vpack.c.bf16 %v18849_v46, %v18845_v3  ;;  %v29848_v7 = vand.u32 4294901760, %v18832_v20  ;;  %v18975_v46 = vsub.f32 %v29776_v54, %v18974_v51  ;;  %v29858_v3 = vsub.f32 %v18816_v52, %v18847_v34 }
 0x474   : > { %22037 = vmatprep.subr.bf16.mxu1 %v22036_v60  ;;  %18746 = vmatprep.mubr.f32.mxu0 %v31576_v33  ;;  %v18958_v60 = vand.u32 4294901760, %v18957_v37  ;;  %v29860_v37 = vpack.c.bf16 %v18851_v6, %v18847_v34  ;;  %v8361_v23 = vand.u32 4294901760, %v8360_v27  ;;  %v31478_v30 = vand.u32 4294901760, %v29825_v10 }
 0x475   : > { %22699 = vmatpush1.bf16.msra.mxu0 %v29774_v16  ;;  %v18913_v52 = vsub.f32 %v29820_v59, %v31480_v19  ;;  %v31476_v2 = vand.u32 4294901760, %v29846_v35  ;;  %v29874_v34 = vsub.f32 %v18832_v20, %v29848_v7 }
 0x476   : > { %18748 = vmatmul.mubr.f32.gmra.mrb[2].mxu0 %v29377_v18  ;;  %8340 = vmatmul.mubr.f32.gmra.mrb[2].mxu1 %v8339_v13  ;;  %v18835_v18 = vsel %vm656_vm0, %v21518_v0, 0  ;;  %v22704_v13 = vpack.c.bf16 %v18970_v14, %v18958_v60  ;;  %v31479_v14 = vand.u32 4294901760, %v29858_v3  ;;  %v18976_v0 = vand.u32 4294901760, %v18975_v46 }
 0x477   : > { %22039 = vmatpush1.bf16.msra.mxu1 %v22038_v5  ;;  %8345 = vmatprep.mubr.f32.mxu1 %v31576_v33  ;;  %v31477_v5 = vand.u32 4294901760, %v29830_v58  ;;  %v29876_v6 = vand.u32 4294901760, %v18835_v18  ;;  %v18981_v20 = vsub.f32 %v29825_v10, %v31478_v30  ;;  %v18914_v60 = vand.u32 4294901760, %v18913_v52 }
 0x478   : > { %22041 = vmatprep.subr.bf16.mxu1 %v22040_v61  ;;  %18753 = vmatprep.mubr.f32.mxu0 %v31576_v33  ;;  %v18998_v61 = vand.u32 4294901760, %v29862_v21  ;;  %v18987_v46 = vsub.f32 %v29858_v3, %v31479_v14 }
 0x479   : > { %22701 = vmatprep.subr.bf16.mxu0 %v29841_v4  ;;  %v18993_v27 = vsub.f32 %v29830_v58, %v31477_v5 }
 0x47a   : > { %8351 = vmatmul.mubr.f32.gmra.mrb[4].mxu1 %v8350_v41  ;;  %18755 = vmatmul.mubr.f32.gmra.mrb[4].mxu0 %v29403_v53  ;;  %v18964_v53 = vand.u32 4294901760, %v18963_v8  ;;  %v18924_v41 = vsub.f32 %v29846_v35, %v31476_v2  ;;  %v29895_v8 = vsub.f32 %v18835_v18, %v29876_v6  ;;  %v18982_v2 = vand.u32 4294901760, %v18981_v20 }
 0x47b   : > { %8356 = vmatprep.mubr.f32.mxu1 %v31576_v33  ;;  %18760 = vmatprep.mubr.f32.mxu0 %v31576_v33  ;;  %v18994_v5 = vand.u32 4294901760, %v18993_v27  ;;  %v22044_v18 = vpack.c.bf16 %v29675_v62, %v29668_v26  ;;  %v22046_v20 = vpack.c.bf16 %v29670_v44, %v29654_v1 }
 0x47c   : > { %22703 = vmatpush1.bf16.msra.mxu0 %v29860_v37  ;;  %v22706_v52 = vpack.c.bf16 %v18976_v0, %v18964_v53  ;;  %v18925_v30 = vand.u32 4294901760, %v18924_v41  ;;  %v18945_v19 = vand.u32 4294901760, %v29895_v8  ;;  %v18988_v53 = vand.u32 4294901760, %v18987_v46 }
 0x47d   : > { %22705 = vmatprep.subr.bf16.mxu0 %v22704_v13  ;;  %v18934_v13 = vand.u32 4294901760, %v29874_v34  ;;  %v22708_v27 = vpack.c.bf16 %v18994_v5, %v18982_v2  ;;  %v22712_v5 = vpack.c.bf16 %v29755_v32, %v29739_v55  ;;  %v22714_v2 = vpack.c.bf16 %v29776_v54, %v29707_v9 }
 0x47e   : > { %8362 = vmatmul.mubr.f32.gmra.mrb[6].mxu1 %v8361_v23  ;;  %18762 = vmatmul.mubr.f32.gmra.mrb[6].mxu0 %v29431_v31  ;;  %v18999_v31 = vsub.f32 %v29862_v21, %v18998_v61  ;;  %v22042_v23 = vpack.c.bf16 %v29642_v42, %v29601_v39  ;;  %v18946_v41 = vsub.f32 %v29895_v8, %v18945_v19  ;;  %v32033_v9 = vand.u32 4294901760, %v29858_v3 }
 0x47f   : > { %8472 = vmatprep.mubr.f32.mxu1 %v31576_v33  ;;  %18909 = vmatprep.mubr.f32.mxu0 %v31576_v33  ;;  %v18935_v14 = vsub.f32 %v29874_v34, %v18934_v13 }
 0x480   : > { %v19000_v0 = vand.u32 4294901760, %v18999_v31  ;;  %v22718_v31 = vpack.c.bf16 %v29862_v21, %v29858_v3 }
 0x482   : > { %8474 = vmatmul.mubr.f32.vlgmr.msra.gmra.mrb[0].mxu1 %v29662_v38  ;;  %18915 = vmatmul.mubr.f32.vlgmr.msra.gmra.mrb[0].mxu0 %v18914_v60  ;;  %v18936_v60 = vand.u32 4294901760, %v18935_v14  ;;  %v22710_v46 = vpack.c.bf16 %v19000_v0, %v18988_v53  ;;  %v22716_v14 = vpack.c.bf16 %v29830_v58, %v29825_v10  ;;  %v32020_v53 = vand.u32 4294901760, %v29668_v26 }
 0x483   : > { %22043 = vmatpush1.bf16.msra.mxu1 %v22042_v23  ;;  %8479 = vmatprep.mubr.f32.mxu1 %v31576_v33  ;;  %v22056_v23 = vpack.c.bf16 %v8382_v28, %v8370_v17  ;;  %v32017_v17 = vand.u32 4294901760, %v29601_v39  ;;  %v32018_v28 = vand.u32 4294901760, %v29642_v42  ;;  %v32021_v0 = vand.u32 4294901760, %v29675_v62 }
 0x484   : > { %22045 = vmatprep.subr.bf16.mxu1 %v22044_v18  ;;  %18920 = vmatprep.mubr.f32.mxu0 %v31576_v33  ;;  %v32019_v18 = vand.u32 4294901760, %v29690_v15  ;;  %v32022_v39 = vand.u32 4294901760, %v29654_v1  ;;  %v32023_v42 = vand.u32 4294901760, %v29670_v44  ;;  %v32024_v62 = vand.u32 4294901760, %v29722_v63 }
 0x485   : > { %22707 = vmatpush1.bf16.msra.mxu0 %v22706_v52  ;;  %v22058_v52 = vpack.c.bf16 %v32018_v28, %v32017_v17  ;;  %v22730_v28 = vpack.c.bf16 %v18974_v51, %v18962_v12  ;;  %v22734_v12 = vpack.c.bf16 %v18998_v61, %v32033_v9 }
 0x486   : > { %8481 = vmatmul.mubr.f32.gmra.mrb[2].mxu1 %v29692_v56  ;;  %18926 = vmatmul.mubr.f32.gmra.mrb[2].mxu0 %v18925_v30  ;;  %v18947_v30 = vand.u32 4294901760, %v18946_v41  ;;  %v22062_v26 = vpack.c.bf16 %v32023_v42, %v32022_v39  ;;  %v32026_v41 = vand.u32 4294901760, %v29755_v32  ;;  %v32028_v32 = vld [vmem:[#allocation46_spill] sm:$0xff] }
 0x487   : > { %22047 = vmatpush1.bf16.msra.mxu1 %v22046_v20  ;;  %8486 = vmatprep.mubr.f32.mxu1 %v31576_v33  ;;  %v22060_v20 = vpack.c.bf16 %v32021_v0, %v32020_v53  ;;  %v32032_v53 = vand.u32 4294901760, %v29830_v58 }
 0x488   : > { %22049 = vmatprep.subr.bf16.mxu1 %v29596_v47  ;;  %18931 = vmatprep.mubr.f32.mxu0 %v31576_v33 }
 0x489   : > { %22709 = vmatprep.subr.bf16.mxu0 %v22708_v27  ;;  %v8962_v27 = vpop.permute.xlu0 %8961 }
 0x48a   : > { %8488 = vmatmul.mubr.f32.gmra.mrb[4].mxu1 %v29724_v29  ;;  %18937 = vmatmul.mubr.f32.gmra.mrb[4].mxu0 %v18936_v60  ;;  %v8964_v60 = vpop.permute.xlu1 %8963  ;;  %v8969_v1 = vsel %vm2081_vm5, %v8962_v27, %v8950_v25 }
 0x48b   : > { %8493 = vmatprep.mubr.f32.mxu1 %v31576_v33  ;;  %18942 = vmatprep.mubr.f32.mxu0 %v31576_v33  ;;  %v8970_v44 = vsel %vm2081_vm5, %v8964_v60, %v8952_v57 }
 0x48c   : > { %22711 = vmatpush1.bf16.msra.mxu0 %v22710_v46 }
 0x48d   : > { %22713 = vmatprep.subr.bf16.mxu0 %v22712_v5 }
 0x48e   : > { %8495 = vmatmul.mubr.f32.gmra.mrb[6].mxu1 %v29760_v36  ;;  %18948 = vmatmul.mubr.f32.gmra.mrb[6].mxu0 %v18947_v30  ;;  %v8956_v5 = vpop.permute.xlu1 %8955  ;;  %v8986_v30 = vmul.f32 %v8969_v1, %v32028_v32 }
 0x48f   : > { %8581 = vmatprep.mubr.f32.mxu1 %v31576_v33  ;;  %19058 = vmatprep.mubr.f32.mxu0 %v31576_v33 }
 0x492   : > { %8584 = vmatmul.mubr.f32.vlgmr.msra.gmra.mrb[0].mxu1 %v29690_v15  ;;  %19060 = vmatmul.mubr.f32.vlgmr.msra.gmra.mrb[0].mxu0 %v29796_v50  ;;  %v32025_v15 = vand.u32 4294901760, %v29739_v55  ;;  %v32027_v55 = vand.u32 4294901760, %v29770_v24  ;;  %v8968_v17 = vpop.permute.xlu1 %8967 }
 0x493   : > { %22051 = vmatpush1.bf16.msra.mxu1 %v29666_v40  ;;  %22715 = vmatpush1.bf16.msra.mxu0 %v22714_v2  ;;  %v8988_v2 = vmul.f32 %v8970_v44, %v32028_v32  ;;  %v8984_v58 = vsel %vm2081_vm5, %v8956_v5, %v8968_v17  ;;  %v8972_v3 = vsel %vm2081_vm5, %v8968_v17, %v8956_v5 }
 0x494   : > { %22053 = vmatprep.subr.bf16.mxu1 %v29682_v48  ;;  %8589 = vmatprep.mubr.f32.mxu1 %v31576_v33  ;;  %v22728_v46 = vpack.c.bf16 %v32026_v41, %v32025_v15  ;;  %v8992_v42 = vmul.f32 %v8972_v3, %v32028_v32 }
 0x495   : > { %19065 = vmatprep.mubr.f32.mxu0 %v31576_v33  ;;  %22717 = vmatprep.subr.bf16.mxu0 %v22716_v14  ;;  %v32029_v14 = vld [vmem:[#allocation52_spill] sm:$0xff] }
 0x496   : > { %8592 = vmatmul.mubr.f32.gmra.mrb[2].mxu1 %v29722_v63  ;;  %19067 = vmatmul.mubr.f32.gmra.mrb[2].mxu0 %v29822_v49  ;;  %v8954_v63 = vpop.permute.xlu0 %8953  ;;  %v19538_v51 = vpop.permute.xlu1 %19537  ;;  %v8991_v39 = vmul.f32 %v8984_v58, %v32029_v14 }
 0x497   : > { %22055 = vmatpush1.bf16.msra.mxu1 %v29694_v43  ;;  %22719 = vmatpush1.bf16.msra.mxu0 %v22718_v31  ;;  %v9010_v31 = vand.u32 4294901760, %v8986_v30 }
 0x498   : > { %22057 = vmatprep.subr.bf16.mxu1 %v22056_v23  ;;  %22721 = vmatprep.subr.bf16.mxu0 %v29716_v11  ;;  %v9024_v5 = vand.u32 4294901760, %v8991_v39 }
 0x499   : > { %8597 = vmatprep.mubr.f32.mxu1 %v31576_v33  ;;  %19072 = vmatprep.mubr.f32.mxu0 %v31576_v33 }
 0x49a   : > { %8600 = vmatmul.mubr.f32.gmra.mrb[4].mxu1 %v29770_v24  ;;  %19074 = vmatmul.mubr.f32.gmra.mrb[4].mxu0 %v29848_v7  ;;  %v8966_v23 = vpop.permute.xlu0 %8965  ;;  %v19542_v41 = vpop.permute.xlu1 %19541 }
 0x49b   : > { %8605 = vmatprep.mubr.f32.mxu1 %v31576_v33  ;;  %19079 = vmatprep.mubr.f32.mxu0 %v31576_v33  ;;  %v8983_v54 = vsel %vm2081_vm5, %v8954_v63, %v8966_v23 }
 0x49e   : > { %8608 = vmatmul.mubr.f32.gmra.mrb[6].mxu1 %v29786_v45  ;;  %19081 = vmatmul.mubr.f32.gmra.mrb[6].mxu0 %v29876_v6  ;;  %v8982_v45 = vsel %vm2081_vm5, %v8952_v57, %v8964_v60 }
 0x49f   : > { %8686 = vmatprep.mubr.f32.mxu1 %v31576_v33  ;;  %19167 = vmatprep.mubr.f32.mxu0 %v31576_v33 }
 0x4a2   : > { %8690 = vmatmul.mubr.f32.vlgmr.msra.gmra.mrb[0].mxu1 %v32019_v18  ;;  %19170 = vmatmul.mubr.f32.vlgmr.msra.gmra.mrb[0].mxu0 %v29820_v59  ;;  %v32031_v18 = vand.u32 4294901760, %v29825_v10  ;;  %v8971_v10 = vsel %vm2081_vm5, %v8966_v23, %v8954_v63 }
 0x4a3   : > { %22059 = vmatpush1.bf16.msra.mxu1 %v22058_v52  ;;  %22723 = vmatpush1.bf16.msra.mxu0 %v29774_v16  ;;  %v8990_v60 = vmul.f32 %v8971_v10, %v32028_v32  ;;  %v9022_v32 = vand.u32 4294901760, %v8992_v42 }
 0x4a4   : > { %22061 = vmatprep.subr.bf16.mxu1 %v22060_v20  ;;  %22725 = vmatprep.subr.bf16.mxu0 %v29841_v4  ;;  %v22732_v0 = vpack.c.bf16 %v32032_v53, %v32031_v18  ;;  %v30024_v20 = vsub.f32 %v8986_v30, %v9010_v31  ;;  %v21463_v30 = vld [vmem:[%s31126_s3 + $0x168] sm:$0xff] }
 0x4a5   : > { %8695 = vmatprep.mubr.f32.mxu1 %v31576_v33  ;;  %19175 = vmatprep.mubr.f32.mxu0 %v31576_v33  ;;  %v9018_v63 = vand.u32 4294901760, %v8990_v60 }
 0x4a6   : > { %8699 = vmatmul.mubr.f32.gmra.mrb[2].mxu1 %v32024_v62  ;;  %19178 = vmatmul.mubr.f32.gmra.mrb[2].mxu0 %v29846_v35  ;;  %v21462_v62 = vld [vmem:[%s31126_s3 + $0x160] sm:$0xff] }
 0x4a7   : > { %22063 = vmatpush1.bf16.msra.mxu1 %v22062_v26  ;;  %22727 = vmatpush1.bf16.msra.mxu0 %v29860_v37  ;;  %v30113_v53 = vsub.f32 %v8990_v60, %v9018_v63 }
 0x4a8   : > { %22065 = vmatprep.subr.bf16.mxu1 %v29596_v47  ;;  %22729 = vmatprep.subr.bf16.mxu0 %v22728_v46  ;;  %v8981_v47 = vsel %vm2081_vm5, %v8950_v25, %v8962_v27  ;;  %v9014_v25 = vand.u32 4294901760, %v8988_v2  ;;  %v30052_v27 = vmul.f32 %v8983_v54, %v32029_v14 }
 0x4a9   : > { %8704 = vmatprep.mubr.f32.mxu1 %v31576_v33  ;;  %19183 = vmatprep.mubr.f32.mxu0 %v31576_v33  ;;  %v30007_v24 = vmul.f32 %v8981_v47, %v32029_v14  ;;  %v8999_v47 = vsel %vm656_vm0, %v21462_v62, 0 }
 0x4aa   : > { %8708 = vmatmul.mubr.f32.gmra.mrb[4].mxu1 %v32027_v55  ;;  %19186 = vmatmul.mubr.f32.gmra.mrb[4].mxu0 %v29874_v34  ;;  %v30032_v57 = vsub.f32 %v8988_v2, %v9014_v25  ;;  %v30041_v21 = vpack.c.bf16 %v9014_v25, %v9010_v31  ;;  %v9020_v46 = vand.u32 4294901760, %v30052_v27 }
 0x4ab   : > { %8713 = vmatprep.mubr.f32.mxu1 %v31576_v33  ;;  %19191 = vmatprep.mubr.f32.mxu0 %v31576_v33  ;;  %v9012_v52 = vand.u32 4294901760, %v30007_v24 }
 0x4ac   : > { %v9141_v26 = vand.u32 4294901760, %v30032_v57  ;;  %v30099_v25 = vsub.f32 %v30052_v27, %v9020_v46 }
 0x4ad   : > { %v30046_v61 = vsub.f32 %v30007_v24, %v9012_v52  ;;  %v21464_v24 = vld [vmem:[%s31126_s3 + $0x170] sm:$0xff] }
 0x4ae   : > { %19194 = vmatmul.mubr.f32.gmra.mrb[6].mxu0 %v29895_v8  ;;  %8717 = vmatmul.mubr.f32.gmra.mrb[6].mxu1 %v8359_v22  ;;  %v32030_v22 = vand.u32 4294901760, %v29820_v59  ;;  %v19536_v59 = vpop.permute.xlu0 %19535  ;;  %v9002_v8 = vsel %vm656_vm0, %v21463_v30, 0  ;;  %v31482_v3 = vand.u32 4294901760, %v30099_v25 }
 0x4af   : > { %8811 = vmatprep.mubr.f32.mxu1 %v31576_v33  ;;  %19272 = vmatprep.mubr.f32.mxu0 %v31576_v33  ;;  %v19567_v1 = vsel %vm5880_vm6, %v19538_v51, %v19536_v59  ;;  %v19551_v55 = vsel %vm5880_vm6, %v19536_v59, %v19538_v51  ;;  %v30127_v59 = vpack.c.bf16 %v9022_v32, %v9018_v63  ;;  %v30137_v60 = vand.u32 4294901760, %v9002_v8 }
 0x4b1   : > { %v30167_v63 = vsub.f32 %v9002_v8, %v30137_v60 }
 0x4b2   : > { %19276 = vmatmul.mubr.f32.vlgmr.msra.gmra.mrb[0].mxu0 %v32030_v22  ;;  %8813 = vmatmul.mubr.f32.vlgmr.msra.gmra.mrb[0].mxu1 %v29662_v38 }
 0x4b3   : > { %22731 = vmatpush1.bf16.msra.mxu0 %v22730_v28  ;;  %22067 = vmatpush1.bf16.msra.mxu1 %v29666_v40  ;;  %v8987_v40 = vmul.f32 %v8982_v45, %v32029_v14  ;;  %v32035_v14 = vld [vmem:[#allocation57_spill] sm:$0xff]  ;;  %v32036_v28 = vld [vmem:[#allocation60_spill] sm:$0xff]  ;;  %v30107_v45 = vand.u32 4294901760, %v8999_v47 }
 0x4b4   : > { %22069 = vmatprep.subr.bf16.mxu1 %v29682_v48  ;;  %22733 = vmatprep.subr.bf16.mxu0 %v22732_v0  ;;  %v32034_v48 = vand.u32 4294901760, %v29846_v35  ;;  %v9129_v35 = vand.u32 4294901760, %v30024_v20  ;;  %v19572_v31 = vmul.f32 %v19567_v1, %v32035_v14  ;;  %v30105_v22 = vmul.f32 %v19551_v55, %v32036_v28 }
 0x4b5   : > { %8818 = vmatprep.mubr.f32.mxu1 %v31576_v33  ;;  %19281 = vmatprep.mubr.f32.mxu0 %v31576_v33  ;;  %v9016_v15 = vand.u32 4294901760, %v8987_v40  ;;  %v30115_v0 = vsub.f32 %v8991_v39, %v9024_v5  ;;  %v30135_v27 = vsub.f32 %v8999_v47, %v30107_v45  ;;  %v30139_v39 = vpack.c.bf16 %v9024_v5, %v9020_v46 }
 0x4b6   : > { %19285 = vmatmul.mubr.f32.gmra.mrb[2].mxu0 %v32034_v48  ;;  %8820 = vmatmul.mubr.f32.gmra.mrb[2].mxu1 %v29692_v56  ;;  %v9130_v34 = vsub.f32 %v30024_v20, %v9129_v35  ;;  %v19596_v51 = vand.u32 4294901760, %v19572_v31  ;;  %v19598_v48 = vand.u32 4294901760, %v30105_v22  ;;  %v31484_v46 = vand.u32 4294901760, %v30113_v53 }
 0x4b7   : > { %22735 = vmatpush1.bf16.msra.mxu0 %v22734_v12  ;;  %22071 = vmatpush1.bf16.msra.mxu1 %v29694_v43  ;;  %v19540_v43 = vpop.permute.xlu0 %19539  ;;  %v30087_v2 = vsub.f32 %v8987_v40, %v9016_v15  ;;  %v30111_v18 = vpack.c.bf16 %v9016_v15, %v9012_v52  ;;  %v19546_v40 = vpop.permute.xlu1 %19545  ;;  %v21465_v15 = vld [vmem:[%s31126_s3 + $0x178] sm:$0xff]  ;;  %v30175_v47 = vsub.f32 %v30099_v25, %v31482_v3 }
 0x4b8   : > { %22737 = vmatprep.subr.bf16.mxu0 %v29716_v11  ;;  %8825 = vmatprep.mubr.f32.mxu1 %v31576_v33  ;;  %v31488_v11 = vand.u32 4294901760, %v30046_v61  ;;  %v19568_v44 = vsel %vm5880_vm6, %v19542_v41, %v19540_v43  ;;  %v9131_v9 = vand.u32 4294901760, %v9130_v34  ;;  %v19552_v54 = vsel %vm5880_vm6, %v19540_v43, %v19542_v41 }
 0x4b9   : > { %19290 = vmatprep.mubr.f32.mxu0 %v31576_v33  ;;  %22073 = vmatprep.subr.bf16.mxu1 %v30041_v21  ;;  %v30091_v23 = vmul.f32 %v19568_v44, %v32035_v14  ;;  %v31487_v52 = vand.u32 4294901760, %v30087_v2  ;;  %v19573_v62 = vmul.f32 %v19552_v54, %v32036_v28  ;;  %v30152_v41 = vsub.f32 %v30105_v22, %v19598_v48 }
 0x4ba   : > { %19294 = vmatmul.mubr.f32.gmra.mrb[4].mxu0 %v18934_v13  ;;  %8827 = vmatmul.mubr.f32.gmra.mrb[4].mxu1 %v29724_v29  ;;  %v9142_v13 = vsub.f32 %v30032_v57, %v9141_v26  ;;  %v30096_v17 = vsub.f32 %v30046_v61, %v31488_v11  ;;  %v9008_v55 = vsel %vm656_vm0, %v21465_v15, 0 }
 0x4bb   : > { %8832 = vmatprep.mubr.f32.mxu1 %v31576_v33  ;;  %19299 = vmatprep.mubr.f32.mxu0 %v31576_v33  ;;  %v19600_v10 = vand.u32 4294901760, %v30091_v23  ;;  %v19544_v58 = vpop.permute.xlu0 %19543  ;;  %v9148_v1 = vsub.f32 %v30087_v2, %v31487_v52  ;;  %v19602_v34 = vand.u32 4294901760, %v19573_v62  ;;  %v19550_v30 = vpop.permute.xlu1 %19549  ;;  %v19721_v22 = vand.u32 4294901760, %v30152_v41 }
 0x4bc   : > { %v9143_v12 = vand.u32 4294901760, %v9142_v13  ;;  %v9137_v8 = vand.u32 4294901760, %v30096_v17  ;;  %v19553_v54 = vsel %vm5880_vm6, %v19544_v58, %v19546_v40  ;;  %v19569_v17 = vsel %vm5880_vm6, %v19546_v40, %v19544_v58 }
 0x4bd   : > { %v30161_v44 = vpack.c.bf16 %v19600_v10, %v19596_v51  ;;  %v30219_v58 = vpack.c.bf16 %v19602_v34, %v19598_v48  ;;  %v30221_v40 = vsub.f32 %v19573_v62, %v19602_v34 }
 0x4be   : > { %8834 = vmatmul.mubr.f32.gmra.mrb[6].mxu1 %v29760_v36  ;;  %19303 = vmatmul.mubr.f32.gmra.mrb[6].mxu0 %v18945_v19  ;;  %v30120_v19 = vsub.f32 %v8992_v42, %v9022_v32  ;;  %v31481_v42 = vand.u32 4294901760, %v30115_v0  ;;  %v22080_v43 = vpack.c.bf16 %v9143_v12, %v9131_v9  ;;  %v30184_v32 = vsub.f32 %v19572_v31, %v19596_v51  ;;  %v21519_v31 = vld [vmem:[%s31126_s3 + $0x320] sm:$0xff] }
 0x4bf   : > { %8912 = vmatprep.mubr.f32.mxu1 %v31576_v33  ;;  %19397 = vmatprep.mubr.f32.mxu0 %v31576_v33  ;;  %v19548_v13 = vpop.permute.xlu0 %19547  ;;  %v9154_v9 = vsub.f32 %v30113_v53, %v31484_v46  ;;  %v30200_v12 = vsub.f32 %v30091_v23, %v19600_v10  ;;  %v31486_v23 = vand.u32 4294901760, %v30167_v63 }
 0x4c0   : > { %v19570_v15 = vsel %vm5880_vm6, %v19550_v30, %v19548_v13  ;;  %v19554_v46 = vsel %vm5880_vm6, %v19548_v13, %v19550_v30  ;;  %v31491_v62 = vand.u32 4294901760, %v30184_v32 }
 0x4c1   : > { %v9155_v3 = vand.u32 4294901760, %v9154_v9  ;;  %v9097_v13 = vsub.f32 %v30167_v63, %v31486_v23  ;;  %v21521_v23 = vld [vmem:[%s31126_s3 + $0x330] sm:$0xff] }
 0x4c2   : > { %8914 = vmatmul.mubr.f32.vlgmr.msra.gmra.mrb[0].mxu1 %v29662_v38  ;;  %19399 = vmatmul.mubr.f32.vlgmr.msra.gmra.mrb[0].mxu0 %v29796_v50  ;;  %v9005_v38 = vsel %vm656_vm0, %v21464_v24, 0  ;;  %v30205_v24 = vand.u32 4294901760, %v9008_v55 }
 0x4c3   : > { %22075 = vmatpush1.bf16.msra.mxu1 %v30111_v18  ;;  %22739 = vmatpush1.bf16.msra.mxu0 %v29774_v16  ;;  %v31483_v16 = vand.u32 4294901760, %v30120_v19  ;;  %v30169_v5 = vand.u32 4294901760, %v9005_v38 }
 0x4c4   : > { %22741 = vmatprep.subr.bf16.mxu0 %v29841_v4  ;;  %8919 = vmatprep.mubr.f32.mxu1 %v31576_v33  ;;  %v31485_v4 = vand.u32 4294901760, %v30135_v27  ;;  %v30231_v48 = vsub.f32 %v9008_v55, %v30205_v24 }
 0x4c5   : > { %22077 = vmatprep.subr.bf16.mxu1 %v30127_v59  ;;  %19404 = vmatprep.mubr.f32.mxu0 %v31576_v33  ;;  %v30215_v10 = vsub.f32 %v9005_v38, %v30169_v5  ;;  %v21520_v38 = vld [vmem:[%s31126_s3 + $0x328] sm:$0xff] }
 0x4c6   : > { %8921 = vmatmul.mubr.f32.gmra.mrb[2].mxu1 %v29692_v56  ;;  %19406 = vmatmul.mubr.f32.gmra.mrb[2].mxu0 %v29822_v49  ;;  %v30180_v56 = vsub.f32 %v30115_v0, %v31481_v42  ;;  %v9086_v51 = vsub.f32 %v30135_v27, %v31485_v4  ;;  %v19576_v42 = vmul.f32 %v19569_v17, %v32035_v14  ;;  %v9118_v11 = vand.u32 4294901760, %v30231_v48 }
 0x4c7   : > { %22079 = vmatpush1.bf16.msra.mxu1 %v30139_v39  ;;  %22743 = vmatpush1.bf16.msra.mxu0 %v29860_v37  ;;  %v9166_v37 = vsub.f32 %v30120_v19, %v31483_v16  ;;  %v19578_v4 = vmul.f32 %v19570_v15, %v32035_v14  ;;  %v31489_v30 = vand.u32 4294901760, %v30215_v10  ;;  %v19575_v14 = vmul.f32 %v19553_v54, %v32036_v28 }
 0x4c8   : > { %22081 = vmatprep.subr.bf16.mxu1 %v22080_v43  ;;  %8926 = vmatprep.mubr.f32.mxu1 %v31576_v33  ;;  %v19585_v43 = vsel %vm656_vm0, %v21519_v31, 0  ;;  %v9087_v34 = vand.u32 4294901760, %v9086_v51  ;;  %v19604_v31 = vand.u32 4294901760, %v19576_v42  ;;  %v19577_v51 = vmul.f32 %v19554_v46, %v32036_v28 }
 0x4c9   : > { %19411 = vmatprep.mubr.f32.mxu0 %v31576_v33  ;;  %22745 = vmatprep.subr.bf16.mxu0 %v30161_v44  ;;  %v9167_v16 = vand.u32 4294901760, %v9166_v37  ;;  %v30241_v9 = vand.u32 4294901760, %v19585_v43  ;;  %v9161_v37 = vand.u32 4294901760, %v30175_v47  ;;  %v9173_v15 = vand.u32 4294901760, %v30180_v56 }
 0x4ca   : > { %19413 = vmatmul.mubr.f32.gmra.mrb[4].mxu0 %v29848_v7  ;;  %8928 = vmatmul.mubr.f32.gmra.mrb[4].mxu1 %v29724_v29  ;;  %v9149_v29 = vand.u32 4294901760, %v9148_v1  ;;  %v31490_v1 = vand.u32 4294901760, %v30200_v12  ;;  %v19608_v52 = vand.u32 4294901760, %v19578_v4  ;;  %v9098_v28 = vand.u32 4294901760, %v9097_v13 }
 0x4cb   : > { %8933 = vmatprep.mubr.f32.mxu1 %v31576_v33  ;;  %19418 = vmatprep.mubr.f32.mxu0 %v31576_v33  ;;  %v22084_v17 = vpack.c.bf16 %v9167_v16, %v9155_v3  ;;  %v9108_v3 = vsub.f32 %v30215_v10, %v31489_v30  ;;  %v30265_v46 = vsub.f32 %v19585_v43, %v30241_v9  ;;  %v19733_v56 = vand.u32 4294901760, %v30221_v40 }
 0x4cc   : > { %v22082_v55 = vpack.c.bf16 %v9149_v29, %v9137_v8  ;;  %v19716_v8 = vsub.f32 %v30184_v32, %v31491_v62  ;;  %v19728_v47 = vsub.f32 %v30200_v12, %v31490_v1  ;;  %v19606_v54 = vand.u32 4294901760, %v19575_v14 }
 0x4cd   : > { %v30270_v29 = vsub.f32 %v19576_v42, %v19604_v31  ;;  %v22086_v43 = vpack.c.bf16 %v9173_v15, %v9161_v37  ;;  %v22088_v13 = vpack.c.bf16 %v30032_v57, %v30024_v20  ;;  %v21522_v42 = vld [vmem:[%s31126_s3 + $0x338] sm:$0xff]  ;;  %v31496_v37 = vand.u32 4294901760, %v30265_v46  ;;  %v9709_v20 = vpop.permute.xlu0 %9708  ;;  %v9711_v57 = vpop.permute.xlu1 %9710 }
 0x4ce   : > { %19420 = vmatmul.mubr.f32.gmra.mrb[6].mxu0 %v29876_v6  ;;  %8935 = vmatmul.mubr.f32.gmra.mrb[6].mxu1 %v29760_v36  ;;  %v19588_v36 = vsel %vm656_vm0, %v21520_v38, 0  ;;  %v19610_v38 = vand.u32 4294901760, %v19577_v51  ;;  %v19729_v30 = vand.u32 4294901760, %v19728_v47  ;;  %v19722_v62 = vsub.f32 %v30152_v41, %v19721_v22 }
 0x4cf   : > { %9082 = vmatprep.mubr.f32.mxu1 %v31576_v33  ;;  %19498 = vmatprep.mubr.f32.mxu0 %v31576_v33  ;;  %v30267_v16 = vand.u32 4294901760, %v19588_v36 }
 0x4d1   : > { %v30291_v15 = vsub.f32 %v19588_v36, %v30267_v16  ;;  %v30307_v36 = vsub.f32 %v19577_v51, %v19610_v38 }
 0x4d2   : > { %19500 = vmatmul.mubr.f32.vlgmr.msra.gmra.mrb[0].mxu0 %v29796_v50  ;;  %9088 = vmatmul.mubr.f32.vlgmr.msra.gmra.mrb[0].mxu1 %v9087_v34  ;;  %v19591_v50 = vsel %vm656_vm0, %v21521_v23, 0  ;;  %v30275_v34 = vsub.f32 %v19578_v4, %v19608_v52  ;;  %v9119_v23 = vsub.f32 %v30231_v48, %v9118_v11  ;;  %v9109_v4 = vand.u32 4294901760, %v9108_v3 }
 0x4d3   : > { %22083 = vmatpush1.bf16.msra.mxu1 %v22082_v55  ;;  %9093 = vmatprep.mubr.f32.mxu1 %v31576_v33  ;;  %v30286_v55 = vpack.c.bf16 %v19608_v52, %v19604_v31  ;;  %v30293_v1 = vand.u32 4294901760, %v19591_v50  ;;  %v19734_v52 = vsub.f32 %v30221_v40, %v19733_v56  ;;  %v30303_v31 = vsub.f32 %v19575_v14, %v19606_v54 }
 0x4d4   : > { %22085 = vmatprep.subr.bf16.mxu1 %v22084_v17  ;;  %19505 = vmatprep.mubr.f32.mxu0 %v31576_v33  ;;  %v19717_v17 = vand.u32 4294901760, %v19716_v8  ;;  %v30305_v8 = vpack.c.bf16 %v19610_v38, %v19606_v54  ;;  %v9120_v47 = vand.u32 4294901760, %v9119_v23  ;;  %v31494_v3 = vand.u32 4294901760, %v30270_v29 }
 0x4d5   : > { %22747 = vmatpush1.bf16.msra.mxu0 %v30219_v58  ;;  %v19672_v14 = vsub.f32 %v30265_v46, %v31496_v37  ;;  %v31492_v51 = vand.u32 4294901760, %v30291_v15  ;;  %v30319_v54 = vsub.f32 %v19591_v50, %v30293_v1 }
 0x4d6   : > { %19507 = vmatmul.mubr.f32.gmra.mrb[2].mxu0 %v29822_v49  ;;  %9099 = vmatmul.mubr.f32.gmra.mrb[2].mxu1 %v9098_v28  ;;  %v19594_v49 = vsel %vm656_vm0, %v21522_v42, 0  ;;  %v22752_v28 = vpack.c.bf16 %v19729_v30, %v19717_v17  ;;  %v31495_v30 = vand.u32 4294901760, %v30303_v31  ;;  %v19735_v42 = vand.u32 4294901760, %v19734_v52 }
 0x4d7   : > { %22087 = vmatpush1.bf16.msra.mxu1 %v22086_v43  ;;  %9104 = vmatprep.mubr.f32.mxu1 %v31576_v33  ;;  %v31493_v43 = vand.u32 4294901760, %v30275_v34  ;;  %v30321_v38 = vand.u32 4294901760, %v19594_v49  ;;  %v19740_v50 = vsub.f32 %v30270_v29, %v31494_v3  ;;  %v19673_v17 = vand.u32 4294901760, %v19672_v14 }
 0x4d8   : > { %22089 = vmatprep.subr.bf16.mxu1 %v22088_v13  ;;  %19512 = vmatprep.mubr.f32.mxu0 %v31576_v33  ;;  %v19757_v13 = vand.u32 4294901760, %v30307_v36  ;;  %v19746_v52 = vsub.f32 %v30303_v31, %v31495_v30 }
 0x4d9   : > { %22749 = vmatprep.subr.bf16.mxu0 %v30286_v55  ;;  %v19752_v23 = vsub.f32 %v30275_v34, %v31493_v43 }
 0x4da   : > { %9110 = vmatmul.mubr.f32.gmra.mrb[4].mxu1 %v9109_v4  ;;  %19514 = vmatmul.mubr.f32.gmra.mrb[4].mxu0 %v29848_v7  ;;  %v19723_v7 = vand.u32 4294901760, %v19722_v62  ;;  %v19683_v4 = vsub.f32 %v30291_v15, %v31492_v51  ;;  %v30340_v62 = vsub.f32 %v19594_v49, %v30321_v38  ;;  %v19741_v51 = vand.u32 4294901760, %v19740_v50 }
 0x4db   : > { %9115 = vmatprep.mubr.f32.mxu1 %v31576_v33  ;;  %19519 = vmatprep.mubr.f32.mxu0 %v31576_v33  ;;  %v19753_v43 = vand.u32 4294901760, %v19752_v23  ;;  %v22092_v49 = vpack.c.bf16 %v30120_v19, %v30113_v53  ;;  %v22094_v50 = vpack.c.bf16 %v30115_v0, %v30099_v25 }
 0x4dc   : > { %22751 = vmatpush1.bf16.msra.mxu0 %v30305_v8  ;;  %v22754_v14 = vpack.c.bf16 %v19735_v42, %v19723_v7  ;;  %v19684_v3 = vand.u32 4294901760, %v19683_v4  ;;  %v19704_v37 = vand.u32 4294901760, %v30340_v62  ;;  %v19747_v7 = vand.u32 4294901760, %v19746_v52 }
 0x4dd   : > { %22753 = vmatprep.subr.bf16.mxu0 %v22752_v28  ;;  %v19693_v28 = vand.u32 4294901760, %v30319_v54  ;;  %v22756_v23 = vpack.c.bf16 %v19753_v43, %v19741_v51  ;;  %v22760_v43 = vpack.c.bf16 %v30200_v12, %v30184_v32  ;;  %v22762_v51 = vpack.c.bf16 %v30221_v40, %v30152_v41 }
 0x4de   : > { %9121 = vmatmul.mubr.f32.gmra.mrb[6].mxu1 %v9120_v47  ;;  %19521 = vmatmul.mubr.f32.gmra.mrb[6].mxu0 %v29876_v6  ;;  %v19758_v6 = vsub.f32 %v30307_v36, %v19757_v13  ;;  %v22090_v47 = vpack.c.bf16 %v30087_v2, %v30046_v61  ;;  %v19705_v4 = vsub.f32 %v30340_v62, %v19704_v37  ;;  %v32053_v41 = vand.u32 4294901760, %v30303_v31 }
 0x4df   : > { %9231 = vmatprep.mubr.f32.mxu1 %v31576_v33  ;;  %19668 = vmatprep.mubr.f32.mxu0 %v31576_v33  ;;  %v19694_v30 = vsub.f32 %v30319_v54, %v19693_v28 }
 0x4e0   : > { %v19759_v42 = vand.u32 4294901760, %v19758_v6  ;;  %v22766_v6 = vpack.c.bf16 %v30307_v36, %v30303_v31 }
 0x4e2   : > { %9233 = vmatmul.mubr.f32.vlgmr.msra.gmra.mrb[0].mxu1 %v30107_v45  ;;  %19674 = vmatmul.mubr.f32.vlgmr.msra.gmra.mrb[0].mxu0 %v19673_v17  ;;  %v19695_v17 = vand.u32 4294901760, %v19694_v30  ;;  %v22758_v52 = vpack.c.bf16 %v19759_v42, %v19747_v7  ;;  %v22764_v30 = vpack.c.bf16 %v30275_v34, %v30270_v29  ;;  %v32040_v7 = vand.u32 4294901760, %v30113_v53 }
 0x4e3   : > { %22091 = vmatpush1.bf16.msra.mxu1 %v22090_v47  ;;  %9238 = vmatprep.mubr.f32.mxu1 %v31576_v33  ;;  %v22104_v47 = vpack.c.bf16 %v9141_v26, %v9129_v35  ;;  %v32037_v35 = vand.u32 4294901760, %v30046_v61  ;;  %v32038_v26 = vand.u32 4294901760, %v30087_v2  ;;  %v32041_v42 = vand.u32 4294901760, %v30120_v19 }
 0x4e4   : > { %22093 = vmatprep.subr.bf16.mxu1 %v22092_v49  ;;  %19679 = vmatprep.mubr.f32.mxu0 %v31576_v33  ;;  %v32039_v49 = vand.u32 4294901760, %v30135_v27  ;;  %v32042_v61 = vand.u32 4294901760, %v30099_v25  ;;  %v32043_v2 = vand.u32 4294901760, %v30115_v0  ;;  %v32044_v19 = vand.u32 4294901760, %v30167_v63 }
 0x4e5   : > { %22755 = vmatpush1.bf16.msra.mxu0 %v22754_v14  ;;  %v22106_v14 = vpack.c.bf16 %v32038_v26, %v32037_v35  ;;  %v32049_v35 = vld [vmem:[#allocation9_spill] sm:$0xff] }
 0x4e6   : > { %9240 = vmatmul.mubr.f32.gmra.mrb[2].mxu1 %v30137_v60  ;;  %19685 = vmatmul.mubr.f32.gmra.mrb[2].mxu0 %v19684_v3  ;;  %v19706_v3 = vand.u32 4294901760, %v19705_v4  ;;  %v22110_v53 = vpack.c.bf16 %v32043_v2, %v32042_v61  ;;  %v32046_v4 = vand.u32 4294901760, %v30200_v12  ;;  %v21466_v61 = vld [vmem:[%s31126_s3 + $0x180] sm:$0xff] }
 0x4e7   : > { %22095 = vmatpush1.bf16.msra.mxu1 %v22094_v50  ;;  %9245 = vmatprep.mubr.f32.mxu1 %v31576_v33  ;;  %v22108_v50 = vpack.c.bf16 %v32041_v42, %v32040_v7 }
 0x4e8   : > { %22097 = vmatprep.subr.bf16.mxu1 %v30041_v21  ;;  %19690 = vmatprep.mubr.f32.mxu0 %v31576_v33 }
 0x4e9   : > { %22757 = vmatprep.subr.bf16.mxu0 %v22756_v23  ;;  %v9721_v23 = vpop.permute.xlu0 %9720 }
 0x4ea   : > { %9247 = vmatmul.mubr.f32.gmra.mrb[4].mxu1 %v30169_v5  ;;  %19696 = vmatmul.mubr.f32.gmra.mrb[4].mxu0 %v19695_v17  ;;  %v9723_v17 = vpop.permute.xlu1 %9722  ;;  %v9728_v25 = vsel %vm2849_vm7, %v9721_v23, %v9709_v20 }
 0x4eb   : > { %9252 = vmatprep.mubr.f32.mxu1 %v31576_v33  ;;  %19701 = vmatprep.mubr.f32.mxu0 %v31576_v33  ;;  %v9729_v0 = vsel %vm2849_vm7, %v9723_v17, %v9711_v57 }
 0x4ec   : > { %22759 = vmatpush1.bf16.msra.mxu0 %v22758_v52 }
 0x4ed   : > { %22761 = vmatprep.subr.bf16.mxu0 %v22760_v43 }
 0x4ee   : > { %9254 = vmatmul.mubr.f32.gmra.mrb[6].mxu1 %v30205_v24  ;;  %19707 = vmatmul.mubr.f32.gmra.mrb[6].mxu0 %v19706_v3  ;;  %v9715_v43 = vpop.permute.xlu1 %9714 }
 0x4ef   : > { %9340 = vmatprep.mubr.f32.mxu1 %v31576_v33  ;;  %19817 = vmatprep.mubr.f32.mxu0 %v31576_v33 }
 0x4f2   : > { %9343 = vmatmul.mubr.f32.vlgmr.msra.gmra.mrb[0].mxu1 %v30135_v27  ;;  %19819 = vmatmul.mubr.f32.vlgmr.msra.gmra.mrb[0].mxu0 %v30241_v9  ;;  %v32045_v27 = vand.u32 4294901760, %v30184_v32  ;;  %v32047_v32 = vand.u32 4294901760, %v30215_v10 }
 0x4f3   : > { %22099 = vmatpush1.bf16.msra.mxu1 %v30111_v18  ;;  %22763 = vmatpush1.bf16.msra.mxu0 %v22762_v51  ;;  %v9740_v51 = vsel %vm2849_vm7, %v9709_v20, %v9721_v23  ;;  %v32051_v20 = vand.u32 4294901760, %v30270_v29 }
 0x4f4   : > { %22101 = vmatprep.subr.bf16.mxu1 %v30127_v59  ;;  %9348 = vmatprep.mubr.f32.mxu1 %v31576_v33  ;;  %v22776_v52 = vpack.c.bf16 %v32046_v4, %v32045_v27  ;;  %v30454_v26 = vmul.f32 %v9740_v51, %v32049_v35 }
 0x4f5   : > { %19824 = vmatprep.mubr.f32.mxu0 %v31576_v33  ;;  %22765 = vmatprep.subr.bf16.mxu0 %v22764_v30 }
 0x4f6   : > { %9351 = vmatmul.mubr.f32.gmra.mrb[2].mxu1 %v30167_v63  ;;  %19826 = vmatmul.mubr.f32.gmra.mrb[2].mxu0 %v30267_v16  ;;  %v9713_v63 = vpop.permute.xlu0 %9712 }
 0x4f7   : > { %22103 = vmatpush1.bf16.msra.mxu1 %v30139_v39  ;;  %22767 = vmatpush1.bf16.msra.mxu0 %v22766_v6  ;;  %v9727_v6 = vpop.permute.xlu1 %9726 }
 0x4f8   : > { %22105 = vmatprep.subr.bf16.mxu1 %v22104_v47  ;;  %22769 = vmatprep.subr.bf16.mxu0 %v30161_v44  ;;  %v9731_v36 = vsel %vm2849_vm7, %v9727_v6, %v9715_v43 }
 0x4f9   : > { %9356 = vmatprep.mubr.f32.mxu1 %v31576_v33  ;;  %19831 = vmatprep.mubr.f32.mxu0 %v31576_v33 }
 0x4fa   : > { %9359 = vmatmul.mubr.f32.gmra.mrb[4].mxu1 %v30215_v10  ;;  %19833 = vmatmul.mubr.f32.gmra.mrb[4].mxu0 %v30293_v1  ;;  %v9725_v30 = vpop.permute.xlu0 %9724 }
 0x4fb   : > { %9364 = vmatprep.mubr.f32.mxu1 %v31576_v33  ;;  %19838 = vmatprep.mubr.f32.mxu0 %v31576_v33  ;;  %v9742_v40 = vsel %vm2849_vm7, %v9713_v63, %v9725_v30  ;;  %v9730_v29 = vsel %vm2849_vm7, %v9725_v30, %v9713_v63 }
 0x4fe   : > { %9367 = vmatmul.mubr.f32.gmra.mrb[6].mxu1 %v30231_v48  ;;  %19840 = vmatmul.mubr.f32.gmra.mrb[6].mxu0 %v30321_v38  ;;  %v9741_v48 = vsel %vm2849_vm7, %v9711_v57, %v9723_v17 }
 0x4ff   : > { %9445 = vmatprep.mubr.f32.mxu1 %v31576_v33  ;;  %19926 = vmatprep.mubr.f32.mxu0 %v31576_v33  ;;  %v9746_v31 = vmul.f32 %v9741_v48, %v32049_v35 }
 0x502   : > { %9449 = vmatmul.mubr.f32.vlgmr.msra.gmra.mrb[0].mxu1 %v32039_v49  ;;  %19929 = vmatmul.mubr.f32.vlgmr.msra.gmra.mrb[0].mxu0 %v30265_v46  ;;  %v32052_v49 = vand.u32 4294901760, %v30275_v34  ;;  %v9743_v34 = vsel %vm2849_vm7, %v9715_v43, %v9727_v6 }
 0x503   : > { %22107 = vmatpush1.bf16.msra.mxu1 %v22106_v14  ;;  %22771 = vmatpush1.bf16.msra.mxu0 %v30219_v58  ;;  %v22778_v14 = vpack.c.bf16 %v19733_v56, %v19721_v22  ;;  %v22782_v22 = vpack.c.bf16 %v19757_v13, %v32053_v41  ;;  %v20297_v56 = vpop.permute.xlu1 %20296  ;;  %v30497_v17 = vmul.f32 %v9743_v34, %v32049_v35 }
 0x504   : > { %22109 = vmatprep.subr.bf16.mxu1 %v22108_v50  ;;  %22773 = vmatprep.subr.bf16.mxu0 %v30286_v55  ;;  %v22780_v7 = vpack.c.bf16 %v32052_v49, %v32051_v20  ;;  %v32054_v50 = vand.u32 4294901760, %v30291_v15 }
 0x505   : > { %9454 = vmatprep.mubr.f32.mxu1 %v31576_v33  ;;  %19934 = vmatprep.mubr.f32.mxu0 %v31576_v33  ;;  %v9783_v43 = vand.u32 4294901760, %v30497_v17 }
 0x506   : > { %9458 = vmatmul.mubr.f32.gmra.mrb[2].mxu1 %v32044_v19  ;;  %19937 = vmatmul.mubr.f32.gmra.mrb[2].mxu0 %v30291_v15  ;;  %v9775_v19 = vand.u32 4294901760, %v9746_v31 }
 0x507   : > { %22111 = vmatpush1.bf16.msra.mxu1 %v22110_v53  ;;  %22775 = vmatpush1.bf16.msra.mxu0 %v30305_v8  ;;  %v20301_v4 = vpop.permute.xlu1 %20300  ;;  %v30565_v20 = vsub.f32 %v30497_v17, %v9783_v43 }
 0x508   : > { %22113 = vmatprep.subr.bf16.mxu1 %v30041_v21  ;;  %22777 = vmatprep.subr.bf16.mxu0 %v22776_v52  ;;  %v32048_v21 = vld [vmem:[#allocation14_spill] sm:$0xff] }
 0x509   : > { %9463 = vmatprep.mubr.f32.mxu1 %v31576_v33  ;;  %19942 = vmatprep.mubr.f32.mxu0 %v31576_v33  ;;  %v9745_v12 = vmul.f32 %v9728_v25, %v32048_v21  ;;  %v9747_v3 = vmul.f32 %v9729_v0, %v32048_v21  ;;  %v9749_v23 = vmul.f32 %v9730_v29, %v32048_v21  ;;  %v9758_v0 = vsel %vm656_vm0, %v21466_v61, 0 }
 0x50a   : > { %9467 = vmatmul.mubr.f32.gmra.mrb[4].mxu1 %v32047_v32  ;;  %19945 = vmatmul.mubr.f32.gmra.mrb[4].mxu0 %v30319_v54  ;;  %v9751_v15 = vmul.f32 %v9731_v36, %v32048_v21  ;;  %v30541_v30 = vand.u32 4294901760, %v9758_v0  ;;  %v31497_v17 = vand.u32 4294901760, %v30565_v20 }
 0x50b   : > { %9472 = vmatprep.mubr.f32.mxu1 %v31576_v33  ;;  %19950 = vmatprep.mubr.f32.mxu0 %v31576_v33  ;;  %v9769_v10 = vand.u32 4294901760, %v9745_v12  ;;  %v9773_v47 = vand.u32 4294901760, %v9747_v3  ;;  %v9777_v63 = vand.u32 4294901760, %v9749_v23 }
 0x50c   : > { %v9781_v21 = vand.u32 4294901760, %v9751_v15 }
 0x50d   : > { %v30468_v42 = vsub.f32 %v9745_v12, %v9769_v10  ;;  %v30476_v57 = vsub.f32 %v9747_v3, %v9773_v47  ;;  %v30486_v13 = vpack.c.bf16 %v9773_v47, %v9769_v10  ;;  %v21467_v12 = vld [vmem:[%s31126_s3 + $0x188] sm:$0xff]  ;;  %v30535_v3 = vld [vmem:[%s31128_s5 + $0x18] ss:$0 sm:$0xff]  ;;  %v30544_v47 = vsub.f32 %v9746_v31, %v9775_v19 }
 0x50e   : > { %19953 = vmatmul.mubr.f32.gmra.mrb[6].mxu0 %v30340_v62  ;;  %9476 = vmatmul.mubr.f32.gmra.mrb[6].mxu1 %v9118_v11  ;;  %v32050_v11 = vand.u32 4294901760, %v30265_v46  ;;  %v20295_v46 = vpop.permute.xlu0 %20294  ;;  %v30562_v48 = vsub.f32 %v9749_v23, %v9777_v63  ;;  %v30570_v62 = vsub.f32 %v9751_v15, %v9781_v21 }
 0x50f   : > { %9570 = vmatprep.mubr.f32.mxu1 %v31576_v33  ;;  %20031 = vmatprep.mubr.f32.mxu0 %v31576_v33  ;;  %v9888_v2 = vand.u32 4294901760, %v30468_v42  ;;  %v9900_v53 = vand.u32 4294901760, %v30476_v57  ;;  %v20326_v52 = vsel %vm6648_vm8, %v20297_v56, %v20295_v46  ;;  %v20310_v32 = vsel %vm6648_vm8, %v20295_v46, %v20297_v56  ;;  %v21468_v46 = vld [vmem:[%s31126_s3 + $0x190] sm:$0xff] }
 0x510   : > { %v20331_v51 = vmul.f32 %v30535_v3, %v20326_v52  ;;  %v30580_v56 = vpack.c.bf16 %v9781_v21, %v9777_v63  ;;  %v31502_v31 = vand.u32 4294901760, %v30544_v47  ;;  %v9764_v15 = vsel %vm656_vm0, %v21468_v46, 0 }
 0x511   : > { %v9889_v54 = vsub.f32 %v30468_v42, %v9888_v2  ;;  %v30633_v21 = vand.u32 4294901760, %v9764_v15 }
 0x512   : > { %20035 = vmatmul.mubr.f32.vlgmr.msra.gmra.mrb[0].mxu0 %v32050_v11  ;;  %9572 = vmatmul.mubr.f32.vlgmr.msra.gmra.mrb[0].mxu1 %v30107_v45  ;;  %v20299_v27 = vpop.permute.xlu0 %20298  ;;  %v20355_v29 = vand.u32 4294901760, %v20331_v51 }
 0x513   : > { %22779 = vmatpush1.bf16.msra.mxu0 %v22778_v14  ;;  %22115 = vmatpush1.bf16.msra.mxu1 %v30111_v18  ;;  %v9771_v18 = vand.u32 4294901760, %v30454_v26  ;;  %v20327_v25 = vsel %vm6648_vm8, %v20301_v4, %v20299_v27  ;;  %v9890_v49 = vand.u32 4294901760, %v9889_v54  ;;  %v20311_v41 = vsel %vm6648_vm8, %v20299_v27, %v20301_v4 }
 0x514   : > { %22117 = vmatprep.subr.bf16.mxu1 %v30127_v59  ;;  %22781 = vmatprep.subr.bf16.mxu0 %v22780_v7  ;;  %v30492_v59 = vmul.f32 %v9742_v40, %v32049_v35  ;;  %v30539_v10 = vmul.f32 %v30535_v3, %v20327_v25  ;;  %v30575_v40 = vpop.permute.xlu1 %20304  ;;  %v31500_v27 = vand.u32 4294901760, %v30562_v48  ;;  %v31499_v4 = vand.u32 4294901760, %v30570_v62 }
 0x515   : > { %9577 = vmatprep.mubr.f32.mxu1 %v31576_v33  ;;  %20040 = vmatprep.mubr.f32.mxu0 %v31576_v33  ;;  %v30560_v11 = vpack.c.bf16 %v9775_v19, %v9771_v18  ;;  %v9907_v25 = vsub.f32 %v30544_v47, %v31502_v31  ;;  %v30638_v54 = vsub.f32 %v30565_v20, %v31497_v17 }
 0x516   : > { %20044 = vmatmul.mubr.f32.gmra.mrb[2].mxu0 %v32054_v50  ;;  %9579 = vmatmul.mubr.f32.gmra.mrb[2].mxu1 %v30137_v60  ;;  %v20359_v34 = vand.u32 4294901760, %v30539_v10 }
 0x517   : > { %22783 = vmatpush1.bf16.msra.mxu0 %v22782_v22  ;;  %22119 = vmatpush1.bf16.msra.mxu1 %v30139_v39  ;;  %v30508_v39 = vsub.f32 %v30454_v26, %v9771_v18  ;;  %v30555_v26 = vld [vmem:[%s31128_s5 + $0x10] ss:$0 sm:$0xff]  ;;  %v30573_v22 = vpop.permute.xlu0 %20302  ;;  %v30584_v18 = vsub.f32 %v9758_v0, %v30541_v30 }
 0x518   : > { %22785 = vmatprep.subr.bf16.mxu0 %v30161_v44  ;;  %9584 = vmatprep.mubr.f32.mxu1 %v31576_v33  ;;  %v9779_v44 = vand.u32 4294901760, %v30492_v59  ;;  %v30558_v14 = vmul.f32 %v30555_v26, %v20310_v32  ;;  %v20332_v61 = vmul.f32 %v30555_v26, %v20311_v41  ;;  %v30618_v52 = vpack.c.bf16 %v20359_v34, %v20355_v29 }
 0x519   : > { %20049 = vmatprep.mubr.f32.mxu0 %v31576_v33  ;;  %22121 = vmatprep.subr.bf16.mxu1 %v30486_v13  ;;  %v31504_v6 = vand.u32 4294901760, %v30508_v39 }
 0x51a   : > { %20053 = vmatmul.mubr.f32.gmra.mrb[4].mxu0 %v19693_v28  ;;  %9586 = vmatmul.mubr.f32.gmra.mrb[4].mxu1 %v30169_v5  ;;  %v9901_v28 = vsub.f32 %v30476_v57, %v9900_v53  ;;  %v30547_v35 = vsub.f32 %v30492_v59, %v9779_v44  ;;  %v20357_v50 = vand.u32 4294901760, %v30558_v14  ;;  %v30593_v23 = vpack.c.bf16 %v9783_v43, %v9779_v44  ;;  %v20309_v43 = vpop.permute.xlu1 %20308 }
 0x51b   : > { %9591 = vmatprep.mubr.f32.mxu1 %v31576_v33  ;;  %20058 = vmatprep.mubr.f32.mxu0 %v31576_v33  ;;  %v30613_v44 = vsub.f32 %v30508_v39, %v31504_v6  ;;  %v20307_v63 = vpop.permute.xlu0 %20306 }
 0x51c   : > { %v9902_v7 = vand.u32 4294901760, %v9901_v28  ;;  %v31498_v36 = vand.u32 4294901760, %v30547_v35  ;;  %v30603_v19 = vsub.f32 %v30558_v14, %v20357_v50  ;;  %v30642_v28 = vsub.f32 %v20331_v51, %v20355_v29  ;;  %v21523_v14 = vld [vmem:[%s31126_s3 + $0x340] sm:$0xff] }
 0x51d   : > { %v9925_v51 = vsub.f32 %v30570_v62, %v31499_v4  ;;  %v9896_v46 = vand.u32 4294901760, %v30613_v44  ;;  %v20329_v29 = vsel %vm6648_vm8, %v20309_v43, %v20307_v63 }
 0x51e   : > { %9593 = vmatmul.mubr.f32.gmra.mrb[6].mxu1 %v30205_v24  ;;  %20062 = vmatmul.mubr.f32.gmra.mrb[6].mxu0 %v19704_v37  ;;  %v9761_v37 = vsel %vm656_vm0, %v21467_v12, 0  ;;  %v30626_v0 = vsub.f32 %v30547_v35, %v31498_v36  ;;  %v9908_v36 = vand.u32 4294901760, %v9907_v25 }
 0x51f   : > { %9671 = vmatprep.mubr.f32.mxu1 %v31576_v33  ;;  %20156 = vmatprep.mubr.f32.mxu0 %v31576_v33  ;;  %v30591_v59 = vand.u32 4294901760, %v9761_v37 }
 0x521   : > { %v30631_v32 = vsub.f32 %v9761_v37, %v30591_v59  ;;  %v31513_v37 = vand.u32 4294901760, %v30603_v19 }
 0x522   : > { %9673 = vmatmul.mubr.f32.vlgmr.msra.gmra.mrb[0].mxu1 %v30107_v45  ;;  %20158 = vmatmul.mubr.f32.vlgmr.msra.gmra.mrb[0].mxu0 %v30241_v9  ;;  %v22128_v45 = vpack.c.bf16 %v9902_v7, %v9890_v49  ;;  %v20328_v49 = vsel %vm6648_vm8, %v30575_v40, %v30573_v22  ;;  %v30661_v7 = vsub.f32 %v30539_v10, %v20359_v34  ;;  %v20344_v34 = vsel %vm656_vm0, %v21523_v14, 0  ;;  %v21524_v14 = vld [vmem:[%s31126_s3 + $0x348] sm:$0xff] }
 0x523   : > { %22123 = vmatpush1.bf16.msra.mxu1 %v30560_v11  ;;  %22787 = vmatpush1.bf16.msra.mxu0 %v30219_v58  ;;  %v21469_v58 = vld [vmem:[%s31126_s3 + $0x198] sm:$0xff]  ;;  %v30693_v31 = vand.u32 4294901760, %v20344_v34 }
 0x524   : > { %22789 = vmatprep.subr.bf16.mxu0 %v30286_v55  ;;  %9678 = vmatprep.mubr.f32.mxu1 %v31576_v33  ;;  %v31501_v55 = vand.u32 4294901760, %v30584_v18  ;;  %v9767_v12 = vsel %vm656_vm0, %v21469_v58, 0  ;;  %v30673_v58 = vsub.f32 %v9764_v15, %v30633_v21  ;;  %v20335_v15 = vmul.f32 %v30535_v3, %v20328_v49 }
 0x525   : > { %22125 = vmatprep.subr.bf16.mxu1 %v30580_v56  ;;  %20163 = vmatprep.mubr.f32.mxu0 %v31576_v33  ;;  %v30675_v10 = vand.u32 4294901760, %v9767_v12  ;;  %v9920_v49 = vand.u32 4294901760, %v30626_v0  ;;  %v30717_v6 = vsub.f32 %v20344_v34, %v30693_v31 }
 0x526   : > { %9680 = vmatmul.mubr.f32.gmra.mrb[2].mxu1 %v30137_v60  ;;  %20165 = vmatmul.mubr.f32.gmra.mrb[2].mxu0 %v30267_v16  ;;  %v20361_v60 = vand.u32 4294901760, %v20332_v61  ;;  %v9845_v41 = vsub.f32 %v30584_v18, %v31501_v55  ;;  %v20313_v55 = vsel %vm6648_vm8, %v20307_v63, %v20309_v43  ;;  %v31505_v25 = vand.u32 4294901760, %v30673_v58 }
 0x527   : > { %22127 = vmatpush1.bf16.msra.mxu1 %v30593_v23  ;;  %22791 = vmatpush1.bf16.msra.mxu0 %v30305_v8  ;;  %v9913_v8 = vsub.f32 %v30562_v48, %v31500_v27  ;;  %v9926_v27 = vand.u32 4294901760, %v9925_v51  ;;  %v30704_v63 = vsub.f32 %v9767_v12, %v30675_v10  ;;  %v22130_v43 = vpack.c.bf16 %v9908_v36, %v9896_v46  ;;  %v21525_v12 = vld [vmem:[%s31126_s3 + $0x350] sm:$0xff] }
 0x528   : > { %22129 = vmatprep.subr.bf16.mxu1 %v22128_v45  ;;  %9685 = vmatprep.mubr.f32.mxu1 %v31576_v33  ;;  %v31503_v45 = vand.u32 4294901760, %v30631_v32  ;;  %v30680_v44 = vpack.c.bf16 %v20361_v60, %v20357_v50  ;;  %v30682_v17 = vsub.f32 %v20332_v61, %v20361_v60  ;;  %v20337_v50 = vmul.f32 %v30535_v3, %v20329_v29 }
 0x529   : > { %20170 = vmatprep.mubr.f32.mxu0 %v31576_v33  ;;  %22793 = vmatprep.subr.bf16.mxu0 %v30618_v52  ;;  %v9914_v4 = vand.u32 4294901760, %v9913_v8  ;;  %v20474_v61 = vand.u32 4294901760, %v30642_v28  ;;  %v31506_v60 = vand.u32 4294901760, %v30661_v7  ;;  %v20363_v8 = vand.u32 4294901760, %v20335_v15 }
 0x52a   : > { %20172 = vmatmul.mubr.f32.gmra.mrb[4].mxu0 %v30293_v1  ;;  %9687 = vmatmul.mubr.f32.gmra.mrb[4].mxu1 %v30169_v5  ;;  %v20312_v5 = vsel %vm6648_vm8, %v30573_v22, %v30575_v40  ;;  %v9846_v22 = vand.u32 4294901760, %v9845_v41  ;;  %v9856_v40 = vsub.f32 %v30631_v32, %v31503_v45  ;;  %v20336_v41 = vmul.f32 %v30555_v26, %v20313_v55 }
 0x52b   : > { %9692 = vmatprep.mubr.f32.mxu1 %v31576_v33  ;;  %20177 = vmatprep.mubr.f32.mxu0 %v31576_v33  ;;  %v20334_v3 = vmul.f32 %v30555_v26, %v20312_v5  ;;  %v22132_v51 = vpack.c.bf16 %v9926_v27, %v9914_v4  ;;  %v9932_v29 = vand.u32 4294901760, %v30638_v54  ;;  %v20367_v45 = vand.u32 4294901760, %v20337_v50 }
 0x52c   : > { %v20475_v36 = vsub.f32 %v30642_v28, %v20474_v61  ;;  %v20487_v27 = vsub.f32 %v30661_v7, %v31506_v60  ;;  %v9857_v26 = vand.u32 4294901760, %v9856_v40  ;;  %v9867_v4 = vsub.f32 %v30673_v58, %v31505_v25 }
 0x52d   : > { %v9877_v55 = vand.u32 4294901760, %v30704_v63  ;;  %v31511_v54 = vand.u32 4294901760, %v30682_v17  ;;  %v20365_v46 = vand.u32 4294901760, %v20334_v3  ;;  %v30733_v34 = vsub.f32 %v20335_v15, %v20363_v8  ;;  %v21526_v15 = vld [vmem:[%s31126_s3 + $0x358] sm:$0xff] }
 0x52e   : > { %20179 = vmatmul.mubr.f32.gmra.mrb[6].mxu0 %v30321_v38  ;;  %9694 = vmatmul.mubr.f32.gmra.mrb[6].mxu1 %v30205_v24  ;;  %v20347_v24 = vsel %vm656_vm0, %v21524_v14, 0  ;;  %v20369_v5 = vand.u32 4294901760, %v20336_v41  ;;  %v30738_v14 = vsub.f32 %v20337_v50, %v20367_v45  ;;  %v22136_v40 = vpack.c.bf16 %v30476_v57, %v30468_v42 }
 0x52f   : > { %9841 = vmatprep.mubr.f32.mxu1 %v31576_v33  ;;  %20257 = vmatprep.mubr.f32.mxu0 %v31576_v33  ;;  %v30730_v0 = vand.u32 4294901760, %v20347_v24  ;;  %v20488_v25 = vand.u32 4294901760, %v20487_v27  ;;  %v9868_v50 = vand.u32 4294901760, %v9867_v4  ;;  %v32055_v42 = vand.u32 4294901760, %v30508_v39 }
 0x530   : > { %v30768_v27 = vpack.c.bf16 %v20369_v5, %v20365_v46  ;;  %v32056_v57 = vand.u32 4294901760, %v30544_v47 }
 0x532   : > { %20259 = vmatmul.mubr.f32.vlgmr.msra.gmra.mrb[0].mxu0 %v30241_v9  ;;  %9847 = vmatmul.mubr.f32.vlgmr.msra.gmra.mrb[0].mxu1 %v9846_v22  ;;  %v20350_v9 = vsel %vm656_vm0, %v21525_v12, 0  ;;  %v22134_v22 = vpack.c.bf16 %v9932_v29, %v9920_v49  ;;  %v31507_v12 = vand.u32 4294901760, %v30717_v6  ;;  %v9878_v49 = vsub.f32 %v30704_v63, %v9877_v55 }
 0x533   : > { %22131 = vmatpush1.bf16.msra.mxu1 %v22130_v43  ;;  %9852 = vmatprep.mubr.f32.mxu1 %v31576_v33  ;;  %v30746_v43 = vpack.c.bf16 %v20367_v45, %v20363_v8  ;;  %v30754_v29 = vsub.f32 %v20347_v24, %v30730_v0  ;;  %v30756_v60 = vand.u32 4294901760, %v20350_v9  ;;  %v20481_v45 = vsub.f32 %v30603_v19, %v31513_v37 }
 0x534   : > { %22133 = vmatprep.subr.bf16.mxu1 %v22132_v51  ;;  %20264 = vmatprep.mubr.f32.mxu0 %v31576_v33  ;;  %v20476_v51 = vand.u32 4294901760, %v20475_v36  ;;  %v20493_v8 = vsub.f32 %v30682_v17, %v31511_v54  ;;  %v30766_v36 = vsub.f32 %v20334_v3, %v20365_v46  ;;  %v30770_v24 = vsub.f32 %v20336_v41, %v20369_v5 }
 0x535   : > { %22795 = vmatpush1.bf16.msra.mxu0 %v30680_v44  ;;  %v9879_v3 = vand.u32 4294901760, %v9878_v49  ;;  %v31508_v41 = vand.u32 4294901760, %v30754_v29  ;;  %v30782_v46 = vsub.f32 %v20350_v9, %v30756_v60 }
 0x536   : > { %20266 = vmatmul.mubr.f32.gmra.mrb[2].mxu0 %v30267_v16  ;;  %9858 = vmatmul.mubr.f32.gmra.mrb[2].mxu1 %v9857_v26  ;;  %v20353_v16 = vsel %vm656_vm0, %v21526_v15, 0  ;;  %v20431_v26 = vsub.f32 %v30717_v6, %v31507_v12  ;;  %v22800_v4 = vpack.c.bf16 %v20488_v25, %v20476_v51  ;;  %v31509_v15 = vand.u32 4294901760, %v30738_v14 }
 0x537   : > { %22135 = vmatpush1.bf16.msra.mxu1 %v22134_v22  ;;  %9863 = vmatprep.mubr.f32.mxu1 %v31576_v33  ;;  %v31510_v22 = vand.u32 4294901760, %v30733_v34  ;;  %v30784_v5 = vand.u32 4294901760, %v20353_v16  ;;  %v31512_v25 = vand.u32 4294901760, %v30766_v36  ;;  %v20482_v51 = vand.u32 4294901760, %v20481_v45 }
 0x538   : > { %22137 = vmatprep.subr.bf16.mxu1 %v22136_v40  ;;  %20271 = vmatprep.mubr.f32.mxu0 %v31576_v33  ;;  %v31514_v40 = vand.u32 4294901760, %v30770_v24  ;;  %v20511_v49 = vsub.f32 %v30738_v14, %v31509_v15  ;;  %v20442_v12 = vsub.f32 %v30754_v29, %v31508_v41  ;;  %v20452_v45 = vand.u32 4294901760, %v30782_v46 }
 0x539   : > { %22797 = vmatprep.subr.bf16.mxu0 %v30746_v43  ;;  %v20499_v9 = vsub.f32 %v30733_v34, %v31510_v22  ;;  %v22138_v41 = vpack.c.bf16 %v30544_v47, %v30508_v39  ;;  %v32060_v39 = vand.u32 4294901760, %v30547_v35  ;;  %v32061_v47 = vand.u32 4294901760, %v30565_v20 }
 0x53a   : > { %9869 = vmatmul.mubr.f32.gmra.mrb[4].mxu1 %v9868_v50  ;;  %20273 = vmatmul.mubr.f32.gmra.mrb[4].mxu0 %v30293_v1  ;;  %v20432_v1 = vand.u32 4294901760, %v20431_v26  ;;  %v20494_v50 = vand.u32 4294901760, %v20493_v8  ;;  %v30803_v26 = vsub.f32 %v20353_v16, %v30784_v5  ;;  %v21053_v8 = vld [vmem:[%s31127_s4] sm:$0xff]  ;;  %v20517_v16 = vsub.f32 %v30770_v24, %v31514_v40 }
 0x53b   : > { %9874 = vmatprep.mubr.f32.mxu1 %v31576_v33  ;;  %20278 = vmatprep.mubr.f32.mxu0 %v31576_v33  ;;  %v20500_v22 = vand.u32 4294901760, %v20499_v9  ;;  %v20512_v54 = vand.u32 4294901760, %v20511_v49  ;;  %v20443_v37 = vand.u32 4294901760, %v20442_v12  ;;  %v20453_v40 = vsub.f32 %v30782_v46, %v20452_v45 }
 0x53c   : > { %22799 = vmatpush1.bf16.msra.mxu0 %v30768_v27  ;;  %v22802_v15 = vpack.c.bf16 %v20494_v50, %v20482_v51  ;;  %v21055_v51 = vld [vmem:[%s31127_s4 + $0x10] sm:$0xff]  ;;  %v20518_v50 = vand.u32 4294901760, %v20517_v16  ;;  %v22142_v12 = vpack.c.bf16 %v30565_v20, %v30547_v35  ;;  %v32059_v16 = vand.u32 4294901760, %v30570_v62 }
 0x53d   : > { %22801 = vmatprep.subr.bf16.mxu0 %v22800_v4  ;;  %v21054_v4 = vld [vmem:[%s31127_s4 + $0x8] sm:$0xff]  ;;  %v22804_v9 = vpack.c.bf16 %v20512_v54, %v20500_v22  ;;  %v20454_v49 = vand.u32 4294901760, %v20453_v40  ;;  %v22812_v40 = vpack.c.bf16 %v30738_v14, %v30733_v34  ;;  %v32064_v35 = vand.u32 4294901760, %v30673_v58 }
 0x53e   : > { %9880 = vmatmul.mubr.f32.gmra.mrb[6].mxu1 %v9879_v3  ;;  %20280 = vmatmul.mubr.f32.gmra.mrb[6].mxu0 %v30321_v38  ;;  %v20505_v38 = vsub.f32 %v30766_v36, %v31512_v25  ;;  %v24238_v3 = vmov 0   ;;  %v22140_v25 = vpack.c.bf16 %v30570_v62, %v30562_v48  ;;  %v32063_v62 = vand.u32 4294901760, %v30661_v7 }
 0x53f   : > { %9990 = vmatprep.mubr.f32.mxu1 %v31576_v33  ;;  %20427 = vmatprep.mubr.f32.mxu0 %v31576_v33  ;;  %v32066_v20 = vand.u32 4294901760, %v30682_v17 }
 0x540   : > { %24179 = vset.pattern.permute.xlu0 %v24238_v3  ;;  %24180 = vset.pattern.permute.xlu1 %v24238_v3  ;;  %v20463_v3 = vand.u32 4294901760, %v30803_v26 }
 0x541   : > { %21059 = vperm.xlu0 %24179, %v21053_v8   ;;  %21064 = vperm.xlu1 %24180, %v21054_v4   ;;  %v22814_v8 = vpack.c.bf16 %v30770_v24, %v30766_v36  ;;  %v22152_v4 = vpack.c.bf16 %v9900_v53, %v9888_v2  ;;  %v22154_v2 = vpack.c.bf16 %v32056_v57, %v32055_v42  ;;  %v32057_v53 = vand.u32 4294901760, %v30584_v18  ;;  %v32091_v42 = vld [vmem:[#allocation34_spill] sm:$0xff] }
 0x542   : > { %9992 = vmatmul.mubr.f32.vlgmr.msra.gmra.mrb[0].mxu1 %v30541_v30  ;;  %20433 = vmatmul.mubr.f32.vlgmr.msra.gmra.mrb[0].mxu0 %v20432_v1  ;;  %v20506_v1 = vand.u32 4294901760, %v20505_v38  ;;  %v32058_v38 = vand.u32 4294901760, %v30562_v48  ;;  %v32062_v48 = vand.u32 4294901760, %v30631_v32  ;;  %v32092_v57 = vand.u32 4294901760, %v32091_v42 }
 0x543   : > { %22139 = vmatpush1.bf16.msra.mxu1 %v22138_v41  ;;  %9997 = vmatprep.mubr.f32.mxu1 %v31576_v33  ;;  %v20464_v41 = vsub.f32 %v30803_v26, %v20463_v3 }
 0x544   : > { %22141 = vmatprep.subr.bf16.mxu1 %v22140_v25  ;;  %20438 = vmatprep.mubr.f32.mxu0 %v31576_v33  ;;  %v21056_v25 = vld [vmem:[%s31127_s4 + $0x18] sm:$0xff]  ;;  %v22806_v54 = vpack.c.bf16 %v20518_v50, %v20506_v1  ;;  %v22824_v1 = vpack.c.bf16 %v32063_v62, %v20474_v61 }
 0x545   : > { %22803 = vmatpush1.bf16.msra.mxu0 %v22802_v15  ;;  %21069 = vperm.xlu1 %24180, %v21055_v51   ;;  %v20465_v22 = vand.u32 4294901760, %v20464_v41  ;;  %v22810_v15 = vpack.c.bf16 %v30682_v17, %v30603_v19  ;;  %v22156_v51 = vpack.c.bf16 %v32059_v16, %v32058_v38  ;;  %v32070_v17 = vand.u32 4294901760, %v30766_v36  ;;  %v32087_v41 = vld [vmem:[#allocation33_spill] sm:$0xff] }
 0x546   : > { %9999 = vmatmul.mubr.f32.gmra.mrb[2].mxu1 %v30591_v59  ;;  %20444 = vmatmul.mubr.f32.gmra.mrb[2].mxu0 %v20443_v37  ;;  %v22808_v37 = vpack.c.bf16 %v30661_v7, %v30642_v28  ;;  %v32067_v28 = vand.u32 4294901760, %v30717_v6  ;;  %v32068_v7 = vand.u32 4294901760, %v30733_v34 }
 0x547   : > { %22143 = vmatpush1.bf16.msra.mxu1 %v22142_v12  ;;  %10004 = vmatprep.mubr.f32.mxu1 %v31576_v33  ;;  %v32084_v12 = vld [vmem:[#allocation35_spill] sm:$0xff] }
 0x548   : > { %22145 = vmatprep.subr.bf16.mxu1 %v30486_v13  ;;  %20449 = vmatprep.mubr.f32.mxu0 %v31576_v33 }
 0x549   : > { %22805 = vmatprep.subr.bf16.mxu0 %v22804_v9  ;;  %21074 = vperm.xlu0 %24179, %v21056_v25   ;;  %v32085_v9 = vld [vmem:[#allocation32_spill] sm:$0xff] }
 0x54a   : > { %10006 = vmatmul.mubr.f32.gmra.mrb[4].mxu1 %v30633_v21  ;;  %20455 = vmatmul.mubr.f32.gmra.mrb[4].mxu0 %v20454_v49 }
 0x54b   : > { %10011 = vmatprep.mubr.f32.mxu1 %v31576_v33  ;;  %20460 = vmatprep.mubr.f32.mxu0 %v31576_v33 }
 0x54c   : > { %22807 = vmatpush1.bf16.msra.mxu0 %v22806_v54  ;;  %v32089_v54 = vld [vmem:[#allocation12_spill] sm:$0xff] }
 0x54d   : > { %22809 = vmatprep.subr.bf16.mxu0 %v22808_v37  ;;  %v32090_v37 = vand.u32 4294901760, %v32089_v54 }
 0x54e   : > { %10013 = vmatmul.mubr.f32.gmra.mrb[6].mxu1 %v30675_v10  ;;  %20466 = vmatmul.mubr.f32.gmra.mrb[6].mxu0 %v20465_v22 }
 0x54f   : > { %10099 = vmatprep.mubr.f32.mxu1 %v31576_v33  ;;  %20576 = vmatprep.mubr.f32.mxu0 %v31576_v33  ;;  %v10568_v22 = vsub.f32 %v32089_v54, %v32090_v37 }
 0x552   : > { %10102 = vmatmul.mubr.f32.vlgmr.msra.gmra.mrb[0].mxu1 %v30584_v18  ;;  %20578 = vmatmul.mubr.f32.vlgmr.msra.gmra.mrb[0].mxu0 %v30693_v31  ;;  %v22158_v18 = vpack.c.bf16 %v32061_v47, %v32060_v39 }
 0x553   : > { %22147 = vmatpush1.bf16.msra.mxu1 %v30560_v11  ;;  %22811 = vmatpush1.bf16.msra.mxu0 %v22810_v15 }
 0x554   : > { %22149 = vmatprep.subr.bf16.mxu1 %v30580_v56  ;;  %10107 = vmatprep.mubr.f32.mxu1 %v31576_v33 }
 0x555   : > { %20583 = vmatprep.mubr.f32.mxu0 %v31576_v33  ;;  %22813 = vmatprep.subr.bf16.mxu0 %v22812_v40 }
 0x556   : > { %10110 = vmatmul.mubr.f32.gmra.mrb[2].mxu1 %v30631_v32  ;;  %20585 = vmatmul.mubr.f32.gmra.mrb[2].mxu0 %v30730_v0 }
 0x557   : > { %22151 = vmatpush1.bf16.msra.mxu1 %v30593_v23  ;;  %22815 = vmatpush1.bf16.msra.mxu0 %v22814_v8 }
 0x558   : > { %22153 = vmatprep.subr.bf16.mxu1 %v22152_v4  ;;  %22817 = vmatprep.subr.bf16.mxu0 %v30618_v52 }
 0x559   : > { %10115 = vmatprep.mubr.f32.mxu1 %v31576_v33  ;;  %20590 = vmatprep.mubr.f32.mxu0 %v31576_v33 }
 0x55a   : > { %10118 = vmatmul.mubr.f32.gmra.mrb[4].mxu1 %v30673_v58  ;;  %20592 = vmatmul.mubr.f32.gmra.mrb[4].mxu0 %v30756_v60  ;;  %v32069_v58 = vand.u32 4294901760, %v30738_v14 }
 0x55b   : > { %10123 = vmatprep.mubr.f32.mxu1 %v31576_v33  ;;  %20597 = vmatprep.mubr.f32.mxu0 %v31576_v33 }
 0x55c   : > { %v22828_v61 = vpack.c.bf16 %v32069_v58, %v32068_v7 }
 0x55e   : > { %10126 = vmatmul.mubr.f32.gmra.mrb[6].mxu1 %v30704_v63  ;;  %20599 = vmatmul.mubr.f32.gmra.mrb[6].mxu0 %v30784_v5  ;;  %v32072_v63 = vand.u32 4294901760, %v30754_v29 }
 0x55f   : > { %10204 = vmatprep.mubr.f32.mxu1 %v31576_v33  ;;  %20685 = vmatprep.mubr.f32.mxu0 %v31576_v33 }
 0x562   : > { %10208 = vmatmul.mubr.f32.vlgmr.msra.gmra.mrb[0].mxu1 %v32057_v53  ;;  %20688 = vmatmul.mubr.f32.vlgmr.msra.gmra.mrb[0].mxu0 %v30717_v6  ;;  %v32071_v6 = vand.u32 4294901760, %v30770_v24  ;;  %v32078_v24 = vld [vmem:[#allocation28_spill] sm:$0xff] }
 0x563   : > { %22155 = vmatpush1.bf16.msra.mxu1 %v22154_v2  ;;  %22819 = vmatpush1.bf16.msra.mxu0 %v30680_v44  ;;  %v10642_v2 = vsub.f32 %v32091_v42, %v32092_v57  ;;  %v32093_v53 = vld [vmem:[#allocation36_spill] sm:$0xff] }
 0x564   : > { %22157 = vmatprep.subr.bf16.mxu1 %v22156_v51  ;;  %22821 = vmatprep.subr.bf16.mxu0 %v30746_v43  ;;  %v32094_v38 = vand.u32 4294901760, %v32093_v53  ;;  %v10569_v51 = vand.u32 4294901760, %v10568_v22 }
 0x565   : > { %10213 = vmatprep.mubr.f32.mxu1 %v31576_v33  ;;  %20693 = vmatprep.mubr.f32.mxu0 %v31576_v33  ;;  %v10643_v62 = vand.u32 4294901760, %v10642_v2 }
 0x566   : > { %10217 = vmatmul.mubr.f32.gmra.mrb[2].mxu1 %v32062_v48  ;;  %20696 = vmatmul.mubr.f32.gmra.mrb[2].mxu0 %v30754_v29  ;;  %v10654_v16 = vsub.f32 %v32093_v53, %v32094_v38  ;;  %v24239_v38 = vmov (!%p21527_p8), 0.0  }
 0x567   : > { %22159 = vmatpush1.bf16.msra.mxu1 %v22158_v18  ;;  %22823 = vmatpush1.bf16.msra.mxu0 %v30768_v27  ;;  %21097 = vst.msk [vmem:[%s24323_s17] sm:$0xff] (!%p21527_p8), %vm2849_vm7, %v24239_v38  ;;  %21098 = vst.msk [vmem:[%s24323_s17 + $0x8] sm:$0xff] (!%p21527_p8), %vm2849_vm7, %v24239_v38 }
 0x568   : > { %22161 = vmatprep.subr.bf16.mxu1 %v30486_v13  ;;  %22825 = vmatprep.subr.bf16.mxu0 %v22824_v1  ;;  %v32065_v13 = vand.u32 4294901760, %v30603_v19  ;;  %v22830_v19 = vpack.c.bf16 %v32071_v6, %v32070_v17  ;;  %v10655_v1 = vand.u32 4294901760, %v10654_v16  ;;  %v22188_v6 = vpack.c.bf16 %v32087_v41, %v32085_v9  ;;  %21099 = vst.msk [vmem:[%s24323_s17 + $0x10] sm:$0xff] (!%p21527_p8), %vm2849_vm7, %v24239_v38 }
 0x569   : > { %10222 = vmatprep.mubr.f32.mxu1 %v31576_v33  ;;  %20701 = vmatprep.mubr.f32.mxu0 %v31576_v33  ;;  %21100 = vst.msk [vmem:[%s24323_s17 + $0x18] sm:$0xff] (!%p21527_p8), %vm2849_vm7, %v24239_v38  ;;  %21101 = vst.msk [vmem:[%s24328_s20] sm:$0xff] (!%p21527_p8), %vm2849_vm7, %v24239_v38 }
 0x56a   : > { %10226 = vmatmul.mubr.f32.gmra.mrb[4].mxu1 %v32064_v35  ;;  %20704 = vmatmul.mubr.f32.gmra.mrb[4].mxu0 %v30782_v46  ;;  %v22826_v32 = vpack.c.bf16 %v32066_v20, %v32065_v13  ;;  %v32079_v46 = vld [vmem:[#allocation31_spill] sm:$0xff]  ;;  %21102 = vst.msk [vmem:[%s24328_s20 + $0x8] sm:$0xff] (!%p21527_p8), %vm2849_vm7, %v24239_v38  ;;  %21103 = vst.msk [vmem:[%s24328_s20 + $0x10] sm:$0xff] (!%p21527_p8), %vm2849_vm7, %v24239_v38 }
 0x56b   : > { %10231 = vmatprep.mubr.f32.mxu1 %v31576_v33  ;;  %20709 = vmatprep.mubr.f32.mxu0 %v31576_v33  ;;  %v32097_v13 = vld [vmem:[#allocation39_spill] sm:$0xff]  ;;  %21104 = vst.msk [vmem:[%s24328_s20 + $0x18] sm:$0xff] (!%p21527_p8), %vm2849_vm7, %v24239_v38 }
 0x56e   : > { %10235 = vmatmul.mubr.f32.gmra.mrb[6].mxu1 %v9877_v55  ;;  %20712 = vmatmul.mubr.f32.gmra.mrb[6].mxu0 %v30803_v26 }
 0x56f   : > { %10329 = vmatprep.mubr.f32.mxu1 %v31576_v33  ;;  %20790 = vmatprep.mubr.f32.mxu0 %v31576_v33 }
 0x572   : > { %10331 = vmatmul.mubr.f32.vlgmr.msra.gmra.mrb[0].mxu1 %v30541_v30  ;;  %20794 = vmatmul.mubr.f32.vlgmr.msra.gmra.mrb[0].mxu0 %v32067_v28 }
 0x573   : > { %22163 = vmatpush1.bf16.msra.mxu1 %v30560_v11  ;;  %22827 = vmatpush1.bf16.msra.mxu0 %v22826_v32  ;;  %v32073_v11 = vld [vmem:[#allocation25_spill] sm:$0xff]  ;;  %v22182_v32 = vpack.c.bf16 %v10655_v1, %v10643_v62 }
 0x574   : > { %22165 = vmatprep.subr.bf16.mxu1 %v30580_v56  ;;  %22829 = vmatprep.subr.bf16.mxu0 %v22828_v61  ;;  %v32074_v56 = vld [vmem:[#allocation26_spill] sm:$0xff] }
 0x575   : > { %10336 = vmatprep.mubr.f32.mxu1 %v31576_v33  ;;  %20799 = vmatprep.mubr.f32.mxu0 %v31576_v33 }
 0x576   : > { %10338 = vmatmul.mubr.f32.gmra.mrb[2].mxu1 %v30591_v59  ;;  %20803 = vmatmul.mubr.f32.gmra.mrb[2].mxu0 %v32072_v63  ;;  %v32102_v63 = vld [vmem:[#allocation24_spill] sm:$0xff] }
 0x577   : > { %22167 = vmatpush1.bf16.msra.mxu1 %v30593_v23  ;;  %22831 = vmatpush1.bf16.msra.mxu0 %v22830_v19  ;;  %v32075_v23 = vand.u32 4294901760, %v32074_v56  ;;  %v32101_v19 = vld [vmem:[#allocation6_spill] sm:$0xff] }
 0x578   : > { %22833 = vmatprep.subr.bf16.mxu0 %v30618_v52  ;;  %10343 = vmatprep.mubr.f32.mxu1 %v31576_v33  ;;  %v32076_v52 = vld [vmem:[#allocation27_spill] sm:$0xff] }
 0x579   : > { %20808 = vmatprep.mubr.f32.mxu0 %v31576_v33  ;;  %22169 = vmatprep.subr.bf16.mxu1 %v32073_v11  ;;  %v10612_v55 = vsub.f32 %v32074_v56, %v32075_v23  ;;  %v32077_v34 = vand.u32 4294901760, %v32076_v52  ;;  %v22184_v28 = vpack.c.bf16 %v32076_v52, %v32074_v56  ;;  %v32104_v11 = vld [vmem:[#allocation40_spill] sm:$0xff] }
 0x57a   : > { %10345 = vmatmul.mubr.f32.gmra.mrb[4].mxu1 %v30633_v21  ;;  %20812 = vmatmul.mubr.f32.gmra.mrb[4].mxu0 %v20452_v45 }
 0x57b   : > { %10350 = vmatprep.mubr.f32.mxu1 %v31576_v33  ;;  %20817 = vmatprep.mubr.f32.mxu0 %v31576_v33  ;;  %v10624_v14 = vsub.f32 %v32076_v52, %v32077_v34  ;;  %v10613_v29 = vand.u32 4294901760, %v10612_v55 }
 0x57d   : > { %v10625_v36 = vand.u32 4294901760, %v10624_v14 }
 0x57e   : > { %10352 = vmatmul.mubr.f32.gmra.mrb[6].mxu1 %v30675_v10  ;;  %20821 = vmatmul.mubr.f32.gmra.mrb[6].mxu0 %v20463_v3 }
 0x57f   : > { %10430 = vmatprep.mubr.f32.mxu1 %v31576_v33  ;;  %20915 = vmatprep.mubr.f32.mxu0 %v31576_v33  ;;  %v22176_v45 = vpack.c.bf16 %v10625_v36, %v10613_v29 }
 0x582   : > { %10432 = vmatmul.mubr.f32.vlgmr.msra.gmra.mrb[0].mxu1 %v30541_v30  ;;  %20917 = vmatmul.mubr.f32.vlgmr.msra.gmra.mrb[0].mxu0 %v30693_v31  ;;  %v32080_v30 = vld [vmem:[#allocation29_spill] sm:$0xff] }
 0x583   : > { %22835 = vmatpush1.bf16.msra.mxu0 %v30680_v44  ;;  %22171 = vmatpush1.bf16.msra.mxu1 %v32078_v24  ;;  %v32081_v44 = vand.u32 4294901760, %v32080_v30 }
 0x584   : > { %22837 = vmatprep.subr.bf16.mxu0 %v30746_v43  ;;  %10437 = vmatprep.mubr.f32.mxu1 %v31576_v33  ;;  %v32082_v43 = vld [vmem:[#allocation30_spill] sm:$0xff] }
 0x585   : > { %20922 = vmatprep.mubr.f32.mxu0 %v31576_v33  ;;  %22173 = vmatprep.subr.bf16.mxu1 %v32079_v46  ;;  %v10618_v26 = vsub.f32 %v32080_v30, %v32081_v44  ;;  %v32083_v3 = vand.u32 4294901760, %v32082_v43 }
 0x586   : > { %10439 = vmatmul.mubr.f32.gmra.mrb[2].mxu1 %v30591_v59  ;;  %20924 = vmatmul.mubr.f32.gmra.mrb[2].mxu0 %v30730_v0  ;;  %v32086_v59 = vand.u32 4294901760, %v32085_v9 }
 0x587   : > { %22839 = vmatpush1.bf16.msra.mxu0 %v30768_v27  ;;  %10444 = vmatprep.mubr.f32.mxu1 %v31576_v33  ;;  %v10630_v50 = vsub.f32 %v32082_v43, %v32083_v3  ;;  %v32088_v27 = vand.u32 4294901760, %v32087_v41  ;;  %v10619_v15 = vand.u32 4294901760, %v10618_v26 }
 0x588   : > { %20929 = vmatprep.mubr.f32.mxu0 %v31576_v33  ;;  %22175 = vmatpush1.bf16.msra.mxu1 %v32084_v12  ;;  %v10636_v49 = vsub.f32 %v32085_v9, %v32086_v59 }
 0x589   : > { %v10648_v25 = vsub.f32 %v32087_v41, %v32088_v27  ;;  %22177 = vmatprep.subr.bf16.mxu1 %v22176_v45  ;;  %v10631_v40 = vand.u32 4294901760, %v10630_v50 }
 0x58a   : > { %10446 = vmatmul.mubr.f32.gmra.mrb[4].mxu1 %v30633_v21  ;;  %20931 = vmatmul.mubr.f32.gmra.mrb[4].mxu0 %v30756_v60  ;;  %v10637_v8 = vand.u32 4294901760, %v10636_v49  ;;  %v32095_v21 = vld [vmem:[#allocation37_spill] sm:$0xff] }
 0x58b   : > { %10451 = vmatprep.mubr.f32.mxu1 %v31576_v33  ;;  %20936 = vmatprep.mubr.f32.mxu0 %v31576_v33  ;;  %v10649_v4 = vand.u32 4294901760, %v10648_v25  ;;  %v32096_v39 = vand.u32 4294901760, %v32095_v21  ;;  %v22178_v18 = vpack.c.bf16 %v10631_v40, %v10619_v15 }
 0x58d   : > { %v10579_v47 = vsub.f32 %v32095_v21, %v32096_v39  ;;  %v22180_v48 = vpack.c.bf16 %v10649_v4, %v10637_v8 }
 0x58e   : > { %10453 = vmatmul.mubr.f32.gmra.mrb[6].mxu1 %v30675_v10  ;;  %20938 = vmatmul.mubr.f32.gmra.mrb[6].mxu0 %v30784_v5  ;;  %v32098_v10 = vand.u32 4294901760, %v32097_v13 }
 0x58f   : > { %10564 = vmatprep.mubr.f32.mxu1 %v31576_v33  ;;  %21016 = vmatprep.mubr.f32.mxu0 %v31576_v33  ;;  %v10580_v35 = vand.u32 4294901760, %v10579_v47 }
 0x590   : > { %v10590_v20 = vsub.f32 %v32097_v13, %v32098_v10 }
 0x592   : > { %10570 = vmatmul.mubr.f32.vlgmr.msra.gmra.mrb[0].mxu1 %v10569_v51  ;;  %21018 = vmatmul.mubr.f32.vlgmr.msra.gmra.mrb[0].mxu0 %v30693_v31  ;;  %v10591_v7 = vand.u32 4294901760, %v10590_v20  ;;  %v32099_v31 = vld [vmem:[#allocation41_spill] sm:$0xff] }
 0x593   : > { %22179 = vmatpush1.bf16.msra.mxu1 %v22178_v18  ;;  %10575 = vmatprep.mubr.f32.mxu1 %v31576_v33  ;;  %v32100_v58 = vand.u32 4294901760, %v32099_v31 }
 0x594   : > { %21023 = vmatprep.mubr.f32.mxu0 %v31576_v33  ;;  %22181 = vmatprep.subr.bf16.mxu1 %v22180_v48 }
 0x595   : > { %v10601_v61 = vsub.f32 %v32099_v31, %v32100_v58 }
 0x596   : > { %10581 = vmatmul.mubr.f32.gmra.mrb[2].mxu1 %v10580_v35  ;;  %21025 = vmatmul.mubr.f32.gmra.mrb[2].mxu0 %v30730_v0  ;;  %v22186_v0 = vpack.c.bf16 %v32082_v43, %v32080_v30 }
 0x597   : > { %10586 = vmatprep.mubr.f32.mxu1 %v31576_v33  ;;  %21030 = vmatprep.mubr.f32.mxu0 %v31576_v33  ;;  %v10602_v17 = vand.u32 4294901760, %v10601_v61 }
 0x598   : > { %22183 = vmatpush1.bf16.msra.mxu1 %v22182_v32 }
 0x599   : > { %22185 = vmatprep.subr.bf16.mxu1 %v22184_v28 }
 0x59a   : > { %10592 = vmatmul.mubr.f32.gmra.mrb[4].mxu1 %v10591_v7  ;;  %21032 = vmatmul.mubr.f32.gmra.mrb[4].mxu0 %v30756_v60  ;;  %v22190_v60 = vpack.c.bf16 %v32093_v53, %v32091_v42 }
 0x59b   : > { %10597 = vmatprep.mubr.f32.mxu1 %v31576_v33  ;;  %21037 = vmatprep.mubr.f32.mxu0 %v31576_v33 }
 0x59e   : > { %10603 = vmatmul.mubr.f32.gmra.mrb[6].mxu1 %v10602_v17  ;;  %21039 = vmatmul.mubr.f32.gmra.mrb[6].mxu0 %v30784_v5  ;;  %v32103_v5 = vld [vmem:[#allocation38_spill] sm:$0xff] }
 0x59f   : > { %10713 = vmatprep.mubr.f32.mxu1 %v31576_v33 }
 0x5a2   : > { %10715 = vmatmul.mubr.f32.vlgmr.msra.gmra.mrb[0].mxu1 %v32101_v19 }
 0x5a3   : > { %22187 = vmatpush1.bf16.msra.mxu1 %v22186_v0  ;;  %10720 = vmatprep.mubr.f32.mxu1 %v31576_v33 }
 0x5a4   : > { %22189 = vmatprep.subr.bf16.mxu1 %v22188_v6 }
 0x5a6   : > { %10722 = vmatmul.mubr.f32.gmra.mrb[2].mxu1 %v32102_v63 }
 0x5a7   : > { %10727 = vmatprep.mubr.f32.mxu1 %v31576_v33  ;;  %22191 = vmatpush1.bf16.msra.mxu1 %v22190_v60 }
 0x5aa   : > { %10729 = vmatmul.mubr.f32.gmra.mrb[4].mxu1 %v32103_v5 }
 0x5ab   : > { %10734 = vmatprep.mubr.f32.mxu1 %v31576_v33 }
 0x5ae   : > { %10736 = vmatmul.mubr.f32.gmra.mrb[6].mxu1 %v32104_v11 }
 0x5af   : > { %10822 = vmatprep.mubr.f32.mxu1 %v31576_v33 }
 0x5b2   : > { %10825 = vmatmul.mubr.f32.vlgmr.msra.gmra.mrb[0].mxu1 %v32089_v54 }
 0x5b3   : > { %10830 = vmatprep.mubr.f32.mxu1 %v31576_v33 }
 0x5b6   : > { %10833 = vmatmul.mubr.f32.gmra.mrb[2].mxu1 %v32095_v21 }
 0x5b7   : > { %10838 = vmatprep.mubr.f32.mxu1 %v31576_v33 }
 0x5ba   : > { %10841 = vmatmul.mubr.f32.gmra.mrb[4].mxu1 %v32097_v13 }
 0x5bb   : > { %10846 = vmatprep.mubr.f32.mxu1 %v31576_v33 }
 0x5be   : > { %10849 = vmatmul.mubr.f32.gmra.mrb[6].mxu1 %v32099_v31 }
 0x5c0   : > { %v21060_v46 = vpop.permute.xlu0 %21059  ;;  %v21065_v33 = vpop.permute.xlu1 %21064 }
 0x5c4   : > { %v21070_v27 = vpop.permute.xlu1 %21069 }
 0x5c8   : > { %v21075_v42 = vpop.permute.xlu0 %21074 }
 0x665   : > { %v21019_v56 = vpop.f32.mrb[0].mxu0 }
 0x666   : > { %v21021_v23 = vpop.f32.mrb[1].mxu0 }
 0x669   : > { %v21026_v55 = vpop.f32.mrb[2].mxu0 }
 0x66a   : > { %v21028_v52 = vpop.f32.mrb[3].mxu0 }
 0x66d   : > { %v21033_v34 = vpop.f32.mrb[4].mxu0 }
 0x66e   : > { %v21035_v14 = vpop.f32.mrb[5].mxu0 }
 0x671   : > { %v21040_v29 = vpop.f32.mrb[6].mxu0 }
 0x672   : > { %v21042_v36 = vpop.f32.mrb[7].mxu0 }
 0x685   : > { %v10826_v24 = vpop.f32.mrb[0].mxu1 }
 0x686   : > { %v22840_v45 = vadd.f32 %v21019_v56, %v10826_v24  ;;  %v10828_v30 = vpop.f32.mrb[1].mxu1 }
 0x687   : > { %v22841_v44 = vadd.f32 %v21021_v23, %v10828_v30 }
 0x688   : > { %v21077_v26 = vadd.f32 %v22840_v45, %v21060_v46 }
 0x689   : > { %v21078_v43 = vadd.f32 %v22841_v44, %v21060_v46  ;;  %v10834_v3 = vpop.f32.mrb[2].mxu1 }
 0x68a   : > { %21085 = vst [vmem:[%s31057_s14] sm:$0xff] %v21077_v26  ;;  %v22842_v50 = vadd.f32 %v21026_v55, %v10834_v3  ;;  %v10836_v12 = vpop.f32.mrb[3].mxu1 }
 0x68b   : > { %21086 = vst [vmem:[%s31057_s14 + $0x8] sm:$0xff] %v21078_v43  ;;  %v22843_v9 = vadd.f32 %v21028_v52, %v10836_v12 }
 0x68c   : > { %v21079_v59 = vadd.f32 %v22842_v50, %v21065_v33 }
 0x68d   : > { %v21080_v49 = vadd.f32 %v22843_v9, %v21065_v33  ;;  %v10842_v41 = vpop.f32.mrb[4].mxu1 }
 0x68e   : > { %21087 = vst [vmem:[%s31057_s14 + $0x10] sm:$0xff] %v21079_v59  ;;  %v22844_v25 = vadd.f32 %v21033_v34, %v10842_v41  ;;  %v10844_v54 = vpop.f32.mrb[5].mxu1 }
 0x68f   : > { %21088 = vst [vmem:[%s31057_s14 + $0x18] sm:$0xff] %v21080_v49  ;;  %v22845_v37 = vadd.f32 %v21035_v14, %v10844_v54 }
 0x690   : > { %v21081_v22 = vadd.f32 %v22844_v25, %v21070_v27 }
 0x691   : > { %v21082_v15 = vadd.f32 %v22845_v37, %v21070_v27  ;;  %v10850_v40 = vpop.f32.mrb[6].mxu1  ;;  %21096 = sbr.rel (%p21527_p8) target bundleno = 1688 (0x698), region = 48 }
 0x692   : > { %21089 = vst [vmem:[%s31057_s14 + $0x20] sm:$0xff] %v21081_v22  ;;  %v22846_v8 = vadd.f32 %v21040_v29, %v10850_v40  ;;  %v10852_v4 = vpop.f32.mrb[7].mxu1 }
 0x693   : > { %21090 = vst [vmem:[%s31057_s14 + $0x28] sm:$0xff] %v21082_v15  ;;  %v22847_v57 = vadd.f32 %v21042_v36, %v10852_v4 }
 0x694   : > { %v21083_v2 = vadd.f32 %v22846_v8, %v21075_v42 }
 0x695   : > { %v21084_v53 = vadd.f32 %v22847_v57, %v21075_v42 }
 0x696   : > { %21091 = vst [vmem:[%s31057_s14 + $0x30] sm:$0xff] %v21083_v2 }
 0x697   : > { %21092 = vst [vmem:[%s31057_s14 + $0x38] sm:$0xff] %v21084_v53 }
 0x698 PF: > { %v21115_v16 = vadd.f32 %v21082_v15, %v21081_v22  ;;  %v21109_v51 = vadd.f32 %v21078_v43, %v21077_v26  ;;  %v21118_v21 = vadd.f32 %v21084_v53, %v21083_v2  ;;  %v21112_v39 = vadd.f32 %v21080_v49, %v21079_v59  ;;  %v21107_v31 = vld [vmem:[%s24323_s17 + $0x10] sm:$0xff]  ;;  %v21105_v58 = vld [vmem:[%s24323_s17] sm:$0xff]  ;;  %v21108_v19 = vld [vmem:[%s24323_s17 + $0x18] sm:$0xff] }
 0x699   : > { %v21135_v47 = vmul.f32 %v21079_v59, %v21079_v59  ;;  %v21136_v18 = vmul.f32 %v21080_v49, %v21080_v49  ;;  %v21133_v48 = vmul.f32 %v21077_v26, %v21077_v26  ;;  %v21134_v62 = vmul.f32 %v21078_v43, %v21078_v43  ;;  %v21106_v60 = vld [vmem:[%s24323_s17 + $0x8] sm:$0xff]  ;;  %v21129_v55 = vld [vmem:[%s24328_s20] sm:$0xff]  ;;  %v21132_v36 = vld [vmem:[%s24328_s20 + $0x18] sm:$0xff] }
 0x69a   : > { %21116 = vadd.xlane.f32.xlu1 %v21115_v16  ;;  %21110 = vadd.xlane.f32.xlu0 %v21109_v51  ;;  %v21139_v1 = vmul.f32 %v21083_v2, %v21083_v2  ;;  %v21140_v35 = vmul.f32 %v21084_v53, %v21084_v53  ;;  %v21137_v13 = vmul.f32 %v21081_v22, %v21081_v22  ;;  %v21130_v23 = vld [vmem:[%s24328_s20 + $0x8] sm:$0xff]  ;;  %v21131_v24 = vld [vmem:[%s24328_s20 + $0x10] sm:$0xff] }
 0x69b   : > { %v21144_v10 = vadd.f32 %v21136_v18, %v21135_v47  ;;  %v21141_v20 = vadd.f32 %v21134_v62, %v21133_v48  ;;  %v21138_v32 = vmul.f32 %v21082_v15, %v21082_v15 }
 0x69c   : > { %v21150_v28 = vadd.f32 %v21140_v35, %v21139_v1 }
 0x69d   : > { %v21147_v7 = vadd.f32 %v21138_v32, %v21137_v13 }
 0x69e   : > { %21119 = vadd.xlane.f32.xlu1 %v21118_v21  ;;  %21113 = vadd.xlane.f32.xlu0 %v21112_v39 }
 0x6a2   : > { %21145 = vadd.xlane.f32.xlu1 %v21144_v10  ;;  %21142 = vadd.xlane.f32.xlu0 %v21141_v20 }
 0x6a6   : > { %21151 = vadd.xlane.f32.xlu1 %v21150_v28  ;;  %21148 = vadd.xlane.f32.xlu0 %v21147_v7 }
 0x727   : > { %v21117_v61 = vpop.xlane.xlu1 %21116  ;;  %v21111_v17 = vpop.xlane.xlu0 %21110 }
 0x728   : > { %v21123_v0 = vadd.f32 %v21117_v61, %v21107_v31  ;;  %v21121_v6 = vadd.f32 %v21111_v17, %v21105_v58 }
 0x72a   : > { %21127 = vst.msk [vmem:[%s24323_s17 + $0x10] sm:$0xff] %vm2849_vm7, %v21123_v0  ;;  %21125 = vst.msk [vmem:[%s24323_s17] sm:$0xff] %vm2849_vm7, %v21121_v6 }
 0x72b   : > { %v21120_v63 = vpop.xlane.xlu1 %21119  ;;  %v21114_v5 = vpop.xlane.xlu0 %21113 }
 0x72c   : > { %v21124_v11 = vadd.f32 %v21120_v63, %v21108_v19  ;;  %v21122_v56 = vadd.f32 %v21114_v5, %v21106_v60 }
 0x72e   : > { %21128 = vst.msk [vmem:[%s24323_s17 + $0x18] sm:$0xff] %vm2849_vm7, %v21124_v11  ;;  %21126 = vst.msk [vmem:[%s24323_s17 + $0x8] sm:$0xff] %vm2849_vm7, %v21122_v56 }
 0x72f   : > { %v21146_v52 = vpop.xlane.xlu1 %21145  ;;  %v21143_v34 = vpop.xlane.xlu0 %21142 }
 0x730   : > { %v21154_v14 = vadd.f32 %v21146_v52, %v21130_v23  ;;  %v21153_v29 = vadd.f32 %v21143_v34, %v21129_v55 }
 0x732   : > { %21158 = vst.msk [vmem:[%s24328_s20 + $0x8] sm:$0xff] %vm2849_vm7, %v21154_v14  ;;  %21157 = vst.msk [vmem:[%s24328_s20] sm:$0xff] %vm2849_vm7, %v21153_v29 }
 0x733   : > { %v21152_v46 = vpop.xlane.xlu1 %21151  ;;  %v21149_v45 = vpop.xlane.xlu0 %21148 }
 0x734   : > { %v21156_v30 = vadd.f32 %v21152_v46, %v21132_v36  ;;  %v21155_v44 = vadd.f32 %v21149_v45, %v21131_v24 }
 0x736   : > { %21160 = vst.msk [vmem:[%s24328_s20 + $0x18] sm:$0xff] %vm2849_vm7, %v21156_v30  ;;  %21159 = vst.msk [vmem:[%s24328_s20 + $0x10] sm:$0xff] %vm2849_vm7, %v21155_v44 }
 0x737 PF: > { %s19_s9 = sadd.s32 1, %s24227_s9   ;;  %s32106_s27 = smov %s24219_s29 }
 0x738   : > { %p16_p9 = scmp.ge.s32.totalorder %s19_s9, 34   ;;  %s32107_s28 = smov %s24223_s30 }
 0x739   : > { %s32108_s29 = smov %s32111_s10  ;;  %s32109_s30 = smov %s32115_s11 }
 0x73a   :  { %18 = sbr.rel (!%p16_p9) target bundleno = 3 (0x3), region = 134 }

</bundles_post_ra>
